<compile_context>
chip_gen: v7x
topology: tpu7x:2x2x1
jax: 0.10.0
libtpu: 0.0.40
codegen_flags: <defaults>
</compile_context>

<pallas_src>
import functools

import jax
import jax.numpy as jnp
from jax.experimental import pallas as pl
from jax.experimental.pallas import tpu as pltpu


# -----------------------------------------------------------------------------
# plain-JAX glue: im2col for the 3x3 stem only (Cin=3 -> patch tensor ~14 KB,
# negligible; the depthwise convs never materialize patches in HBM).
# -----------------------------------------------------------------------------
def stem_patches(x, kh=3, kw=3, stride=2, padding=1):
    """x: (B,H,W,C) -> (B*Ho*Wo, kh*kw*C), Ho, Wo."""
    xp = jnp.pad(x, ((0, 0), (padding, padding), (padding, padding), (0, 0)))
    B, Hp, Wp, C = xp.shape
    Ho = (Hp - kh) // stride + 1
    Wo = (Wp - kw) // stride + 1
    taps = []
    for dy in range(kh):
        for dx in range(kw):
            taps.append(xp[:, dy:dy + stride * Ho:stride,
                           dx:dx + stride * Wo:stride, :])
    p = jnp.stack(taps, axis=3)                       # (B,Ho,Wo,kh*kw,C)
    return p.reshape(B * Ho * Wo, kh * kw * C), Ho, Wo


# -----------------------------------------------------------------------------
# Pallas kernels
# -----------------------------------------------------------------------------
def _matmul_bn_silu_kernel(x_ref, w_ref, s_ref, b_ref,
                           conv_ref, bn_ref, act_ref):
    """conv-as-matmul (MXU, bf16 in / f32 acc) + folded BN + SiLU.

    Emits all three tensors (post-conv, post-BN, post-SiLU) because the
    Encoder's feature list keeps each of them."""
    conv = jnp.dot(x_ref[...].astype(jnp.bfloat16), w_ref[...],
                   preferred_element_type=jnp.float32)
    conv_ref[...] = conv
    bn = conv * s_ref[...] + b_ref[...]
    bn_ref[...] = bn
    act_ref[...] = bn * jax.nn.sigmoid(bn)


def _mbconv_kernel(x_ref, wexp_ref, sexp_ref, bexp_ref,
                   wdw_ref, sdw_ref, bdw_ref,
                   wproj_ref, sproj_ref, bproj_ref,
                   o_ref, pad_ref, dw_ref,
                   *, B, H, W, Ho, Wo, stride, residual):
    """One fused MBConv block, fully resident in VMEM.

    x_ref : (B*H*W, Cin) f32          wexp_ref : (Cin, mid)  bf16
    wdw_ref: (9, mid)    f32 (taps)   wproj_ref: (mid, Cout) bf16
    o_ref  : (B*Ho*Wo, Cout) f32
    pad_ref: (B, H+2, W+2, mid) f32 scratch (zero-padded expanded activation)
    dw_ref : (B*Ho*Wo, mid) f32 scratch (depthwise output, pre BN/SiLU)
    """
    mid = wexp_ref.shape[1]

    # (1) pointwise expansion on the MXU + BN + SiLU (f32 elementwise).
    x = x_ref[...]
    h = jnp.dot(x.astype(jnp.bfloat16), wexp_ref[...],
                preferred_element_type=jnp.float32)          # (B*H*W, mid)
    h = h * sexp_ref[...] + bexp_ref[...]
    h = h * jax.nn.sigmoid(h)

    # (2) scatter rows into the zero-padded spatial scratch (never hits HBM).
    pad_ref[...] = jnp.zeros_like(pad_ref)
    for b in range(B):
        for i in range(H):
            r0 = (b * H + i) * W
            pad_ref[b, i + 1, 1:W + 1, :] = h[r0:r0 + W, :]

    # (3) depthwise 3x3: unrolled 9-tap FMA on 2-D (W, mid) row slices.
    #     Stride-2 blocks compute full-width rows and subsample columns when
    #     storing (only contiguous, statically-indexed loads/stores).
    wd = wdw_ref[...]                                        # (9, mid)
    for b in range(B):
        for i in range(Ho):
            acc = jnp.zeros((W, mid), jnp.float32)
            for dy in range(3):
                for dx in range(3):
                    t = dy * 3 + dx
                    tap = pad_ref[b, i * stride + dy, dx:dx + W, :]
                    acc = acc + tap * wd[t:t + 1, :]
            r0 = (b * Ho + i) * Wo
            if stride == 1:
                dw_ref[r0:r0 + Wo, :] = acc
            else:
                for j in range(Wo):
                    dw_ref[r0 + j:r0 + j + 1, :] = \
                        acc[stride * j:stride * j + 1, :]

    d = dw_ref[...]                                          # (B*Ho*Wo, mid)
    d = d * sdw_ref[...] + bdw_ref[...]
    d = d * jax.nn.sigmoid(d)

    # (4) pointwise projection on the MXU + BN + fused residual.
    y = jnp.dot(d.astype(jnp.bfloat16), wproj_ref[...],
                preferred_element_type=jnp.float32)          # (B*Ho*Wo, Cout)
    y = y * sproj_ref[...] + bproj_ref[...]
    if residual:
        y = y + x
    o_ref[...] = y


# -----------------------------------------------------------------------------
# Pallas wrappers (single full-array block per call; everything fits in VMEM)
# -----------------------------------------------------------------------------
def fused_matmul_bn_silu(x2d, w, scale, shift):
    M = x2d.shape[0]
    N = w.shape[1]
    sh = jax.ShapeDtypeStruct((M, N), jnp.float32)
    return pl.pallas_call(
        _matmul_bn_silu_kernel,
        out_shape=(sh, sh, sh),
    )(x2d, w, scale.reshape(1, N), shift.reshape(1, N))


def fused_mbconv(x2d, p, B, H, W, stride, residual):
    mid = p['exp_w'].shape[1]
    cout = p['proj_w'].shape[1]
    Ho = (H - 1) // stride + 1
    Wo = (W - 1) // stride + 1
    Mo = B * Ho * Wo
    kern = functools.partial(_mbconv_kernel, B=B, H=H, W=W, Ho=Ho, Wo=Wo,
                             stride=stride, residual=residual)
    return pl.pallas_call(
        kern,
        out_shape=jax.ShapeDtypeStruct((Mo, cout), jnp.float32),
        scratch_shapes=[pltpu.VMEM((B, H + 2, W + 2, mid), jnp.float32),
                        pltpu.VMEM((Mo, mid), jnp.float32)],
    )(x2d,
      p['exp_w'], p['exp_s'].reshape(1, mid), p['exp_b'].reshape(1, mid),
      p['dw_w'], p['dw_s'].reshape(1, mid), p['dw_b'].reshape(1, mid),
      p['proj_w'], p['proj_s'].reshape(1, cout), p['proj_b'].reshape(1, cout))


# -----------------------------------------------------------------------------
# Encoder: module sequence + feature-list semantics of the PyTorch module
# -----------------------------------------------------------------------------
def encoder_forward(x_nchw, params):
    x = jnp.transpose(x_nchw, (0, 2, 3, 1))          # NCHW -> NHWC
    B = x.shape[0]
    to_nchw = lambda t: jnp.transpose(t, (0, 3, 1, 2))

    features = [x_nchw]

    # conv_stem + bn1 + act1 (one fused pallas_call, three feature tensors)
    p2d, H, W = stem_patches(x)
    conv, bn, act = fused_matmul_bn_silu(p2d, params['stem_w'],
                                         params['bn1_scale'],
                                         params['bn1_shift'])
    c = conv.shape[1]
    for t in (conv, bn, act):
        features.append(to_nchw(t.reshape(B, H, W, c)))

    # blocks: one fused pallas_call per MBConv block
    h2d = act
    for blk in params['blocks']:
        stride = blk['stride']
        Ho = (H - 1) // stride + 1
        Wo = (W - 1) // stride + 1
        h2d = fused_mbconv(h2d, blk['params'], B, H, W, stride,
                           blk['residual'])
        features.append(to_nchw(h2d.reshape(B, Ho, Wo, h2d.shape[1])))
        H, W = Ho, Wo

    # conv_head + bn2 + act2 (one fused pallas_call, three feature tensors)
    conv, bn, act = fused_matmul_bn_silu(h2d, params['head_w'],
                                         params['bn2_scale'],
                                         params['bn2_shift'])
    c = conv.shape[1]
    for t in (conv, bn, act):
        features.append(to_nchw(t.reshape(B, H, W, c)))

    # global_pool = Identity ; classifier = Identity
    features.append(features[-1])
    features.append(features[-1])
    return features


# -----------------------------------------------------------------------------
# deterministic parameter init (kernel-ready shapes; matmul weights in bf16)
# -----------------------------------------------------------------------------
def init_params(key):
    keys = iter(jax.random.split(key, 64))

    def conv_w(kh, kw, cin, cout):
        fan_in = kh * kw * cin
        w = jax.random.normal(next(keys), (kh, kw, cin, cout), jnp.float32)
        w = w * (2.0 / fan_in) ** 0.5
        return w.reshape(kh * kw * cin, cout).astype(jnp.bfloat16)

    def bn(c, eps=1e-3):
        gamma = 1.0 + 0.1 * jax.random.normal(next(keys), (c,), jnp.float32)
        beta = 0.1 * jax.random.normal(next(keys), (c,), jnp.float32)
        mean = 0.05 * jax.random.normal(next(keys), (c,), jnp.float32)
        var = 1.0 + 0.1 * jnp.abs(jax.random.normal(next(keys), (c,), jnp.float32))
        scale = gamma / jnp.sqrt(var + eps)
        shift = beta - mean * scale
        return scale, shift

    params = {}
    params['stem_w'] = conv_w(3, 3, 3, 16)                     # (27, 16) bf16
    params['bn1_scale'], params['bn1_shift'] = bn(16)

    # (cin, cout, stride, expand)
    block_cfg = [(16, 16, 1, 2), (16, 24, 2, 2), (24, 32, 2, 2)]
    blocks = []
    for cin, cout, stride, exp in block_cfg:
        mid = cin * exp
        bp = {}
        bp['exp_w'] = conv_w(1, 1, cin, mid)                   # (cin, mid) bf16
        bp['exp_s'], bp['exp_b'] = bn(mid)
        bp['dw_w'] = (jax.random.normal(next(keys), (9, mid), jnp.float32)
                      * (2.0 / 9.0) ** 0.5)                    # (9, mid) f32
        bp['dw_s'], bp['dw_b'] = bn(mid)
        bp['proj_w'] = conv_w(1, 1, mid, cout)                 # (mid, cout) bf16
        bp['proj_s'], bp['proj_b'] = bn(cout)
        blocks.append({'params': bp, 'stride': stride,
                       'residual': (stride == 1 and cin == cout)})
    params['blocks'] = blocks

    params['head_w'] = conv_w(1, 1, 32, 64)                    # (32, 64) bf16
    params['bn2_scale'], params['bn2_shift'] = bn(64)
    return params


# -----------------------------------------------------------------------------
if __name__ == "__main__":
    key = jax.random.PRNGKey(0)
    kp, kx = jax.random.split(key)
    params = init_params(kp)

    # NCHW input, like the PyTorch module
    x = jax.random.normal(kx, (2, 3, 16, 16), jnp.float32)

    fwd = jax.jit(functools.partial(encoder_forward, params=params))
    feats = fwd(x)
    feats = jax.block_until_ready(feats)

    # sanity: 1 input + 3 (stem/bn1/act1) + 3 blocks + 3 (head/bn2/act2) + 2 identities
    assert len(feats) == 12
    assert feats[1].shape == (2, 16, 8, 8)      # conv_stem (stride 2)
    assert feats[4].shape == (2, 16, 8, 8)      # block 1 (stride 1, residual)
    assert feats[5].shape == (2, 24, 4, 4)      # block 2 (stride 2)
    assert feats[6].shape == (2, 32, 2, 2)      # block 3 (stride 2)
    assert feats[7].shape == (2, 64, 2, 2)      # conv_head
    assert feats[-1].shape == (2, 64, 2, 2)     # classifier (Identity)
    assert all(bool(jnp.all(jnp.isfinite(f))) for f in feats)

    print("KERNEL_OK")
</pallas_src>

<mosaic_0001>
module attributes {stable_mosaic.version = 11 : i64} {
  func.func @_matmul_bn_silu_kernel(%arg0: memref<128x27xf32, #tpu.memory_space<vmem>>, %arg1: memref<27x16xbf16, #tpu.memory_space<vmem>>, %arg2: memref<1x16xf32, #tpu.memory_space<vmem>>, %arg3: memref<1x16xf32, #tpu.memory_space<vmem>>, %arg4: memref<128x16xf32, #tpu.memory_space<vmem>>, %arg5: memref<128x16xf32, #tpu.memory_space<vmem>>, %arg6: memref<128x16xf32, #tpu.memory_space<vmem>>) attributes {dimension_semantics = [], scalar_prefetch = 0 : i64, scratch_operands = 0 : i64, tpu.core_type = #tpu.core_type<tc>} {
    %c0 = arith.constant 0 : index
    %c0_0 = arith.constant 0 : index
    %0 = vector.load %arg0[%c0, %c0_0] : memref<128x27xf32, #tpu.memory_space<vmem>>, vector<128x27xf32>
    %1 = arith.truncf %0 : vector<128x27xf32> to vector<128x27xbf16>
    %c0_1 = arith.constant 0 : index
    %c0_2 = arith.constant 0 : index
    %2 = vector.load %arg1[%c0_1, %c0_2] : memref<27x16xbf16, #tpu.memory_space<vmem>>, vector<27x16xbf16>
    %cst = arith.constant dense<0.000000e+00> : vector<128x16xf32>
    %3 = tpu.matmul %1, %2, %cst {dimension_numbers = #tpu.dot_dimension_numbers<[1], [0], [0], [1], [0, 0, 1, 1], [], []>} : vector<128x27xbf16>, vector<27x16xbf16>, vector<128x16xf32> -> vector<128x16xf32>
    %c0_3 = arith.constant 0 : index
    %c0_4 = arith.constant 0 : index
    %4 = vector.load %arg4[%c0_3, %c0_4] : memref<128x16xf32, #tpu.memory_space<vmem>>, vector<128x16xf32>
    tpu.vector_store %arg4[%c0_3, %c0_4], %3 {strides = array<i32>} : memref<128x16xf32, #tpu.memory_space<vmem>>, vector<128x16xf32>,
    %c0_5 = arith.constant 0 : index
    %c0_6 = arith.constant 0 : index
    %5 = vector.load %arg2[%c0_5, %c0_6] : memref<1x16xf32, #tpu.memory_space<vmem>>, vector<1x16xf32>
    %6 = vector.broadcast %5 : vector<1x16xf32> to vector<128x16xf32>
    %7 = arith.mulf %3, %6 : vector<128x16xf32>
    %c0_7 = arith.constant 0 : index
    %c0_8 = arith.constant 0 : index
    %8 = vector.load %arg3[%c0_7, %c0_8] : memref<1x16xf32, #tpu.memory_space<vmem>>, vector<1x16xf32>
    %9 = vector.broadcast %8 : vector<1x16xf32> to vector<128x16xf32>
    %10 = arith.addf %7, %9 : vector<128x16xf32>
    %c0_9 = arith.constant 0 : index
    %c0_10 = arith.constant 0 : index
    %11 = vector.load %arg5[%c0_9, %c0_10] : memref<128x16xf32, #tpu.memory_space<vmem>>, vector<128x16xf32>
    tpu.vector_store %arg5[%c0_9, %c0_10], %10 {strides = array<i32>} : memref<128x16xf32, #tpu.memory_space<vmem>>, vector<128x16xf32>,
    %12 = arith.negf %10 : vector<128x16xf32>
    %13 = math.exp %12 : vector<128x16xf32>
    %cst_11 = arith.constant 1.000000e+00 : f32
    %14 = vector.broadcast %cst_11 : f32 to vector<128x16xf32>
    %15 = arith.addf %14, %13 : vector<128x16xf32>
    %16 = arith.divf %14, %15 : vector<128x16xf32>
    %17 = arith.mulf %10, %16 : vector<128x16xf32>
    %c0_12 = arith.constant 0 : index
    %c0_13 = arith.constant 0 : index
    %18 = vector.load %arg6[%c0_12, %c0_13] : memref<128x16xf32, #tpu.memory_space<vmem>>, vector<128x16xf32>
    tpu.vector_store %arg6[%c0_12, %c0_13], %17 {strides = array<i32>} : memref<128x16xf32, #tpu.memory_space<vmem>>, vector<128x16xf32>,
    return
  }
}

module attributes {stable_mosaic.version = 11 : i64} {
  func.func @_mbconv_kernel(%arg0: memref<128x16xf32, #tpu.memory_space<vmem>>, %arg1: memref<16x32xbf16, #tpu.memory_space<vmem>>, %arg2: memref<1x32xf32, #tpu.memory_space<vmem>>, %arg3: memref<1x32xf32, #tpu.memory_space<vmem>>, %arg4: memref<9x32xf32, #tpu.memory_space<vmem>>, %arg5: memref<1x32xf32, #tpu.memory_space<vmem>>, %arg6: memref<1x32xf32, #tpu.memory_space<vmem>>, %arg7: memref<32x16xbf16, #tpu.memory_space<vmem>>, %arg8: memref<1x16xf32, #tpu.memory_space<vmem>>, %arg9: memref<1x16xf32, #tpu.memory_space<vmem>>, %arg10: memref<128x16xf32, #tpu.memory_space<vmem>>, %arg11: memref<2x10x10x32xf32, #tpu.memory_space<vmem>>, %arg12: memref<128x32xf32, #tpu.memory_space<vmem>>) attributes {dimension_semantics = [], scalar_prefetch = 0 : i64, scratch_operands = 2 : i64, tpu.core_type = #tpu.core_type<tc>} {
    %c0 = arith.constant 0 : index
    %c0_0 = arith.constant 0 : index
    %0 = vector.load %arg0[%c0, %c0_0] : memref<128x16xf32, #tpu.memory_space<vmem>>, vector<128x16xf32>
    %1 = arith.truncf %0 : vector<128x16xf32> to vector<128x16xbf16>
    %c0_1 = arith.constant 0 : index
    %c0_2 = arith.constant 0 : index
    %2 = vector.load %arg1[%c0_1, %c0_2] : memref<16x32xbf16, #tpu.memory_space<vmem>>, vector<16x32xbf16>
    %cst = arith.constant dense<0.000000e+00> : vector<128x32xf32>
    %3 = tpu.matmul %1, %2, %cst {dimension_numbers = #tpu.dot_dimension_numbers<[1], [0], [0], [1], [0, 0, 1, 1], [], []>} : vector<128x16xbf16>, vector<16x32xbf16>, vector<128x32xf32> -> vector<128x32xf32>
    %c0_3 = arith.constant 0 : index
    %c0_4 = arith.constant 0 : index
    %4 = vector.load %arg2[%c0_3, %c0_4] : memref<1x32xf32, #tpu.memory_space<vmem>>, vector<1x32xf32>
    %5 = vector.broadcast %4 : vector<1x32xf32> to vector<128x32xf32>
    %6 = arith.mulf %3, %5 : vector<128x32xf32>
    %c0_5 = arith.constant 0 : index
    %c0_6 = arith.constant 0 : index
    %7 = vector.load %arg3[%c0_5, %c0_6] : memref<1x32xf32, #tpu.memory_space<vmem>>, vector<1x32xf32>
    %8 = vector.broadcast %7 : vector<1x32xf32> to vector<128x32xf32>
    %9 = arith.addf %6, %8 : vector<128x32xf32>
    %10 = arith.negf %9 : vector<128x32xf32>
    %11 = math.exp %10 : vector<128x32xf32>
    %cst_7 = arith.constant 1.000000e+00 : f32
    %12 = vector.broadcast %cst_7 : f32 to vector<128x32xf32>
    %13 = arith.addf %12, %11 : vector<128x32xf32>
    %14 = arith.divf %12, %13 : vector<128x32xf32>
    %15 = arith.mulf %9, %14 : vector<128x32xf32>
    %cst_8 = arith.constant 0.000000e+00 : f32
    %16 = vector.broadcast %cst_8 : f32 to vector<2x10x10x32xf32>
    %c0_9 = arith.constant 0 : index
    %c0_10 = arith.constant 0 : index
    %c0_11 = arith.constant 0 : index
    %c0_12 = arith.constant 0 : index
    %17 = vector.load %arg11[%c0_9, %c0_10, %c0_11, %c0_12] : memref<2x10x10x32xf32, #tpu.memory_space<vmem>>, vector<2x10x10x32xf32>
    tpu.vector_store %arg11[%c0_9, %c0_10, %c0_11, %c0_12], %16 {strides = array<i32>} : memref<2x10x10x32xf32, #tpu.memory_space<vmem>>, vector<2x10x10x32xf32>,
    %18 = vector.extract_strided_slice %15 {offsets = [0, 0], sizes = [8, 32], strides = [1, 1]} : vector<128x32xf32> to vector<8x32xf32>
    %c0_13 = arith.constant 0 : index
    %c1 = arith.constant 1 : index
    %c1_14 = arith.constant 1 : index
    %c0_15 = arith.constant 0 : index
    %19 = vector.load %arg11[%c0_13, %c1, %c1_14, %c0_15] : memref<2x10x10x32xf32, #tpu.memory_space<vmem>>, vector<1x1x8x32xf32>
    %20 = vector.shape_cast %19 : vector<1x1x8x32xf32> to vector<8x32xf32>
    %21 = vector.shape_cast %18 : vector<8x32xf32> to vector<1x1x8x32xf32>
    tpu.vector_store %arg11[%c0_13, %c1, %c1_14, %c0_15], %21 {strides = array<i32>} : memref<2x10x10x32xf32, #tpu.memory_space<vmem>>, vector<1x1x8x32xf32>,
    %22 = vector.extract_strided_slice %15 {offsets = [8, 0], sizes = [8, 32], strides = [1, 1]} : vector<128x32xf32> to vector<8x32xf32>
    %c0_16 = arith.constant 0 : index
    %c2 = arith.constant 2 : index
    %c1_17 = arith.constant 1 : index
    %c0_18 = arith.constant 0 : index
    %23 = vector.load %arg11[%c0_16, %c2, %c1_17, %c0_18] : memref<2x10x10x32xf32, #tpu.memory_space<vmem>>, vector<1x1x8x32xf32>
    %24 = vector.shape_cast %23 : vector<1x1x8x32xf32> to vector<8x32xf32>
    %25 = vector.shape_cast %22 : vector<8x32xf32> to vector<1x1x8x32xf32>
    tpu.vector_store %arg11[%c0_16, %c2, %c1_17, %c0_18], %25 {strides = array<i32>} : memref<2x10x10x32xf32, #tpu.memory_space<vmem>>, vector<1x1x8x32xf32>,
    %26 = vector.extract_strided_slice %15 {offsets = [16, 0], sizes = [8, 32], strides = [1, 1]} : vector<128x32xf32> to vector<8x32xf32>
    %c0_19 = arith.constant 0 : index
    %c3 = arith.constant 3 : index
    %c1_20 = arith.constant 1 : index
    %c0_21 = arith.constant 0 : index
    %27 = vector.load %arg11[%c0_19, %c3, %c1_20, %c0_21] : memref<2x10x10x32xf32, #tpu.memory_space<vmem>>, vector<1x1x8x32xf32>
    %28 = vector.shape_cast %27 : vector<1x1x8x32xf32> to vector<8x32xf32>
    %29 = vector.shape_cast %26 : vector<8x32xf32> to vector<1x1x8x32xf32>
    tpu.vector_store %arg11[%c0_19, %c3, %c1_20, %c0_21], %29 {strides = array<i32>} : memref<2x10x10x32xf32, #tpu.memory_space<vmem>>, vector<1x1x8x32xf32>,
    %30 = vector.extract_strided_slice %15 {offsets = [24, 0], sizes = [8, 32], strides = [1, 1]} : vector<128x32xf32> to vector<8x32xf32>
    %c0_22 = arith.constant 0 : index
    %c4 = arith.constant 4 : index
    %c1_23 = arith.constant 1 : index
    %c0_24 = arith.constant 0 : index
    %31 = vector.load %arg11[%c0_22, %c4, %c1_23, %c0_24] : memref<2x10x10x32xf32, #tpu.memory_space<vmem>>, vector<1x1x8x32xf32>
    %32 = vector.shape_cast %31 : vector<1x1x8x32xf32> to vector<8x32xf32>
    %33 = vector.shape_cast %30 : vector<8x32xf32> to vector<1x1x8x32xf32>
    tpu.vector_store %arg11[%c0_22, %c4, %c1_23, %c0_24], %33 {strides = array<i32>} : memref<2x10x10x32xf32, #tpu.memory_space<vmem>>, vector<1x1x8x32xf32>,
    %34 = vector.extract_strided_slice %15 {offsets = [32, 0], sizes = [8, 32], strides = [1, 1]} : vector<128x32xf32> to vector<8x32xf32>
    %c0_25 = arith.constant 0 : index
    %c5 = arith.constant 5 : index
    %c1_26 = arith.constant 1 : index
    %c0_27 = arith.constant 0 : index
    %35 = vector.load %arg11[%c0_25, %c5, %c1_26, %c0_27] : memref<2x10x10x32xf32, #tpu.memory_space<vmem>>, vector<1x1x8x32xf32>
    %36 = vector.shape_cast %35 : vector<1x1x8x32xf32> to vector<8x32xf32>
    %37 = vector.shape_cast %34 : vector<8x32xf32> to vector<1x1x8x32xf32>
    tpu.vector_store %arg11[%c0_25, %c5, %c1_26, %c0_27], %37 {strides = array<i32>} : memref<2x10x10x32xf32, #tpu.memory_space<vmem>>, vector<1x1x8x32xf32>,
    %38 = vector.extract_strided_slice %15 {offsets = [40, 0], sizes = [8, 32], strides = [1, 1]} : vector<128x32xf32> to vector<8x32xf32>
    %c0_28 = arith.constant 0 : index
    %c6 = arith.constant 6 : index
    %c1_29 = arith.constant 1 : index
    %c0_30 = arith.constant 0 : index
    %39 = vector.load %arg11[%c0_28, %c6, %c1_29, %c0_30] : memref<2x10x10x32xf32, #tpu.memory_space<vmem>>, vector<1x1x8x32xf32>
    %40 = vector.shape_cast %39 : vector<1x1x8x32xf32> to vector<8x32xf32>
    %41 = vector.shape_cast %38 : vector<8x32xf32> to vector<1x1x8x32xf32>
    tpu.vector_store %arg11[%c0_28, %c6, %c1_29, %c0_30], %41 {strides = array<i32>} : memref<2x10x10x32xf32, #tpu.memory_space<vmem>>, vector<1x1x8x32xf32>,
    %42 = vector.extract_strided_slice %15 {offsets = [48, 0], sizes = [8, 32], strides = [1, 1]} : vector<128x32xf32> to vector<8x32xf32>
    %c0_31 = arith.constant 0 : index
    %c7 = arith.constant 7 : index
    %c1_32 = arith.constant 1 : index
    %c0_33 = arith.constant 0 : index
    %43 = vector.load %arg11[%c0_31, %c7, %c1_32, %c0_33] : memref<2x10x10x32xf32, #tpu.memory_space<vmem>>, vector<1x1x8x32xf32>
    %44 = vector.shape_cast %43 : vector<1x1x8x32xf32> to vector<8x32xf32>
    %45 = vector.shape_cast %42 : vector<8x32xf32> to vector<1x1x8x32xf32>
    tpu.vector_store %arg11[%c0_31, %c7, %c1_32, %c0_33], %45 {strides = array<i32>} : memref<2x10x10x32xf32, #tpu.memory_space<vmem>>, vector<1x1x8x32xf32>,
    %46 = vector.extract_strided_slice %15 {offsets = [56, 0], sizes = [8, 32], strides = [1, 1]} : vector<128x32xf32> to vector<8x32xf32>
    %c0_34 = arith.constant 0 : index
    %c8 = arith.constant 8 : index
    %c1_35 = arith.constant 1 : index
    %c0_36 = arith.constant 0 : index
    %47 = vector.load %arg11[%c0_34, %c8, %c1_35, %c0_36] : memref<2x10x10x32xf32, #tpu.memory_space<vmem>>, vector<1x1x8x32xf32>
    %48 = vector.shape_cast %47 : vector<1x1x8x32xf32> to vector<8x32xf32>
    %49 = vector.shape_cast %46 : vector<8x32xf32> to vector<1x1x8x32xf32>
    tpu.vector_store %arg11[%c0_34, %c8, %c1_35, %c0_36], %49 {strides = array<i32>} : memref<2x10x10x32xf32, #tpu.memory_space<vmem>>, vector<1x1x8x32xf32>,
    %50 = vector.extract_strided_slice %15 {offsets = [64, 0], sizes = [8, 32], strides = [1, 1]} : vector<128x32xf32> to vector<8x32xf32>
    %c1_37 = arith.constant 1 : index
    %c1_38 = arith.constant 1 : index
    %c1_39 = arith.constant 1 : index
    %c0_40 = arith.constant 0 : index
    %51 = vector.load %arg11[%c1_37, %c1_38, %c1_39, %c0_40] : memref<2x10x10x32xf32, #tpu.memory_space<vmem>>, vector<1x1x8x32xf32>
    %52 = vector.shape_cast %51 : vector<1x1x8x32xf32> to vector<8x32xf32>
    %53 = vector.shape_cast %50 : vector<8x32xf32> to vector<1x1x8x32xf32>
    tpu.vector_store %arg11[%c1_37, %c1_38, %c1_39, %c0_40], %53 {strides = array<i32>} : memref<2x10x10x32xf32, #tpu.memory_space<vmem>>, vector<1x1x8x32xf32>,
    %54 = vector.extract_strided_slice %15 {offsets = [72, 0], sizes = [8, 32], strides = [1, 1]} : vector<128x32xf32> to vector<8x32xf32>
    %c1_41 = arith.constant 1 : index
    %c2_42 = arith.constant 2 : index
    %c1_43 = arith.constant 1 : index
    %c0_44 = arith.constant 0 : index
    %55 = vector.load %arg11[%c1_41, %c2_42, %c1_43, %c0_44] : memref<2x10x10x32xf32, #tpu.memory_space<vmem>>, vector<1x1x8x32xf32>
    %56 = vector.shape_cast %55 : vector<1x1x8x32xf32> to vector<8x32xf32>
    %57 = vector.shape_cast %54 : vector<8x32xf32> to vector<1x1x8x32xf32>
    tpu.vector_store %arg11[%c1_41, %c2_42, %c1_43, %c0_44], %57 {strides = array<i32>} : memref<2x10x10x32xf32, #tpu.memory_space<vmem>>, vector<1x1x8x32xf32>,
    %58 = vector.extract_strided_slice %15 {offsets = [80, 0], sizes = [8, 32], strides = [1, 1]} : vector<128x32xf32> to vector<8x32xf32>
    %c1_45 = arith.constant 1 : index
    %c3_46 = arith.constant 3 : index
    %c1_47 = arith.constant 1 : index
    %c0_48 = arith.constant 0 : index
    %59 = vector.load %arg11[%c1_45, %c3_46, %c1_47, %c0_48] : memref<2x10x10x32xf32, #tpu.memory_space<vmem>>, vector<1x1x8x32xf32>
    %60 = vector.shape_cast %59 : vector<1x1x8x32xf32> to vector<8x32xf32>
    %61 = vector.shape_cast %58 : vector<8x32xf32> to vector<1x1x8x32xf32>
    tpu.vector_store %arg11[%c1_45, %c3_46, %c1_47, %c0_48], %61 {strides = array<i32>} : memref<2x10x10x32xf32, #tpu.memory_space<vmem>>, vector<1x1x8x32xf32>,
    %62 = vector.extract_strided_slice %15 {offsets = [88, 0], sizes = [8, 32], strides = [1, 1]} : vector<128x32xf32> to vector<8x32xf32>
    %c1_49 = arith.constant 1 : index
    %c4_50 = arith.constant 4 : index
    %c1_51 = arith.constant 1 : index
    %c0_52 = arith.constant 0 : index
    %63 = vector.load %arg11[%c1_49, %c4_50, %c1_51, %c0_52] : memref<2x10x10x32xf32, #tpu.memory_space<vmem>>, vector<1x1x8x32xf32>
    %64 = vector.shape_cast %63 : vector<1x1x8x32xf32> to vector<8x32xf32>
    %65 = vector.shape_cast %62 : vector<8x32xf32> to vector<1x1x8x32xf32>
    tpu.vector_store %arg11[%c1_49, %c4_50, %c1_51, %c0_52], %65 {strides = array<i32>} : memref<2x10x10x32xf32, #tpu.memory_space<vmem>>, vector<1x1x8x32xf32>,
    %66 = vector.extract_strided_slice %15 {offsets = [96, 0], sizes = [8, 32], strides = [1, 1]} : vector<128x32xf32> to vector<8x32xf32>
    %c1_53 = arith.constant 1 : index
    %c5_54 = arith.constant 5 : index
    %c1_55 = arith.constant 1 : index
    %c0_56 = arith.constant 0 : index
    %67 = vector.load %arg11[%c1_53, %c5_54, %c1_55, %c0_56] : memref<2x10x10x32xf32, #tpu.memory_space<vmem>>, vector<1x1x8x32xf32>
    %68 = vector.shape_cast %67 : vector<1x1x8x32xf32> to vector<8x32xf32>
    %69 = vector.shape_cast %66 : vector<8x32xf32> to vector<1x1x8x32xf32>
    tpu.vector_store %arg11[%c1_53, %c5_54, %c1_55, %c0_56], %69 {strides = array<i32>} : memref<2x10x10x32xf32, #tpu.memory_space<vmem>>, vector<1x1x8x32xf32>,
    %70 = vector.extract_strided_slice %15 {offsets = [104, 0], sizes = [8, 32], strides = [1, 1]} : vector<128x32xf32> to vector<8x32xf32>
    %c1_57 = arith.constant 1 : index
    %c6_58 = arith.constant 6 : index
    %c1_59 = arith.constant 1 : index
    %c0_60 = arith.constant 0 : index
    %71 = vector.load %arg11[%c1_57, %c6_58, %c1_59, %c0_60] : memref<2x10x10x32xf32, #tpu.memory_space<vmem>>, vector<1x1x8x32xf32>
    %72 = vector.shape_cast %71 : vector<1x1x8x32xf32> to vector<8x32xf32>
    %73 = vector.shape_cast %70 : vector<8x32xf32> to vector<1x1x8x32xf32>
    tpu.vector_store %arg11[%c1_57, %c6_58, %c1_59, %c0_60], %73 {strides = array<i32>} : memref<2x10x10x32xf32, #tpu.memory_space<vmem>>, vector<1x1x8x32xf32>,
    %74 = vector.extract_strided_slice %15 {offsets = [112, 0], sizes = [8, 32], strides = [1, 1]} : vector<128x32xf32> to vector<8x32xf32>
    %c1_61 = arith.constant 1 : index
    %c7_62 = arith.constant 7 : index
    %c1_63 = arith.constant 1 : index
    %c0_64 = arith.constant 0 : index
    %75 = vector.load %arg11[%c1_61, %c7_62, %c1_63, %c0_64] : memref<2x10x10x32xf32, #tpu.memory_space<vmem>>, vector<1x1x8x32xf32>
    %76 = vector.shape_cast %75 : vector<1x1x8x32xf32> to vector<8x32xf32>
    %77 = vector.shape_cast %74 : vector<8x32xf32> to vector<1x1x8x32xf32>
    tpu.vector_store %arg11[%c1_61, %c7_62, %c1_63, %c0_64], %77 {strides = array<i32>} : memref<2x10x10x32xf32, #tpu.memory_space<vmem>>, vector<1x1x8x32xf32>,
    %78 = vector.extract_strided_slice %15 {offsets = [120, 0], sizes = [8, 32], strides = [1, 1]} : vector<128x32xf32> to vector<8x32xf32>
    %c1_65 = arith.constant 1 : index
    %c8_66 = arith.constant 8 : index
    %c1_67 = arith.constant 1 : index
    %c0_68 = arith.constant 0 : index
    %79 = vector.load %arg11[%c1_65, %c8_66, %c1_67, %c0_68] : memref<2x10x10x32xf32, #tpu.memory_space<vmem>>, vector<1x1x8x32xf32>
    %80 = vector.shape_cast %79 : vector<1x1x8x32xf32> to vector<8x32xf32>
    %81 = vector.shape_cast %78 : vector<8x32xf32> to vector<1x1x8x32xf32>
    tpu.vector_store %arg11[%c1_65, %c8_66, %c1_67, %c0_68], %81 {strides = array<i32>} : memref<2x10x10x32xf32, #tpu.memory_space<vmem>>, vector<1x1x8x32xf32>,
    %c0_69 = arith.constant 0 : index
    %c0_70 = arith.constant 0 : index
    %82 = vector.load %arg4[%c0_69, %c0_70] : memref<9x32xf32, #tpu.memory_space<vmem>>, vector<9x32xf32>
    %cst_71 = arith.constant 0.000000e+00 : f32
    %83 = vector.broadcast %cst_71 : f32 to vector<8x32xf32>
    %c0_72 = arith.constant 0 : index
    %c0_73 = arith.constant 0 : index
    %c0_74 = arith.constant 0 : index
    %c0_75 = arith.constant 0 : index
    %84 = vector.load %arg11[%c0_72, %c0_73, %c0_74, %c0_75] : memref<2x10x10x32xf32, #tpu.memory_space<vmem>>, vector<1x1x8x32xf32>
    %85 = vector.shape_cast %84 : vector<1x1x8x32xf32> to vector<8x32xf32>
    %86 = vector.extract_strided_slice %82 {offsets = [0, 0], sizes = [1, 32], strides = [1, 1]} : vector<9x32xf32> to vector<1x32xf32>
    %87 = vector.broadcast %86 : vector<1x32xf32> to vector<8x32xf32>
    %88 = arith.mulf %85, %87 : vector<8x32xf32>
    %89 = arith.addf %83, %88 : vector<8x32xf32>
    %c0_76 = arith.constant 0 : index
    %c0_77 = arith.constant 0 : index
    %c1_78 = arith.constant 1 : index
    %c0_79 = arith.constant 0 : index
    %90 = vector.load %arg11[%c0_76, %c0_77, %c1_78, %c0_79] : memref<2x10x10x32xf32, #tpu.memory_space<vmem>>, vector<1x1x8x32xf32>
    %91 = vector.shape_cast %90 : vector<1x1x8x32xf32> to vector<8x32xf32>
    %92 = vector.extract_strided_slice %82 {offsets = [1, 0], sizes = [1, 32], strides = [1, 1]} : vector<9x32xf32> to vector<1x32xf32>
    %93 = vector.broadcast %92 : vector<1x32xf32> to vector<8x32xf32>
    %94 = arith.mulf %91, %93 : vector<8x32xf32>
    %95 = arith.addf %89, %94 : vector<8x32xf32>
    %c0_80 = arith.constant 0 : index
    %c0_81 = arith.constant 0 : index
    %c2_82 = arith.constant 2 : index
    %c0_83 = arith.constant 0 : index
    %96 = vector.load %arg11[%c0_80, %c0_81, %c2_82, %c0_83] : memref<2x10x10x32xf32, #tpu.memory_space<vmem>>, vector<1x1x8x32xf32>
    %97 = vector.shape_cast %96 : vector<1x1x8x32xf32> to vector<8x32xf32>
    %98 = vector.extract_strided_slice %82 {offsets = [2, 0], sizes = [1, 32], strides = [1, 1]} : vector<9x32xf32> to vector<1x32xf32>
    %99 = vector.broadcast %98 : vector<1x32xf32> to vector<8x32xf32>
    %100 = arith.mulf %97, %99 : vector<8x32xf32>
    %101 = arith.addf %95, %100 : vector<8x32xf32>
    %c0_84 = arith.constant 0 : index
    %c1_85 = arith.constant 1 : index
    %c0_86 = arith.constant 0 : index
    %c0_87 = arith.constant 0 : index
    %102 = vector.load %arg11[%c0_84, %c1_85, %c0_86, %c0_87] : memref<2x10x10x32xf32, #tpu.memory_space<vmem>>, vector<1x1x8x32xf32>
    %103 = vector.shape_cast %102 : vector<1x1x8x32xf32> to vector<8x32xf32>
    %104 = vector.extract_strided_slice %82 {offsets = [3, 0], sizes = [1, 32], strides = [1, 1]} : vector<9x32xf32> to vector<1x32xf32>
    %105 = vector.broadcast %104 : vector<1x32xf32> to vector<8x32xf32>
    %106 = arith.mulf %103, %105 : vector<8x32xf32>
    %107 = arith.addf %101, %106 : vector<8x32xf32>
    %c0_88 = arith.constant 0 : index
    %c1_89 = arith.constant 1 : index
    %c1_90 = arith.constant 1 : index
    %c0_91 = arith.constant 0 : index
    %108 = vector.load %arg11[%c0_88, %c1_89, %c1_90, %c0_91] : memref<2x10x10x32xf32, #tpu.memory_space<vmem>>, vector<1x1x8x32xf32>
    %109 = vector.shape_cast %108 : vector<1x1x8x32xf32> to vector<8x32xf32>
    %110 = vector.extract_strided_slice %82 {offsets = [4, 0], sizes = [1, 32], strides = [1, 1]} : vector<9x32xf32> to vector<1x32xf32>
    %111 = vector.broadcast %110 : vector<1x32xf32> to vector<8x32xf32>
    %112 = arith.mulf %109, %111 : vector<8x32xf32>
    %113 = arith.addf %107, %112 : vector<8x32xf32>
    %c0_92 = arith.constant 0 : index
    %c1_93 = arith.constant 1 : index
    %c2_94 = arith.constant 2 : index
    %c0_95 = arith.constant 0 : index
    %114 = vector.load %arg11[%c0_92, %c1_93, %c2_94, %c0_95] : memref<2x10x10x32xf32, #tpu.memory_space<vmem>>, vector<1x1x8x32xf32>
    %115 = vector.shape_cast %114 : vector<1x1x8x32xf32> to vector<8x32xf32>
    %116 = vector.extract_strided_slice %82 {offsets = [5, 0], sizes = [1, 32], strides = [1, 1]} : vector<9x32xf32> to vector<1x32xf32>
    %117 = vector.broadcast %116 : vector<1x32xf32> to vector<8x32xf32>
    %118 = arith.mulf %115, %117 : vector<8x32xf32>
    %119 = arith.addf %113, %118 : vector<8x32xf32>
    %c0_96 = arith.constant 0 : index
    %c2_97 = arith.constant 2 : index
    %c0_98 = arith.constant 0 : index
    %c0_99 = arith.constant 0 : index
    %120 = vector.load %arg11[%c0_96, %c2_97, %c0_98, %c0_99] : memref<2x10x10x32xf32, #tpu.memory_space<vmem>>, vector<1x1x8x32xf32>
    %121 = vector.shape_cast %120 : vector<1x1x8x32xf32> to vector<8x32xf32>
    %122 = vector.extract_strided_slice %82 {offsets = [6, 0], sizes = [1, 32], strides = [1, 1]} : vector<9x32xf32> to vector<1x32xf32>
    %123 = vector.broadcast %122 : vector<1x32xf32> to vector<8x32xf32>
    %124 = arith.mulf %121, %123 : vector<8x32xf32>
    %125 = arith.addf %119, %124 : vector<8x32xf32>
    %c0_100 = arith.constant 0 : index
    %c2_101 = arith.constant 2 : index
    %c1_102 = arith.constant 1 : index
    %c0_103 = arith.constant 0 : index
    %126 = vector.load %arg11[%c0_100, %c2_101, %c1_102, %c0_103] : memref<2x10x10x32xf32, #tpu.memory_space<vmem>>, vector<1x1x8x32xf32>
    %127 = vector.shape_cast %126 : vector<1x1x8x32xf32> to vector<8x32xf32>
    %128 = vector.extract_strided_slice %82 {offsets = [7, 0], sizes = [1, 32], strides = [1, 1]} : vector<9x32xf32> to vector<1x32xf32>
    %129 = vector.broadcast %128 : vector<1x32xf32> to vector<8x32xf32>
    %130 = arith.mulf %127, %129 : vector<8x32xf32>
    %131 = arith.addf %125, %130 : vector<8x32xf32>
    %c0_104 = arith.constant 0 : index
    %c2_105 = arith.constant 2 : index
    %c2_106 = arith.constant 2 : index
    %c0_107 = arith.constant 0 : index
    %132 = vector.load %arg11[%c0_104, %c2_105, %c2_106, %c0_107] : memref<2x10x10x32xf32, #tpu.memory_space<vmem>>, vector<1x1x8x32xf32>
    %133 = vector.shape_cast %132 : vector<1x1x8x32xf32> to vector<8x32xf32>
    %134 = vector.extract_strided_slice %82 {offsets = [8, 0], sizes = [1, 32], strides = [1, 1]} : vector<9x32xf32> to vector<1x32xf32>
    %135 = vector.broadcast %134 : vector<1x32xf32> to vector<8x32xf32>
    %136 = arith.mulf %133, %135 : vector<8x32xf32>
    %137 = arith.addf %131, %136 : vector<8x32xf32>
    %c0_108 = arith.constant 0 : index
    %c0_109 = arith.constant 0 : index
    %138 = vector.load %arg12[%c0_108, %c0_109] : memref<128x32xf32, #tpu.memory_space<vmem>>, vector<8x32xf32>
    tpu.vector_store %arg12[%c0_108, %c0_109], %137 {strides = array<i32>} : memref<128x32xf32, #tpu.memory_space<vmem>>, vector<8x32xf32>,
    %cst_110 = arith.constant 0.000000e+00 : f32
    %139 = vector.broadcast %cst_110 : f32 to vector<8x32xf32>
    %c0_111 = arith.constant 0 : index
    %c1_112 = arith.constant 1 : index
    %c0_113 = arith.constant 0 : index
    %c0_114 = arith.constant 0 : index
    %140 = vector.load %arg11[%c0_111, %c1_112, %c0_113, %c0_114] : memref<2x10x10x32xf32, #tpu.memory_space<vmem>>, vector<1x1x8x32xf32>
    %141 = vector.shape_cast %140 : vector<1x1x8x32xf32> to vector<8x32xf32>
    %142 = vector.extract_strided_slice %82 {offsets = [0, 0], sizes = [1, 32], strides = [1, 1]} : vector<9x32xf32> to vector<1x32xf32>
    %143 = vector.broadcast %142 : vector<1x32xf32> to vector<8x32xf32>
    %144 = arith.mulf %141, %143 : vector<8x32xf32>
    %145 = arith.addf %139, %144 : vector<8x32xf32>
    %c0_115 = arith.constant 0 : index
    %c1_116 = arith.constant 1 : index
    %c1_117 = arith.constant 1 : index
    %c0_118 = arith.constant 0 : index
    %146 = vector.load %arg11[%c0_115, %c1_116, %c1_117, %c0_118] : memref<2x10x10x32xf32, #tpu.memory_space<vmem>>, vector<1x1x8x32xf32>
    %147 = vector.shape_cast %146 : vector<1x1x8x32xf32> to vector<8x32xf32>
    %148 = vector.extract_strided_slice %82 {offsets = [1, 0], sizes = [1, 32], strides = [1, 1]} : vector<9x32xf32> to vector<1x32xf32>
    %149 = vector.broadcast %148 : vector<1x32xf32> to vector<8x32xf32>
    %150 = arith.mulf %147, %149 : vector<8x32xf32>
    %151 = arith.addf %145, %150 : vector<8x32xf32>
    %c0_119 = arith.constant 0 : index
    %c1_120 = arith.constant 1 : index
    %c2_121 = arith.constant 2 : index
    %c0_122 = arith.constant 0 : index
    %152 = vector.load %arg11[%c0_119, %c1_120, %c2_121, %c0_122] : memref<2x10x10x32xf32, #tpu.memory_space<vmem>>, vector<1x1x8x32xf32>
    %153 = vector.shape_cast %152 : vector<1x1x8x32xf32> to vector<8x32xf32>
    %154 = vector.extract_strided_slice %82 {offsets = [2, 0], sizes = [1, 32], strides = [1, 1]} : vector<9x32xf32> to vector<1x32xf32>
    %155 = vector.broadcast %154 : vector<1x32xf32> to vector<8x32xf32>
    %156 = arith.mulf %153, %155 : vector<8x32xf32>
    %157 = arith.addf %151, %156 : vector<8x32xf32>
    %c0_123 = arith.constant 0 : index
    %c2_124 = arith.constant 2 : index
    %c0_125 = arith.constant 0 : index
    %c0_126 = arith.constant 0 : index
    %158 = vector.load %arg11[%c0_123, %c2_124, %c0_125, %c0_126] : memref<2x10x10x32xf32, #tpu.memory_space<vmem>>, vector<1x1x8x32xf32>
    %159 = vector.shape_cast %158 : vector<1x1x8x32xf32> to vector<8x32xf32>
    %160 = vector.extract_strided_slice %82 {offsets = [3, 0], sizes = [1, 32], strides = [1, 1]} : vector<9x32xf32> to vector<1x32xf32>
    %161 = vector.broadcast %160 : vector<1x32xf32> to vector<8x32xf32>
    %162 = arith.mulf %159, %161 : vector<8x32xf32>
    %163 = arith.addf %157, %162 : vector<8x32xf32>
    %c0_127 = arith.constant 0 : index
    %c2_128 = arith.constant 2 : index
    %c1_129 = arith.constant 1 : index
    %c0_130 = arith.constant 0 : index
    %164 = vector.load %arg11[%c0_127, %c2_128, %c1_129, %c0_130] : memref<2x10x10x32xf32, #tpu.memory_space<vmem>>, vector<1x1x8x32xf32>
    %165 = vector.shape_cast %164 : vector<1x1x8x32xf32> to vector<8x32xf32>
    %166 = vector.extract_strided_slice %82 {offsets = [4, 0], sizes = [1, 32], strides = [1, 1]} : vector<9x32xf32> to vector<1x32xf32>
    %167 = vector.broadcast %166 : vector<1x32xf32> to vector<8x32xf32>
    %168 = arith.mulf %165, %167 : vector<8x32xf32>
    %169 = arith.addf %163, %168 : vector<8x32xf32>
    %c0_131 = arith.constant 0 : index
    %c2_132 = arith.constant 2 : index
    %c2_133 = arith.constant 2 : index
    %c0_134 = arith.constant 0 : index
    %170 = vector.load %arg11[%c0_131, %c2_132, %c2_133, %c0_134] : memref<2x10x10x32xf32, #tpu.memory_space<vmem>>, vector<1x1x8x32xf32>
    %171 = vector.shape_cast %170 : vector<1x1x8x32xf32> to vector<8x32xf32>
    %172 = vector.extract_strided_slice %82 {offsets = [5, 0], sizes = [1, 32], strides = [1, 1]} : vector<9x32xf32> to vector<1x32xf32>
    %173 = vector.broadcast %172 : vector<1x32xf32> to vector<8x32xf32>
    %174 = arith.mulf %171, %173 : vector<8x32xf32>
    %175 = arith.addf %169, %174 : vector<8x32xf32>
    %c0_135 = arith.constant 0 : index
    %c3_136 = arith.constant 3 : index
    %c0_137 = arith.constant 0 : index
    %c0_138 = arith.constant 0 : index
    %176 = vector.load %arg11[%c0_135, %c3_136, %c0_137, %c0_138] : memref<2x10x10x32xf32, #tpu.memory_space<vmem>>, vector<1x1x8x32xf32>
    %177 = vector.shape_cast %176 : vector<1x1x8x32xf32> to vector<8x32xf32>
    %178 = vector.extract_strided_slice %82 {offsets = [6, 0], sizes = [1, 32], strides = [1, 1]} : vector<9x32xf32> to vector<1x32xf32>
    %179 = vector.broadcast %178 : vector<1x32xf32> to vector<8x32xf32>
    %180 = arith.mulf %177, %179 : vector<8x32xf32>
    %181 = arith.addf %175, %180 : vector<8x32xf32>
    %c0_139 = arith.constant 0 : index
    %c3_140 = arith.constant 3 : index
    %c1_141 = arith.constant 1 : index
    %c0_142 = arith.constant 0 : index
    %182 = vector.load %arg11[%c0_139, %c3_140, %c1_141, %c0_142] : memref<2x10x10x32xf32, #tpu.memory_space<vmem>>, vector<1x1x8x32xf32>
    %183 = vector.shape_cast %182 : vector<1x1x8x32xf32> to vector<8x32xf32>
    %184 = vector.extract_strided_slice %82 {offsets = [7, 0], sizes = [1, 32], strides = [1, 1]} : vector<9x32xf32> to vector<1x32xf32>
    %185 = vector.broadcast %184 : vector<1x32xf32> to vector<8x32xf32>
    %186 = arith.mulf %183, %185 : vector<8x32xf32>
    %187 = arith.addf %181, %186 : vector<8x32xf32>
    %c0_143 = arith.constant 0 : index
    %c3_144 = arith.constant 3 : index
    %c2_145 = arith.constant 2 : index
    %c0_146 = arith.constant 0 : index
    %188 = vector.load %arg11[%c0_143, %c3_144, %c2_145, %c0_146] : memref<2x10x10x32xf32, #tpu.memory_space<vmem>>, vector<1x1x8x32xf32>
    %189 = vector.shape_cast %188 : vector<1x1x8x32xf32> to vector<8x32xf32>
    %190 = vector.extract_strided_slice %82 {offsets = [8, 0], sizes = [1, 32], strides = [1, 1]} : vector<9x32xf32> to vector<1x32xf32>
    %191 = vector.broadcast %190 : vector<1x32xf32> to vector<8x32xf32>
    %192 = arith.mulf %189, %191 : vector<8x32xf32>
    %193 = arith.addf %187, %192 : vector<8x32xf32>
    %c8_147 = arith.constant 8 : index
    %c0_148 = arith.constant 0 : index
    %194 = vector.load %arg12[%c8_147, %c0_148] : memref<128x32xf32, #tpu.memory_space<vmem>>, vector<8x32xf32>
    tpu.vector_store %arg12[%c8_147, %c0_148], %193 {strides = array<i32>} : memref<128x32xf32, #tpu.memory_space<vmem>>, vector<8x32xf32>,
    %cst_149 = arith.constant 0.000000e+00 : f32
    %195 = vector.broadcast %cst_149 : f32 to vector<8x32xf32>
    %c0_150 = arith.constant 0 : index
    %c2_151 = arith.constant 2 : index
    %c0_152 = arith.constant 0 : index
    %c0_153 = arith.constant 0 : index
    %196 = vector.load %arg11[%c0_150, %c2_151, %c0_152, %c0_153] : memref<2x10x10x32xf32, #tpu.memory_space<vmem>>, vector<1x1x8x32xf32>
    %197 = vector.shape_cast %196 : vector<1x1x8x32xf32> to vector<8x32xf32>
    %198 = vector.extract_strided_slice %82 {offsets = [0, 0], sizes = [1, 32], strides = [1, 1]} : vector<9x32xf32> to vector<1x32xf32>
    %199 = vector.broadcast %198 : vector<1x32xf32> to vector<8x32xf32>
    %200 = arith.mulf %197, %199 : vector<8x32xf32>
    %201 = arith.addf %195, %200 : vector<8x32xf32>
    %c0_154 = arith.constant 0 : index
    %c2_155 = arith.constant 2 : index
    %c1_156 = arith.constant 1 : index
    %c0_157 = arith.constant 0 : index
    %202 = vector.load %arg11[%c0_154, %c2_155, %c1_156, %c0_157] : memref<2x10x10x32xf32, #tpu.memory_space<vmem>>, vector<1x1x8x32xf32>
    %203 = vector.shape_cast %202 : vector<1x1x8x32xf32> to vector<8x32xf32>
    %204 = vector.extract_strided_slice %82 {offsets = [1, 0], sizes = [1, 32], strides = [1, 1]} : vector<9x32xf32> to vector<1x32xf32>
    %205 = vector.broadcast %204 : vector<1x32xf32> to vector<8x32xf32>
    %206 = arith.mulf %203, %205 : vector<8x32xf32>
    %207 = arith.addf %201, %206 : vector<8x32xf32>
    %c0_158 = arith.constant 0 : index
    %c2_159 = arith.constant 2 : index
    %c2_160 = arith.constant 2 : index
    %c0_161 = arith.constant 0 : index
    %208 = vector.load %arg11[%c0_158, %c2_159, %c2_160, %c0_161] : memref<2x10x10x32xf32, #tpu.memory_space<vmem>>, vector<1x1x8x32xf32>
    %209 = vector.shape_cast %208 : vector<1x1x8x32xf32> to vector<8x32xf32>
    %210 = vector.extract_strided_slice %82 {offsets = [2, 0], sizes = [1, 32], strides = [1, 1]} : vector<9x32xf32> to vector<1x32xf32>
    %211 = vector.broadcast %210 : vector<1x32xf32> to vector<8x32xf32>
    %212 = arith.mulf %209, %211 : vector<8x32xf32>
    %213 = arith.addf %207, %212 : vector<8x32xf32>
    %c0_162 = arith.constant 0 : index
    %c3_163 = arith.constant 3 : index
    %c0_164 = arith.constant 0 : index
    %c0_165 = arith.constant 0 : index
    %214 = vector.load %arg11[%c0_162, %c3_163, %c0_164, %c0_165] : memref<2x10x10x32xf32, #tpu.memory_space<vmem>>, vector<1x1x8x32xf32>
    %215 = vector.shape_cast %214 : vector<1x1x8x32xf32> to vector<8x32xf32>
    %216 = vector.extract_strided_slice %82 {offsets = [3, 0], sizes = [1, 32], strides = [1, 1]} : vector<9x32xf32> to vector<1x32xf32>
    %217 = vector.broadcast %216 : vector<1x32xf32> to vector<8x32xf32>
    %218 = arith.mulf %215, %217 : vector<8x32xf32>
    %219 = arith.addf %213, %218 : vector<8x32xf32>
    %c0_166 = arith.constant 0 : index
    %c3_167 = arith.constant 3 : index
    %c1_168 = arith.constant 1 : index
    %c0_169 = arith.constant 0 : index
    %220 = vector.load %arg11[%c0_166, %c3_167, %c1_168, %c0_169] : memref<2x10x10x32xf32, #tpu.memory_space<vmem>>, vector<1x1x8x32xf32>
    %221 = vector.shape_cast %220 : vector<1x1x8x32xf32> to vector<8x32xf32>
    %222 = vector.extract_strided_slice %82 {offsets = [4, 0], sizes = [1, 32], strides = [1, 1]} : vector<9x32xf32> to vector<1x32xf32>
    %223 = vector.broadcast %222 : vector<1x32xf32> to vector<8x32xf32>
    %224 = arith.mulf %221, %223 : vector<8x32xf32>
    %225 = arith.addf %219, %224 : vector<8x32xf32>
    %c0_170 = arith.constant 0 : index
    %c3_171 = arith.constant 3 : index
    %c2_172 = arith.constant 2 : index
    %c0_173 = arith.constant 0 : index
    %226 = vector.load %arg11[%c0_170, %c3_171, %c2_172, %c0_173] : memref<2x10x10x32xf32, #tpu.memory_space<vmem>>, vector<1x1x8x32xf32>
    %227 = vector.shape_cast %226 : vector<1x1x8x32xf32> to vector<8x32xf32>
    %228 = vector.extract_strided_slice %82 {offsets = [5, 0], sizes = [1, 32], strides = [1, 1]} : vector<9x32xf32> to vector<1x32xf32>
    %229 = vector.broadcast %228 : vector<1x32xf32> to vector<8x32xf32>
    %230 = arith.mulf %227, %229 : vector<8x32xf32>
    %231 = arith.addf %225, %230 : vector<8x32xf32>
    %c0_174 = arith.constant 0 : index
    %c4_175 = arith.constant 4 : index
    %c0_176 = arith.constant 0 : index
    %c0_177 = arith.constant 0 : index
    %232 = vector.load %arg11[%c0_174, %c4_175, %c0_176, %c0_177] : memref<2x10x10x32xf32, #tpu.memory_space<vmem>>, vector<1x1x8x32xf32>
    %233 = vector.shape_cast %232 : vector<1x1x8x32xf32> to vector<8x32xf32>
    %234 = vector.extract_strided_slice %82 {offsets = [6, 0], sizes = [1, 32], strides = [1, 1]} : vector<9x32xf32> to vector<1x32xf32>
    %235 = vector.broadcast %234 : vector<1x32xf32> to vector<8x32xf32>
    %236 = arith.mulf %233, %235 : vector<8x32xf32>
    %237 = arith.addf %231, %236 : vector<8x32xf32>
    %c0_178 = arith.constant 0 : index
    %c4_179 = arith.constant 4 : index
    %c1_180 = arith.constant 1 : index
    %c0_181 = arith.constant 0 : index
    %238 = vector.load %arg11[%c0_178, %c4_179, %c1_180, %c0_181] : memref<2x10x10x32xf32, #tpu.memory_space<vmem>>, vector<1x1x8x32xf32>
    %239 = vector.shape_cast %238 : vector<1x1x8x32xf32> to vector<8x32xf32>
    %240 = vector.extract_strided_slice %82 {offsets = [7, 0], sizes = [1, 32], strides = [1, 1]} : vector<9x32xf32> to vector<1x32xf32>
    %241 = vector.broadcast %240 : vector<1x32xf32> to vector<8x32xf32>
    %242 = arith.mulf %239, %241 : vector<8x32xf32>
    %243 = arith.addf %237, %242 : vector<8x32xf32>
    %c0_182 = arith.constant 0 : index
    %c4_183 = arith.constant 4 : index
    %c2_184 = arith.constant 2 : index
    %c0_185 = arith.constant 0 : index
    %244 = vector.load %arg11[%c0_182, %c4_183, %c2_184, %c0_185] : memref<2x10x10x32xf32, #tpu.memory_space<vmem>>, vector<1x1x8x32xf32>
    %245 = vector.shape_cast %244 : vector<1x1x8x32xf32> to vector<8x32xf32>
    %246 = vector.extract_strided_slice %82 {offsets = [8, 0], sizes = [1, 32], strides = [1, 1]} : vector<9x32xf32> to vector<1x32xf32>
    %247 = vector.broadcast %246 : vector<1x32xf32> to vector<8x32xf32>
    %248 = arith.mulf %245, %247 : vector<8x32xf32>
    %249 = arith.addf %243, %248 : vector<8x32xf32>
    %c16 = arith.constant 16 : index
    %c0_186 = arith.constant 0 : index
    %250 = vector.load %arg12[%c16, %c0_186] : memref<128x32xf32, #tpu.memory_space<vmem>>, vector<8x32xf32>
    tpu.vector_store %arg12[%c16, %c0_186], %249 {strides = array<i32>} : memref<128x32xf32, #tpu.memory_space<vmem>>, vector<8x32xf32>,
    %cst_187 = arith.constant 0.000000e+00 : f32
    %251 = vector.broadcast %cst_187 : f32 to vector<8x32xf32>
    %c0_188 = arith.constant 0 : index
    %c3_189 = arith.constant 3 : index
    %c0_190 = arith.constant 0 : index
    %c0_191 = arith.constant 0 : index
    %252 = vector.load %arg11[%c0_188, %c3_189, %c0_190, %c0_191] : memref<2x10x10x32xf32, #tpu.memory_space<vmem>>, vector<1x1x8x32xf32>
    %253 = vector.shape_cast %252 : vector<1x1x8x32xf32> to vector<8x32xf32>
    %254 = vector.extract_strided_slice %82 {offsets = [0, 0], sizes = [1, 32], strides = [1, 1]} : vector<9x32xf32> to vector<1x32xf32>
    %255 = vector.broadcast %254 : vector<1x32xf32> to vector<8x32xf32>
    %256 = arith.mulf %253, %255 : vector<8x32xf32>
    %257 = arith.addf %251, %256 : vector<8x32xf32>
    %c0_192 = arith.constant 0 : index
    %c3_193 = arith.constant 3 : index
    %c1_194 = arith.constant 1 : index
    %c0_195 = arith.constant 0 : index
    %258 = vector.load %arg11[%c0_192, %c3_193, %c1_194, %c0_195] : memref<2x10x10x32xf32, #tpu.memory_space<vmem>>, vector<1x1x8x32xf32>
    %259 = vector.shape_cast %258 : vector<1x1x8x32xf32> to vector<8x32xf32>
    %260 = vector.extract_strided_slice %82 {offsets = [1, 0], sizes = [1, 32], strides = [1, 1]} : vector<9x32xf32> to vector<1x32xf32>
    %261 = vector.broadcast %260 : vector<1x32xf32> to vector<8x32xf32>
    %262 = arith.mulf %259, %261 : vector<8x32xf32>
    %263 = arith.addf %257, %262 : vector<8x32xf32>
    %c0_196 = arith.constant 0 : index
    %c3_197 = arith.constant 3 : index
    %c2_198 = arith.constant 2 : index
    %c0_199 = arith.constant 0 : index
    %264 = vector.load %arg11[%c0_196, %c3_197, %c2_198, %c0_199] : memref<2x10x10x32xf32, #tpu.memory_space<vmem>>, vector<1x1x8x32xf32>
    %265 = vector.shape_cast %264 : vector<1x1x8x32xf32> to vector<8x32xf32>
    %266 = vector.extract_strided_slice %82 {offsets = [2, 0], sizes = [1, 32], strides = [1, 1]} : vector<9x32xf32> to vector<1x32xf32>
    %267 = vector.broadcast %266 : vector<1x32xf32> to vector<8x32xf32>
    %268 = arith.mulf %265, %267 : vector<8x32xf32>
    %269 = arith.addf %263, %268 : vector<8x32xf32>
    %c0_200 = arith.constant 0 : index
    %c4_201 = arith.constant 4 : index
    %c0_202 = arith.constant 0 : index
    %c0_203 = arith.constant 0 : index
    %270 = vector.load %arg11[%c0_200, %c4_201, %c0_202, %c0_203] : memref<2x10x10x32xf32, #tpu.memory_space<vmem>>, vector<1x1x8x32xf32>
    %271 = vector.shape_cast %270 : vector<1x1x8x32xf32> to vector<8x32xf32>
    %272 = vector.extract_strided_slice %82 {offsets = [3, 0], sizes = [1, 32], strides = [1, 1]} : vector<9x32xf32> to vector<1x32xf32>
    %273 = vector.broadcast %272 : vector<1x32xf32> to vector<8x32xf32>
    %274 = arith.mulf %271, %273 : vector<8x32xf32>
    %275 = arith.addf %269, %274 : vector<8x32xf32>
    %c0_204 = arith.constant 0 : index
    %c4_205 = arith.constant 4 : index
    %c1_206 = arith.constant 1 : index
    %c0_207 = arith.constant 0 : index
    %276 = vector.load %arg11[%c0_204, %c4_205, %c1_206, %c0_207] : memref<2x10x10x32xf32, #tpu.memory_space<vmem>>, vector<1x1x8x32xf32>
    %277 = vector.shape_cast %276 : vector<1x1x8x32xf32> to vector<8x32xf32>
    %278 = vector.extract_strided_slice %82 {offsets = [4, 0], sizes = [1, 32], strides = [1, 1]} : vector<9x32xf32> to vector<1x32xf32>
    %279 = vector.broadcast %278 : vector<1x32xf32> to vector<8x32xf32>
    %280 = arith.mulf %277, %279 : vector<8x32xf32>
    %281 = arith.addf %275, %280 : vector<8x32xf32>
    %c0_208 = arith.constant 0 : index
    %c4_209 = arith.constant 4 : index
    %c2_210 = arith.constant 2 : index
    %c0_211 = arith.constant 0 : index
    %282 = vector.load %arg11[%c0_208, %c4_209, %c2_210, %c0_211] : memref<2x10x10x32xf32, #tpu.memory_space<vmem>>, vector<1x1x8x32xf32>
    %283 = vector.shape_cast %282 : vector<1x1x8x32xf32> to vector<8x32xf32>
    %284 = vector.extract_strided_slice %82 {offsets = [5, 0], sizes = [1, 32], strides = [1, 1]} : vector<9x32xf32> to vector<1x32xf32>
    %285 = vector.broadcast %284 : vector<1x32xf32> to vector<8x32xf32>
    %286 = arith.mulf %283, %285 : vector<8x32xf32>
    %287 = arith.addf %281, %286 : vector<8x32xf32>
    %c0_212 = arith.constant 0 : index
    %c5_213 = arith.constant 5 : index
    %c0_214 = arith.constant 0 : index
    %c0_215 = arith.constant 0 : index
    %288 = vector.load %arg11[%c0_212, %c5_213, %c0_214, %c0_215] : memref<2x10x10x32xf32, #tpu.memory_space<vmem>>, vector<1x1x8x32xf32>
    %289 = vector.shape_cast %288 : vector<1x1x8x32xf32> to vector<8x32xf32>
    %290 = vector.extract_strided_slice %82 {offsets = [6, 0], sizes = [1, 32], strides = [1, 1]} : vector<9x32xf32> to vector<1x32xf32>
    %291 = vector.broadcast %290 : vector<1x32xf32> to vector<8x32xf32>
    %292 = arith.mulf %289, %291 : vector<8x32xf32>
    %293 = arith.addf %287, %292 : vector<8x32xf32>
    %c0_216 = arith.constant 0 : index
    %c5_217 = arith.constant 5 : index
    %c1_218 = arith.constant 1 : index
    %c0_219 = arith.constant 0 : index
    %294 = vector.load %arg11[%c0_216, %c5_217, %c1_218, %c0_219] : memref<2x10x10x32xf32, #tpu.memory_space<vmem>>, vector<1x1x8x32xf32>
    %295 = vector.shape_cast %294 : vector<1x1x8x32xf32> to vector<8x32xf32>
    %296 = vector.extract_strided_slice %82 {offsets = [7, 0], sizes = [1, 32], strides = [1, 1]} : vector<9x32xf32> to vector<1x32xf32>
    %297 = vector.broadcast %296 : vector<1x32xf32> to vector<8x32xf32>
    %298 = arith.mulf %295, %297 : vector<8x32xf32>
    %299 = arith.addf %293, %298 : vector<8x32xf32>
    %c0_220 = arith.constant 0 : index
    %c5_221 = arith.constant 5 : index
    %c2_222 = arith.constant 2 : index
    %c0_223 = arith.constant 0 : index
    %300 = vector.load %arg11[%c0_220, %c5_221, %c2_222, %c0_223] : memref<2x10x10x32xf32, #tpu.memory_space<vmem>>, vector<1x1x8x32xf32>
    %301 = vector.shape_cast %300 : vector<1x1x8x32xf32> to vector<8x32xf32>
    %302 = vector.extract_strided_slice %82 {offsets = [8, 0], sizes = [1, 32], strides = [1, 1]} : vector<9x32xf32> to vector<1x32xf32>
    %303 = vector.broadcast %302 : vector<1x32xf32> to vector<8x32xf32>
    %304 = arith.mulf %301, %303 : vector<8x32xf32>
    %305 = arith.addf %299, %304 : vector<8x32xf32>
    %c24 = arith.constant 24 : index
    %c0_224 = arith.constant 0 : index
    %306 = vector.load %arg12[%c24, %c0_224] : memref<128x32xf32, #tpu.memory_space<vmem>>, vector<8x32xf32>
    tpu.vector_store %arg12[%c24, %c0_224], %305 {strides = array<i32>} : memref<128x32xf32, #tpu.memory_space<vmem>>, vector<8x32xf32>,
    %cst_225 = arith.constant 0.000000e+00 : f32
    %307 = vector.broadcast %cst_225 : f32 to vector<8x32xf32>
    %c0_226 = arith.constant 0 : index
    %c4_227 = arith.constant 4 : index
    %c0_228 = arith.constant 0 : index
    %c0_229 = arith.constant 0 : index
    %308 = vector.load %arg11[%c0_226, %c4_227, %c0_228, %c0_229] : memref<2x10x10x32xf32, #tpu.memory_space<vmem>>, vector<1x1x8x32xf32>
    %309 = vector.shape_cast %308 : vector<1x1x8x32xf32> to vector<8x32xf32>
    %310 = vector.extract_strided_slice %82 {offsets = [0, 0], sizes = [1, 32], strides = [1, 1]} : vector<9x32xf32> to vector<1x32xf32>
    %311 = vector.broadcast %310 : vector<1x32xf32> to vector<8x32xf32>
    %312 = arith.mulf %309, %311 : vector<8x32xf32>
    %313 = arith.addf %307, %312 : vector<8x32xf32>
    %c0_230 = arith.constant 0 : index
    %c4_231 = arith.constant 4 : index
    %c1_232 = arith.constant 1 : index
    %c0_233 = arith.constant 0 : index
    %314 = vector.load %arg11[%c0_230, %c4_231, %c1_232, %c0_233] : memref<2x10x10x32xf32, #tpu.memory_space<vmem>>, vector<1x1x8x32xf32>
    %315 = vector.shape_cast %314 : vector<1x1x8x32xf32> to vector<8x32xf32>
    %316 = vector.extract_strided_slice %82 {offsets = [1, 0], sizes = [1, 32], strides = [1, 1]} : vector<9x32xf32> to vector<1x32xf32>
    %317 = vector.broadcast %316 : vector<1x32xf32> to vector<8x32xf32>
    %318 = arith.mulf %315, %317 : vector<8x32xf32>
    %319 = arith.addf %313, %318 : vector<8x32xf32>
    %c0_234 = arith.constant 0 : index
    %c4_235 = arith.constant 4 : index
    %c2_236 = arith.constant 2 : index
    %c0_237 = arith.constant 0 : index
    %320 = vector.load %arg11[%c0_234, %c4_235, %c2_236, %c0_237] : memref<2x10x10x32xf32, #tpu.memory_space<vmem>>, vector<1x1x8x32xf32>
    %321 = vector.shape_cast %320 : vector<1x1x8x32xf32> to vector<8x32xf32>
    %322 = vector.extract_strided_slice %82 {offsets = [2, 0], sizes = [1, 32], strides = [1, 1]} : vector<9x32xf32> to vector<1x32xf32>
    %323 = vector.broadcast %322 : vector<1x32xf32> to vector<8x32xf32>
    %324 = arith.mulf %321, %323 : vector<8x32xf32>
    %325 = arith.addf %319, %324 : vector<8x32xf32>
    %c0_238 = arith.constant 0 : index
    %c5_239 = arith.constant 5 : index
    %c0_240 = arith.constant 0 : index
    %c0_241 = arith.constant 0 : index
    %326 = vector.load %arg11[%c0_238, %c5_239, %c0_240, %c0_241] : memref<2x10x10x32xf32, #tpu.memory_space<vmem>>, vector<1x1x8x32xf32>
    %327 = vector.shape_cast %326 : vector<1x1x8x32xf32> to vector<8x32xf32>
    %328 = vector.extract_strided_slice %82 {offsets = [3, 0], sizes = [1, 32], strides = [1, 1]} : vector<9x32xf32> to vector<1x32xf32>
    %329 = vector.broadcast %328 : vector<1x32xf32> to vector<8x32xf32>
    %330 = arith.mulf %327, %329 : vector<8x32xf32>
    %331 = arith.addf %325, %330 : vector<8x32xf32>
    %c0_242 = arith.constant 0 : index
    %c5_243 = arith.constant 5 : index
    %c1_244 = arith.constant 1 : index
    %c0_245 = arith.constant 0 : index
    %332 = vector.load %arg11[%c0_242, %c5_243, %c1_244, %c0_245] : memref<2x10x10x32xf32, #tpu.memory_space<vmem>>, vector<1x1x8x32xf32>
    %333 = vector.shape_cast %332 : vector<1x1x8x32xf32> to vector<8x32xf32>
    %334 = vector.extract_strided_slice %82 {offsets = [4, 0], sizes = [1, 32], strides = [1, 1]} : vector<9x32xf32> to vector<1x32xf32>
    %335 = vector.broadcast %334 : vector<1x32xf32> to vector<8x32xf32>
    %336 = arith.mulf %333, %335 : vector<8x32xf32>
    %337 = arith.addf %331, %336 : vector<8x32xf32>
    %c0_246 = arith.constant 0 : index
    %c5_247 = arith.constant 5 : index
    %c2_248 = arith.constant 2 : index
    %c0_249 = arith.constant 0 : index
    %338 = vector.load %arg11[%c0_246, %c5_247, %c2_248, %c0_249] : memref<2x10x10x32xf32, #tpu.memory_space<vmem>>, vector<1x1x8x32xf32>
    %339 = vector.shape_cast %338 : vector<1x1x8x32xf32> to vector<8x32xf32>
    %340 = vector.extract_strided_slice %82 {offsets = [5, 0], sizes = [1, 32], strides = [1, 1]} : vector<9x32xf32> to vector<1x32xf32>
    %341 = vector.broadcast %340 : vector<1x32xf32> to vector<8x32xf32>
    %342 = arith.mulf %339, %341 : vector<8x32xf32>
    %343 = arith.addf %337, %342 : vector<8x32xf32>
    %c0_250 = arith.constant 0 : index
    %c6_251 = arith.constant 6 : index
    %c0_252 = arith.constant 0 : index
    %c0_253 = arith.constant 0 : index
    %344 = vector.load %arg11[%c0_250, %c6_251, %c0_252, %c0_253] : memref<2x10x10x32xf32, #tpu.memory_space<vmem>>, vector<1x1x8x32xf32>
    %345 = vector.shape_cast %344 : vector<1x1x8x32xf32> to vector<8x32xf32>
    %346 = vector.extract_strided_slice %82 {offsets = [6, 0], sizes = [1, 32], strides = [1, 1]} : vector<9x32xf32> to vector<1x32xf32>
    %347 = vector.broadcast %346 : vector<1x32xf32> to vector<8x32xf32>
    %348 = arith.mulf %345, %347 : vector<8x32xf32>
    %349 = arith.addf %343, %348 : vector<8x32xf32>
    %c0_254 = arith.constant 0 : index
    %c6_255 = arith.constant 6 : index
    %c1_256 = arith.constant 1 : index
    %c0_257 = arith.constant 0 : index
    %350 = vector.load %arg11[%c0_254, %c6_255, %c1_256, %c0_257] : memref<2x10x10x32xf32, #tpu.memory_space<vmem>>, vector<1x1x8x32xf32>
    %351 = vector.shape_cast %350 : vector<1x1x8x32xf32> to vector<8x32xf32>
    %352 = vector.extract_strided_slice %82 {offsets = [7, 0], sizes = [1, 32], strides = [1, 1]} : vector<9x32xf32> to vector<1x32xf32>
    %353 = vector.broadcast %352 : vector<1x32xf32> to vector<8x32xf32>
    %354 = arith.mulf %351, %353 : vector<8x32xf32>
    %355 = arith.addf %349, %354 : vector<8x32xf32>
    %c0_258 = arith.constant 0 : index
    %c6_259 = arith.constant 6 : index
    %c2_260 = arith.constant 2 : index
    %c0_261 = arith.constant 0 : index
    %356 = vector.load %arg11[%c0_258, %c6_259, %c2_260, %c0_261] : memref<2x10x10x32xf32, #tpu.memory_space<vmem>>, vector<1x1x8x32xf32>
    %357 = vector.shape_cast %356 : vector<1x1x8x32xf32> to vector<8x32xf32>
    %358 = vector.extract_strided_slice %82 {offsets = [8, 0], sizes = [1, 32], strides = [1, 1]} : vector<9x32xf32> to vector<1x32xf32>
    %359 = vector.broadcast %358 : vector<1x32xf32> to vector<8x32xf32>
    %360 = arith.mulf %357, %359 : vector<8x32xf32>
    %361 = arith.addf %355, %360 : vector<8x32xf32>
    %c32 = arith.constant 32 : index
    %c0_262 = arith.constant 0 : index
    %362 = vector.load %arg12[%c32, %c0_262] : memref<128x32xf32, #tpu.memory_space<vmem>>, vector<8x32xf32>
    tpu.vector_store %arg12[%c32, %c0_262], %361 {strides = array<i32>} : memref<128x32xf32, #tpu.memory_space<vmem>>, vector<8x32xf32>,
    %cst_263 = arith.constant 0.000000e+00 : f32
    %363 = vector.broadcast %cst_263 : f32 to vector<8x32xf32>
    %c0_264 = arith.constant 0 : index
    %c5_265 = arith.constant 5 : index
    %c0_266 = arith.constant 0 : index
    %c0_267 = arith.constant 0 : index
    %364 = vector.load %arg11[%c0_264, %c5_265, %c0_266, %c0_267] : memref<2x10x10x32xf32, #tpu.memory_space<vmem>>, vector<1x1x8x32xf32>
    %365 = vector.shape_cast %364 : vector<1x1x8x32xf32> to vector<8x32xf32>
    %366 = vector.extract_strided_slice %82 {offsets = [0, 0], sizes = [1, 32], strides = [1, 1]} : vector<9x32xf32> to vector<1x32xf32>
    %367 = vector.broadcast %366 : vector<1x32xf32> to vector<8x32xf32>
    %368 = arith.mulf %365, %367 : vector<8x32xf32>
    %369 = arith.addf %363, %368 : vector<8x32xf32>
    %c0_268 = arith.constant 0 : index
    %c5_269 = arith.constant 5 : index
    %c1_270 = arith.constant 1 : index
    %c0_271 = arith.constant 0 : index
    %370 = vector.load %arg11[%c0_268, %c5_269, %c1_270, %c0_271] : memref<2x10x10x32xf32, #tpu.memory_space<vmem>>, vector<1x1x8x32xf32>
    %371 = vector.shape_cast %370 : vector<1x1x8x32xf32> to vector<8x32xf32>
    %372 = vector.extract_strided_slice %82 {offsets = [1, 0], sizes = [1, 32], strides = [1, 1]} : vector<9x32xf32> to vector<1x32xf32>
    %373 = vector.broadcast %372 : vector<1x32xf32> to vector<8x32xf32>
    %374 = arith.mulf %371, %373 : vector<8x32xf32>
    %375 = arith.addf %369, %374 : vector<8x32xf32>
    %c0_272 = arith.constant 0 : index
    %c5_273 = arith.constant 5 : index
    %c2_274 = arith.constant 2 : index
    %c0_275 = arith.constant 0 : index
    %376 = vector.load %arg11[%c0_272, %c5_273, %c2_274, %c0_275] : memref<2x10x10x32xf32, #tpu.memory_space<vmem>>, vector<1x1x8x32xf32>
    %377 = vector.shape_cast %376 : vector<1x1x8x32xf32> to vector<8x32xf32>
    %378 = vector.extract_strided_slice %82 {offsets = [2, 0], sizes = [1, 32], strides = [1, 1]} : vector<9x32xf32> to vector<1x32xf32>
    %379 = vector.broadcast %378 : vector<1x32xf32> to vector<8x32xf32>
    %380 = arith.mulf %377, %379 : vector<8x32xf32>
    %381 = arith.addf %375, %380 : vector<8x32xf32>
    %c0_276 = arith.constant 0 : index
    %c6_277 = arith.constant 6 : index
    %c0_278 = arith.constant 0 : index
    %c0_279 = arith.constant 0 : index
    %382 = vector.load %arg11[%c0_276, %c6_277, %c0_278, %c0_279] : memref<2x10x10x32xf32, #tpu.memory_space<vmem>>, vector<1x1x8x32xf32>
    %383 = vector.shape_cast %382 : vector<1x1x8x32xf32> to vector<8x32xf32>
    %384 = vector.extract_strided_slice %82 {offsets = [3, 0], sizes = [1, 32], strides = [1, 1]} : vector<9x32xf32> to vector<1x32xf32>
    %385 = vector.broadcast %384 : vector<1x32xf32> to vector<8x32xf32>
    %386 = arith.mulf %383, %385 : vector<8x32xf32>
    %387 = arith.addf %381, %386 : vector<8x32xf32>
    %c0_280 = arith.constant 0 : index
    %c6_281 = arith.constant 6 : index
    %c1_282 = arith.constant 1 : index
    %c0_283 = arith.constant 0 : index
    %388 = vector.load %arg11[%c0_280, %c6_281, %c1_282, %c0_283] : memref<2x10x10x32xf32, #tpu.memory_space<vmem>>, vector<1x1x8x32xf32>
    %389 = vector.shape_cast %388 : vector<1x1x8x32xf32> to vector<8x32xf32>
    %390 = vector.extract_strided_slice %82 {offsets = [4, 0], sizes = [1, 32], strides = [1, 1]} : vector<9x32xf32> to vector<1x32xf32>
    %391 = vector.broadcast %390 : vector<1x32xf32> to vector<8x32xf32>
    %392 = arith.mulf %389, %391 : vector<8x32xf32>
    %393 = arith.addf %387, %392 : vector<8x32xf32>
    %c0_284 = arith.constant 0 : index
    %c6_285 = arith.constant 6 : index
    %c2_286 = arith.constant 2 : index
    %c0_287 = arith.constant 0 : index
    %394 = vector.load %arg11[%c0_284, %c6_285, %c2_286, %c0_287] : memref<2x10x10x32xf32, #tpu.memory_space<vmem>>, vector<1x1x8x32xf32>
    %395 = vector.shape_cast %394 : vector<1x1x8x32xf32> to vector<8x32xf32>
    %396 = vector.extract_strided_slice %82 {offsets = [5, 0], sizes = [1, 32], strides = [1, 1]} : vector<9x32xf32> to vector<1x32xf32>
    %397 = vector.broadcast %396 : vector<1x32xf32> to vector<8x32xf32>
    %398 = arith.mulf %395, %397 : vector<8x32xf32>
    %399 = arith.addf %393, %398 : vector<8x32xf32>
    %c0_288 = arith.constant 0 : index
    %c7_289 = arith.constant 7 : index
    %c0_290 = arith.constant 0 : index
    %c0_291 = arith.constant 0 : index
    %400 = vector.load %arg11[%c0_288, %c7_289, %c0_290, %c0_291] : memref<2x10x10x32xf32, #tpu.memory_space<vmem>>, vector<1x1x8x32xf32>
    %401 = vector.shape_cast %400 : vector<1x1x8x32xf32> to vector<8x32xf32>
    %402 = vector.extract_strided_slice %82 {offsets = [6, 0], sizes = [1, 32], strides = [1, 1]} : vector<9x32xf32> to vector<1x32xf32>
    %403 = vector.broadcast %402 : vector<1x32xf32> to vector<8x32xf32>
    %404 = arith.mulf %401, %403 : vector<8x32xf32>
    %405 = arith.addf %399, %404 : vector<8x32xf32>
    %c0_292 = arith.constant 0 : index
    %c7_293 = arith.constant 7 : index
    %c1_294 = arith.constant 1 : index
    %c0_295 = arith.constant 0 : index
    %406 = vector.load %arg11[%c0_292, %c7_293, %c1_294, %c0_295] : memref<2x10x10x32xf32, #tpu.memory_space<vmem>>, vector<1x1x8x32xf32>
    %407 = vector.shape_cast %406 : vector<1x1x8x32xf32> to vector<8x32xf32>
    %408 = vector.extract_strided_slice %82 {offsets = [7, 0], sizes = [1, 32], strides = [1, 1]} : vector<9x32xf32> to vector<1x32xf32>
    %409 = vector.broadcast %408 : vector<1x32xf32> to vector<8x32xf32>
    %410 = arith.mulf %407, %409 : vector<8x32xf32>
    %411 = arith.addf %405, %410 : vector<8x32xf32>
    %c0_296 = arith.constant 0 : index
    %c7_297 = arith.constant 7 : index
    %c2_298 = arith.constant 2 : index
    %c0_299 = arith.constant 0 : index
    %412 = vector.load %arg11[%c0_296, %c7_297, %c2_298, %c0_299] : memref<2x10x10x32xf32, #tpu.memory_space<vmem>>, vector<1x1x8x32xf32>
    %413 = vector.shape_cast %412 : vector<1x1x8x32xf32> to vector<8x32xf32>
    %414 = vector.extract_strided_slice %82 {offsets = [8, 0], sizes = [1, 32], strides = [1, 1]} : vector<9x32xf32> to vector<1x32xf32>
    %415 = vector.broadcast %414 : vector<1x32xf32> to vector<8x32xf32>
    %416 = arith.mulf %413, %415 : vector<8x32xf32>
    %417 = arith.addf %411, %416 : vector<8x32xf32>
    %c40 = arith.constant 40 : index
    %c0_300 = arith.constant 0 : index
    %418 = vector.load %arg12[%c40, %c0_300] : memref<128x32xf32, #tpu.memory_space<vmem>>, vector<8x32xf32>
    tpu.vector_store %arg12[%c40, %c0_300], %417 {strides = array<i32>} : memref<128x32xf32, #tpu.memory_space<vmem>>, vector<8x32xf32>,
    %cst_301 = arith.constant 0.000000e+00 : f32
    %419 = vector.broadcast %cst_301 : f32 to vector<8x32xf32>
    %c0_302 = arith.constant 0 : index
    %c6_303 = arith.constant 6 : index
    %c0_304 = arith.constant 0 : index
    %c0_305 = arith.constant 0 : index
    %420 = vector.load %arg11[%c0_302, %c6_303, %c0_304, %c0_305] : memref<2x10x10x32xf32, #tpu.memory_space<vmem>>, vector<1x1x8x32xf32>
    %421 = vector.shape_cast %420 : vector<1x1x8x32xf32> to vector<8x32xf32>
    %422 = vector.extract_strided_slice %82 {offsets = [0, 0], sizes = [1, 32], strides = [1, 1]} : vector<9x32xf32> to vector<1x32xf32>
    %423 = vector.broadcast %422 : vector<1x32xf32> to vector<8x32xf32>
    %424 = arith.mulf %421, %423 : vector<8x32xf32>
    %425 = arith.addf %419, %424 : vector<8x32xf32>
    %c0_306 = arith.constant 0 : index
    %c6_307 = arith.constant 6 : index
    %c1_308 = arith.constant 1 : index
    %c0_309 = arith.constant 0 : index
    %426 = vector.load %arg11[%c0_306, %c6_307, %c1_308, %c0_309] : memref<2x10x10x32xf32, #tpu.memory_space<vmem>>, vector<1x1x8x32xf32>
    %427 = vector.shape_cast %426 : vector<1x1x8x32xf32> to vector<8x32xf32>
    %428 = vector.extract_strided_slice %82 {offsets = [1, 0], sizes = [1, 32], strides = [1, 1]} : vector<9x32xf32> to vector<1x32xf32>
    %429 = vector.broadcast %428 : vector<1x32xf32> to vector<8x32xf32>
    %430 = arith.mulf %427, %429 : vector<8x32xf32>
    %431 = arith.addf %425, %430 : vector<8x32xf32>
    %c0_310 = arith.constant 0 : index
    %c6_311 = arith.constant 6 : index
    %c2_312 = arith.constant 2 : index
    %c0_313 = arith.constant 0 : index
    %432 = vector.load %arg11[%c0_310, %c6_311, %c2_312, %c0_313] : memref<2x10x10x32xf32, #tpu.memory_space<vmem>>, vector<1x1x8x32xf32>
    %433 = vector.shape_cast %432 : vector<1x1x8x32xf32> to vector<8x32xf32>
    %434 = vector.extract_strided_slice %82 {offsets = [2, 0], sizes = [1, 32], strides = [1, 1]} : vector<9x32xf32> to vector<1x32xf32>
    %435 = vector.broadcast %434 : vector<1x32xf32> to vector<8x32xf32>
    %436 = arith.mulf %433, %435 : vector<8x32xf32>
    %437 = arith.addf %431, %436 : vector<8x32xf32>
    %c0_314 = arith.constant 0 : index
    %c7_315 = arith.constant 7 : index
    %c0_316 = arith.constant 0 : index
    %c0_317 = arith.constant 0 : index
    %438 = vector.load %arg11[%c0_314, %c7_315, %c0_316, %c0_317] : memref<2x10x10x32xf32, #tpu.memory_space<vmem>>, vector<1x1x8x32xf32>
    %439 = vector.shape_cast %438 : vector<1x1x8x32xf32> to vector<8x32xf32>
    %440 = vector.extract_strided_slice %82 {offsets = [3, 0], sizes = [1, 32], strides = [1, 1]} : vector<9x32xf32> to vector<1x32xf32>
    %441 = vector.broadcast %440 : vector<1x32xf32> to vector<8x32xf32>
    %442 = arith.mulf %439, %441 : vector<8x32xf32>
    %443 = arith.addf %437, %442 : vector<8x32xf32>
    %c0_318 = arith.constant 0 : index
    %c7_319 = arith.constant 7 : index
    %c1_320 = arith.constant 1 : index
    %c0_321 = arith.constant 0 : index
    %444 = vector.load %arg11[%c0_318, %c7_319, %c1_320, %c0_321] : memref<2x10x10x32xf32, #tpu.memory_space<vmem>>, vector<1x1x8x32xf32>
    %445 = vector.shape_cast %444 : vector<1x1x8x32xf32> to vector<8x32xf32>
    %446 = vector.extract_strided_slice %82 {offsets = [4, 0], sizes = [1, 32], strides = [1, 1]} : vector<9x32xf32> to vector<1x32xf32>
    %447 = vector.broadcast %446 : vector<1x32xf32> to vector<8x32xf32>
    %448 = arith.mulf %445, %447 : vector<8x32xf32>
    %449 = arith.addf %443, %448 : vector<8x32xf32>
    %c0_322 = arith.constant 0 : index
    %c7_323 = arith.constant 7 : index
    %c2_324 = arith.constant 2 : index
    %c0_325 = arith.constant 0 : index
    %450 = vector.load %arg11[%c0_322, %c7_323, %c2_324, %c0_325] : memref<2x10x10x32xf32, #tpu.memory_space<vmem>>, vector<1x1x8x32xf32>
    %451 = vector.shape_cast %450 : vector<1x1x8x32xf32> to vector<8x32xf32>
    %452 = vector.extract_strided_slice %82 {offsets = [5, 0], sizes = [1, 32], strides = [1, 1]} : vector<9x32xf32> to vector<1x32xf32>
    %453 = vector.broadcast %452 : vector<1x32xf32> to vector<8x32xf32>
    %454 = arith.mulf %451, %453 : vector<8x32xf32>
    %455 = arith.addf %449, %454 : vector<8x32xf32>
    %c0_326 = arith.constant 0 : index
    %c8_327 = arith.constant 8 : index
    %c0_328 = arith.constant 0 : index
    %c0_329 = arith.constant 0 : index
    %456 = vector.load %arg11[%c0_326, %c8_327, %c0_328, %c0_329] : memref<2x10x10x32xf32, #tpu.memory_space<vmem>>, vector<1x1x8x32xf32>
    %457 = vector.shape_cast %456 : vector<1x1x8x32xf32> to vector<8x32xf32>
    %458 = vector.extract_strided_slice %82 {offsets = [6, 0], sizes = [1, 32], strides = [1, 1]} : vector<9x32xf32> to vector<1x32xf32>
    %459 = vector.broadcast %458 : vector<1x32xf32> to vector<8x32xf32>
    %460 = arith.mulf %457, %459 : vector<8x32xf32>
    %461 = arith.addf %455, %460 : vector<8x32xf32>
    %c0_330 = arith.constant 0 : index
    %c8_331 = arith.constant 8 : index
    %c1_332 = arith.constant 1 : index
    %c0_333 = arith.constant 0 : index
    %462 = vector.load %arg11[%c0_330, %c8_331, %c1_332, %c0_333] : memref<2x10x10x32xf32, #tpu.memory_space<vmem>>, vector<1x1x8x32xf32>
    %463 = vector.shape_cast %462 : vector<1x1x8x32xf32> to vector<8x32xf32>
    %464 = vector.extract_strided_slice %82 {offsets = [7, 0], sizes = [1, 32], strides = [1, 1]} : vector<9x32xf32> to vector<1x32xf32>
    %465 = vector.broadcast %464 : vector<1x32xf32> to vector<8x32xf32>
    %466 = arith.mulf %463, %465 : vector<8x32xf32>
    %467 = arith.addf %461, %466 : vector<8x32xf32>
    %c0_334 = arith.constant 0 : index
    %c8_335 = arith.constant 8 : index
    %c2_336 = arith.constant 2 : index
    %c0_337 = arith.constant 0 : index
    %468 = vector.load %arg11[%c0_334, %c8_335, %c2_336, %c0_337] : memref<2x10x10x32xf32, #tpu.memory_space<vmem>>, vector<1x1x8x32xf32>
    %469 = vector.shape_cast %468 : vector<1x1x8x32xf32> to vector<8x32xf32>
    %470 = vector.extract_strided_slice %82 {offsets = [8, 0], sizes = [1, 32], strides = [1, 1]} : vector<9x32xf32> to vector<1x32xf32>
    %471 = vector.broadcast %470 : vector<1x32xf32> to vector<8x32xf32>
    %472 = arith.mulf %469, %471 : vector<8x32xf32>
    %473 = arith.addf %467, %472 : vector<8x32xf32>
    %c48 = arith.constant 48 : index
    %c0_338 = arith.constant 0 : index
    %474 = vector.load %arg12[%c48, %c0_338] : memref<128x32xf32, #tpu.memory_space<vmem>>, vector<8x32xf32>
    tpu.vector_store %arg12[%c48, %c0_338], %473 {strides = array<i32>} : memref<128x32xf32, #tpu.memory_space<vmem>>, vector<8x32xf32>,
    %cst_339 = arith.constant 0.000000e+00 : f32
    %475 = vector.broadcast %cst_339 : f32 to vector<8x32xf32>
    %c0_340 = arith.constant 0 : index
    %c7_341 = arith.constant 7 : index
    %c0_342 = arith.constant 0 : index
    %c0_343 = arith.constant 0 : index
    %476 = vector.load %arg11[%c0_340, %c7_341, %c0_342, %c0_343] : memref<2x10x10x32xf32, #tpu.memory_space<vmem>>, vector<1x1x8x32xf32>
    %477 = vector.shape_cast %476 : vector<1x1x8x32xf32> to vector<8x32xf32>
    %478 = vector.extract_strided_slice %82 {offsets = [0, 0], sizes = [1, 32], strides = [1, 1]} : vector<9x32xf32> to vector<1x32xf32>
    %479 = vector.broadcast %478 : vector<1x32xf32> to vector<8x32xf32>
    %480 = arith.mulf %477, %479 : vector<8x32xf32>
    %481 = arith.addf %475, %480 : vector<8x32xf32>
    %c0_344 = arith.constant 0 : index
    %c7_345 = arith.constant 7 : index
    %c1_346 = arith.constant 1 : index
    %c0_347 = arith.constant 0 : index
    %482 = vector.load %arg11[%c0_344, %c7_345, %c1_346, %c0_347] : memref<2x10x10x32xf32, #tpu.memory_space<vmem>>, vector<1x1x8x32xf32>
    %483 = vector.shape_cast %482 : vector<1x1x8x32xf32> to vector<8x32xf32>
    %484 = vector.extract_strided_slice %82 {offsets = [1, 0], sizes = [1, 32], strides = [1, 1]} : vector<9x32xf32> to vector<1x32xf32>
    %485 = vector.broadcast %484 : vector<1x32xf32> to vector<8x32xf32>
    %486 = arith.mulf %483, %485 : vector<8x32xf32>
    %487 = arith.addf %481, %486 : vector<8x32xf32>
    %c0_348 = arith.constant 0 : index
    %c7_349 = arith.constant 7 : index
    %c2_350 = arith.constant 2 : index
    %c0_351 = arith.constant 0 : index
    %488 = vector.load %arg11[%c0_348, %c7_349, %c2_350, %c0_351] : memref<2x10x10x32xf32, #tpu.memory_space<vmem>>, vector<1x1x8x32xf32>
    %489 = vector.shape_cast %488 : vector<1x1x8x32xf32> to vector<8x32xf32>
    %490 = vector.extract_strided_slice %82 {offsets = [2, 0], sizes = [1, 32], strides = [1, 1]} : vector<9x32xf32> to vector<1x32xf32>
    %491 = vector.broadcast %490 : vector<1x32xf32> to vector<8x32xf32>
    %492 = arith.mulf %489, %491 : vector<8x32xf32>
    %493 = arith.addf %487, %492 : vector<8x32xf32>
    %c0_352 = arith.constant 0 : index
    %c8_353 = arith.constant 8 : index
    %c0_354 = arith.constant 0 : index
    %c0_355 = arith.constant 0 : index
    %494 = vector.load %arg11[%c0_352, %c8_353, %c0_354, %c0_355] : memref<2x10x10x32xf32, #tpu.memory_space<vmem>>, vector<1x1x8x32xf32>
    %495 = vector.shape_cast %494 : vector<1x1x8x32xf32> to vector<8x32xf32>
    %496 = vector.extract_strided_slice %82 {offsets = [3, 0], sizes = [1, 32], strides = [1, 1]} : vector<9x32xf32> to vector<1x32xf32>
    %497 = vector.broadcast %496 : vector<1x32xf32> to vector<8x32xf32>
    %498 = arith.mulf %495, %497 : vector<8x32xf32>
    %499 = arith.addf %493, %498 : vector<8x32xf32>
    %c0_356 = arith.constant 0 : index
    %c8_357 = arith.constant 8 : index
    %c1_358 = arith.constant 1 : index
    %c0_359 = arith.constant 0 : index
    %500 = vector.load %arg11[%c0_356, %c8_357, %c1_358, %c0_359] : memref<2x10x10x32xf32, #tpu.memory_space<vmem>>, vector<1x1x8x32xf32>
    %501 = vector.shape_cast %500 : vector<1x1x8x32xf32> to vector<8x32xf32>
    %502 = vector.extract_strided_slice %82 {offsets = [4, 0], sizes = [1, 32], strides = [1, 1]} : vector<9x32xf32> to vector<1x32xf32>
    %503 = vector.broadcast %502 : vector<1x32xf32> to vector<8x32xf32>
    %504 = arith.mulf %501, %503 : vector<8x32xf32>
    %505 = arith.addf %499, %504 : vector<8x32xf32>
    %c0_360 = arith.constant 0 : index
    %c8_361 = arith.constant 8 : index
    %c2_362 = arith.constant 2 : index
    %c0_363 = arith.constant 0 : index
    %506 = vector.load %arg11[%c0_360, %c8_361, %c2_362, %c0_363] : memref<2x10x10x32xf32, #tpu.memory_space<vmem>>, vector<1x1x8x32xf32>
    %507 = vector.shape_cast %506 : vector<1x1x8x32xf32> to vector<8x32xf32>
    %508 = vector.extract_strided_slice %82 {offsets = [5, 0], sizes = [1, 32], strides = [1, 1]} : vector<9x32xf32> to vector<1x32xf32>
    %509 = vector.broadcast %508 : vector<1x32xf32> to vector<8x32xf32>
    %510 = arith.mulf %507, %509 : vector<8x32xf32>
    %511 = arith.addf %505, %510 : vector<8x32xf32>
    %c0_364 = arith.constant 0 : index
    %c9 = arith.constant 9 : index
    %c0_365 = arith.constant 0 : index
    %c0_366 = arith.constant 0 : index
    %512 = vector.load %arg11[%c0_364, %c9, %c0_365, %c0_366] : memref<2x10x10x32xf32, #tpu.memory_space<vmem>>, vector<1x1x8x32xf32>
    %513 = vector.shape_cast %512 : vector<1x1x8x32xf32> to vector<8x32xf32>
    %514 = vector.extract_strided_slice %82 {offsets = [6, 0], sizes = [1, 32], strides = [1, 1]} : vector<9x32xf32> to vector<1x32xf32>
    %515 = vector.broadcast %514 : vector<1x32xf32> to vector<8x32xf32>
    %516 = arith.mulf %513, %515 : vector<8x32xf32>
    %517 = arith.addf %511, %516 : vector<8x32xf32>
    %c0_367 = arith.constant 0 : index
    %c9_368 = arith.constant 9 : index
    %c1_369 = arith.constant 1 : index
    %c0_370 = arith.constant 0 : index
    %518 = vector.load %arg11[%c0_367, %c9_368, %c1_369, %c0_370] : memref<2x10x10x32xf32, #tpu.memory_space<vmem>>, vector<1x1x8x32xf32>
    %519 = vector.shape_cast %518 : vector<1x1x8x32xf32> to vector<8x32xf32>
    %520 = vector.extract_strided_slice %82 {offsets = [7, 0], sizes = [1, 32], strides = [1, 1]} : vector<9x32xf32> to vector<1x32xf32>
    %521 = vector.broadcast %520 : vector<1x32xf32> to vector<8x32xf32>
    %522 = arith.mulf %519, %521 : vector<8x32xf32>
    %523 = arith.addf %517, %522 : vector<8x32xf32>
    %c0_371 = arith.constant 0 : index
    %c9_372 = arith.constant 9 : index
    %c2_373 = arith.constant 2 : index
    %c0_374 = arith.constant 0 : index
    %524 = vector.load %arg11[%c0_371, %c9_372, %c2_373, %c0_374] : memref<2x10x10x32xf32, #tpu.memory_space<vmem>>, vector<1x1x8x32xf32>
    %525 = vector.shape_cast %524 : vector<1x1x8x32xf32> to vector<8x32xf32>
    %526 = vector.extract_strided_slice %82 {offsets = [8, 0], sizes = [1, 32], strides = [1, 1]} : vector<9x32xf32> to vector<1x32xf32>
    %527 = vector.broadcast %526 : vector<1x32xf32> to vector<8x32xf32>
    %528 = arith.mulf %525, %527 : vector<8x32xf32>
    %529 = arith.addf %523, %528 : vector<8x32xf32>
    %c56 = arith.constant 56 : index
    %c0_375 = arith.constant 0 : index
    %530 = vector.load %arg12[%c56, %c0_375] : memref<128x32xf32, #tpu.memory_space<vmem>>, vector<8x32xf32>
    tpu.vector_store %arg12[%c56, %c0_375], %529 {strides = array<i32>} : memref<128x32xf32, #tpu.memory_space<vmem>>, vector<8x32xf32>,
    %cst_376 = arith.constant 0.000000e+00 : f32
    %531 = vector.broadcast %cst_376 : f32 to vector<8x32xf32>
    %c1_377 = arith.constant 1 : index
    %c0_378 = arith.constant 0 : index
    %c0_379 = arith.constant 0 : index
    %c0_380 = arith.constant 0 : index
    %532 = vector.load %arg11[%c1_377, %c0_378, %c0_379, %c0_380] : memref<2x10x10x32xf32, #tpu.memory_space<vmem>>, vector<1x1x8x32xf32>
    %533 = vector.shape_cast %532 : vector<1x1x8x32xf32> to vector<8x32xf32>
    %534 = vector.extract_strided_slice %82 {offsets = [0, 0], sizes = [1, 32], strides = [1, 1]} : vector<9x32xf32> to vector<1x32xf32>
    %535 = vector.broadcast %534 : vector<1x32xf32> to vector<8x32xf32>
    %536 = arith.mulf %533, %535 : vector<8x32xf32>
    %537 = arith.addf %531, %536 : vector<8x32xf32>
    %c1_381 = arith.constant 1 : index
    %c0_382 = arith.constant 0 : index
    %c1_383 = arith.constant 1 : index
    %c0_384 = arith.constant 0 : index
    %538 = vector.load %arg11[%c1_381, %c0_382, %c1_383, %c0_384] : memref<2x10x10x32xf32, #tpu.memory_space<vmem>>, vector<1x1x8x32xf32>
    %539 = vector.shape_cast %538 : vector<1x1x8x32xf32> to vector<8x32xf32>
    %540 = vector.extract_strided_slice %82 {offsets = [1, 0], sizes = [1, 32], strides = [1, 1]} : vector<9x32xf32> to vector<1x32xf32>
    %541 = vector.broadcast %540 : vector<1x32xf32> to vector<8x32xf32>
    %542 = arith.mulf %539, %541 : vector<8x32xf32>
    %543 = arith.addf %537, %542 : vector<8x32xf32>
    %c1_385 = arith.constant 1 : index
    %c0_386 = arith.constant 0 : index
    %c2_387 = arith.constant 2 : index
    %c0_388 = arith.constant 0 : index
    %544 = vector.load %arg11[%c1_385, %c0_386, %c2_387, %c0_388] : memref<2x10x10x32xf32, #tpu.memory_space<vmem>>, vector<1x1x8x32xf32>
    %545 = vector.shape_cast %544 : vector<1x1x8x32xf32> to vector<8x32xf32>
    %546 = vector.extract_strided_slice %82 {offsets = [2, 0], sizes = [1, 32], strides = [1, 1]} : vector<9x32xf32> to vector<1x32xf32>
    %547 = vector.broadcast %546 : vector<1x32xf32> to vector<8x32xf32>
    %548 = arith.mulf %545, %547 : vector<8x32xf32>
    %549 = arith.addf %543, %548 : vector<8x32xf32>
    %c1_389 = arith.constant 1 : index
    %c1_390 = arith.constant 1 : index
    %c0_391 = arith.constant 0 : index
    %c0_392 = arith.constant 0 : index
    %550 = vector.load %arg11[%c1_389, %c1_390, %c0_391, %c0_392] : memref<2x10x10x32xf32, #tpu.memory_space<vmem>>, vector<1x1x8x32xf32>
    %551 = vector.shape_cast %550 : vector<1x1x8x32xf32> to vector<8x32xf32>
    %552 = vector.extract_strided_slice %82 {offsets = [3, 0], sizes = [1, 32], strides = [1, 1]} : vector<9x32xf32> to vector<1x32xf32>
    %553 = vector.broadcast %552 : vector<1x32xf32> to vector<8x32xf32>
    %554 = arith.mulf %551, %553 : vector<8x32xf32>
    %555 = arith.addf %549, %554 : vector<8x32xf32>
    %c1_393 = arith.constant 1 : index
    %c1_394 = arith.constant 1 : index
    %c1_395 = arith.constant 1 : index
    %c0_396 = arith.constant 0 : index
    %556 = vector.load %arg11[%c1_393, %c1_394, %c1_395, %c0_396] : memref<2x10x10x32xf32, #tpu.memory_space<vmem>>, vector<1x1x8x32xf32>
    %557 = vector.shape_cast %556 : vector<1x1x8x32xf32> to vector<8x32xf32>
    %558 = vector.extract_strided_slice %82 {offsets = [4, 0], sizes = [1, 32], strides = [1, 1]} : vector<9x32xf32> to vector<1x32xf32>
    %559 = vector.broadcast %558 : vector<1x32xf32> to vector<8x32xf32>
    %560 = arith.mulf %557, %559 : vector<8x32xf32>
    %561 = arith.addf %555, %560 : vector<8x32xf32>
    %c1_397 = arith.constant 1 : index
    %c1_398 = arith.constant 1 : index
    %c2_399 = arith.constant 2 : index
    %c0_400 = arith.constant 0 : index
    %562 = vector.load %arg11[%c1_397, %c1_398, %c2_399, %c0_400] : memref<2x10x10x32xf32, #tpu.memory_space<vmem>>, vector<1x1x8x32xf32>
    %563 = vector.shape_cast %562 : vector<1x1x8x32xf32> to vector<8x32xf32>
    %564 = vector.extract_strided_slice %82 {offsets = [5, 0], sizes = [1, 32], strides = [1, 1]} : vector<9x32xf32> to vector<1x32xf32>
    %565 = vector.broadcast %564 : vector<1x32xf32> to vector<8x32xf32>
    %566 = arith.mulf %563, %565 : vector<8x32xf32>
    %567 = arith.addf %561, %566 : vector<8x32xf32>
    %c1_401 = arith.constant 1 : index
    %c2_402 = arith.constant 2 : index
    %c0_403 = arith.constant 0 : index
    %c0_404 = arith.constant 0 : index
    %568 = vector.load %arg11[%c1_401, %c2_402, %c0_403, %c0_404] : memref<2x10x10x32xf32, #tpu.memory_space<vmem>>, vector<1x1x8x32xf32>
    %569 = vector.shape_cast %568 : vector<1x1x8x32xf32> to vector<8x32xf32>
    %570 = vector.extract_strided_slice %82 {offsets = [6, 0], sizes = [1, 32], strides = [1, 1]} : vector<9x32xf32> to vector<1x32xf32>
    %571 = vector.broadcast %570 : vector<1x32xf32> to vector<8x32xf32>
    %572 = arith.mulf %569, %571 : vector<8x32xf32>
    %573 = arith.addf %567, %572 : vector<8x32xf32>
    %c1_405 = arith.constant 1 : index
    %c2_406 = arith.constant 2 : index
    %c1_407 = arith.constant 1 : index
    %c0_408 = arith.constant 0 : index
    %574 = vector.load %arg11[%c1_405, %c2_406, %c1_407, %c0_408] : memref<2x10x10x32xf32, #tpu.memory_space<vmem>>, vector<1x1x8x32xf32>
    %575 = vector.shape_cast %574 : vector<1x1x8x32xf32> to vector<8x32xf32>
    %576 = vector.extract_strided_slice %82 {offsets = [7, 0], sizes = [1, 32], strides = [1, 1]} : vector<9x32xf32> to vector<1x32xf32>
    %577 = vector.broadcast %576 : vector<1x32xf32> to vector<8x32xf32>
    %578 = arith.mulf %575, %577 : vector<8x32xf32>
    %579 = arith.addf %573, %578 : vector<8x32xf32>
    %c1_409 = arith.constant 1 : index
    %c2_410 = arith.constant 2 : index
    %c2_411 = arith.constant 2 : index
    %c0_412 = arith.constant 0 : index
    %580 = vector.load %arg11[%c1_409, %c2_410, %c2_411, %c0_412] : memref<2x10x10x32xf32, #tpu.memory_space<vmem>>, vector<1x1x8x32xf32>
    %581 = vector.shape_cast %580 : vector<1x1x8x32xf32> to vector<8x32xf32>
    %582 = vector.extract_strided_slice %82 {offsets = [8, 0], sizes = [1, 32], strides = [1, 1]} : vector<9x32xf32> to vector<1x32xf32>
    %583 = vector.broadcast %582 : vector<1x32xf32> to vector<8x32xf32>
    %584 = arith.mulf %581, %583 : vector<8x32xf32>
    %585 = arith.addf %579, %584 : vector<8x32xf32>
    %c64 = arith.constant 64 : index
    %c0_413 = arith.constant 0 : index
    %586 = vector.load %arg12[%c64, %c0_413] : memref<128x32xf32, #tpu.memory_space<vmem>>, vector<8x32xf32>
    tpu.vector_store %arg12[%c64, %c0_413], %585 {strides = array<i32>} : memref<128x32xf32, #tpu.memory_space<vmem>>, vector<8x32xf32>,
    %cst_414 = arith.constant 0.000000e+00 : f32
    %587 = vector.broadcast %cst_414 : f32 to vector<8x32xf32>
    %c1_415 = arith.constant 1 : index
    %c1_416 = arith.constant 1 : index
    %c0_417 = arith.constant 0 : index
    %c0_418 = arith.constant 0 : index
    %588 = vector.load %arg11[%c1_415, %c1_416, %c0_417, %c0_418] : memref<2x10x10x32xf32, #tpu.memory_space<vmem>>, vector<1x1x8x32xf32>
    %589 = vector.shape_cast %588 : vector<1x1x8x32xf32> to vector<8x32xf32>
    %590 = vector.extract_strided_slice %82 {offsets = [0, 0], sizes = [1, 32], strides = [1, 1]} : vector<9x32xf32> to vector<1x32xf32>
    %591 = vector.broadcast %590 : vector<1x32xf32> to vector<8x32xf32>
    %592 = arith.mulf %589, %591 : vector<8x32xf32>
    %593 = arith.addf %587, %592 : vector<8x32xf32>
    %c1_419 = arith.constant 1 : index
    %c1_420 = arith.constant 1 : index
    %c1_421 = arith.constant 1 : index
    %c0_422 = arith.constant 0 : index
    %594 = vector.load %arg11[%c1_419, %c1_420, %c1_421, %c0_422] : memref<2x10x10x32xf32, #tpu.memory_space<vmem>>, vector<1x1x8x32xf32>
    %595 = vector.shape_cast %594 : vector<1x1x8x32xf32> to vector<8x32xf32>
    %596 = vector.extract_strided_slice %82 {offsets = [1, 0], sizes = [1, 32], strides = [1, 1]} : vector<9x32xf32> to vector<1x32xf32>
    %597 = vector.broadcast %596 : vector<1x32xf32> to vector<8x32xf32>
    %598 = arith.mulf %595, %597 : vector<8x32xf32>
    %599 = arith.addf %593, %598 : vector<8x32xf32>
    %c1_423 = arith.constant 1 : index
    %c1_424 = arith.constant 1 : index
    %c2_425 = arith.constant 2 : index
    %c0_426 = arith.constant 0 : index
    %600 = vector.load %arg11[%c1_423, %c1_424, %c2_425, %c0_426] : memref<2x10x10x32xf32, #tpu.memory_space<vmem>>, vector<1x1x8x32xf32>
    %601 = vector.shape_cast %600 : vector<1x1x8x32xf32> to vector<8x32xf32>
    %602 = vector.extract_strided_slice %82 {offsets = [2, 0], sizes = [1, 32], strides = [1, 1]} : vector<9x32xf32> to vector<1x32xf32>
    %603 = vector.broadcast %602 : vector<1x32xf32> to vector<8x32xf32>
    %604 = arith.mulf %601, %603 : vector<8x32xf32>
    %605 = arith.addf %599, %604 : vector<8x32xf32>
    %c1_427 = arith.constant 1 : index
    %c2_428 = arith.constant 2 : index
    %c0_429 = arith.constant 0 : index
    %c0_430 = arith.constant 0 : index
    %606 = vector.load %arg11[%c1_427, %c2_428, %c0_429, %c0_430] : memref<2x10x10x32xf32, #tpu.memory_space<vmem>>, vector<1x1x8x32xf32>
    %607 = vector.shape_cast %606 : vector<1x1x8x32xf32> to vector<8x32xf32>
    %608 = vector.extract_strided_slice %82 {offsets = [3, 0], sizes = [1, 32], strides = [1, 1]} : vector<9x32xf32> to vector<1x32xf32>
    %609 = vector.broadcast %608 : vector<1x32xf32> to vector<8x32xf32>
    %610 = arith.mulf %607, %609 : vector<8x32xf32>
    %611 = arith.addf %605, %610 : vector<8x32xf32>
    %c1_431 = arith.constant 1 : index
    %c2_432 = arith.constant 2 : index
    %c1_433 = arith.constant 1 : index
    %c0_434 = arith.constant 0 : index
    %612 = vector.load %arg11[%c1_431, %c2_432, %c1_433, %c0_434] : memref<2x10x10x32xf32, #tpu.memory_space<vmem>>, vector<1x1x8x32xf32>
    %613 = vector.shape_cast %612 : vector<1x1x8x32xf32> to vector<8x32xf32>
    %614 = vector.extract_strided_slice %82 {offsets = [4, 0], sizes = [1, 32], strides = [1, 1]} : vector<9x32xf32> to vector<1x32xf32>
    %615 = vector.broadcast %614 : vector<1x32xf32> to vector<8x32xf32>
    %616 = arith.mulf %613, %615 : vector<8x32xf32>
    %617 = arith.addf %611, %616 : vector<8x32xf32>
    %c1_435 = arith.constant 1 : index
    %c2_436 = arith.constant 2 : index
    %c2_437 = arith.constant 2 : index
    %c0_438 = arith.constant 0 : index
    %618 = vector.load %arg11[%c1_435, %c2_436, %c2_437, %c0_438] : memref<2x10x10x32xf32, #tpu.memory_space<vmem>>, vector<1x1x8x32xf32>
    %619 = vector.shape_cast %618 : vector<1x1x8x32xf32> to vector<8x32xf32>
    %620 = vector.extract_strided_slice %82 {offsets = [5, 0], sizes = [1, 32], strides = [1, 1]} : vector<9x32xf32> to vector<1x32xf32>
    %621 = vector.broadcast %620 : vector<1x32xf32> to vector<8x32xf32>
    %622 = arith.mulf %619, %621 : vector<8x32xf32>
    %623 = arith.addf %617, %622 : vector<8x32xf32>
    %c1_439 = arith.constant 1 : index
    %c3_440 = arith.constant 3 : index
    %c0_441 = arith.constant 0 : index
    %c0_442 = arith.constant 0 : index
    %624 = vector.load %arg11[%c1_439, %c3_440, %c0_441, %c0_442] : memref<2x10x10x32xf32, #tpu.memory_space<vmem>>, vector<1x1x8x32xf32>
    %625 = vector.shape_cast %624 : vector<1x1x8x32xf32> to vector<8x32xf32>
    %626 = vector.extract_strided_slice %82 {offsets = [6, 0], sizes = [1, 32], strides = [1, 1]} : vector<9x32xf32> to vector<1x32xf32>
    %627 = vector.broadcast %626 : vector<1x32xf32> to vector<8x32xf32>
    %628 = arith.mulf %625, %627 : vector<8x32xf32>
    %629 = arith.addf %623, %628 : vector<8x32xf32>
    %c1_443 = arith.constant 1 : index
    %c3_444 = arith.constant 3 : index
    %c1_445 = arith.constant 1 : index
    %c0_446 = arith.constant 0 : index
    %630 = vector.load %arg11[%c1_443, %c3_444, %c1_445, %c0_446] : memref<2x10x10x32xf32, #tpu.memory_space<vmem>>, vector<1x1x8x32xf32>
    %631 = vector.shape_cast %630 : vector<1x1x8x32xf32> to vector<8x32xf32>
    %632 = vector.extract_strided_slice %82 {offsets = [7, 0], sizes = [1, 32], strides = [1, 1]} : vector<9x32xf32> to vector<1x32xf32>
    %633 = vector.broadcast %632 : vector<1x32xf32> to vector<8x32xf32>
    %634 = arith.mulf %631, %633 : vector<8x32xf32>
    %635 = arith.addf %629, %634 : vector<8x32xf32>
    %c1_447 = arith.constant 1 : index
    %c3_448 = arith.constant 3 : index
    %c2_449 = arith.constant 2 : index
    %c0_450 = arith.constant 0 : index
    %636 = vector.load %arg11[%c1_447, %c3_448, %c2_449, %c0_450] : memref<2x10x10x32xf32, #tpu.memory_space<vmem>>, vector<1x1x8x32xf32>
    %637 = vector.shape_cast %636 : vector<1x1x8x32xf32> to vector<8x32xf32>
    %638 = vector.extract_strided_slice %82 {offsets = [8, 0], sizes = [1, 32], strides = [1, 1]} : vector<9x32xf32> to vector<1x32xf32>
    %639 = vector.broadcast %638 : vector<1x32xf32> to vector<8x32xf32>
    %640 = arith.mulf %637, %639 : vector<8x32xf32>
    %641 = arith.addf %635, %640 : vector<8x32xf32>
    %c72 = arith.constant 72 : index
    %c0_451 = arith.constant 0 : index
    %642 = vector.load %arg12[%c72, %c0_451] : memref<128x32xf32, #tpu.memory_space<vmem>>, vector<8x32xf32>
    tpu.vector_store %arg12[%c72, %c0_451], %641 {strides = array<i32>} : memref<128x32xf32, #tpu.memory_space<vmem>>, vector<8x32xf32>,
    %cst_452 = arith.constant 0.000000e+00 : f32
    %643 = vector.broadcast %cst_452 : f32 to vector<8x32xf32>
    %c1_453 = arith.constant 1 : index
    %c2_454 = arith.constant 2 : index
    %c0_455 = arith.constant 0 : index
    %c0_456 = arith.constant 0 : index
    %644 = vector.load %arg11[%c1_453, %c2_454, %c0_455, %c0_456] : memref<2x10x10x32xf32, #tpu.memory_space<vmem>>, vector<1x1x8x32xf32>
    %645 = vector.shape_cast %644 : vector<1x1x8x32xf32> to vector<8x32xf32>
    %646 = vector.extract_strided_slice %82 {offsets = [0, 0], sizes = [1, 32], strides = [1, 1]} : vector<9x32xf32> to vector<1x32xf32>
    %647 = vector.broadcast %646 : vector<1x32xf32> to vector<8x32xf32>
    %648 = arith.mulf %645, %647 : vector<8x32xf32>
    %649 = arith.addf %643, %648 : vector<8x32xf32>
    %c1_457 = arith.constant 1 : index
    %c2_458 = arith.constant 2 : index
    %c1_459 = arith.constant 1 : index
    %c0_460 = arith.constant 0 : index
    %650 = vector.load %arg11[%c1_457, %c2_458, %c1_459, %c0_460] : memref<2x10x10x32xf32, #tpu.memory_space<vmem>>, vector<1x1x8x32xf32>
    %651 = vector.shape_cast %650 : vector<1x1x8x32xf32> to vector<8x32xf32>
    %652 = vector.extract_strided_slice %82 {offsets = [1, 0], sizes = [1, 32], strides = [1, 1]} : vector<9x32xf32> to vector<1x32xf32>
    %653 = vector.broadcast %652 : vector<1x32xf32> to vector<8x32xf32>
    %654 = arith.mulf %651, %653 : vector<8x32xf32>
    %655 = arith.addf %649, %654 : vector<8x32xf32>
    %c1_461 = arith.constant 1 : index
    %c2_462 = arith.constant 2 : index
    %c2_463 = arith.constant 2 : index
    %c0_464 = arith.constant 0 : index
    %656 = vector.load %arg11[%c1_461, %c2_462, %c2_463, %c0_464] : memref<2x10x10x32xf32, #tpu.memory_space<vmem>>, vector<1x1x8x32xf32>
    %657 = vector.shape_cast %656 : vector<1x1x8x32xf32> to vector<8x32xf32>
    %658 = vector.extract_strided_slice %82 {offsets = [2, 0], sizes = [1, 32], strides = [1, 1]} : vector<9x32xf32> to vector<1x32xf32>
    %659 = vector.broadcast %658 : vector<1x32xf32> to vector<8x32xf32>
    %660 = arith.mulf %657, %659 : vector<8x32xf32>
    %661 = arith.addf %655, %660 : vector<8x32xf32>
    %c1_465 = arith.constant 1 : index
    %c3_466 = arith.constant 3 : index
    %c0_467 = arith.constant 0 : index
    %c0_468 = arith.constant 0 : index
    %662 = vector.load %arg11[%c1_465, %c3_466, %c0_467, %c0_468] : memref<2x10x10x32xf32, #tpu.memory_space<vmem>>, vector<1x1x8x32xf32>
    %663 = vector.shape_cast %662 : vector<1x1x8x32xf32> to vector<8x32xf32>
    %664 = vector.extract_strided_slice %82 {offsets = [3, 0], sizes = [1, 32], strides = [1, 1]} : vector<9x32xf32> to vector<1x32xf32>
    %665 = vector.broadcast %664 : vector<1x32xf32> to vector<8x32xf32>
    %666 = arith.mulf %663, %665 : vector<8x32xf32>
    %667 = arith.addf %661, %666 : vector<8x32xf32>
    %c1_469 = arith.constant 1 : index
    %c3_470 = arith.constant 3 : index
    %c1_471 = arith.constant 1 : index
    %c0_472 = arith.constant 0 : index
    %668 = vector.load %arg11[%c1_469, %c3_470, %c1_471, %c0_472] : memref<2x10x10x32xf32, #tpu.memory_space<vmem>>, vector<1x1x8x32xf32>
    %669 = vector.shape_cast %668 : vector<1x1x8x32xf32> to vector<8x32xf32>
    %670 = vector.extract_strided_slice %82 {offsets = [4, 0], sizes = [1, 32], strides = [1, 1]} : vector<9x32xf32> to vector<1x32xf32>
    %671 = vector.broadcast %670 : vector<1x32xf32> to vector<8x32xf32>
    %672 = arith.mulf %669, %671 : vector<8x32xf32>
    %673 = arith.addf %667, %672 : vector<8x32xf32>
    %c1_473 = arith.constant 1 : index
    %c3_474 = arith.constant 3 : index
    %c2_475 = arith.constant 2 : index
    %c0_476 = arith.constant 0 : index
    %674 = vector.load %arg11[%c1_473, %c3_474, %c2_475, %c0_476] : memref<2x10x10x32xf32, #tpu.memory_space<vmem>>, vector<1x1x8x32xf32>
    %675 = vector.shape_cast %674 : vector<1x1x8x32xf32> to vector<8x32xf32>
    %676 = vector.extract_strided_slice %82 {offsets = [5, 0], sizes = [1, 32], strides = [1, 1]} : vector<9x32xf32> to vector<1x32xf32>
    %677 = vector.broadcast %676 : vector<1x32xf32> to vector<8x32xf32>
    %678 = arith.mulf %675, %677 : vector<8x32xf32>
    %679 = arith.addf %673, %678 : vector<8x32xf32>
    %c1_477 = arith.constant 1 : index
    %c4_478 = arith.constant 4 : index
    %c0_479 = arith.constant 0 : index
    %c0_480 = arith.constant 0 : index
    %680 = vector.load %arg11[%c1_477, %c4_478, %c0_479, %c0_480] : memref<2x10x10x32xf32, #tpu.memory_space<vmem>>, vector<1x1x8x32xf32>
    %681 = vector.shape_cast %680 : vector<1x1x8x32xf32> to vector<8x32xf32>
    %682 = vector.extract_strided_slice %82 {offsets = [6, 0], sizes = [1, 32], strides = [1, 1]} : vector<9x32xf32> to vector<1x32xf32>
    %683 = vector.broadcast %682 : vector<1x32xf32> to vector<8x32xf32>
    %684 = arith.mulf %681, %683 : vector<8x32xf32>
    %685 = arith.addf %679, %684 : vector<8x32xf32>
    %c1_481 = arith.constant 1 : index
    %c4_482 = arith.constant 4 : index
    %c1_483 = arith.constant 1 : index
    %c0_484 = arith.constant 0 : index
    %686 = vector.load %arg11[%c1_481, %c4_482, %c1_483, %c0_484] : memref<2x10x10x32xf32, #tpu.memory_space<vmem>>, vector<1x1x8x32xf32>
    %687 = vector.shape_cast %686 : vector<1x1x8x32xf32> to vector<8x32xf32>
    %688 = vector.extract_strided_slice %82 {offsets = [7, 0], sizes = [1, 32], strides = [1, 1]} : vector<9x32xf32> to vector<1x32xf32>
    %689 = vector.broadcast %688 : vector<1x32xf32> to vector<8x32xf32>
    %690 = arith.mulf %687, %689 : vector<8x32xf32>
    %691 = arith.addf %685, %690 : vector<8x32xf32>
    %c1_485 = arith.constant 1 : index
    %c4_486 = arith.constant 4 : index
    %c2_487 = arith.constant 2 : index
    %c0_488 = arith.constant 0 : index
    %692 = vector.load %arg11[%c1_485, %c4_486, %c2_487, %c0_488] : memref<2x10x10x32xf32, #tpu.memory_space<vmem>>, vector<1x1x8x32xf32>
    %693 = vector.shape_cast %692 : vector<1x1x8x32xf32> to vector<8x32xf32>
    %694 = vector.extract_strided_slice %82 {offsets = [8, 0], sizes = [1, 32], strides = [1, 1]} : vector<9x32xf32> to vector<1x32xf32>
    %695 = vector.broadcast %694 : vector<1x32xf32> to vector<8x32xf32>
    %696 = arith.mulf %693, %695 : vector<8x32xf32>
    %697 = arith.addf %691, %696 : vector<8x32xf32>
    %c80 = arith.constant 80 : index
    %c0_489 = arith.constant 0 : index
    %698 = vector.load %arg12[%c80, %c0_489] : memref<128x32xf32, #tpu.memory_space<vmem>>, vector<8x32xf32>
    tpu.vector_store %arg12[%c80, %c0_489], %697 {strides = array<i32>} : memref<128x32xf32, #tpu.memory_space<vmem>>, vector<8x32xf32>,
    %cst_490 = arith.constant 0.000000e+00 : f32
    %699 = vector.broadcast %cst_490 : f32 to vector<8x32xf32>
    %c1_491 = arith.constant 1 : index
    %c3_492 = arith.constant 3 : index
    %c0_493 = arith.constant 0 : index
    %c0_494 = arith.constant 0 : index
    %700 = vector.load %arg11[%c1_491, %c3_492, %c0_493, %c0_494] : memref<2x10x10x32xf32, #tpu.memory_space<vmem>>, vector<1x1x8x32xf32>
    %701 = vector.shape_cast %700 : vector<1x1x8x32xf32> to vector<8x32xf32>
    %702 = vector.extract_strided_slice %82 {offsets = [0, 0], sizes = [1, 32], strides = [1, 1]} : vector<9x32xf32> to vector<1x32xf32>
    %703 = vector.broadcast %702 : vector<1x32xf32> to vector<8x32xf32>
    %704 = arith.mulf %701, %703 : vector<8x32xf32>
    %705 = arith.addf %699, %704 : vector<8x32xf32>
    %c1_495 = arith.constant 1 : index
    %c3_496 = arith.constant 3 : index
    %c1_497 = arith.constant 1 : index
    %c0_498 = arith.constant 0 : index
    %706 = vector.load %arg11[%c1_495, %c3_496, %c1_497, %c0_498] : memref<2x10x10x32xf32, #tpu.memory_space<vmem>>, vector<1x1x8x32xf32>
    %707 = vector.shape_cast %706 : vector<1x1x8x32xf32> to vector<8x32xf32>
    %708 = vector.extract_strided_slice %82 {offsets = [1, 0], sizes = [1, 32], strides = [1, 1]} : vector<9x32xf32> to vector<1x32xf32>
    %709 = vector.broadcast %708 : vector<1x32xf32> to vector<8x32xf32>
    %710 = arith.mulf %707, %709 : vector<8x32xf32>
    %711 = arith.addf %705, %710 : vector<8x32xf32>
    %c1_499 = arith.constant 1 : index
    %c3_500 = arith.constant 3 : index
    %c2_501 = arith.constant 2 : index
    %c0_502 = arith.constant 0 : index
    %712 = vector.load %arg11[%c1_499, %c3_500, %c2_501, %c0_502] : memref<2x10x10x32xf32, #tpu.memory_space<vmem>>, vector<1x1x8x32xf32>
    %713 = vector.shape_cast %712 : vector<1x1x8x32xf32> to vector<8x32xf32>
    %714 = vector.extract_strided_slice %82 {offsets = [2, 0], sizes = [1, 32], strides = [1, 1]} : vector<9x32xf32> to vector<1x32xf32>
    %715 = vector.broadcast %714 : vector<1x32xf32> to vector<8x32xf32>
    %716 = arith.mulf %713, %715 : vector<8x32xf32>
    %717 = arith.addf %711, %716 : vector<8x32xf32>
    %c1_503 = arith.constant 1 : index
    %c4_504 = arith.constant 4 : index
    %c0_505 = arith.constant 0 : index
    %c0_506 = arith.constant 0 : index
    %718 = vector.load %arg11[%c1_503, %c4_504, %c0_505, %c0_506] : memref<2x10x10x32xf32, #tpu.memory_space<vmem>>, vector<1x1x8x32xf32>
    %719 = vector.shape_cast %718 : vector<1x1x8x32xf32> to vector<8x32xf32>
    %720 = vector.extract_strided_slice %82 {offsets = [3, 0], sizes = [1, 32], strides = [1, 1]} : vector<9x32xf32> to vector<1x32xf32>
    %721 = vector.broadcast %720 : vector<1x32xf32> to vector<8x32xf32>
    %722 = arith.mulf %719, %721 : vector<8x32xf32>
    %723 = arith.addf %717, %722 : vector<8x32xf32>
    %c1_507 = arith.constant 1 : index
    %c4_508 = arith.constant 4 : index
    %c1_509 = arith.constant 1 : index
    %c0_510 = arith.constant 0 : index
    %724 = vector.load %arg11[%c1_507, %c4_508, %c1_509, %c0_510] : memref<2x10x10x32xf32, #tpu.memory_space<vmem>>, vector<1x1x8x32xf32>
    %725 = vector.shape_cast %724 : vector<1x1x8x32xf32> to vector<8x32xf32>
    %726 = vector.extract_strided_slice %82 {offsets = [4, 0], sizes = [1, 32], strides = [1, 1]} : vector<9x32xf32> to vector<1x32xf32>
    %727 = vector.broadcast %726 : vector<1x32xf32> to vector<8x32xf32>
    %728 = arith.mulf %725, %727 : vector<8x32xf32>
    %729 = arith.addf %723, %728 : vector<8x32xf32>
    %c1_511 = arith.constant 1 : index
    %c4_512 = arith.constant 4 : index
    %c2_513 = arith.constant 2 : index
    %c0_514 = arith.constant 0 : index
    %730 = vector.load %arg11[%c1_511, %c4_512, %c2_513, %c0_514] : memref<2x10x10x32xf32, #tpu.memory_space<vmem>>, vector<1x1x8x32xf32>
    %731 = vector.shape_cast %730 : vector<1x1x8x32xf32> to vector<8x32xf32>
    %732 = vector.extract_strided_slice %82 {offsets = [5, 0], sizes = [1, 32], strides = [1, 1]} : vector<9x32xf32> to vector<1x32xf32>
    %733 = vector.broadcast %732 : vector<1x32xf32> to vector<8x32xf32>
    %734 = arith.mulf %731, %733 : vector<8x32xf32>
    %735 = arith.addf %729, %734 : vector<8x32xf32>
    %c1_515 = arith.constant 1 : index
    %c5_516 = arith.constant 5 : index
    %c0_517 = arith.constant 0 : index
    %c0_518 = arith.constant 0 : index
    %736 = vector.load %arg11[%c1_515, %c5_516, %c0_517, %c0_518] : memref<2x10x10x32xf32, #tpu.memory_space<vmem>>, vector<1x1x8x32xf32>
    %737 = vector.shape_cast %736 : vector<1x1x8x32xf32> to vector<8x32xf32>
    %738 = vector.extract_strided_slice %82 {offsets = [6, 0], sizes = [1, 32], strides = [1, 1]} : vector<9x32xf32> to vector<1x32xf32>
    %739 = vector.broadcast %738 : vector<1x32xf32> to vector<8x32xf32>
    %740 = arith.mulf %737, %739 : vector<8x32xf32>
    %741 = arith.addf %735, %740 : vector<8x32xf32>
    %c1_519 = arith.constant 1 : index
    %c5_520 = arith.constant 5 : index
    %c1_521 = arith.constant 1 : index
    %c0_522 = arith.constant 0 : index
    %742 = vector.load %arg11[%c1_519, %c5_520, %c1_521, %c0_522] : memref<2x10x10x32xf32, #tpu.memory_space<vmem>>, vector<1x1x8x32xf32>
    %743 = vector.shape_cast %742 : vector<1x1x8x32xf32> to vector<8x32xf32>
    %744 = vector.extract_strided_slice %82 {offsets = [7, 0], sizes = [1, 32], strides = [1, 1]} : vector<9x32xf32> to vector<1x32xf32>
    %745 = vector.broadcast %744 : vector<1x32xf32> to vector<8x32xf32>
    %746 = arith.mulf %743, %745 : vector<8x32xf32>
    %747 = arith.addf %741, %746 : vector<8x32xf32>
    %c1_523 = arith.constant 1 : index
    %c5_524 = arith.constant 5 : index
    %c2_525 = arith.constant 2 : index
    %c0_526 = arith.constant 0 : index
    %748 = vector.load %arg11[%c1_523, %c5_524, %c2_525, %c0_526] : memref<2x10x10x32xf32, #tpu.memory_space<vmem>>, vector<1x1x8x32xf32>
    %749 = vector.shape_cast %748 : vector<1x1x8x32xf32> to vector<8x32xf32>
    %750 = vector.extract_strided_slice %82 {offsets = [8, 0], sizes = [1, 32], strides = [1, 1]} : vector<9x32xf32> to vector<1x32xf32>
    %751 = vector.broadcast %750 : vector<1x32xf32> to vector<8x32xf32>
    %752 = arith.mulf %749, %751 : vector<8x32xf32>
    %753 = arith.addf %747, %752 : vector<8x32xf32>
    %c88 = arith.constant 88 : index
    %c0_527 = arith.constant 0 : index
    %754 = vector.load %arg12[%c88, %c0_527] : memref<128x32xf32, #tpu.memory_space<vmem>>, vector<8x32xf32>
    tpu.vector_store %arg12[%c88, %c0_527], %753 {strides = array<i32>} : memref<128x32xf32, #tpu.memory_space<vmem>>, vector<8x32xf32>,
    %cst_528 = arith.constant 0.000000e+00 : f32
    %755 = vector.broadcast %cst_528 : f32 to vector<8x32xf32>
    %c1_529 = arith.constant 1 : index
    %c4_530 = arith.constant 4 : index
    %c0_531 = arith.constant 0 : index
    %c0_532 = arith.constant 0 : index
    %756 = vector.load %arg11[%c1_529, %c4_530, %c0_531, %c0_532] : memref<2x10x10x32xf32, #tpu.memory_space<vmem>>, vector<1x1x8x32xf32>
    %757 = vector.shape_cast %756 : vector<1x1x8x32xf32> to vector<8x32xf32>
    %758 = vector.extract_strided_slice %82 {offsets = [0, 0], sizes = [1, 32], strides = [1, 1]} : vector<9x32xf32> to vector<1x32xf32>
    %759 = vector.broadcast %758 : vector<1x32xf32> to vector<8x32xf32>
    %760 = arith.mulf %757, %759 : vector<8x32xf32>
    %761 = arith.addf %755, %760 : vector<8x32xf32>
    %c1_533 = arith.constant 1 : index
    %c4_534 = arith.constant 4 : index
    %c1_535 = arith.constant 1 : index
    %c0_536 = arith.constant 0 : index
    %762 = vector.load %arg11[%c1_533, %c4_534, %c1_535, %c0_536] : memref<2x10x10x32xf32, #tpu.memory_space<vmem>>, vector<1x1x8x32xf32>
    %763 = vector.shape_cast %762 : vector<1x1x8x32xf32> to vector<8x32xf32>
    %764 = vector.extract_strided_slice %82 {offsets = [1, 0], sizes = [1, 32], strides = [1, 1]} : vector<9x32xf32> to vector<1x32xf32>
    %765 = vector.broadcast %764 : vector<1x32xf32> to vector<8x32xf32>
    %766 = arith.mulf %763, %765 : vector<8x32xf32>
    %767 = arith.addf %761, %766 : vector<8x32xf32>
    %c1_537 = arith.constant 1 : index
    %c4_538 = arith.constant 4 : index
    %c2_539 = arith.constant 2 : index
    %c0_540 = arith.constant 0 : index
    %768 = vector.load %arg11[%c1_537, %c4_538, %c2_539, %c0_540] : memref<2x10x10x32xf32, #tpu.memory_space<vmem>>, vector<1x1x8x32xf32>
    %769 = vector.shape_cast %768 : vector<1x1x8x32xf32> to vector<8x32xf32>
    %770 = vector.extract_strided_slice %82 {offsets = [2, 0], sizes = [1, 32], strides = [1, 1]} : vector<9x32xf32> to vector<1x32xf32>
    %771 = vector.broadcast %770 : vector<1x32xf32> to vector<8x32xf32>
    %772 = arith.mulf %769, %771 : vector<8x32xf32>
    %773 = arith.addf %767, %772 : vector<8x32xf32>
    %c1_541 = arith.constant 1 : index
    %c5_542 = arith.constant 5 : index
    %c0_543 = arith.constant 0 : index
    %c0_544 = arith.constant 0 : index
    %774 = vector.load %arg11[%c1_541, %c5_542, %c0_543, %c0_544] : memref<2x10x10x32xf32, #tpu.memory_space<vmem>>, vector<1x1x8x32xf32>
    %775 = vector.shape_cast %774 : vector<1x1x8x32xf32> to vector<8x32xf32>
    %776 = vector.extract_strided_slice %82 {offsets = [3, 0], sizes = [1, 32], strides = [1, 1]} : vector<9x32xf32> to vector<1x32xf32>
    %777 = vector.broadcast %776 : vector<1x32xf32> to vector<8x32xf32>
    %778 = arith.mulf %775, %777 : vector<8x32xf32>
    %779 = arith.addf %773, %778 : vector<8x32xf32>
    %c1_545 = arith.constant 1 : index
    %c5_546 = arith.constant 5 : index
    %c1_547 = arith.constant 1 : index
    %c0_548 = arith.constant 0 : index
    %780 = vector.load %arg11[%c1_545, %c5_546, %c1_547, %c0_548] : memref<2x10x10x32xf32, #tpu.memory_space<vmem>>, vector<1x1x8x32xf32>
    %781 = vector.shape_cast %780 : vector<1x1x8x32xf32> to vector<8x32xf32>
    %782 = vector.extract_strided_slice %82 {offsets = [4, 0], sizes = [1, 32], strides = [1, 1]} : vector<9x32xf32> to vector<1x32xf32>
    %783 = vector.broadcast %782 : vector<1x32xf32> to vector<8x32xf32>
    %784 = arith.mulf %781, %783 : vector<8x32xf32>
    %785 = arith.addf %779, %784 : vector<8x32xf32>
    %c1_549 = arith.constant 1 : index
    %c5_550 = arith.constant 5 : index
    %c2_551 = arith.constant 2 : index
    %c0_552 = arith.constant 0 : index
    %786 = vector.load %arg11[%c1_549, %c5_550, %c2_551, %c0_552] : memref<2x10x10x32xf32, #tpu.memory_space<vmem>>, vector<1x1x8x32xf32>
    %787 = vector.shape_cast %786 : vector<1x1x8x32xf32> to vector<8x32xf32>
    %788 = vector.extract_strided_slice %82 {offsets = [5, 0], sizes = [1, 32], strides = [1, 1]} : vector<9x32xf32> to vector<1x32xf32>
    %789 = vector.broadcast %788 : vector<1x32xf32> to vector<8x32xf32>
    %790 = arith.mulf %787, %789 : vector<8x32xf32>
    %791 = arith.addf %785, %790 : vector<8x32xf32>
    %c1_553 = arith.constant 1 : index
    %c6_554 = arith.constant 6 : index
    %c0_555 = arith.constant 0 : index
    %c0_556 = arith.constant 0 : index
    %792 = vector.load %arg11[%c1_553, %c6_554, %c0_555, %c0_556] : memref<2x10x10x32xf32, #tpu.memory_space<vmem>>, vector<1x1x8x32xf32>
    %793 = vector.shape_cast %792 : vector<1x1x8x32xf32> to vector<8x32xf32>
    %794 = vector.extract_strided_slice %82 {offsets = [6, 0], sizes = [1, 32], strides = [1, 1]} : vector<9x32xf32> to vector<1x32xf32>
    %795 = vector.broadcast %794 : vector<1x32xf32> to vector<8x32xf32>
    %796 = arith.mulf %793, %795 : vector<8x32xf32>
    %797 = arith.addf %791, %796 : vector<8x32xf32>
    %c1_557 = arith.constant 1 : index
    %c6_558 = arith.constant 6 : index
    %c1_559 = arith.constant 1 : index
    %c0_560 = arith.constant 0 : index
    %798 = vector.load %arg11[%c1_557, %c6_558, %c1_559, %c0_560] : memref<2x10x10x32xf32, #tpu.memory_space<vmem>>, vector<1x1x8x32xf32>
    %799 = vector.shape_cast %798 : vector<1x1x8x32xf32> to vector<8x32xf32>
    %800 = vector.extract_strided_slice %82 {offsets = [7, 0], sizes = [1, 32], strides = [1, 1]} : vector<9x32xf32> to vector<1x32xf32>
    %801 = vector.broadcast %800 : vector<1x32xf32> to vector<8x32xf32>
    %802 = arith.mulf %799, %801 : vector<8x32xf32>
    %803 = arith.addf %797, %802 : vector<8x32xf32>
    %c1_561 = arith.constant 1 : index
    %c6_562 = arith.constant 6 : index
    %c2_563 = arith.constant 2 : index
    %c0_564 = arith.constant 0 : index
    %804 = vector.load %arg11[%c1_561, %c6_562, %c2_563, %c0_564] : memref<2x10x10x32xf32, #tpu.memory_space<vmem>>, vector<1x1x8x32xf32>
    %805 = vector.shape_cast %804 : vector<1x1x8x32xf32> to vector<8x32xf32>
    %806 = vector.extract_strided_slice %82 {offsets = [8, 0], sizes = [1, 32], strides = [1, 1]} : vector<9x32xf32> to vector<1x32xf32>
    %807 = vector.broadcast %806 : vector<1x32xf32> to vector<8x32xf32>
    %808 = arith.mulf %805, %807 : vector<8x32xf32>
    %809 = arith.addf %803, %808 : vector<8x32xf32>
    %c96 = arith.constant 96 : index
    %c0_565 = arith.constant 0 : index
    %810 = vector.load %arg12[%c96, %c0_565] : memref<128x32xf32, #tpu.memory_space<vmem>>, vector<8x32xf32>
    tpu.vector_store %arg12[%c96, %c0_565], %809 {strides = array<i32>} : memref<128x32xf32, #tpu.memory_space<vmem>>, vector<8x32xf32>,
    %cst_566 = arith.constant 0.000000e+00 : f32
    %811 = vector.broadcast %cst_566 : f32 to vector<8x32xf32>
    %c1_567 = arith.constant 1 : index
    %c5_568 = arith.constant 5 : index
    %c0_569 = arith.constant 0 : index
    %c0_570 = arith.constant 0 : index
    %812 = vector.load %arg11[%c1_567, %c5_568, %c0_569, %c0_570] : memref<2x10x10x32xf32, #tpu.memory_space<vmem>>, vector<1x1x8x32xf32>
    %813 = vector.shape_cast %812 : vector<1x1x8x32xf32> to vector<8x32xf32>
    %814 = vector.extract_strided_slice %82 {offsets = [0, 0], sizes = [1, 32], strides = [1, 1]} : vector<9x32xf32> to vector<1x32xf32>
    %815 = vector.broadcast %814 : vector<1x32xf32> to vector<8x32xf32>
    %816 = arith.mulf %813, %815 : vector<8x32xf32>
    %817 = arith.addf %811, %816 : vector<8x32xf32>
    %c1_571 = arith.constant 1 : index
    %c5_572 = arith.constant 5 : index
    %c1_573 = arith.constant 1 : index
    %c0_574 = arith.constant 0 : index
    %818 = vector.load %arg11[%c1_571, %c5_572, %c1_573, %c0_574] : memref<2x10x10x32xf32, #tpu.memory_space<vmem>>, vector<1x1x8x32xf32>
    %819 = vector.shape_cast %818 : vector<1x1x8x32xf32> to vector<8x32xf32>
    %820 = vector.extract_strided_slice %82 {offsets = [1, 0], sizes = [1, 32], strides = [1, 1]} : vector<9x32xf32> to vector<1x32xf32>
    %821 = vector.broadcast %820 : vector<1x32xf32> to vector<8x32xf32>
    %822 = arith.mulf %819, %821 : vector<8x32xf32>
    %823 = arith.addf %817, %822 : vector<8x32xf32>
    %c1_575 = arith.constant 1 : index
    %c5_576 = arith.constant 5 : index
    %c2_577 = arith.constant 2 : index
    %c0_578 = arith.constant 0 : index
    %824 = vector.load %arg11[%c1_575, %c5_576, %c2_577, %c0_578] : memref<2x10x10x32xf32, #tpu.memory_space<vmem>>, vector<1x1x8x32xf32>
    %825 = vector.shape_cast %824 : vector<1x1x8x32xf32> to vector<8x32xf32>
    %826 = vector.extract_strided_slice %82 {offsets = [2, 0], sizes = [1, 32], strides = [1, 1]} : vector<9x32xf32> to vector<1x32xf32>
    %827 = vector.broadcast %826 : vector<1x32xf32> to vector<8x32xf32>
    %828 = arith.mulf %825, %827 : vector<8x32xf32>
    %829 = arith.addf %823, %828 : vector<8x32xf32>
    %c1_579 = arith.constant 1 : index
    %c6_580 = arith.constant 6 : index
    %c0_581 = arith.constant 0 : index
    %c0_582 = arith.constant 0 : index
    %830 = vector.load %arg11[%c1_579, %c6_580, %c0_581, %c0_582] : memref<2x10x10x32xf32, #tpu.memory_space<vmem>>, vector<1x1x8x32xf32>
    %831 = vector.shape_cast %830 : vector<1x1x8x32xf32> to vector<8x32xf32>
    %832 = vector.extract_strided_slice %82 {offsets = [3, 0], sizes = [1, 32], strides = [1, 1]} : vector<9x32xf32> to vector<1x32xf32>
    %833 = vector.broadcast %832 : vector<1x32xf32> to vector<8x32xf32>
    %834 = arith.mulf %831, %833 : vector<8x32xf32>
    %835 = arith.addf %829, %834 : vector<8x32xf32>
    %c1_583 = arith.constant 1 : index
    %c6_584 = arith.constant 6 : index
    %c1_585 = arith.constant 1 : index
    %c0_586 = arith.constant 0 : index
    %836 = vector.load %arg11[%c1_583, %c6_584, %c1_585, %c0_586] : memref<2x10x10x32xf32, #tpu.memory_space<vmem>>, vector<1x1x8x32xf32>
    %837 = vector.shape_cast %836 : vector<1x1x8x32xf32> to vector<8x32xf32>
    %838 = vector.extract_strided_slice %82 {offsets = [4, 0], sizes = [1, 32], strides = [1, 1]} : vector<9x32xf32> to vector<1x32xf32>
    %839 = vector.broadcast %838 : vector<1x32xf32> to vector<8x32xf32>
    %840 = arith.mulf %837, %839 : vector<8x32xf32>
    %841 = arith.addf %835, %840 : vector<8x32xf32>
    %c1_587 = arith.constant 1 : index
    %c6_588 = arith.constant 6 : index
    %c2_589 = arith.constant 2 : index
    %c0_590 = arith.constant 0 : index
    %842 = vector.load %arg11[%c1_587, %c6_588, %c2_589, %c0_590] : memref<2x10x10x32xf32, #tpu.memory_space<vmem>>, vector<1x1x8x32xf32>
    %843 = vector.shape_cast %842 : vector<1x1x8x32xf32> to vector<8x32xf32>
    %844 = vector.extract_strided_slice %82 {offsets = [5, 0], sizes = [1, 32], strides = [1, 1]} : vector<9x32xf32> to vector<1x32xf32>
    %845 = vector.broadcast %844 : vector<1x32xf32> to vector<8x32xf32>
    %846 = arith.mulf %843, %845 : vector<8x32xf32>
    %847 = arith.addf %841, %846 : vector<8x32xf32>
    %c1_591 = arith.constant 1 : index
    %c7_592 = arith.constant 7 : index
    %c0_593 = arith.constant 0 : index
    %c0_594 = arith.constant 0 : index
    %848 = vector.load %arg11[%c1_591, %c7_592, %c0_593, %c0_594] : memref<2x10x10x32xf32, #tpu.memory_space<vmem>>, vector<1x1x8x32xf32>
    %849 = vector.shape_cast %848 : vector<1x1x8x32xf32> to vector<8x32xf32>
    %850 = vector.extract_strided_slice %82 {offsets = [6, 0], sizes = [1, 32], strides = [1, 1]} : vector<9x32xf32> to vector<1x32xf32>
    %851 = vector.broadcast %850 : vector<1x32xf32> to vector<8x32xf32>
    %852 = arith.mulf %849, %851 : vector<8x32xf32>
    %853 = arith.addf %847, %852 : vector<8x32xf32>
    %c1_595 = arith.constant 1 : index
    %c7_596 = arith.constant 7 : index
    %c1_597 = arith.constant 1 : index
    %c0_598 = arith.constant 0 : index
    %854 = vector.load %arg11[%c1_595, %c7_596, %c1_597, %c0_598] : memref<2x10x10x32xf32, #tpu.memory_space<vmem>>, vector<1x1x8x32xf32>
    %855 = vector.shape_cast %854 : vector<1x1x8x32xf32> to vector<8x32xf32>
    %856 = vector.extract_strided_slice %82 {offsets = [7, 0], sizes = [1, 32], strides = [1, 1]} : vector<9x32xf32> to vector<1x32xf32>
    %857 = vector.broadcast %856 : vector<1x32xf32> to vector<8x32xf32>
    %858 = arith.mulf %855, %857 : vector<8x32xf32>
    %859 = arith.addf %853, %858 : vector<8x32xf32>
    %c1_599 = arith.constant 1 : index
    %c7_600 = arith.constant 7 : index
    %c2_601 = arith.constant 2 : index
    %c0_602 = arith.constant 0 : index
    %860 = vector.load %arg11[%c1_599, %c7_600, %c2_601, %c0_602] : memref<2x10x10x32xf32, #tpu.memory_space<vmem>>, vector<1x1x8x32xf32>
    %861 = vector.shape_cast %860 : vector<1x1x8x32xf32> to vector<8x32xf32>
    %862 = vector.extract_strided_slice %82 {offsets = [8, 0], sizes = [1, 32], strides = [1, 1]} : vector<9x32xf32> to vector<1x32xf32>
    %863 = vector.broadcast %862 : vector<1x32xf32> to vector<8x32xf32>
    %864 = arith.mulf %861, %863 : vector<8x32xf32>
    %865 = arith.addf %859, %864 : vector<8x32xf32>
    %c104 = arith.constant 104 : index
    %c0_603 = arith.constant 0 : index
    %866 = vector.load %arg12[%c104, %c0_603] : memref<128x32xf32, #tpu.memory_space<vmem>>, vector<8x32xf32>
    tpu.vector_store %arg12[%c104, %c0_603], %865 {strides = array<i32>} : memref<128x32xf32, #tpu.memory_space<vmem>>, vector<8x32xf32>,
    %cst_604 = arith.constant 0.000000e+00 : f32
    %867 = vector.broadcast %cst_604 : f32 to vector<8x32xf32>
    %c1_605 = arith.constant 1 : index
    %c6_606 = arith.constant 6 : index
    %c0_607 = arith.constant 0 : index
    %c0_608 = arith.constant 0 : index
    %868 = vector.load %arg11[%c1_605, %c6_606, %c0_607, %c0_608] : memref<2x10x10x32xf32, #tpu.memory_space<vmem>>, vector<1x1x8x32xf32>
    %869 = vector.shape_cast %868 : vector<1x1x8x32xf32> to vector<8x32xf32>
    %870 = vector.extract_strided_slice %82 {offsets = [0, 0], sizes = [1, 32], strides = [1, 1]} : vector<9x32xf32> to vector<1x32xf32>
    %871 = vector.broadcast %870 : vector<1x32xf32> to vector<8x32xf32>
    %872 = arith.mulf %869, %871 : vector<8x32xf32>
    %873 = arith.addf %867, %872 : vector<8x32xf32>
    %c1_609 = arith.constant 1 : index
    %c6_610 = arith.constant 6 : index
    %c1_611 = arith.constant 1 : index
    %c0_612 = arith.constant 0 : index
    %874 = vector.load %arg11[%c1_609, %c6_610, %c1_611, %c0_612] : memref<2x10x10x32xf32, #tpu.memory_space<vmem>>, vector<1x1x8x32xf32>
    %875 = vector.shape_cast %874 : vector<1x1x8x32xf32> to vector<8x32xf32>
    %876 = vector.extract_strided_slice %82 {offsets = [1, 0], sizes = [1, 32], strides = [1, 1]} : vector<9x32xf32> to vector<1x32xf32>
    %877 = vector.broadcast %876 : vector<1x32xf32> to vector<8x32xf32>
    %878 = arith.mulf %875, %877 : vector<8x32xf32>
    %879 = arith.addf %873, %878 : vector<8x32xf32>
    %c1_613 = arith.constant 1 : index
    %c6_614 = arith.constant 6 : index
    %c2_615 = arith.constant 2 : index
    %c0_616 = arith.constant 0 : index
    %880 = vector.load %arg11[%c1_613, %c6_614, %c2_615, %c0_616] : memref<2x10x10x32xf32, #tpu.memory_space<vmem>>, vector<1x1x8x32xf32>
    %881 = vector.shape_cast %880 : vector<1x1x8x32xf32> to vector<8x32xf32>
    %882 = vector.extract_strided_slice %82 {offsets = [2, 0], sizes = [1, 32], strides = [1, 1]} : vector<9x32xf32> to vector<1x32xf32>
    %883 = vector.broadcast %882 : vector<1x32xf32> to vector<8x32xf32>
    %884 = arith.mulf %881, %883 : vector<8x32xf32>
    %885 = arith.addf %879, %884 : vector<8x32xf32>
    %c1_617 = arith.constant 1 : index
    %c7_618 = arith.constant 7 : index
    %c0_619 = arith.constant 0 : index
    %c0_620 = arith.constant 0 : index
    %886 = vector.load %arg11[%c1_617, %c7_618, %c0_619, %c0_620] : memref<2x10x10x32xf32, #tpu.memory_space<vmem>>, vector<1x1x8x32xf32>
    %887 = vector.shape_cast %886 : vector<1x1x8x32xf32> to vector<8x32xf32>
    %888 = vector.extract_strided_slice %82 {offsets = [3, 0], sizes = [1, 32], strides = [1, 1]} : vector<9x32xf32> to vector<1x32xf32>
    %889 = vector.broadcast %888 : vector<1x32xf32> to vector<8x32xf32>
    %890 = arith.mulf %887, %889 : vector<8x32xf32>
    %891 = arith.addf %885, %890 : vector<8x32xf32>
    %c1_621 = arith.constant 1 : index
    %c7_622 = arith.constant 7 : index
    %c1_623 = arith.constant 1 : index
    %c0_624 = arith.constant 0 : index
    %892 = vector.load %arg11[%c1_621, %c7_622, %c1_623, %c0_624] : memref<2x10x10x32xf32, #tpu.memory_space<vmem>>, vector<1x1x8x32xf32>
    %893 = vector.shape_cast %892 : vector<1x1x8x32xf32> to vector<8x32xf32>
    %894 = vector.extract_strided_slice %82 {offsets = [4, 0], sizes = [1, 32], strides = [1, 1]} : vector<9x32xf32> to vector<1x32xf32>
    %895 = vector.broadcast %894 : vector<1x32xf32> to vector<8x32xf32>
    %896 = arith.mulf %893, %895 : vector<8x32xf32>
    %897 = arith.addf %891, %896 : vector<8x32xf32>
    %c1_625 = arith.constant 1 : index
    %c7_626 = arith.constant 7 : index
    %c2_627 = arith.constant 2 : index
    %c0_628 = arith.constant 0 : index
    %898 = vector.load %arg11[%c1_625, %c7_626, %c2_627, %c0_628] : memref<2x10x10x32xf32, #tpu.memory_space<vmem>>, vector<1x1x8x32xf32>
    %899 = vector.shape_cast %898 : vector<1x1x8x32xf32> to vector<8x32xf32>
    %900 = vector.extract_strided_slice %82 {offsets = [5, 0], sizes = [1, 32], strides = [1, 1]} : vector<9x32xf32> to vector<1x32xf32>
    %901 = vector.broadcast %900 : vector<1x32xf32> to vector<8x32xf32>
    %902 = arith.mulf %899, %901 : vector<8x32xf32>
    %903 = arith.addf %897, %902 : vector<8x32xf32>
    %c1_629 = arith.constant 1 : index
    %c8_630 = arith.constant 8 : index
    %c0_631 = arith.constant 0 : index
    %c0_632 = arith.constant 0 : index
    %904 = vector.load %arg11[%c1_629, %c8_630, %c0_631, %c0_632] : memref<2x10x10x32xf32, #tpu.memory_space<vmem>>, vector<1x1x8x32xf32>
    %905 = vector.shape_cast %904 : vector<1x1x8x32xf32> to vector<8x32xf32>
    %906 = vector.extract_strided_slice %82 {offsets = [6, 0], sizes = [1, 32], strides = [1, 1]} : vector<9x32xf32> to vector<1x32xf32>
    %907 = vector.broadcast %906 : vector<1x32xf32> to vector<8x32xf32>
    %908 = arith.mulf %905, %907 : vector<8x32xf32>
    %909 = arith.addf %903, %908 : vector<8x32xf32>
    %c1_633 = arith.constant 1 : index
    %c8_634 = arith.constant 8 : index
    %c1_635 = arith.constant 1 : index
    %c0_636 = arith.constant 0 : index
    %910 = vector.load %arg11[%c1_633, %c8_634, %c1_635, %c0_636] : memref<2x10x10x32xf32, #tpu.memory_space<vmem>>, vector<1x1x8x32xf32>
    %911 = vector.shape_cast %910 : vector<1x1x8x32xf32> to vector<8x32xf32>
    %912 = vector.extract_strided_slice %82 {offsets = [7, 0], sizes = [1, 32], strides = [1, 1]} : vector<9x32xf32> to vector<1x32xf32>
    %913 = vector.broadcast %912 : vector<1x32xf32> to vector<8x32xf32>
    %914 = arith.mulf %911, %913 : vector<8x32xf32>
    %915 = arith.addf %909, %914 : vector<8x32xf32>
    %c1_637 = arith.constant 1 : index
    %c8_638 = arith.constant 8 : index
    %c2_639 = arith.constant 2 : index
    %c0_640 = arith.constant 0 : index
    %916 = vector.load %arg11[%c1_637, %c8_638, %c2_639, %c0_640] : memref<2x10x10x32xf32, #tpu.memory_space<vmem>>, vector<1x1x8x32xf32>
    %917 = vector.shape_cast %916 : vector<1x1x8x32xf32> to vector<8x32xf32>
    %918 = vector.extract_strided_slice %82 {offsets = [8, 0], sizes = [1, 32], strides = [1, 1]} : vector<9x32xf32> to vector<1x32xf32>
    %919 = vector.broadcast %918 : vector<1x32xf32> to vector<8x32xf32>
    %920 = arith.mulf %917, %919 : vector<8x32xf32>
    %921 = arith.addf %915, %920 : vector<8x32xf32>
    %c112 = arith.constant 112 : index
    %c0_641 = arith.constant 0 : index
    %922 = vector.load %arg12[%c112, %c0_641] : memref<128x32xf32, #tpu.memory_space<vmem>>, vector<8x32xf32>
    tpu.vector_store %arg12[%c112, %c0_641], %921 {strides = array<i32>} : memref<128x32xf32, #tpu.memory_space<vmem>>, vector<8x32xf32>,
    %cst_642 = arith.constant 0.000000e+00 : f32
    %923 = vector.broadcast %cst_642 : f32 to vector<8x32xf32>
    %c1_643 = arith.constant 1 : index
    %c7_644 = arith.constant 7 : index
    %c0_645 = arith.constant 0 : index
    %c0_646 = arith.constant 0 : index
    %924 = vector.load %arg11[%c1_643, %c7_644, %c0_645, %c0_646] : memref<2x10x10x32xf32, #tpu.memory_space<vmem>>, vector<1x1x8x32xf32>
    %925 = vector.shape_cast %924 : vector<1x1x8x32xf32> to vector<8x32xf32>
    %926 = vector.extract_strided_slice %82 {offsets = [0, 0], sizes = [1, 32], strides = [1, 1]} : vector<9x32xf32> to vector<1x32xf32>
    %927 = vector.broadcast %926 : vector<1x32xf32> to vector<8x32xf32>
    %928 = arith.mulf %925, %927 : vector<8x32xf32>
    %929 = arith.addf %923, %928 : vector<8x32xf32>
    %c1_647 = arith.constant 1 : index
    %c7_648 = arith.constant 7 : index
    %c1_649 = arith.constant 1 : index
    %c0_650 = arith.constant 0 : index
    %930 = vector.load %arg11[%c1_647, %c7_648, %c1_649, %c0_650] : memref<2x10x10x32xf32, #tpu.memory_space<vmem>>, vector<1x1x8x32xf32>
    %931 = vector.shape_cast %930 : vector<1x1x8x32xf32> to vector<8x32xf32>
    %932 = vector.extract_strided_slice %82 {offsets = [1, 0], sizes = [1, 32], strides = [1, 1]} : vector<9x32xf32> to vector<1x32xf32>
    %933 = vector.broadcast %932 : vector<1x32xf32> to vector<8x32xf32>
    %934 = arith.mulf %931, %933 : vector<8x32xf32>
    %935 = arith.addf %929, %934 : vector<8x32xf32>
    %c1_651 = arith.constant 1 : index
    %c7_652 = arith.constant 7 : index
    %c2_653 = arith.constant 2 : index
    %c0_654 = arith.constant 0 : index
    %936 = vector.load %arg11[%c1_651, %c7_652, %c2_653, %c0_654] : memref<2x10x10x32xf32, #tpu.memory_space<vmem>>, vector<1x1x8x32xf32>
    %937 = vector.shape_cast %936 : vector<1x1x8x32xf32> to vector<8x32xf32>
    %938 = vector.extract_strided_slice %82 {offsets = [2, 0], sizes = [1, 32], strides = [1, 1]} : vector<9x32xf32> to vector<1x32xf32>
    %939 = vector.broadcast %938 : vector<1x32xf32> to vector<8x32xf32>
    %940 = arith.mulf %937, %939 : vector<8x32xf32>
    %941 = arith.addf %935, %940 : vector<8x32xf32>
    %c1_655 = arith.constant 1 : index
    %c8_656 = arith.constant 8 : index
    %c0_657 = arith.constant 0 : index
    %c0_658 = arith.constant 0 : index
    %942 = vector.load %arg11[%c1_655, %c8_656, %c0_657, %c0_658] : memref<2x10x10x32xf32, #tpu.memory_space<vmem>>, vector<1x1x8x32xf32>
    %943 = vector.shape_cast %942 : vector<1x1x8x32xf32> to vector<8x32xf32>
    %944 = vector.extract_strided_slice %82 {offsets = [3, 0], sizes = [1, 32], strides = [1, 1]} : vector<9x32xf32> to vector<1x32xf32>
    %945 = vector.broadcast %944 : vector<1x32xf32> to vector<8x32xf32>
    %946 = arith.mulf %943, %945 : vector<8x32xf32>
    %947 = arith.addf %941, %946 : vector<8x32xf32>
    %c1_659 = arith.constant 1 : index
    %c8_660 = arith.constant 8 : index
    %c1_661 = arith.constant 1 : index
    %c0_662 = arith.constant 0 : index
    %948 = vector.load %arg11[%c1_659, %c8_660, %c1_661, %c0_662] : memref<2x10x10x32xf32, #tpu.memory_space<vmem>>, vector<1x1x8x32xf32>
    %949 = vector.shape_cast %948 : vector<1x1x8x32xf32> to vector<8x32xf32>
    %950 = vector.extract_strided_slice %82 {offsets = [4, 0], sizes = [1, 32], strides = [1, 1]} : vector<9x32xf32> to vector<1x32xf32>
    %951 = vector.broadcast %950 : vector<1x32xf32> to vector<8x32xf32>
    %952 = arith.mulf %949, %951 : vector<8x32xf32>
    %953 = arith.addf %947, %952 : vector<8x32xf32>
    %c1_663 = arith.constant 1 : index
    %c8_664 = arith.constant 8 : index
    %c2_665 = arith.constant 2 : index
    %c0_666 = arith.constant 0 : index
    %954 = vector.load %arg11[%c1_663, %c8_664, %c2_665, %c0_666] : memref<2x10x10x32xf32, #tpu.memory_space<vmem>>, vector<1x1x8x32xf32>
    %955 = vector.shape_cast %954 : vector<1x1x8x32xf32> to vector<8x32xf32>
    %956 = vector.extract_strided_slice %82 {offsets = [5, 0], sizes = [1, 32], strides = [1, 1]} : vector<9x32xf32> to vector<1x32xf32>
    %957 = vector.broadcast %956 : vector<1x32xf32> to vector<8x32xf32>
    %958 = arith.mulf %955, %957 : vector<8x32xf32>
    %959 = arith.addf %953, %958 : vector<8x32xf32>
    %c1_667 = arith.constant 1 : index
    %c9_668 = arith.constant 9 : index
    %c0_669 = arith.constant 0 : index
    %c0_670 = arith.constant 0 : index
    %960 = vector.load %arg11[%c1_667, %c9_668, %c0_669, %c0_670] : memref<2x10x10x32xf32, #tpu.memory_space<vmem>>, vector<1x1x8x32xf32>
    %961 = vector.shape_cast %960 : vector<1x1x8x32xf32> to vector<8x32xf32>
    %962 = vector.extract_strided_slice %82 {offsets = [6, 0], sizes = [1, 32], strides = [1, 1]} : vector<9x32xf32> to vector<1x32xf32>
    %963 = vector.broadcast %962 : vector<1x32xf32> to vector<8x32xf32>
    %964 = arith.mulf %961, %963 : vector<8x32xf32>
    %965 = arith.addf %959, %964 : vector<8x32xf32>
    %c1_671 = arith.constant 1 : index
    %c9_672 = arith.constant 9 : index
    %c1_673 = arith.constant 1 : index
    %c0_674 = arith.constant 0 : index
    %966 = vector.load %arg11[%c1_671, %c9_672, %c1_673, %c0_674] : memref<2x10x10x32xf32, #tpu.memory_space<vmem>>, vector<1x1x8x32xf32>
    %967 = vector.shape_cast %966 : vector<1x1x8x32xf32> to vector<8x32xf32>
    %968 = vector.extract_strided_slice %82 {offsets = [7, 0], sizes = [1, 32], strides = [1, 1]} : vector<9x32xf32> to vector<1x32xf32>
    %969 = vector.broadcast %968 : vector<1x32xf32> to vector<8x32xf32>
    %970 = arith.mulf %967, %969 : vector<8x32xf32>
    %971 = arith.addf %965, %970 : vector<8x32xf32>
    %c1_675 = arith.constant 1 : index
    %c9_676 = arith.constant 9 : index
    %c2_677 = arith.constant 2 : index
    %c0_678 = arith.constant 0 : index
    %972 = vector.load %arg11[%c1_675, %c9_676, %c2_677, %c0_678] : memref<2x10x10x32xf32, #tpu.memory_space<vmem>>, vector<1x1x8x32xf32>
    %973 = vector.shape_cast %972 : vector<1x1x8x32xf32> to vector<8x32xf32>
    %974 = vector.extract_strided_slice %82 {offsets = [8, 0], sizes = [1, 32], strides = [1, 1]} : vector<9x32xf32> to vector<1x32xf32>
    %975 = vector.broadcast %974 : vector<1x32xf32> to vector<8x32xf32>
    %976 = arith.mulf %973, %975 : vector<8x32xf32>
    %977 = arith.addf %971, %976 : vector<8x32xf32>
    %c120 = arith.constant 120 : index
    %c0_679 = arith.constant 0 : index
    %978 = vector.load %arg12[%c120, %c0_679] : memref<128x32xf32, #tpu.memory_space<vmem>>, vector<8x32xf32>
    tpu.vector_store %arg12[%c120, %c0_679], %977 {strides = array<i32>} : memref<128x32xf32, #tpu.memory_space<vmem>>, vector<8x32xf32>,
    %c0_680 = arith.constant 0 : index
    %c0_681 = arith.constant 0 : index
    %979 = vector.load %arg12[%c0_680, %c0_681] : memref<128x32xf32, #tpu.memory_space<vmem>>, vector<128x32xf32>
    %c0_682 = arith.constant 0 : index
    %c0_683 = arith.constant 0 : index
    %980 = vector.load %arg5[%c0_682, %c0_683] : memref<1x32xf32, #tpu.memory_space<vmem>>, vector<1x32xf32>
    %981 = vector.broadcast %980 : vector<1x32xf32> to vector<128x32xf32>
    %982 = arith.mulf %979, %981 : vector<128x32xf32>
    %c0_684 = arith.constant 0 : index
    %c0_685 = arith.constant 0 : index
    %983 = vector.load %arg6[%c0_684, %c0_685] : memref<1x32xf32, #tpu.memory_space<vmem>>, vector<1x32xf32>
    %984 = vector.broadcast %983 : vector<1x32xf32> to vector<128x32xf32>
    %985 = arith.addf %982, %984 : vector<128x32xf32>
    %986 = arith.negf %985 : vector<128x32xf32>
    %987 = math.exp %986 : vector<128x32xf32>
    %cst_686 = arith.constant 1.000000e+00 : f32
    %988 = vector.broadcast %cst_686 : f32 to vector<128x32xf32>
    %989 = arith.addf %988, %987 : vector<128x32xf32>
    %990 = arith.divf %988, %989 : vector<128x32xf32>
    %991 = arith.mulf %985, %990 : vector<128x32xf32>
    %992 = arith.truncf %991 : vector<128x32xf32> to vector<128x32xbf16>
    %c0_687 = arith.constant 0 : index
    %c0_688 = arith.constant 0 : index
    %993 = vector.load %arg7[%c0_687, %c0_688] : memref<32x16xbf16, #tpu.memory_space<vmem>>, vector<32x16xbf16>
    %cst_689 = arith.constant dense<0.000000e+00> : vector<128x16xf32>
    %994 = tpu.matmul %992, %993, %cst_689 {dimension_numbers = #tpu.dot_dimension_numbers<[1], [0], [0], [1], [0, 0, 1, 1], [], []>} : vector<128x32xbf16>, vector<32x16xbf16>, vector<128x16xf32> -> vector<128x16xf32>
    %c0_690 = arith.constant 0 : index
    %c0_691 = arith.constant 0 : index
    %995 = vector.load %arg8[%c0_690, %c0_691] : memref<1x16xf32, #tpu.memory_space<vmem>>, vector<1x16xf32>
    %996 = vector.broadcast %995 : vector<1x16xf32> to vector<128x16xf32>
    %997 = arith.mulf %994, %996 : vector<128x16xf32>
    %c0_692 = arith.constant 0 : index
    %c0_693 = arith.constant 0 : index
    %998 = vector.load %arg9[%c0_692, %c0_693] : memref<1x16xf32, #tpu.memory_space<vmem>>, vector<1x16xf32>
    %999 = vector.broadcast %998 : vector<1x16xf32> to vector<128x16xf32>
    %1000 = arith.addf %997, %999 : vector<128x16xf32>
    %1001 = arith.addf %1000, %0 : vector<128x16xf32>
    %c0_694 = arith.constant 0 : index
    %c0_695 = arith.constant 0 : index
    %1002 = vector.load %arg10[%c0_694, %c0_695] : memref<128x16xf32, #tpu.memory_space<vmem>>, vector<128x16xf32>
    tpu.vector_store %arg10[%c0_694, %c0_695], %1001 {strides = array<i32>} : memref<128x16xf32, #tpu.memory_space<vmem>>, vector<128x16xf32>,
    return
  }
}

module attributes {stable_mosaic.version = 11 : i64} {
  func.func @_mbconv_kernel(%arg0: memref<128x16xf32, #tpu.memory_space<vmem>>, %arg1: memref<16x32xbf16, #tpu.memory_space<vmem>>, %arg2: memref<1x32xf32, #tpu.memory_space<vmem>>, %arg3: memref<1x32xf32, #tpu.memory_space<vmem>>, %arg4: memref<9x32xf32, #tpu.memory_space<vmem>>, %arg5: memref<1x32xf32, #tpu.memory_space<vmem>>, %arg6: memref<1x32xf32, #tpu.memory_space<vmem>>, %arg7: memref<32x24xbf16, #tpu.memory_space<vmem>>, %arg8: memref<1x24xf32, #tpu.memory_space<vmem>>, %arg9: memref<1x24xf32, #tpu.memory_space<vmem>>, %arg10: memref<32x24xf32, #tpu.memory_space<vmem>>, %arg11: memref<2x10x10x32xf32, #tpu.memory_space<vmem>>, %arg12: memref<32x32xf32, #tpu.memory_space<vmem>>) attributes {dimension_semantics = [], scalar_prefetch = 0 : i64, scratch_operands = 2 : i64, tpu.core_type = #tpu.core_type<tc>} {
    %c0 = arith.constant 0 : index
    %c0_0 = arith.constant 0 : index
    %0 = vector.load %arg0[%c0, %c0_0] : memref<128x16xf32, #tpu.memory_space<vmem>>, vector<128x16xf32>
    %1 = arith.truncf %0 : vector<128x16xf32> to vector<128x16xbf16>
    %c0_1 = arith.constant 0 : index
    %c0_2 = arith.constant 0 : index
    %2 = vector.load %arg1[%c0_1, %c0_2] : memref<16x32xbf16, #tpu.memory_space<vmem>>, vector<16x32xbf16>
    %cst = arith.constant dense<0.000000e+00> : vector<128x32xf32>
    %3 = tpu.matmul %1, %2, %cst {dimension_numbers = #tpu.dot_dimension_numbers<[1], [0], [0], [1], [0, 0, 1, 1], [], []>} : vector<128x16xbf16>, vector<16x32xbf16>, vector<128x32xf32> -> vector<128x32xf32>
    %c0_3 = arith.constant 0 : index
    %c0_4 = arith.constant 0 : index
    %4 = vector.load %arg2[%c0_3, %c0_4] : memref<1x32xf32, #tpu.memory_space<vmem>>, vector<1x32xf32>
    %5 = vector.broadcast %4 : vector<1x32xf32> to vector<128x32xf32>
    %6 = arith.mulf %3, %5 : vector<128x32xf32>
    %c0_5 = arith.constant 0 : index
    %c0_6 = arith.constant 0 : index
    %7 = vector.load %arg3[%c0_5, %c0_6] : memref<1x32xf32, #tpu.memory_space<vmem>>, vector<1x32xf32>
    %8 = vector.broadcast %7 : vector<1x32xf32> to vector<128x32xf32>
    %9 = arith.addf %6, %8 : vector<128x32xf32>
    %10 = arith.negf %9 : vector<128x32xf32>
    %11 = math.exp %10 : vector<128x32xf32>
    %cst_7 = arith.constant 1.000000e+00 : f32
    %12 = vector.broadcast %cst_7 : f32 to vector<128x32xf32>
    %13 = arith.addf %12, %11 : vector<128x32xf32>
    %14 = arith.divf %12, %13 : vector<128x32xf32>
    %15 = arith.mulf %9, %14 : vector<128x32xf32>
    %cst_8 = arith.constant 0.000000e+00 : f32
    %16 = vector.broadcast %cst_8 : f32 to vector<2x10x10x32xf32>
    %c0_9 = arith.constant 0 : index
    %c0_10 = arith.constant 0 : index
    %c0_11 = arith.constant 0 : index
    %c0_12 = arith.constant 0 : index
    %17 = vector.load %arg11[%c0_9, %c0_10, %c0_11, %c0_12] : memref<2x10x10x32xf32, #tpu.memory_space<vmem>>, vector<2x10x10x32xf32>
    tpu.vector_store %arg11[%c0_9, %c0_10, %c0_11, %c0_12], %16 {strides = array<i32>} : memref<2x10x10x32xf32, #tpu.memory_space<vmem>>, vector<2x10x10x32xf32>,
    %18 = vector.extract_strided_slice %15 {offsets = [0, 0], sizes = [8, 32], strides = [1, 1]} : vector<128x32xf32> to vector<8x32xf32>
    %c0_13 = arith.constant 0 : index
    %c1 = arith.constant 1 : index
    %c1_14 = arith.constant 1 : index
    %c0_15 = arith.constant 0 : index
    %19 = vector.load %arg11[%c0_13, %c1, %c1_14, %c0_15] : memref<2x10x10x32xf32, #tpu.memory_space<vmem>>, vector<1x1x8x32xf32>
    %20 = vector.shape_cast %19 : vector<1x1x8x32xf32> to vector<8x32xf32>
    %21 = vector.shape_cast %18 : vector<8x32xf32> to vector<1x1x8x32xf32>
    tpu.vector_store %arg11[%c0_13, %c1, %c1_14, %c0_15], %21 {strides = array<i32>} : memref<2x10x10x32xf32, #tpu.memory_space<vmem>>, vector<1x1x8x32xf32>,
    %22 = vector.extract_strided_slice %15 {offsets = [8, 0], sizes = [8, 32], strides = [1, 1]} : vector<128x32xf32> to vector<8x32xf32>
    %c0_16 = arith.constant 0 : index
    %c2 = arith.constant 2 : index
    %c1_17 = arith.constant 1 : index
    %c0_18 = arith.constant 0 : index
    %23 = vector.load %arg11[%c0_16, %c2, %c1_17, %c0_18] : memref<2x10x10x32xf32, #tpu.memory_space<vmem>>, vector<1x1x8x32xf32>
    %24 = vector.shape_cast %23 : vector<1x1x8x32xf32> to vector<8x32xf32>
    %25 = vector.shape_cast %22 : vector<8x32xf32> to vector<1x1x8x32xf32>
    tpu.vector_store %arg11[%c0_16, %c2, %c1_17, %c0_18], %25 {strides = array<i32>} : memref<2x10x10x32xf32, #tpu.memory_space<vmem>>, vector<1x1x8x32xf32>,
    %26 = vector.extract_strided_slice %15 {offsets = [16, 0], sizes = [8, 32], strides = [1, 1]} : vector<128x32xf32> to vector<8x32xf32>
    %c0_19 = arith.constant 0 : index
    %c3 = arith.constant 3 : index
    %c1_20 = arith.constant 1 : index
    %c0_21 = arith.constant 0 : index
    %27 = vector.load %arg11[%c0_19, %c3, %c1_20, %c0_21] : memref<2x10x10x32xf32, #tpu.memory_space<vmem>>, vector<1x1x8x32xf32>
    %28 = vector.shape_cast %27 : vector<1x1x8x32xf32> to vector<8x32xf32>
    %29 = vector.shape_cast %26 : vector<8x32xf32> to vector<1x1x8x32xf32>
    tpu.vector_store %arg11[%c0_19, %c3, %c1_20, %c0_21], %29 {strides = array<i32>} : memref<2x10x10x32xf32, #tpu.memory_space<vmem>>, vector<1x1x8x32xf32>,
    %30 = vector.extract_strided_slice %15 {offsets = [24, 0], sizes = [8, 32], strides = [1, 1]} : vector<128x32xf32> to vector<8x32xf32>
    %c0_22 = arith.constant 0 : index
    %c4 = arith.constant 4 : index
    %c1_23 = arith.constant 1 : index
    %c0_24 = arith.constant 0 : index
    %31 = vector.load %arg11[%c0_22, %c4, %c1_23, %c0_24] : memref<2x10x10x32xf32, #tpu.memory_space<vmem>>, vector<1x1x8x32xf32>
    %32 = vector.shape_cast %31 : vector<1x1x8x32xf32> to vector<8x32xf32>
    %33 = vector.shape_cast %30 : vector<8x32xf32> to vector<1x1x8x32xf32>
    tpu.vector_store %arg11[%c0_22, %c4, %c1_23, %c0_24], %33 {strides = array<i32>} : memref<2x10x10x32xf32, #tpu.memory_space<vmem>>, vector<1x1x8x32xf32>,
    %34 = vector.extract_strided_slice %15 {offsets = [32, 0], sizes = [8, 32], strides = [1, 1]} : vector<128x32xf32> to vector<8x32xf32>
    %c0_25 = arith.constant 0 : index
    %c5 = arith.constant 5 : index
    %c1_26 = arith.constant 1 : index
    %c0_27 = arith.constant 0 : index
    %35 = vector.load %arg11[%c0_25, %c5, %c1_26, %c0_27] : memref<2x10x10x32xf32, #tpu.memory_space<vmem>>, vector<1x1x8x32xf32>
    %36 = vector.shape_cast %35 : vector<1x1x8x32xf32> to vector<8x32xf32>
    %37 = vector.shape_cast %34 : vector<8x32xf32> to vector<1x1x8x32xf32>
    tpu.vector_store %arg11[%c0_25, %c5, %c1_26, %c0_27], %37 {strides = array<i32>} : memref<2x10x10x32xf32, #tpu.memory_space<vmem>>, vector<1x1x8x32xf32>,
    %38 = vector.extract_strided_slice %15 {offsets = [40, 0], sizes = [8, 32], strides = [1, 1]} : vector<128x32xf32> to vector<8x32xf32>
    %c0_28 = arith.constant 0 : index
    %c6 = arith.constant 6 : index
    %c1_29 = arith.constant 1 : index
    %c0_30 = arith.constant 0 : index
    %39 = vector.load %arg11[%c0_28, %c6, %c1_29, %c0_30] : memref<2x10x10x32xf32, #tpu.memory_space<vmem>>, vector<1x1x8x32xf32>
    %40 = vector.shape_cast %39 : vector<1x1x8x32xf32> to vector<8x32xf32>
    %41 = vector.shape_cast %38 : vector<8x32xf32> to vector<1x1x8x32xf32>
    tpu.vector_store %arg11[%c0_28, %c6, %c1_29, %c0_30], %41 {strides = array<i32>} : memref<2x10x10x32xf32, #tpu.memory_space<vmem>>, vector<1x1x8x32xf32>,
    %42 = vector.extract_strided_slice %15 {offsets = [48, 0], sizes = [8, 32], strides = [1, 1]} : vector<128x32xf32> to vector<8x32xf32>
    %c0_31 = arith.constant 0 : index
    %c7 = arith.constant 7 : index
    %c1_32 = arith.constant 1 : index
    %c0_33 = arith.constant 0 : index
    %43 = vector.load %arg11[%c0_31, %c7, %c1_32, %c0_33] : memref<2x10x10x32xf32, #tpu.memory_space<vmem>>, vector<1x1x8x32xf32>
    %44 = vector.shape_cast %43 : vector<1x1x8x32xf32> to vector<8x32xf32>
    %45 = vector.shape_cast %42 : vector<8x32xf32> to vector<1x1x8x32xf32>
    tpu.vector_store %arg11[%c0_31, %c7, %c1_32, %c0_33], %45 {strides = array<i32>} : memref<2x10x10x32xf32, #tpu.memory_space<vmem>>, vector<1x1x8x32xf32>,
    %46 = vector.extract_strided_slice %15 {offsets = [56, 0], sizes = [8, 32], strides = [1, 1]} : vector<128x32xf32> to vector<8x32xf32>
    %c0_34 = arith.constant 0 : index
    %c8 = arith.constant 8 : index
    %c1_35 = arith.constant 1 : index
    %c0_36 = arith.constant 0 : index
    %47 = vector.load %arg11[%c0_34, %c8, %c1_35, %c0_36] : memref<2x10x10x32xf32, #tpu.memory_space<vmem>>, vector<1x1x8x32xf32>
    %48 = vector.shape_cast %47 : vector<1x1x8x32xf32> to vector<8x32xf32>
    %49 = vector.shape_cast %46 : vector<8x32xf32> to vector<1x1x8x32xf32>
    tpu.vector_store %arg11[%c0_34, %c8, %c1_35, %c0_36], %49 {strides = array<i32>} : memref<2x10x10x32xf32, #tpu.memory_space<vmem>>, vector<1x1x8x32xf32>,
    %50 = vector.extract_strided_slice %15 {offsets = [64, 0], sizes = [8, 32], strides = [1, 1]} : vector<128x32xf32> to vector<8x32xf32>
    %c1_37 = arith.constant 1 : index
    %c1_38 = arith.constant 1 : index
    %c1_39 = arith.constant 1 : index
    %c0_40 = arith.constant 0 : index
    %51 = vector.load %arg11[%c1_37, %c1_38, %c1_39, %c0_40] : memref<2x10x10x32xf32, #tpu.memory_space<vmem>>, vector<1x1x8x32xf32>
    %52 = vector.shape_cast %51 : vector<1x1x8x32xf32> to vector<8x32xf32>
    %53 = vector.shape_cast %50 : vector<8x32xf32> to vector<1x1x8x32xf32>
    tpu.vector_store %arg11[%c1_37, %c1_38, %c1_39, %c0_40], %53 {strides = array<i32>} : memref<2x10x10x32xf32, #tpu.memory_space<vmem>>, vector<1x1x8x32xf32>,
    %54 = vector.extract_strided_slice %15 {offsets = [72, 0], sizes = [8, 32], strides = [1, 1]} : vector<128x32xf32> to vector<8x32xf32>
    %c1_41 = arith.constant 1 : index
    %c2_42 = arith.constant 2 : index
    %c1_43 = arith.constant 1 : index
    %c0_44 = arith.constant 0 : index
    %55 = vector.load %arg11[%c1_41, %c2_42, %c1_43, %c0_44] : memref<2x10x10x32xf32, #tpu.memory_space<vmem>>, vector<1x1x8x32xf32>
    %56 = vector.shape_cast %55 : vector<1x1x8x32xf32> to vector<8x32xf32>
    %57 = vector.shape_cast %54 : vector<8x32xf32> to vector<1x1x8x32xf32>
    tpu.vector_store %arg11[%c1_41, %c2_42, %c1_43, %c0_44], %57 {strides = array<i32>} : memref<2x10x10x32xf32, #tpu.memory_space<vmem>>, vector<1x1x8x32xf32>,
    %58 = vector.extract_strided_slice %15 {offsets = [80, 0], sizes = [8, 32], strides = [1, 1]} : vector<128x32xf32> to vector<8x32xf32>
    %c1_45 = arith.constant 1 : index
    %c3_46 = arith.constant 3 : index
    %c1_47 = arith.constant 1 : index
    %c0_48 = arith.constant 0 : index
    %59 = vector.load %arg11[%c1_45, %c3_46, %c1_47, %c0_48] : memref<2x10x10x32xf32, #tpu.memory_space<vmem>>, vector<1x1x8x32xf32>
    %60 = vector.shape_cast %59 : vector<1x1x8x32xf32> to vector<8x32xf32>
    %61 = vector.shape_cast %58 : vector<8x32xf32> to vector<1x1x8x32xf32>
    tpu.vector_store %arg11[%c1_45, %c3_46, %c1_47, %c0_48], %61 {strides = array<i32>} : memref<2x10x10x32xf32, #tpu.memory_space<vmem>>, vector<1x1x8x32xf32>,
    %62 = vector.extract_strided_slice %15 {offsets = [88, 0], sizes = [8, 32], strides = [1, 1]} : vector<128x32xf32> to vector<8x32xf32>
    %c1_49 = arith.constant 1 : index
    %c4_50 = arith.constant 4 : index
    %c1_51 = arith.constant 1 : index
    %c0_52 = arith.constant 0 : index
    %63 = vector.load %arg11[%c1_49, %c4_50, %c1_51, %c0_52] : memref<2x10x10x32xf32, #tpu.memory_space<vmem>>, vector<1x1x8x32xf32>
    %64 = vector.shape_cast %63 : vector<1x1x8x32xf32> to vector<8x32xf32>
    %65 = vector.shape_cast %62 : vector<8x32xf32> to vector<1x1x8x32xf32>
    tpu.vector_store %arg11[%c1_49, %c4_50, %c1_51, %c0_52], %65 {strides = array<i32>} : memref<2x10x10x32xf32, #tpu.memory_space<vmem>>, vector<1x1x8x32xf32>,
    %66 = vector.extract_strided_slice %15 {offsets = [96, 0], sizes = [8, 32], strides = [1, 1]} : vector<128x32xf32> to vector<8x32xf32>
    %c1_53 = arith.constant 1 : index
    %c5_54 = arith.constant 5 : index
    %c1_55 = arith.constant 1 : index
    %c0_56 = arith.constant 0 : index
    %67 = vector.load %arg11[%c1_53, %c5_54, %c1_55, %c0_56] : memref<2x10x10x32xf32, #tpu.memory_space<vmem>>, vector<1x1x8x32xf32>
    %68 = vector.shape_cast %67 : vector<1x1x8x32xf32> to vector<8x32xf32>
    %69 = vector.shape_cast %66 : vector<8x32xf32> to vector<1x1x8x32xf32>
    tpu.vector_store %arg11[%c1_53, %c5_54, %c1_55, %c0_56], %69 {strides = array<i32>} : memref<2x10x10x32xf32, #tpu.memory_space<vmem>>, vector<1x1x8x32xf32>,
    %70 = vector.extract_strided_slice %15 {offsets = [104, 0], sizes = [8, 32], strides = [1, 1]} : vector<128x32xf32> to vector<8x32xf32>
    %c1_57 = arith.constant 1 : index
    %c6_58 = arith.constant 6 : index
    %c1_59 = arith.constant 1 : index
    %c0_60 = arith.constant 0 : index
    %71 = vector.load %arg11[%c1_57, %c6_58, %c1_59, %c0_60] : memref<2x10x10x32xf32, #tpu.memory_space<vmem>>, vector<1x1x8x32xf32>
    %72 = vector.shape_cast %71 : vector<1x1x8x32xf32> to vector<8x32xf32>
    %73 = vector.shape_cast %70 : vector<8x32xf32> to vector<1x1x8x32xf32>
    tpu.vector_store %arg11[%c1_57, %c6_58, %c1_59, %c0_60], %73 {strides = array<i32>} : memref<2x10x10x32xf32, #tpu.memory_space<vmem>>, vector<1x1x8x32xf32>,
    %74 = vector.extract_strided_slice %15 {offsets = [112, 0], sizes = [8, 32], strides = [1, 1]} : vector<128x32xf32> to vector<8x32xf32>
    %c1_61 = arith.constant 1 : index
    %c7_62 = arith.constant 7 : index
    %c1_63 = arith.constant 1 : index
    %c0_64 = arith.constant 0 : index
    %75 = vector.load %arg11[%c1_61, %c7_62, %c1_63, %c0_64] : memref<2x10x10x32xf32, #tpu.memory_space<vmem>>, vector<1x1x8x32xf32>
    %76 = vector.shape_cast %75 : vector<1x1x8x32xf32> to vector<8x32xf32>
    %77 = vector.shape_cast %74 : vector<8x32xf32> to vector<1x1x8x32xf32>
    tpu.vector_store %arg11[%c1_61, %c7_62, %c1_63, %c0_64], %77 {strides = array<i32>} : memref<2x10x10x32xf32, #tpu.memory_space<vmem>>, vector<1x1x8x32xf32>,
    %78 = vector.extract_strided_slice %15 {offsets = [120, 0], sizes = [8, 32], strides = [1, 1]} : vector<128x32xf32> to vector<8x32xf32>
    %c1_65 = arith.constant 1 : index
    %c8_66 = arith.constant 8 : index
    %c1_67 = arith.constant 1 : index
    %c0_68 = arith.constant 0 : index
    %79 = vector.load %arg11[%c1_65, %c8_66, %c1_67, %c0_68] : memref<2x10x10x32xf32, #tpu.memory_space<vmem>>, vector<1x1x8x32xf32>
    %80 = vector.shape_cast %79 : vector<1x1x8x32xf32> to vector<8x32xf32>
    %81 = vector.shape_cast %78 : vector<8x32xf32> to vector<1x1x8x32xf32>
    tpu.vector_store %arg11[%c1_65, %c8_66, %c1_67, %c0_68], %81 {strides = array<i32>} : memref<2x10x10x32xf32, #tpu.memory_space<vmem>>, vector<1x1x8x32xf32>,
    %c0_69 = arith.constant 0 : index
    %c0_70 = arith.constant 0 : index
    %82 = vector.load %arg4[%c0_69, %c0_70] : memref<9x32xf32, #tpu.memory_space<vmem>>, vector<9x32xf32>
    %cst_71 = arith.constant 0.000000e+00 : f32
    %83 = vector.broadcast %cst_71 : f32 to vector<8x32xf32>
    %c0_72 = arith.constant 0 : index
    %c0_73 = arith.constant 0 : index
    %c0_74 = arith.constant 0 : index
    %c0_75 = arith.constant 0 : index
    %84 = vector.load %arg11[%c0_72, %c0_73, %c0_74, %c0_75] : memref<2x10x10x32xf32, #tpu.memory_space<vmem>>, vector<1x1x8x32xf32>
    %85 = vector.shape_cast %84 : vector<1x1x8x32xf32> to vector<8x32xf32>
    %86 = vector.extract_strided_slice %82 {offsets = [0, 0], sizes = [1, 32], strides = [1, 1]} : vector<9x32xf32> to vector<1x32xf32>
    %87 = vector.broadcast %86 : vector<1x32xf32> to vector<8x32xf32>
    %88 = arith.mulf %85, %87 : vector<8x32xf32>
    %89 = arith.addf %83, %88 : vector<8x32xf32>
    %c0_76 = arith.constant 0 : index
    %c0_77 = arith.constant 0 : index
    %c1_78 = arith.constant 1 : index
    %c0_79 = arith.constant 0 : index
    %90 = vector.load %arg11[%c0_76, %c0_77, %c1_78, %c0_79] : memref<2x10x10x32xf32, #tpu.memory_space<vmem>>, vector<1x1x8x32xf32>
    %91 = vector.shape_cast %90 : vector<1x1x8x32xf32> to vector<8x32xf32>
    %92 = vector.extract_strided_slice %82 {offsets = [1, 0], sizes = [1, 32], strides = [1, 1]} : vector<9x32xf32> to vector<1x32xf32>
    %93 = vector.broadcast %92 : vector<1x32xf32> to vector<8x32xf32>
    %94 = arith.mulf %91, %93 : vector<8x32xf32>
    %95 = arith.addf %89, %94 : vector<8x32xf32>
    %c0_80 = arith.constant 0 : index
    %c0_81 = arith.constant 0 : index
    %c2_82 = arith.constant 2 : index
    %c0_83 = arith.constant 0 : index
    %96 = vector.load %arg11[%c0_80, %c0_81, %c2_82, %c0_83] : memref<2x10x10x32xf32, #tpu.memory_space<vmem>>, vector<1x1x8x32xf32>
    %97 = vector.shape_cast %96 : vector<1x1x8x32xf32> to vector<8x32xf32>
    %98 = vector.extract_strided_slice %82 {offsets = [2, 0], sizes = [1, 32], strides = [1, 1]} : vector<9x32xf32> to vector<1x32xf32>
    %99 = vector.broadcast %98 : vector<1x32xf32> to vector<8x32xf32>
    %100 = arith.mulf %97, %99 : vector<8x32xf32>
    %101 = arith.addf %95, %100 : vector<8x32xf32>
    %c0_84 = arith.constant 0 : index
    %c1_85 = arith.constant 1 : index
    %c0_86 = arith.constant 0 : index
    %c0_87 = arith.constant 0 : index
    %102 = vector.load %arg11[%c0_84, %c1_85, %c0_86, %c0_87] : memref<2x10x10x32xf32, #tpu.memory_space<vmem>>, vector<1x1x8x32xf32>
    %103 = vector.shape_cast %102 : vector<1x1x8x32xf32> to vector<8x32xf32>
    %104 = vector.extract_strided_slice %82 {offsets = [3, 0], sizes = [1, 32], strides = [1, 1]} : vector<9x32xf32> to vector<1x32xf32>
    %105 = vector.broadcast %104 : vector<1x32xf32> to vector<8x32xf32>
    %106 = arith.mulf %103, %105 : vector<8x32xf32>
    %107 = arith.addf %101, %106 : vector<8x32xf32>
    %c0_88 = arith.constant 0 : index
    %c1_89 = arith.constant 1 : index
    %c1_90 = arith.constant 1 : index
    %c0_91 = arith.constant 0 : index
    %108 = vector.load %arg11[%c0_88, %c1_89, %c1_90, %c0_91] : memref<2x10x10x32xf32, #tpu.memory_space<vmem>>, vector<1x1x8x32xf32>
    %109 = vector.shape_cast %108 : vector<1x1x8x32xf32> to vector<8x32xf32>
    %110 = vector.extract_strided_slice %82 {offsets = [4, 0], sizes = [1, 32], strides = [1, 1]} : vector<9x32xf32> to vector<1x32xf32>
    %111 = vector.broadcast %110 : vector<1x32xf32> to vector<8x32xf32>
    %112 = arith.mulf %109, %111 : vector<8x32xf32>
    %113 = arith.addf %107, %112 : vector<8x32xf32>
    %c0_92 = arith.constant 0 : index
    %c1_93 = arith.constant 1 : index
    %c2_94 = arith.constant 2 : index
    %c0_95 = arith.constant 0 : index
    %114 = vector.load %arg11[%c0_92, %c1_93, %c2_94, %c0_95] : memref<2x10x10x32xf32, #tpu.memory_space<vmem>>, vector<1x1x8x32xf32>
    %115 = vector.shape_cast %114 : vector<1x1x8x32xf32> to vector<8x32xf32>
    %116 = vector.extract_strided_slice %82 {offsets = [5, 0], sizes = [1, 32], strides = [1, 1]} : vector<9x32xf32> to vector<1x32xf32>
    %117 = vector.broadcast %116 : vector<1x32xf32> to vector<8x32xf32>
    %118 = arith.mulf %115, %117 : vector<8x32xf32>
    %119 = arith.addf %113, %118 : vector<8x32xf32>
    %c0_96 = arith.constant 0 : index
    %c2_97 = arith.constant 2 : index
    %c0_98 = arith.constant 0 : index
    %c0_99 = arith.constant 0 : index
    %120 = vector.load %arg11[%c0_96, %c2_97, %c0_98, %c0_99] : memref<2x10x10x32xf32, #tpu.memory_space<vmem>>, vector<1x1x8x32xf32>
    %121 = vector.shape_cast %120 : vector<1x1x8x32xf32> to vector<8x32xf32>
    %122 = vector.extract_strided_slice %82 {offsets = [6, 0], sizes = [1, 32], strides = [1, 1]} : vector<9x32xf32> to vector<1x32xf32>
    %123 = vector.broadcast %122 : vector<1x32xf32> to vector<8x32xf32>
    %124 = arith.mulf %121, %123 : vector<8x32xf32>
    %125 = arith.addf %119, %124 : vector<8x32xf32>
    %c0_100 = arith.constant 0 : index
    %c2_101 = arith.constant 2 : index
    %c1_102 = arith.constant 1 : index
    %c0_103 = arith.constant 0 : index
    %126 = vector.load %arg11[%c0_100, %c2_101, %c1_102, %c0_103] : memref<2x10x10x32xf32, #tpu.memory_space<vmem>>, vector<1x1x8x32xf32>
    %127 = vector.shape_cast %126 : vector<1x1x8x32xf32> to vector<8x32xf32>
    %128 = vector.extract_strided_slice %82 {offsets = [7, 0], sizes = [1, 32], strides = [1, 1]} : vector<9x32xf32> to vector<1x32xf32>
    %129 = vector.broadcast %128 : vector<1x32xf32> to vector<8x32xf32>
    %130 = arith.mulf %127, %129 : vector<8x32xf32>
    %131 = arith.addf %125, %130 : vector<8x32xf32>
    %c0_104 = arith.constant 0 : index
    %c2_105 = arith.constant 2 : index
    %c2_106 = arith.constant 2 : index
    %c0_107 = arith.constant 0 : index
    %132 = vector.load %arg11[%c0_104, %c2_105, %c2_106, %c0_107] : memref<2x10x10x32xf32, #tpu.memory_space<vmem>>, vector<1x1x8x32xf32>
    %133 = vector.shape_cast %132 : vector<1x1x8x32xf32> to vector<8x32xf32>
    %134 = vector.extract_strided_slice %82 {offsets = [8, 0], sizes = [1, 32], strides = [1, 1]} : vector<9x32xf32> to vector<1x32xf32>
    %135 = vector.broadcast %134 : vector<1x32xf32> to vector<8x32xf32>
    %136 = arith.mulf %133, %135 : vector<8x32xf32>
    %137 = arith.addf %131, %136 : vector<8x32xf32>
    %138 = vector.extract_strided_slice %137 {offsets = [0, 0], sizes = [1, 32], strides = [1, 1]} : vector<8x32xf32> to vector<1x32xf32>
    %c0_108 = arith.constant 0 : index
    %c0_109 = arith.constant 0 : index
    %139 = vector.load %arg12[%c0_108, %c0_109] : memref<32x32xf32, #tpu.memory_space<vmem>>, vector<1x32xf32>
    tpu.vector_store %arg12[%c0_108, %c0_109], %138 {strides = array<i32>} : memref<32x32xf32, #tpu.memory_space<vmem>>, vector<1x32xf32>,
    %140 = vector.extract_strided_slice %137 {offsets = [2, 0], sizes = [1, 32], strides = [1, 1]} : vector<8x32xf32> to vector<1x32xf32>
    %c1_110 = arith.constant 1 : index
    %c0_111 = arith.constant 0 : index
    %141 = vector.load %arg12[%c1_110, %c0_111] : memref<32x32xf32, #tpu.memory_space<vmem>>, vector<1x32xf32>
    tpu.vector_store %arg12[%c1_110, %c0_111], %140 {strides = array<i32>} : memref<32x32xf32, #tpu.memory_space<vmem>>, vector<1x32xf32>,
    %142 = vector.extract_strided_slice %137 {offsets = [4, 0], sizes = [1, 32], strides = [1, 1]} : vector<8x32xf32> to vector<1x32xf32>
    %c2_112 = arith.constant 2 : index
    %c0_113 = arith.constant 0 : index
    %143 = vector.load %arg12[%c2_112, %c0_113] : memref<32x32xf32, #tpu.memory_space<vmem>>, vector<1x32xf32>
    tpu.vector_store %arg12[%c2_112, %c0_113], %142 {strides = array<i32>} : memref<32x32xf32, #tpu.memory_space<vmem>>, vector<1x32xf32>,
    %144 = vector.extract_strided_slice %137 {offsets = [6, 0], sizes = [1, 32], strides = [1, 1]} : vector<8x32xf32> to vector<1x32xf32>
    %c3_114 = arith.constant 3 : index
    %c0_115 = arith.constant 0 : index
    %145 = vector.load %arg12[%c3_114, %c0_115] : memref<32x32xf32, #tpu.memory_space<vmem>>, vector<1x32xf32>
    tpu.vector_store %arg12[%c3_114, %c0_115], %144 {strides = array<i32>} : memref<32x32xf32, #tpu.memory_space<vmem>>, vector<1x32xf32>,
    %cst_116 = arith.constant 0.000000e+00 : f32
    %146 = vector.broadcast %cst_116 : f32 to vector<8x32xf32>
    %c0_117 = arith.constant 0 : index
    %c2_118 = arith.constant 2 : index
    %c0_119 = arith.constant 0 : index
    %c0_120 = arith.constant 0 : index
    %147 = vector.load %arg11[%c0_117, %c2_118, %c0_119, %c0_120] : memref<2x10x10x32xf32, #tpu.memory_space<vmem>>, vector<1x1x8x32xf32>
    %148 = vector.shape_cast %147 : vector<1x1x8x32xf32> to vector<8x32xf32>
    %149 = vector.extract_strided_slice %82 {offsets = [0, 0], sizes = [1, 32], strides = [1, 1]} : vector<9x32xf32> to vector<1x32xf32>
    %150 = vector.broadcast %149 : vector<1x32xf32> to vector<8x32xf32>
    %151 = arith.mulf %148, %150 : vector<8x32xf32>
    %152 = arith.addf %146, %151 : vector<8x32xf32>
    %c0_121 = arith.constant 0 : index
    %c2_122 = arith.constant 2 : index
    %c1_123 = arith.constant 1 : index
    %c0_124 = arith.constant 0 : index
    %153 = vector.load %arg11[%c0_121, %c2_122, %c1_123, %c0_124] : memref<2x10x10x32xf32, #tpu.memory_space<vmem>>, vector<1x1x8x32xf32>
    %154 = vector.shape_cast %153 : vector<1x1x8x32xf32> to vector<8x32xf32>
    %155 = vector.extract_strided_slice %82 {offsets = [1, 0], sizes = [1, 32], strides = [1, 1]} : vector<9x32xf32> to vector<1x32xf32>
    %156 = vector.broadcast %155 : vector<1x32xf32> to vector<8x32xf32>
    %157 = arith.mulf %154, %156 : vector<8x32xf32>
    %158 = arith.addf %152, %157 : vector<8x32xf32>
    %c0_125 = arith.constant 0 : index
    %c2_126 = arith.constant 2 : index
    %c2_127 = arith.constant 2 : index
    %c0_128 = arith.constant 0 : index
    %159 = vector.load %arg11[%c0_125, %c2_126, %c2_127, %c0_128] : memref<2x10x10x32xf32, #tpu.memory_space<vmem>>, vector<1x1x8x32xf32>
    %160 = vector.shape_cast %159 : vector<1x1x8x32xf32> to vector<8x32xf32>
    %161 = vector.extract_strided_slice %82 {offsets = [2, 0], sizes = [1, 32], strides = [1, 1]} : vector<9x32xf32> to vector<1x32xf32>
    %162 = vector.broadcast %161 : vector<1x32xf32> to vector<8x32xf32>
    %163 = arith.mulf %160, %162 : vector<8x32xf32>
    %164 = arith.addf %158, %163 : vector<8x32xf32>
    %c0_129 = arith.constant 0 : index
    %c3_130 = arith.constant 3 : index
    %c0_131 = arith.constant 0 : index
    %c0_132 = arith.constant 0 : index
    %165 = vector.load %arg11[%c0_129, %c3_130, %c0_131, %c0_132] : memref<2x10x10x32xf32, #tpu.memory_space<vmem>>, vector<1x1x8x32xf32>
    %166 = vector.shape_cast %165 : vector<1x1x8x32xf32> to vector<8x32xf32>
    %167 = vector.extract_strided_slice %82 {offsets = [3, 0], sizes = [1, 32], strides = [1, 1]} : vector<9x32xf32> to vector<1x32xf32>
    %168 = vector.broadcast %167 : vector<1x32xf32> to vector<8x32xf32>
    %169 = arith.mulf %166, %168 : vector<8x32xf32>
    %170 = arith.addf %164, %169 : vector<8x32xf32>
    %c0_133 = arith.constant 0 : index
    %c3_134 = arith.constant 3 : index
    %c1_135 = arith.constant 1 : index
    %c0_136 = arith.constant 0 : index
    %171 = vector.load %arg11[%c0_133, %c3_134, %c1_135, %c0_136] : memref<2x10x10x32xf32, #tpu.memory_space<vmem>>, vector<1x1x8x32xf32>
    %172 = vector.shape_cast %171 : vector<1x1x8x32xf32> to vector<8x32xf32>
    %173 = vector.extract_strided_slice %82 {offsets = [4, 0], sizes = [1, 32], strides = [1, 1]} : vector<9x32xf32> to vector<1x32xf32>
    %174 = vector.broadcast %173 : vector<1x32xf32> to vector<8x32xf32>
    %175 = arith.mulf %172, %174 : vector<8x32xf32>
    %176 = arith.addf %170, %175 : vector<8x32xf32>
    %c0_137 = arith.constant 0 : index
    %c3_138 = arith.constant 3 : index
    %c2_139 = arith.constant 2 : index
    %c0_140 = arith.constant 0 : index
    %177 = vector.load %arg11[%c0_137, %c3_138, %c2_139, %c0_140] : memref<2x10x10x32xf32, #tpu.memory_space<vmem>>, vector<1x1x8x32xf32>
    %178 = vector.shape_cast %177 : vector<1x1x8x32xf32> to vector<8x32xf32>
    %179 = vector.extract_strided_slice %82 {offsets = [5, 0], sizes = [1, 32], strides = [1, 1]} : vector<9x32xf32> to vector<1x32xf32>
    %180 = vector.broadcast %179 : vector<1x32xf32> to vector<8x32xf32>
    %181 = arith.mulf %178, %180 : vector<8x32xf32>
    %182 = arith.addf %176, %181 : vector<8x32xf32>
    %c0_141 = arith.constant 0 : index
    %c4_142 = arith.constant 4 : index
    %c0_143 = arith.constant 0 : index
    %c0_144 = arith.constant 0 : index
    %183 = vector.load %arg11[%c0_141, %c4_142, %c0_143, %c0_144] : memref<2x10x10x32xf32, #tpu.memory_space<vmem>>, vector<1x1x8x32xf32>
    %184 = vector.shape_cast %183 : vector<1x1x8x32xf32> to vector<8x32xf32>
    %185 = vector.extract_strided_slice %82 {offsets = [6, 0], sizes = [1, 32], strides = [1, 1]} : vector<9x32xf32> to vector<1x32xf32>
    %186 = vector.broadcast %185 : vector<1x32xf32> to vector<8x32xf32>
    %187 = arith.mulf %184, %186 : vector<8x32xf32>
    %188 = arith.addf %182, %187 : vector<8x32xf32>
    %c0_145 = arith.constant 0 : index
    %c4_146 = arith.constant 4 : index
    %c1_147 = arith.constant 1 : index
    %c0_148 = arith.constant 0 : index
    %189 = vector.load %arg11[%c0_145, %c4_146, %c1_147, %c0_148] : memref<2x10x10x32xf32, #tpu.memory_space<vmem>>, vector<1x1x8x32xf32>
    %190 = vector.shape_cast %189 : vector<1x1x8x32xf32> to vector<8x32xf32>
    %191 = vector.extract_strided_slice %82 {offsets = [7, 0], sizes = [1, 32], strides = [1, 1]} : vector<9x32xf32> to vector<1x32xf32>
    %192 = vector.broadcast %191 : vector<1x32xf32> to vector<8x32xf32>
    %193 = arith.mulf %190, %192 : vector<8x32xf32>
    %194 = arith.addf %188, %193 : vector<8x32xf32>
    %c0_149 = arith.constant 0 : index
    %c4_150 = arith.constant 4 : index
    %c2_151 = arith.constant 2 : index
    %c0_152 = arith.constant 0 : index
    %195 = vector.load %arg11[%c0_149, %c4_150, %c2_151, %c0_152] : memref<2x10x10x32xf32, #tpu.memory_space<vmem>>, vector<1x1x8x32xf32>
    %196 = vector.shape_cast %195 : vector<1x1x8x32xf32> to vector<8x32xf32>
    %197 = vector.extract_strided_slice %82 {offsets = [8, 0], sizes = [1, 32], strides = [1, 1]} : vector<9x32xf32> to vector<1x32xf32>
    %198 = vector.broadcast %197 : vector<1x32xf32> to vector<8x32xf32>
    %199 = arith.mulf %196, %198 : vector<8x32xf32>
    %200 = arith.addf %194, %199 : vector<8x32xf32>
    %201 = vector.extract_strided_slice %200 {offsets = [0, 0], sizes = [1, 32], strides = [1, 1]} : vector<8x32xf32> to vector<1x32xf32>
    %c4_153 = arith.constant 4 : index
    %c0_154 = arith.constant 0 : index
    %202 = vector.load %arg12[%c4_153, %c0_154] : memref<32x32xf32, #tpu.memory_space<vmem>>, vector<1x32xf32>
    tpu.vector_store %arg12[%c4_153, %c0_154], %201 {strides = array<i32>} : memref<32x32xf32, #tpu.memory_space<vmem>>, vector<1x32xf32>,
    %203 = vector.extract_strided_slice %200 {offsets = [2, 0], sizes = [1, 32], strides = [1, 1]} : vector<8x32xf32> to vector<1x32xf32>
    %c5_155 = arith.constant 5 : index
    %c0_156 = arith.constant 0 : index
    %204 = vector.load %arg12[%c5_155, %c0_156] : memref<32x32xf32, #tpu.memory_space<vmem>>, vector<1x32xf32>
    tpu.vector_store %arg12[%c5_155, %c0_156], %203 {strides = array<i32>} : memref<32x32xf32, #tpu.memory_space<vmem>>, vector<1x32xf32>,
    %205 = vector.extract_strided_slice %200 {offsets = [4, 0], sizes = [1, 32], strides = [1, 1]} : vector<8x32xf32> to vector<1x32xf32>
    %c6_157 = arith.constant 6 : index
    %c0_158 = arith.constant 0 : index
    %206 = vector.load %arg12[%c6_157, %c0_158] : memref<32x32xf32, #tpu.memory_space<vmem>>, vector<1x32xf32>
    tpu.vector_store %arg12[%c6_157, %c0_158], %205 {strides = array<i32>} : memref<32x32xf32, #tpu.memory_space<vmem>>, vector<1x32xf32>,
    %207 = vector.extract_strided_slice %200 {offsets = [6, 0], sizes = [1, 32], strides = [1, 1]} : vector<8x32xf32> to vector<1x32xf32>
    %c7_159 = arith.constant 7 : index
    %c0_160 = arith.constant 0 : index
    %208 = vector.load %arg12[%c7_159, %c0_160] : memref<32x32xf32, #tpu.memory_space<vmem>>, vector<1x32xf32>
    tpu.vector_store %arg12[%c7_159, %c0_160], %207 {strides = array<i32>} : memref<32x32xf32, #tpu.memory_space<vmem>>, vector<1x32xf32>,
    %cst_161 = arith.constant 0.000000e+00 : f32
    %209 = vector.broadcast %cst_161 : f32 to vector<8x32xf32>
    %c0_162 = arith.constant 0 : index
    %c4_163 = arith.constant 4 : index
    %c0_164 = arith.constant 0 : index
    %c0_165 = arith.constant 0 : index
    %210 = vector.load %arg11[%c0_162, %c4_163, %c0_164, %c0_165] : memref<2x10x10x32xf32, #tpu.memory_space<vmem>>, vector<1x1x8x32xf32>
    %211 = vector.shape_cast %210 : vector<1x1x8x32xf32> to vector<8x32xf32>
    %212 = vector.extract_strided_slice %82 {offsets = [0, 0], sizes = [1, 32], strides = [1, 1]} : vector<9x32xf32> to vector<1x32xf32>
    %213 = vector.broadcast %212 : vector<1x32xf32> to vector<8x32xf32>
    %214 = arith.mulf %211, %213 : vector<8x32xf32>
    %215 = arith.addf %209, %214 : vector<8x32xf32>
    %c0_166 = arith.constant 0 : index
    %c4_167 = arith.constant 4 : index
    %c1_168 = arith.constant 1 : index
    %c0_169 = arith.constant 0 : index
    %216 = vector.load %arg11[%c0_166, %c4_167, %c1_168, %c0_169] : memref<2x10x10x32xf32, #tpu.memory_space<vmem>>, vector<1x1x8x32xf32>
    %217 = vector.shape_cast %216 : vector<1x1x8x32xf32> to vector<8x32xf32>
    %218 = vector.extract_strided_slice %82 {offsets = [1, 0], sizes = [1, 32], strides = [1, 1]} : vector<9x32xf32> to vector<1x32xf32>
    %219 = vector.broadcast %218 : vector<1x32xf32> to vector<8x32xf32>
    %220 = arith.mulf %217, %219 : vector<8x32xf32>
    %221 = arith.addf %215, %220 : vector<8x32xf32>
    %c0_170 = arith.constant 0 : index
    %c4_171 = arith.constant 4 : index
    %c2_172 = arith.constant 2 : index
    %c0_173 = arith.constant 0 : index
    %222 = vector.load %arg11[%c0_170, %c4_171, %c2_172, %c0_173] : memref<2x10x10x32xf32, #tpu.memory_space<vmem>>, vector<1x1x8x32xf32>
    %223 = vector.shape_cast %222 : vector<1x1x8x32xf32> to vector<8x32xf32>
    %224 = vector.extract_strided_slice %82 {offsets = [2, 0], sizes = [1, 32], strides = [1, 1]} : vector<9x32xf32> to vector<1x32xf32>
    %225 = vector.broadcast %224 : vector<1x32xf32> to vector<8x32xf32>
    %226 = arith.mulf %223, %225 : vector<8x32xf32>
    %227 = arith.addf %221, %226 : vector<8x32xf32>
    %c0_174 = arith.constant 0 : index
    %c5_175 = arith.constant 5 : index
    %c0_176 = arith.constant 0 : index
    %c0_177 = arith.constant 0 : index
    %228 = vector.load %arg11[%c0_174, %c5_175, %c0_176, %c0_177] : memref<2x10x10x32xf32, #tpu.memory_space<vmem>>, vector<1x1x8x32xf32>
    %229 = vector.shape_cast %228 : vector<1x1x8x32xf32> to vector<8x32xf32>
    %230 = vector.extract_strided_slice %82 {offsets = [3, 0], sizes = [1, 32], strides = [1, 1]} : vector<9x32xf32> to vector<1x32xf32>
    %231 = vector.broadcast %230 : vector<1x32xf32> to vector<8x32xf32>
    %232 = arith.mulf %229, %231 : vector<8x32xf32>
    %233 = arith.addf %227, %232 : vector<8x32xf32>
    %c0_178 = arith.constant 0 : index
    %c5_179 = arith.constant 5 : index
    %c1_180 = arith.constant 1 : index
    %c0_181 = arith.constant 0 : index
    %234 = vector.load %arg11[%c0_178, %c5_179, %c1_180, %c0_181] : memref<2x10x10x32xf32, #tpu.memory_space<vmem>>, vector<1x1x8x32xf32>
    %235 = vector.shape_cast %234 : vector<1x1x8x32xf32> to vector<8x32xf32>
    %236 = vector.extract_strided_slice %82 {offsets = [4, 0], sizes = [1, 32], strides = [1, 1]} : vector<9x32xf32> to vector<1x32xf32>
    %237 = vector.broadcast %236 : vector<1x32xf32> to vector<8x32xf32>
    %238 = arith.mulf %235, %237 : vector<8x32xf32>
    %239 = arith.addf %233, %238 : vector<8x32xf32>
    %c0_182 = arith.constant 0 : index
    %c5_183 = arith.constant 5 : index
    %c2_184 = arith.constant 2 : index
    %c0_185 = arith.constant 0 : index
    %240 = vector.load %arg11[%c0_182, %c5_183, %c2_184, %c0_185] : memref<2x10x10x32xf32, #tpu.memory_space<vmem>>, vector<1x1x8x32xf32>
    %241 = vector.shape_cast %240 : vector<1x1x8x32xf32> to vector<8x32xf32>
    %242 = vector.extract_strided_slice %82 {offsets = [5, 0], sizes = [1, 32], strides = [1, 1]} : vector<9x32xf32> to vector<1x32xf32>
    %243 = vector.broadcast %242 : vector<1x32xf32> to vector<8x32xf32>
    %244 = arith.mulf %241, %243 : vector<8x32xf32>
    %245 = arith.addf %239, %244 : vector<8x32xf32>
    %c0_186 = arith.constant 0 : index
    %c6_187 = arith.constant 6 : index
    %c0_188 = arith.constant 0 : index
    %c0_189 = arith.constant 0 : index
    %246 = vector.load %arg11[%c0_186, %c6_187, %c0_188, %c0_189] : memref<2x10x10x32xf32, #tpu.memory_space<vmem>>, vector<1x1x8x32xf32>
    %247 = vector.shape_cast %246 : vector<1x1x8x32xf32> to vector<8x32xf32>
    %248 = vector.extract_strided_slice %82 {offsets = [6, 0], sizes = [1, 32], strides = [1, 1]} : vector<9x32xf32> to vector<1x32xf32>
    %249 = vector.broadcast %248 : vector<1x32xf32> to vector<8x32xf32>
    %250 = arith.mulf %247, %249 : vector<8x32xf32>
    %251 = arith.addf %245, %250 : vector<8x32xf32>
    %c0_190 = arith.constant 0 : index
    %c6_191 = arith.constant 6 : index
    %c1_192 = arith.constant 1 : index
    %c0_193 = arith.constant 0 : index
    %252 = vector.load %arg11[%c0_190, %c6_191, %c1_192, %c0_193] : memref<2x10x10x32xf32, #tpu.memory_space<vmem>>, vector<1x1x8x32xf32>
    %253 = vector.shape_cast %252 : vector<1x1x8x32xf32> to vector<8x32xf32>
    %254 = vector.extract_strided_slice %82 {offsets = [7, 0], sizes = [1, 32], strides = [1, 1]} : vector<9x32xf32> to vector<1x32xf32>
    %255 = vector.broadcast %254 : vector<1x32xf32> to vector<8x32xf32>
    %256 = arith.mulf %253, %255 : vector<8x32xf32>
    %257 = arith.addf %251, %256 : vector<8x32xf32>
    %c0_194 = arith.constant 0 : index
    %c6_195 = arith.constant 6 : index
    %c2_196 = arith.constant 2 : index
    %c0_197 = arith.constant 0 : index
    %258 = vector.load %arg11[%c0_194, %c6_195, %c2_196, %c0_197] : memref<2x10x10x32xf32, #tpu.memory_space<vmem>>, vector<1x1x8x32xf32>
    %259 = vector.shape_cast %258 : vector<1x1x8x32xf32> to vector<8x32xf32>
    %260 = vector.extract_strided_slice %82 {offsets = [8, 0], sizes = [1, 32], strides = [1, 1]} : vector<9x32xf32> to vector<1x32xf32>
    %261 = vector.broadcast %260 : vector<1x32xf32> to vector<8x32xf32>
    %262 = arith.mulf %259, %261 : vector<8x32xf32>
    %263 = arith.addf %257, %262 : vector<8x32xf32>
    %264 = vector.extract_strided_slice %263 {offsets = [0, 0], sizes = [1, 32], strides = [1, 1]} : vector<8x32xf32> to vector<1x32xf32>
    %c8_198 = arith.constant 8 : index
    %c0_199 = arith.constant 0 : index
    %265 = vector.load %arg12[%c8_198, %c0_199] : memref<32x32xf32, #tpu.memory_space<vmem>>, vector<1x32xf32>
    tpu.vector_store %arg12[%c8_198, %c0_199], %264 {strides = array<i32>} : memref<32x32xf32, #tpu.memory_space<vmem>>, vector<1x32xf32>,
    %266 = vector.extract_strided_slice %263 {offsets = [2, 0], sizes = [1, 32], strides = [1, 1]} : vector<8x32xf32> to vector<1x32xf32>
    %c9 = arith.constant 9 : index
    %c0_200 = arith.constant 0 : index
    %267 = vector.load %arg12[%c9, %c0_200] : memref<32x32xf32, #tpu.memory_space<vmem>>, vector<1x32xf32>
    tpu.vector_store %arg12[%c9, %c0_200], %266 {strides = array<i32>} : memref<32x32xf32, #tpu.memory_space<vmem>>, vector<1x32xf32>,
    %268 = vector.extract_strided_slice %263 {offsets = [4, 0], sizes = [1, 32], strides = [1, 1]} : vector<8x32xf32> to vector<1x32xf32>
    %c10 = arith.constant 10 : index
    %c0_201 = arith.constant 0 : index
    %269 = vector.load %arg12[%c10, %c0_201] : memref<32x32xf32, #tpu.memory_space<vmem>>, vector<1x32xf32>
    tpu.vector_store %arg12[%c10, %c0_201], %268 {strides = array<i32>} : memref<32x32xf32, #tpu.memory_space<vmem>>, vector<1x32xf32>,
    %270 = vector.extract_strided_slice %263 {offsets = [6, 0], sizes = [1, 32], strides = [1, 1]} : vector<8x32xf32> to vector<1x32xf32>
    %c11 = arith.constant 11 : index
    %c0_202 = arith.constant 0 : index
    %271 = vector.load %arg12[%c11, %c0_202] : memref<32x32xf32, #tpu.memory_space<vmem>>, vector<1x32xf32>
    tpu.vector_store %arg12[%c11, %c0_202], %270 {strides = array<i32>} : memref<32x32xf32, #tpu.memory_space<vmem>>, vector<1x32xf32>,
    %cst_203 = arith.constant 0.000000e+00 : f32
    %272 = vector.broadcast %cst_203 : f32 to vector<8x32xf32>
    %c0_204 = arith.constant 0 : index
    %c6_205 = arith.constant 6 : index
    %c0_206 = arith.constant 0 : index
    %c0_207 = arith.constant 0 : index
    %273 = vector.load %arg11[%c0_204, %c6_205, %c0_206, %c0_207] : memref<2x10x10x32xf32, #tpu.memory_space<vmem>>, vector<1x1x8x32xf32>
    %274 = vector.shape_cast %273 : vector<1x1x8x32xf32> to vector<8x32xf32>
    %275 = vector.extract_strided_slice %82 {offsets = [0, 0], sizes = [1, 32], strides = [1, 1]} : vector<9x32xf32> to vector<1x32xf32>
    %276 = vector.broadcast %275 : vector<1x32xf32> to vector<8x32xf32>
    %277 = arith.mulf %274, %276 : vector<8x32xf32>
    %278 = arith.addf %272, %277 : vector<8x32xf32>
    %c0_208 = arith.constant 0 : index
    %c6_209 = arith.constant 6 : index
    %c1_210 = arith.constant 1 : index
    %c0_211 = arith.constant 0 : index
    %279 = vector.load %arg11[%c0_208, %c6_209, %c1_210, %c0_211] : memref<2x10x10x32xf32, #tpu.memory_space<vmem>>, vector<1x1x8x32xf32>
    %280 = vector.shape_cast %279 : vector<1x1x8x32xf32> to vector<8x32xf32>
    %281 = vector.extract_strided_slice %82 {offsets = [1, 0], sizes = [1, 32], strides = [1, 1]} : vector<9x32xf32> to vector<1x32xf32>
    %282 = vector.broadcast %281 : vector<1x32xf32> to vector<8x32xf32>
    %283 = arith.mulf %280, %282 : vector<8x32xf32>
    %284 = arith.addf %278, %283 : vector<8x32xf32>
    %c0_212 = arith.constant 0 : index
    %c6_213 = arith.constant 6 : index
    %c2_214 = arith.constant 2 : index
    %c0_215 = arith.constant 0 : index
    %285 = vector.load %arg11[%c0_212, %c6_213, %c2_214, %c0_215] : memref<2x10x10x32xf32, #tpu.memory_space<vmem>>, vector<1x1x8x32xf32>
    %286 = vector.shape_cast %285 : vector<1x1x8x32xf32> to vector<8x32xf32>
    %287 = vector.extract_strided_slice %82 {offsets = [2, 0], sizes = [1, 32], strides = [1, 1]} : vector<9x32xf32> to vector<1x32xf32>
    %288 = vector.broadcast %287 : vector<1x32xf32> to vector<8x32xf32>
    %289 = arith.mulf %286, %288 : vector<8x32xf32>
    %290 = arith.addf %284, %289 : vector<8x32xf32>
    %c0_216 = arith.constant 0 : index
    %c7_217 = arith.constant 7 : index
    %c0_218 = arith.constant 0 : index
    %c0_219 = arith.constant 0 : index
    %291 = vector.load %arg11[%c0_216, %c7_217, %c0_218, %c0_219] : memref<2x10x10x32xf32, #tpu.memory_space<vmem>>, vector<1x1x8x32xf32>
    %292 = vector.shape_cast %291 : vector<1x1x8x32xf32> to vector<8x32xf32>
    %293 = vector.extract_strided_slice %82 {offsets = [3, 0], sizes = [1, 32], strides = [1, 1]} : vector<9x32xf32> to vector<1x32xf32>
    %294 = vector.broadcast %293 : vector<1x32xf32> to vector<8x32xf32>
    %295 = arith.mulf %292, %294 : vector<8x32xf32>
    %296 = arith.addf %290, %295 : vector<8x32xf32>
    %c0_220 = arith.constant 0 : index
    %c7_221 = arith.constant 7 : index
    %c1_222 = arith.constant 1 : index
    %c0_223 = arith.constant 0 : index
    %297 = vector.load %arg11[%c0_220, %c7_221, %c1_222, %c0_223] : memref<2x10x10x32xf32, #tpu.memory_space<vmem>>, vector<1x1x8x32xf32>
    %298 = vector.shape_cast %297 : vector<1x1x8x32xf32> to vector<8x32xf32>
    %299 = vector.extract_strided_slice %82 {offsets = [4, 0], sizes = [1, 32], strides = [1, 1]} : vector<9x32xf32> to vector<1x32xf32>
    %300 = vector.broadcast %299 : vector<1x32xf32> to vector<8x32xf32>
    %301 = arith.mulf %298, %300 : vector<8x32xf32>
    %302 = arith.addf %296, %301 : vector<8x32xf32>
    %c0_224 = arith.constant 0 : index
    %c7_225 = arith.constant 7 : index
    %c2_226 = arith.constant 2 : index
    %c0_227 = arith.constant 0 : index
    %303 = vector.load %arg11[%c0_224, %c7_225, %c2_226, %c0_227] : memref<2x10x10x32xf32, #tpu.memory_space<vmem>>, vector<1x1x8x32xf32>
    %304 = vector.shape_cast %303 : vector<1x1x8x32xf32> to vector<8x32xf32>
    %305 = vector.extract_strided_slice %82 {offsets = [5, 0], sizes = [1, 32], strides = [1, 1]} : vector<9x32xf32> to vector<1x32xf32>
    %306 = vector.broadcast %305 : vector<1x32xf32> to vector<8x32xf32>
    %307 = arith.mulf %304, %306 : vector<8x32xf32>
    %308 = arith.addf %302, %307 : vector<8x32xf32>
    %c0_228 = arith.constant 0 : index
    %c8_229 = arith.constant 8 : index
    %c0_230 = arith.constant 0 : index
    %c0_231 = arith.constant 0 : index
    %309 = vector.load %arg11[%c0_228, %c8_229, %c0_230, %c0_231] : memref<2x10x10x32xf32, #tpu.memory_space<vmem>>, vector<1x1x8x32xf32>
    %310 = vector.shape_cast %309 : vector<1x1x8x32xf32> to vector<8x32xf32>
    %311 = vector.extract_strided_slice %82 {offsets = [6, 0], sizes = [1, 32], strides = [1, 1]} : vector<9x32xf32> to vector<1x32xf32>
    %312 = vector.broadcast %311 : vector<1x32xf32> to vector<8x32xf32>
    %313 = arith.mulf %310, %312 : vector<8x32xf32>
    %314 = arith.addf %308, %313 : vector<8x32xf32>
    %c0_232 = arith.constant 0 : index
    %c8_233 = arith.constant 8 : index
    %c1_234 = arith.constant 1 : index
    %c0_235 = arith.constant 0 : index
    %315 = vector.load %arg11[%c0_232, %c8_233, %c1_234, %c0_235] : memref<2x10x10x32xf32, #tpu.memory_space<vmem>>, vector<1x1x8x32xf32>
    %316 = vector.shape_cast %315 : vector<1x1x8x32xf32> to vector<8x32xf32>
    %317 = vector.extract_strided_slice %82 {offsets = [7, 0], sizes = [1, 32], strides = [1, 1]} : vector<9x32xf32> to vector<1x32xf32>
    %318 = vector.broadcast %317 : vector<1x32xf32> to vector<8x32xf32>
    %319 = arith.mulf %316, %318 : vector<8x32xf32>
    %320 = arith.addf %314, %319 : vector<8x32xf32>
    %c0_236 = arith.constant 0 : index
    %c8_237 = arith.constant 8 : index
    %c2_238 = arith.constant 2 : index
    %c0_239 = arith.constant 0 : index
    %321 = vector.load %arg11[%c0_236, %c8_237, %c2_238, %c0_239] : memref<2x10x10x32xf32, #tpu.memory_space<vmem>>, vector<1x1x8x32xf32>
    %322 = vector.shape_cast %321 : vector<1x1x8x32xf32> to vector<8x32xf32>
    %323 = vector.extract_strided_slice %82 {offsets = [8, 0], sizes = [1, 32], strides = [1, 1]} : vector<9x32xf32> to vector<1x32xf32>
    %324 = vector.broadcast %323 : vector<1x32xf32> to vector<8x32xf32>
    %325 = arith.mulf %322, %324 : vector<8x32xf32>
    %326 = arith.addf %320, %325 : vector<8x32xf32>
    %327 = vector.extract_strided_slice %326 {offsets = [0, 0], sizes = [1, 32], strides = [1, 1]} : vector<8x32xf32> to vector<1x32xf32>
    %c12 = arith.constant 12 : index
    %c0_240 = arith.constant 0 : index
    %328 = vector.load %arg12[%c12, %c0_240] : memref<32x32xf32, #tpu.memory_space<vmem>>, vector<1x32xf32>
    tpu.vector_store %arg12[%c12, %c0_240], %327 {strides = array<i32>} : memref<32x32xf32, #tpu.memory_space<vmem>>, vector<1x32xf32>,
    %329 = vector.extract_strided_slice %326 {offsets = [2, 0], sizes = [1, 32], strides = [1, 1]} : vector<8x32xf32> to vector<1x32xf32>
    %c13 = arith.constant 13 : index
    %c0_241 = arith.constant 0 : index
    %330 = vector.load %arg12[%c13, %c0_241] : memref<32x32xf32, #tpu.memory_space<vmem>>, vector<1x32xf32>
    tpu.vector_store %arg12[%c13, %c0_241], %329 {strides = array<i32>} : memref<32x32xf32, #tpu.memory_space<vmem>>, vector<1x32xf32>,
    %331 = vector.extract_strided_slice %326 {offsets = [4, 0], sizes = [1, 32], strides = [1, 1]} : vector<8x32xf32> to vector<1x32xf32>
    %c14 = arith.constant 14 : index
    %c0_242 = arith.constant 0 : index
    %332 = vector.load %arg12[%c14, %c0_242] : memref<32x32xf32, #tpu.memory_space<vmem>>, vector<1x32xf32>
    tpu.vector_store %arg12[%c14, %c0_242], %331 {strides = array<i32>} : memref<32x32xf32, #tpu.memory_space<vmem>>, vector<1x32xf32>,
    %333 = vector.extract_strided_slice %326 {offsets = [6, 0], sizes = [1, 32], strides = [1, 1]} : vector<8x32xf32> to vector<1x32xf32>
    %c15 = arith.constant 15 : index
    %c0_243 = arith.constant 0 : index
    %334 = vector.load %arg12[%c15, %c0_243] : memref<32x32xf32, #tpu.memory_space<vmem>>, vector<1x32xf32>
    tpu.vector_store %arg12[%c15, %c0_243], %333 {strides = array<i32>} : memref<32x32xf32, #tpu.memory_space<vmem>>, vector<1x32xf32>,
    %cst_244 = arith.constant 0.000000e+00 : f32
    %335 = vector.broadcast %cst_244 : f32 to vector<8x32xf32>
    %c1_245 = arith.constant 1 : index
    %c0_246 = arith.constant 0 : index
    %c0_247 = arith.constant 0 : index
    %c0_248 = arith.constant 0 : index
    %336 = vector.load %arg11[%c1_245, %c0_246, %c0_247, %c0_248] : memref<2x10x10x32xf32, #tpu.memory_space<vmem>>, vector<1x1x8x32xf32>
    %337 = vector.shape_cast %336 : vector<1x1x8x32xf32> to vector<8x32xf32>
    %338 = vector.extract_strided_slice %82 {offsets = [0, 0], sizes = [1, 32], strides = [1, 1]} : vector<9x32xf32> to vector<1x32xf32>
    %339 = vector.broadcast %338 : vector<1x32xf32> to vector<8x32xf32>
    %340 = arith.mulf %337, %339 : vector<8x32xf32>
    %341 = arith.addf %335, %340 : vector<8x32xf32>
    %c1_249 = arith.constant 1 : index
    %c0_250 = arith.constant 0 : index
    %c1_251 = arith.constant 1 : index
    %c0_252 = arith.constant 0 : index
    %342 = vector.load %arg11[%c1_249, %c0_250, %c1_251, %c0_252] : memref<2x10x10x32xf32, #tpu.memory_space<vmem>>, vector<1x1x8x32xf32>
    %343 = vector.shape_cast %342 : vector<1x1x8x32xf32> to vector<8x32xf32>
    %344 = vector.extract_strided_slice %82 {offsets = [1, 0], sizes = [1, 32], strides = [1, 1]} : vector<9x32xf32> to vector<1x32xf32>
    %345 = vector.broadcast %344 : vector<1x32xf32> to vector<8x32xf32>
    %346 = arith.mulf %343, %345 : vector<8x32xf32>
    %347 = arith.addf %341, %346 : vector<8x32xf32>
    %c1_253 = arith.constant 1 : index
    %c0_254 = arith.constant 0 : index
    %c2_255 = arith.constant 2 : index
    %c0_256 = arith.constant 0 : index
    %348 = vector.load %arg11[%c1_253, %c0_254, %c2_255, %c0_256] : memref<2x10x10x32xf32, #tpu.memory_space<vmem>>, vector<1x1x8x32xf32>
    %349 = vector.shape_cast %348 : vector<1x1x8x32xf32> to vector<8x32xf32>
    %350 = vector.extract_strided_slice %82 {offsets = [2, 0], sizes = [1, 32], strides = [1, 1]} : vector<9x32xf32> to vector<1x32xf32>
    %351 = vector.broadcast %350 : vector<1x32xf32> to vector<8x32xf32>
    %352 = arith.mulf %349, %351 : vector<8x32xf32>
    %353 = arith.addf %347, %352 : vector<8x32xf32>
    %c1_257 = arith.constant 1 : index
    %c1_258 = arith.constant 1 : index
    %c0_259 = arith.constant 0 : index
    %c0_260 = arith.constant 0 : index
    %354 = vector.load %arg11[%c1_257, %c1_258, %c0_259, %c0_260] : memref<2x10x10x32xf32, #tpu.memory_space<vmem>>, vector<1x1x8x32xf32>
    %355 = vector.shape_cast %354 : vector<1x1x8x32xf32> to vector<8x32xf32>
    %356 = vector.extract_strided_slice %82 {offsets = [3, 0], sizes = [1, 32], strides = [1, 1]} : vector<9x32xf32> to vector<1x32xf32>
    %357 = vector.broadcast %356 : vector<1x32xf32> to vector<8x32xf32>
    %358 = arith.mulf %355, %357 : vector<8x32xf32>
    %359 = arith.addf %353, %358 : vector<8x32xf32>
    %c1_261 = arith.constant 1 : index
    %c1_262 = arith.constant 1 : index
    %c1_263 = arith.constant 1 : index
    %c0_264 = arith.constant 0 : index
    %360 = vector.load %arg11[%c1_261, %c1_262, %c1_263, %c0_264] : memref<2x10x10x32xf32, #tpu.memory_space<vmem>>, vector<1x1x8x32xf32>
    %361 = vector.shape_cast %360 : vector<1x1x8x32xf32> to vector<8x32xf32>
    %362 = vector.extract_strided_slice %82 {offsets = [4, 0], sizes = [1, 32], strides = [1, 1]} : vector<9x32xf32> to vector<1x32xf32>
    %363 = vector.broadcast %362 : vector<1x32xf32> to vector<8x32xf32>
    %364 = arith.mulf %361, %363 : vector<8x32xf32>
    %365 = arith.addf %359, %364 : vector<8x32xf32>
    %c1_265 = arith.constant 1 : index
    %c1_266 = arith.constant 1 : index
    %c2_267 = arith.constant 2 : index
    %c0_268 = arith.constant 0 : index
    %366 = vector.load %arg11[%c1_265, %c1_266, %c2_267, %c0_268] : memref<2x10x10x32xf32, #tpu.memory_space<vmem>>, vector<1x1x8x32xf32>
    %367 = vector.shape_cast %366 : vector<1x1x8x32xf32> to vector<8x32xf32>
    %368 = vector.extract_strided_slice %82 {offsets = [5, 0], sizes = [1, 32], strides = [1, 1]} : vector<9x32xf32> to vector<1x32xf32>
    %369 = vector.broadcast %368 : vector<1x32xf32> to vector<8x32xf32>
    %370 = arith.mulf %367, %369 : vector<8x32xf32>
    %371 = arith.addf %365, %370 : vector<8x32xf32>
    %c1_269 = arith.constant 1 : index
    %c2_270 = arith.constant 2 : index
    %c0_271 = arith.constant 0 : index
    %c0_272 = arith.constant 0 : index
    %372 = vector.load %arg11[%c1_269, %c2_270, %c0_271, %c0_272] : memref<2x10x10x32xf32, #tpu.memory_space<vmem>>, vector<1x1x8x32xf32>
    %373 = vector.shape_cast %372 : vector<1x1x8x32xf32> to vector<8x32xf32>
    %374 = vector.extract_strided_slice %82 {offsets = [6, 0], sizes = [1, 32], strides = [1, 1]} : vector<9x32xf32> to vector<1x32xf32>
    %375 = vector.broadcast %374 : vector<1x32xf32> to vector<8x32xf32>
    %376 = arith.mulf %373, %375 : vector<8x32xf32>
    %377 = arith.addf %371, %376 : vector<8x32xf32>
    %c1_273 = arith.constant 1 : index
    %c2_274 = arith.constant 2 : index
    %c1_275 = arith.constant 1 : index
    %c0_276 = arith.constant 0 : index
    %378 = vector.load %arg11[%c1_273, %c2_274, %c1_275, %c0_276] : memref<2x10x10x32xf32, #tpu.memory_space<vmem>>, vector<1x1x8x32xf32>
    %379 = vector.shape_cast %378 : vector<1x1x8x32xf32> to vector<8x32xf32>
    %380 = vector.extract_strided_slice %82 {offsets = [7, 0], sizes = [1, 32], strides = [1, 1]} : vector<9x32xf32> to vector<1x32xf32>
    %381 = vector.broadcast %380 : vector<1x32xf32> to vector<8x32xf32>
    %382 = arith.mulf %379, %381 : vector<8x32xf32>
    %383 = arith.addf %377, %382 : vector<8x32xf32>
    %c1_277 = arith.constant 1 : index
    %c2_278 = arith.constant 2 : index
    %c2_279 = arith.constant 2 : index
    %c0_280 = arith.constant 0 : index
    %384 = vector.load %arg11[%c1_277, %c2_278, %c2_279, %c0_280] : memref<2x10x10x32xf32, #tpu.memory_space<vmem>>, vector<1x1x8x32xf32>
    %385 = vector.shape_cast %384 : vector<1x1x8x32xf32> to vector<8x32xf32>
    %386 = vector.extract_strided_slice %82 {offsets = [8, 0], sizes = [1, 32], strides = [1, 1]} : vector<9x32xf32> to vector<1x32xf32>
    %387 = vector.broadcast %386 : vector<1x32xf32> to vector<8x32xf32>
    %388 = arith.mulf %385, %387 : vector<8x32xf32>
    %389 = arith.addf %383, %388 : vector<8x32xf32>
    %390 = vector.extract_strided_slice %389 {offsets = [0, 0], sizes = [1, 32], strides = [1, 1]} : vector<8x32xf32> to vector<1x32xf32>
    %c16 = arith.constant 16 : index
    %c0_281 = arith.constant 0 : index
    %391 = vector.load %arg12[%c16, %c0_281] : memref<32x32xf32, #tpu.memory_space<vmem>>, vector<1x32xf32>
    tpu.vector_store %arg12[%c16, %c0_281], %390 {strides = array<i32>} : memref<32x32xf32, #tpu.memory_space<vmem>>, vector<1x32xf32>,
    %392 = vector.extract_strided_slice %389 {offsets = [2, 0], sizes = [1, 32], strides = [1, 1]} : vector<8x32xf32> to vector<1x32xf32>
    %c17 = arith.constant 17 : index
    %c0_282 = arith.constant 0 : index
    %393 = vector.load %arg12[%c17, %c0_282] : memref<32x32xf32, #tpu.memory_space<vmem>>, vector<1x32xf32>
    tpu.vector_store %arg12[%c17, %c0_282], %392 {strides = array<i32>} : memref<32x32xf32, #tpu.memory_space<vmem>>, vector<1x32xf32>,
    %394 = vector.extract_strided_slice %389 {offsets = [4, 0], sizes = [1, 32], strides = [1, 1]} : vector<8x32xf32> to vector<1x32xf32>
    %c18 = arith.constant 18 : index
    %c0_283 = arith.constant 0 : index
    %395 = vector.load %arg12[%c18, %c0_283] : memref<32x32xf32, #tpu.memory_space<vmem>>, vector<1x32xf32>
    tpu.vector_store %arg12[%c18, %c0_283], %394 {strides = array<i32>} : memref<32x32xf32, #tpu.memory_space<vmem>>, vector<1x32xf32>,
    %396 = vector.extract_strided_slice %389 {offsets = [6, 0], sizes = [1, 32], strides = [1, 1]} : vector<8x32xf32> to vector<1x32xf32>
    %c19 = arith.constant 19 : index
    %c0_284 = arith.constant 0 : index
    %397 = vector.load %arg12[%c19, %c0_284] : memref<32x32xf32, #tpu.memory_space<vmem>>, vector<1x32xf32>
    tpu.vector_store %arg12[%c19, %c0_284], %396 {strides = array<i32>} : memref<32x32xf32, #tpu.memory_space<vmem>>, vector<1x32xf32>,
    %cst_285 = arith.constant 0.000000e+00 : f32
    %398 = vector.broadcast %cst_285 : f32 to vector<8x32xf32>
    %c1_286 = arith.constant 1 : index
    %c2_287 = arith.constant 2 : index
    %c0_288 = arith.constant 0 : index
    %c0_289 = arith.constant 0 : index
    %399 = vector.load %arg11[%c1_286, %c2_287, %c0_288, %c0_289] : memref<2x10x10x32xf32, #tpu.memory_space<vmem>>, vector<1x1x8x32xf32>
    %400 = vector.shape_cast %399 : vector<1x1x8x32xf32> to vector<8x32xf32>
    %401 = vector.extract_strided_slice %82 {offsets = [0, 0], sizes = [1, 32], strides = [1, 1]} : vector<9x32xf32> to vector<1x32xf32>
    %402 = vector.broadcast %401 : vector<1x32xf32> to vector<8x32xf32>
    %403 = arith.mulf %400, %402 : vector<8x32xf32>
    %404 = arith.addf %398, %403 : vector<8x32xf32>
    %c1_290 = arith.constant 1 : index
    %c2_291 = arith.constant 2 : index
    %c1_292 = arith.constant 1 : index
    %c0_293 = arith.constant 0 : index
    %405 = vector.load %arg11[%c1_290, %c2_291, %c1_292, %c0_293] : memref<2x10x10x32xf32, #tpu.memory_space<vmem>>, vector<1x1x8x32xf32>
    %406 = vector.shape_cast %405 : vector<1x1x8x32xf32> to vector<8x32xf32>
    %407 = vector.extract_strided_slice %82 {offsets = [1, 0], sizes = [1, 32], strides = [1, 1]} : vector<9x32xf32> to vector<1x32xf32>
    %408 = vector.broadcast %407 : vector<1x32xf32> to vector<8x32xf32>
    %409 = arith.mulf %406, %408 : vector<8x32xf32>
    %410 = arith.addf %404, %409 : vector<8x32xf32>
    %c1_294 = arith.constant 1 : index
    %c2_295 = arith.constant 2 : index
    %c2_296 = arith.constant 2 : index
    %c0_297 = arith.constant 0 : index
    %411 = vector.load %arg11[%c1_294, %c2_295, %c2_296, %c0_297] : memref<2x10x10x32xf32, #tpu.memory_space<vmem>>, vector<1x1x8x32xf32>
    %412 = vector.shape_cast %411 : vector<1x1x8x32xf32> to vector<8x32xf32>
    %413 = vector.extract_strided_slice %82 {offsets = [2, 0], sizes = [1, 32], strides = [1, 1]} : vector<9x32xf32> to vector<1x32xf32>
    %414 = vector.broadcast %413 : vector<1x32xf32> to vector<8x32xf32>
    %415 = arith.mulf %412, %414 : vector<8x32xf32>
    %416 = arith.addf %410, %415 : vector<8x32xf32>
    %c1_298 = arith.constant 1 : index
    %c3_299 = arith.constant 3 : index
    %c0_300 = arith.constant 0 : index
    %c0_301 = arith.constant 0 : index
    %417 = vector.load %arg11[%c1_298, %c3_299, %c0_300, %c0_301] : memref<2x10x10x32xf32, #tpu.memory_space<vmem>>, vector<1x1x8x32xf32>
    %418 = vector.shape_cast %417 : vector<1x1x8x32xf32> to vector<8x32xf32>
    %419 = vector.extract_strided_slice %82 {offsets = [3, 0], sizes = [1, 32], strides = [1, 1]} : vector<9x32xf32> to vector<1x32xf32>
    %420 = vector.broadcast %419 : vector<1x32xf32> to vector<8x32xf32>
    %421 = arith.mulf %418, %420 : vector<8x32xf32>
    %422 = arith.addf %416, %421 : vector<8x32xf32>
    %c1_302 = arith.constant 1 : index
    %c3_303 = arith.constant 3 : index
    %c1_304 = arith.constant 1 : index
    %c0_305 = arith.constant 0 : index
    %423 = vector.load %arg11[%c1_302, %c3_303, %c1_304, %c0_305] : memref<2x10x10x32xf32, #tpu.memory_space<vmem>>, vector<1x1x8x32xf32>
    %424 = vector.shape_cast %423 : vector<1x1x8x32xf32> to vector<8x32xf32>
    %425 = vector.extract_strided_slice %82 {offsets = [4, 0], sizes = [1, 32], strides = [1, 1]} : vector<9x32xf32> to vector<1x32xf32>
    %426 = vector.broadcast %425 : vector<1x32xf32> to vector<8x32xf32>
    %427 = arith.mulf %424, %426 : vector<8x32xf32>
    %428 = arith.addf %422, %427 : vector<8x32xf32>
    %c1_306 = arith.constant 1 : index
    %c3_307 = arith.constant 3 : index
    %c2_308 = arith.constant 2 : index
    %c0_309 = arith.constant 0 : index
    %429 = vector.load %arg11[%c1_306, %c3_307, %c2_308, %c0_309] : memref<2x10x10x32xf32, #tpu.memory_space<vmem>>, vector<1x1x8x32xf32>
    %430 = vector.shape_cast %429 : vector<1x1x8x32xf32> to vector<8x32xf32>
    %431 = vector.extract_strided_slice %82 {offsets = [5, 0], sizes = [1, 32], strides = [1, 1]} : vector<9x32xf32> to vector<1x32xf32>
    %432 = vector.broadcast %431 : vector<1x32xf32> to vector<8x32xf32>
    %433 = arith.mulf %430, %432 : vector<8x32xf32>
    %434 = arith.addf %428, %433 : vector<8x32xf32>
    %c1_310 = arith.constant 1 : index
    %c4_311 = arith.constant 4 : index
    %c0_312 = arith.constant 0 : index
    %c0_313 = arith.constant 0 : index
    %435 = vector.load %arg11[%c1_310, %c4_311, %c0_312, %c0_313] : memref<2x10x10x32xf32, #tpu.memory_space<vmem>>, vector<1x1x8x32xf32>
    %436 = vector.shape_cast %435 : vector<1x1x8x32xf32> to vector<8x32xf32>
    %437 = vector.extract_strided_slice %82 {offsets = [6, 0], sizes = [1, 32], strides = [1, 1]} : vector<9x32xf32> to vector<1x32xf32>
    %438 = vector.broadcast %437 : vector<1x32xf32> to vector<8x32xf32>
    %439 = arith.mulf %436, %438 : vector<8x32xf32>
    %440 = arith.addf %434, %439 : vector<8x32xf32>
    %c1_314 = arith.constant 1 : index
    %c4_315 = arith.constant 4 : index
    %c1_316 = arith.constant 1 : index
    %c0_317 = arith.constant 0 : index
    %441 = vector.load %arg11[%c1_314, %c4_315, %c1_316, %c0_317] : memref<2x10x10x32xf32, #tpu.memory_space<vmem>>, vector<1x1x8x32xf32>
    %442 = vector.shape_cast %441 : vector<1x1x8x32xf32> to vector<8x32xf32>
    %443 = vector.extract_strided_slice %82 {offsets = [7, 0], sizes = [1, 32], strides = [1, 1]} : vector<9x32xf32> to vector<1x32xf32>
    %444 = vector.broadcast %443 : vector<1x32xf32> to vector<8x32xf32>
    %445 = arith.mulf %442, %444 : vector<8x32xf32>
    %446 = arith.addf %440, %445 : vector<8x32xf32>
    %c1_318 = arith.constant 1 : index
    %c4_319 = arith.constant 4 : index
    %c2_320 = arith.constant 2 : index
    %c0_321 = arith.constant 0 : index
    %447 = vector.load %arg11[%c1_318, %c4_319, %c2_320, %c0_321] : memref<2x10x10x32xf32, #tpu.memory_space<vmem>>, vector<1x1x8x32xf32>
    %448 = vector.shape_cast %447 : vector<1x1x8x32xf32> to vector<8x32xf32>
    %449 = vector.extract_strided_slice %82 {offsets = [8, 0], sizes = [1, 32], strides = [1, 1]} : vector<9x32xf32> to vector<1x32xf32>
    %450 = vector.broadcast %449 : vector<1x32xf32> to vector<8x32xf32>
    %451 = arith.mulf %448, %450 : vector<8x32xf32>
    %452 = arith.addf %446, %451 : vector<8x32xf32>
    %453 = vector.extract_strided_slice %452 {offsets = [0, 0], sizes = [1, 32], strides = [1, 1]} : vector<8x32xf32> to vector<1x32xf32>
    %c20 = arith.constant 20 : index
    %c0_322 = arith.constant 0 : index
    %454 = vector.load %arg12[%c20, %c0_322] : memref<32x32xf32, #tpu.memory_space<vmem>>, vector<1x32xf32>
    tpu.vector_store %arg12[%c20, %c0_322], %453 {strides = array<i32>} : memref<32x32xf32, #tpu.memory_space<vmem>>, vector<1x32xf32>,
    %455 = vector.extract_strided_slice %452 {offsets = [2, 0], sizes = [1, 32], strides = [1, 1]} : vector<8x32xf32> to vector<1x32xf32>
    %c21 = arith.constant 21 : index
    %c0_323 = arith.constant 0 : index
    %456 = vector.load %arg12[%c21, %c0_323] : memref<32x32xf32, #tpu.memory_space<vmem>>, vector<1x32xf32>
    tpu.vector_store %arg12[%c21, %c0_323], %455 {strides = array<i32>} : memref<32x32xf32, #tpu.memory_space<vmem>>, vector<1x32xf32>,
    %457 = vector.extract_strided_slice %452 {offsets = [4, 0], sizes = [1, 32], strides = [1, 1]} : vector<8x32xf32> to vector<1x32xf32>
    %c22 = arith.constant 22 : index
    %c0_324 = arith.constant 0 : index
    %458 = vector.load %arg12[%c22, %c0_324] : memref<32x32xf32, #tpu.memory_space<vmem>>, vector<1x32xf32>
    tpu.vector_store %arg12[%c22, %c0_324], %457 {strides = array<i32>} : memref<32x32xf32, #tpu.memory_space<vmem>>, vector<1x32xf32>,
    %459 = vector.extract_strided_slice %452 {offsets = [6, 0], sizes = [1, 32], strides = [1, 1]} : vector<8x32xf32> to vector<1x32xf32>
    %c23 = arith.constant 23 : index
    %c0_325 = arith.constant 0 : index
    %460 = vector.load %arg12[%c23, %c0_325] : memref<32x32xf32, #tpu.memory_space<vmem>>, vector<1x32xf32>
    tpu.vector_store %arg12[%c23, %c0_325], %459 {strides = array<i32>} : memref<32x32xf32, #tpu.memory_space<vmem>>, vector<1x32xf32>,
    %cst_326 = arith.constant 0.000000e+00 : f32
    %461 = vector.broadcast %cst_326 : f32 to vector<8x32xf32>
    %c1_327 = arith.constant 1 : index
    %c4_328 = arith.constant 4 : index
    %c0_329 = arith.constant 0 : index
    %c0_330 = arith.constant 0 : index
    %462 = vector.load %arg11[%c1_327, %c4_328, %c0_329, %c0_330] : memref<2x10x10x32xf32, #tpu.memory_space<vmem>>, vector<1x1x8x32xf32>
    %463 = vector.shape_cast %462 : vector<1x1x8x32xf32> to vector<8x32xf32>
    %464 = vector.extract_strided_slice %82 {offsets = [0, 0], sizes = [1, 32], strides = [1, 1]} : vector<9x32xf32> to vector<1x32xf32>
    %465 = vector.broadcast %464 : vector<1x32xf32> to vector<8x32xf32>
    %466 = arith.mulf %463, %465 : vector<8x32xf32>
    %467 = arith.addf %461, %466 : vector<8x32xf32>
    %c1_331 = arith.constant 1 : index
    %c4_332 = arith.constant 4 : index
    %c1_333 = arith.constant 1 : index
    %c0_334 = arith.constant 0 : index
    %468 = vector.load %arg11[%c1_331, %c4_332, %c1_333, %c0_334] : memref<2x10x10x32xf32, #tpu.memory_space<vmem>>, vector<1x1x8x32xf32>
    %469 = vector.shape_cast %468 : vector<1x1x8x32xf32> to vector<8x32xf32>
    %470 = vector.extract_strided_slice %82 {offsets = [1, 0], sizes = [1, 32], strides = [1, 1]} : vector<9x32xf32> to vector<1x32xf32>
    %471 = vector.broadcast %470 : vector<1x32xf32> to vector<8x32xf32>
    %472 = arith.mulf %469, %471 : vector<8x32xf32>
    %473 = arith.addf %467, %472 : vector<8x32xf32>
    %c1_335 = arith.constant 1 : index
    %c4_336 = arith.constant 4 : index
    %c2_337 = arith.constant 2 : index
    %c0_338 = arith.constant 0 : index
    %474 = vector.load %arg11[%c1_335, %c4_336, %c2_337, %c0_338] : memref<2x10x10x32xf32, #tpu.memory_space<vmem>>, vector<1x1x8x32xf32>
    %475 = vector.shape_cast %474 : vector<1x1x8x32xf32> to vector<8x32xf32>
    %476 = vector.extract_strided_slice %82 {offsets = [2, 0], sizes = [1, 32], strides = [1, 1]} : vector<9x32xf32> to vector<1x32xf32>
    %477 = vector.broadcast %476 : vector<1x32xf32> to vector<8x32xf32>
    %478 = arith.mulf %475, %477 : vector<8x32xf32>
    %479 = arith.addf %473, %478 : vector<8x32xf32>
    %c1_339 = arith.constant 1 : index
    %c5_340 = arith.constant 5 : index
    %c0_341 = arith.constant 0 : index
    %c0_342 = arith.constant 0 : index
    %480 = vector.load %arg11[%c1_339, %c5_340, %c0_341, %c0_342] : memref<2x10x10x32xf32, #tpu.memory_space<vmem>>, vector<1x1x8x32xf32>
    %481 = vector.shape_cast %480 : vector<1x1x8x32xf32> to vector<8x32xf32>
    %482 = vector.extract_strided_slice %82 {offsets = [3, 0], sizes = [1, 32], strides = [1, 1]} : vector<9x32xf32> to vector<1x32xf32>
    %483 = vector.broadcast %482 : vector<1x32xf32> to vector<8x32xf32>
    %484 = arith.mulf %481, %483 : vector<8x32xf32>
    %485 = arith.addf %479, %484 : vector<8x32xf32>
    %c1_343 = arith.constant 1 : index
    %c5_344 = arith.constant 5 : index
    %c1_345 = arith.constant 1 : index
    %c0_346 = arith.constant 0 : index
    %486 = vector.load %arg11[%c1_343, %c5_344, %c1_345, %c0_346] : memref<2x10x10x32xf32, #tpu.memory_space<vmem>>, vector<1x1x8x32xf32>
    %487 = vector.shape_cast %486 : vector<1x1x8x32xf32> to vector<8x32xf32>
    %488 = vector.extract_strided_slice %82 {offsets = [4, 0], sizes = [1, 32], strides = [1, 1]} : vector<9x32xf32> to vector<1x32xf32>
    %489 = vector.broadcast %488 : vector<1x32xf32> to vector<8x32xf32>
    %490 = arith.mulf %487, %489 : vector<8x32xf32>
    %491 = arith.addf %485, %490 : vector<8x32xf32>
    %c1_347 = arith.constant 1 : index
    %c5_348 = arith.constant 5 : index
    %c2_349 = arith.constant 2 : index
    %c0_350 = arith.constant 0 : index
    %492 = vector.load %arg11[%c1_347, %c5_348, %c2_349, %c0_350] : memref<2x10x10x32xf32, #tpu.memory_space<vmem>>, vector<1x1x8x32xf32>
    %493 = vector.shape_cast %492 : vector<1x1x8x32xf32> to vector<8x32xf32>
    %494 = vector.extract_strided_slice %82 {offsets = [5, 0], sizes = [1, 32], strides = [1, 1]} : vector<9x32xf32> to vector<1x32xf32>
    %495 = vector.broadcast %494 : vector<1x32xf32> to vector<8x32xf32>
    %496 = arith.mulf %493, %495 : vector<8x32xf32>
    %497 = arith.addf %491, %496 : vector<8x32xf32>
    %c1_351 = arith.constant 1 : index
    %c6_352 = arith.constant 6 : index
    %c0_353 = arith.constant 0 : index
    %c0_354 = arith.constant 0 : index
    %498 = vector.load %arg11[%c1_351, %c6_352, %c0_353, %c0_354] : memref<2x10x10x32xf32, #tpu.memory_space<vmem>>, vector<1x1x8x32xf32>
    %499 = vector.shape_cast %498 : vector<1x1x8x32xf32> to vector<8x32xf32>
    %500 = vector.extract_strided_slice %82 {offsets = [6, 0], sizes = [1, 32], strides = [1, 1]} : vector<9x32xf32> to vector<1x32xf32>
    %501 = vector.broadcast %500 : vector<1x32xf32> to vector<8x32xf32>
    %502 = arith.mulf %499, %501 : vector<8x32xf32>
    %503 = arith.addf %497, %502 : vector<8x32xf32>
    %c1_355 = arith.constant 1 : index
    %c6_356 = arith.constant 6 : index
    %c1_357 = arith.constant 1 : index
    %c0_358 = arith.constant 0 : index
    %504 = vector.load %arg11[%c1_355, %c6_356, %c1_357, %c0_358] : memref<2x10x10x32xf32, #tpu.memory_space<vmem>>, vector<1x1x8x32xf32>
    %505 = vector.shape_cast %504 : vector<1x1x8x32xf32> to vector<8x32xf32>
    %506 = vector.extract_strided_slice %82 {offsets = [7, 0], sizes = [1, 32], strides = [1, 1]} : vector<9x32xf32> to vector<1x32xf32>
    %507 = vector.broadcast %506 : vector<1x32xf32> to vector<8x32xf32>
    %508 = arith.mulf %505, %507 : vector<8x32xf32>
    %509 = arith.addf %503, %508 : vector<8x32xf32>
    %c1_359 = arith.constant 1 : index
    %c6_360 = arith.constant 6 : index
    %c2_361 = arith.constant 2 : index
    %c0_362 = arith.constant 0 : index
    %510 = vector.load %arg11[%c1_359, %c6_360, %c2_361, %c0_362] : memref<2x10x10x32xf32, #tpu.memory_space<vmem>>, vector<1x1x8x32xf32>
    %511 = vector.shape_cast %510 : vector<1x1x8x32xf32> to vector<8x32xf32>
    %512 = vector.extract_strided_slice %82 {offsets = [8, 0], sizes = [1, 32], strides = [1, 1]} : vector<9x32xf32> to vector<1x32xf32>
    %513 = vector.broadcast %512 : vector<1x32xf32> to vector<8x32xf32>
    %514 = arith.mulf %511, %513 : vector<8x32xf32>
    %515 = arith.addf %509, %514 : vector<8x32xf32>
    %516 = vector.extract_strided_slice %515 {offsets = [0, 0], sizes = [1, 32], strides = [1, 1]} : vector<8x32xf32> to vector<1x32xf32>
    %c24 = arith.constant 24 : index
    %c0_363 = arith.constant 0 : index
    %517 = vector.load %arg12[%c24, %c0_363] : memref<32x32xf32, #tpu.memory_space<vmem>>, vector<1x32xf32>
    tpu.vector_store %arg12[%c24, %c0_363], %516 {strides = array<i32>} : memref<32x32xf32, #tpu.memory_space<vmem>>, vector<1x32xf32>,
    %518 = vector.extract_strided_slice %515 {offsets = [2, 0], sizes = [1, 32], strides = [1, 1]} : vector<8x32xf32> to vector<1x32xf32>
    %c25 = arith.constant 25 : index
    %c0_364 = arith.constant 0 : index
    %519 = vector.load %arg12[%c25, %c0_364] : memref<32x32xf32, #tpu.memory_space<vmem>>, vector<1x32xf32>
    tpu.vector_store %arg12[%c25, %c0_364], %518 {strides = array<i32>} : memref<32x32xf32, #tpu.memory_space<vmem>>, vector<1x32xf32>,
    %520 = vector.extract_strided_slice %515 {offsets = [4, 0], sizes = [1, 32], strides = [1, 1]} : vector<8x32xf32> to vector<1x32xf32>
    %c26 = arith.constant 26 : index
    %c0_365 = arith.constant 0 : index
    %521 = vector.load %arg12[%c26, %c0_365] : memref<32x32xf32, #tpu.memory_space<vmem>>, vector<1x32xf32>
    tpu.vector_store %arg12[%c26, %c0_365], %520 {strides = array<i32>} : memref<32x32xf32, #tpu.memory_space<vmem>>, vector<1x32xf32>,
    %522 = vector.extract_strided_slice %515 {offsets = [6, 0], sizes = [1, 32], strides = [1, 1]} : vector<8x32xf32> to vector<1x32xf32>
    %c27 = arith.constant 27 : index
    %c0_366 = arith.constant 0 : index
    %523 = vector.load %arg12[%c27, %c0_366] : memref<32x32xf32, #tpu.memory_space<vmem>>, vector<1x32xf32>
    tpu.vector_store %arg12[%c27, %c0_366], %522 {strides = array<i32>} : memref<32x32xf32, #tpu.memory_space<vmem>>, vector<1x32xf32>,
    %cst_367 = arith.constant 0.000000e+00 : f32
    %524 = vector.broadcast %cst_367 : f32 to vector<8x32xf32>
    %c1_368 = arith.constant 1 : index
    %c6_369 = arith.constant 6 : index
    %c0_370 = arith.constant 0 : index
    %c0_371 = arith.constant 0 : index
    %525 = vector.load %arg11[%c1_368, %c6_369, %c0_370, %c0_371] : memref<2x10x10x32xf32, #tpu.memory_space<vmem>>, vector<1x1x8x32xf32>
    %526 = vector.shape_cast %525 : vector<1x1x8x32xf32> to vector<8x32xf32>
    %527 = vector.extract_strided_slice %82 {offsets = [0, 0], sizes = [1, 32], strides = [1, 1]} : vector<9x32xf32> to vector<1x32xf32>
    %528 = vector.broadcast %527 : vector<1x32xf32> to vector<8x32xf32>
    %529 = arith.mulf %526, %528 : vector<8x32xf32>
    %530 = arith.addf %524, %529 : vector<8x32xf32>
    %c1_372 = arith.constant 1 : index
    %c6_373 = arith.constant 6 : index
    %c1_374 = arith.constant 1 : index
    %c0_375 = arith.constant 0 : index
    %531 = vector.load %arg11[%c1_372, %c6_373, %c1_374, %c0_375] : memref<2x10x10x32xf32, #tpu.memory_space<vmem>>, vector<1x1x8x32xf32>
    %532 = vector.shape_cast %531 : vector<1x1x8x32xf32> to vector<8x32xf32>
    %533 = vector.extract_strided_slice %82 {offsets = [1, 0], sizes = [1, 32], strides = [1, 1]} : vector<9x32xf32> to vector<1x32xf32>
    %534 = vector.broadcast %533 : vector<1x32xf32> to vector<8x32xf32>
    %535 = arith.mulf %532, %534 : vector<8x32xf32>
    %536 = arith.addf %530, %535 : vector<8x32xf32>
    %c1_376 = arith.constant 1 : index
    %c6_377 = arith.constant 6 : index
    %c2_378 = arith.constant 2 : index
    %c0_379 = arith.constant 0 : index
    %537 = vector.load %arg11[%c1_376, %c6_377, %c2_378, %c0_379] : memref<2x10x10x32xf32, #tpu.memory_space<vmem>>, vector<1x1x8x32xf32>
    %538 = vector.shape_cast %537 : vector<1x1x8x32xf32> to vector<8x32xf32>
    %539 = vector.extract_strided_slice %82 {offsets = [2, 0], sizes = [1, 32], strides = [1, 1]} : vector<9x32xf32> to vector<1x32xf32>
    %540 = vector.broadcast %539 : vector<1x32xf32> to vector<8x32xf32>
    %541 = arith.mulf %538, %540 : vector<8x32xf32>
    %542 = arith.addf %536, %541 : vector<8x32xf32>
    %c1_380 = arith.constant 1 : index
    %c7_381 = arith.constant 7 : index
    %c0_382 = arith.constant 0 : index
    %c0_383 = arith.constant 0 : index
    %543 = vector.load %arg11[%c1_380, %c7_381, %c0_382, %c0_383] : memref<2x10x10x32xf32, #tpu.memory_space<vmem>>, vector<1x1x8x32xf32>
    %544 = vector.shape_cast %543 : vector<1x1x8x32xf32> to vector<8x32xf32>
    %545 = vector.extract_strided_slice %82 {offsets = [3, 0], sizes = [1, 32], strides = [1, 1]} : vector<9x32xf32> to vector<1x32xf32>
    %546 = vector.broadcast %545 : vector<1x32xf32> to vector<8x32xf32>
    %547 = arith.mulf %544, %546 : vector<8x32xf32>
    %548 = arith.addf %542, %547 : vector<8x32xf32>
    %c1_384 = arith.constant 1 : index
    %c7_385 = arith.constant 7 : index
    %c1_386 = arith.constant 1 : index
    %c0_387 = arith.constant 0 : index
    %549 = vector.load %arg11[%c1_384, %c7_385, %c1_386, %c0_387] : memref<2x10x10x32xf32, #tpu.memory_space<vmem>>, vector<1x1x8x32xf32>
    %550 = vector.shape_cast %549 : vector<1x1x8x32xf32> to vector<8x32xf32>
    %551 = vector.extract_strided_slice %82 {offsets = [4, 0], sizes = [1, 32], strides = [1, 1]} : vector<9x32xf32> to vector<1x32xf32>
    %552 = vector.broadcast %551 : vector<1x32xf32> to vector<8x32xf32>
    %553 = arith.mulf %550, %552 : vector<8x32xf32>
    %554 = arith.addf %548, %553 : vector<8x32xf32>
    %c1_388 = arith.constant 1 : index
    %c7_389 = arith.constant 7 : index
    %c2_390 = arith.constant 2 : index
    %c0_391 = arith.constant 0 : index
    %555 = vector.load %arg11[%c1_388, %c7_389, %c2_390, %c0_391] : memref<2x10x10x32xf32, #tpu.memory_space<vmem>>, vector<1x1x8x32xf32>
    %556 = vector.shape_cast %555 : vector<1x1x8x32xf32> to vector<8x32xf32>
    %557 = vector.extract_strided_slice %82 {offsets = [5, 0], sizes = [1, 32], strides = [1, 1]} : vector<9x32xf32> to vector<1x32xf32>
    %558 = vector.broadcast %557 : vector<1x32xf32> to vector<8x32xf32>
    %559 = arith.mulf %556, %558 : vector<8x32xf32>
    %560 = arith.addf %554, %559 : vector<8x32xf32>
    %c1_392 = arith.constant 1 : index
    %c8_393 = arith.constant 8 : index
    %c0_394 = arith.constant 0 : index
    %c0_395 = arith.constant 0 : index
    %561 = vector.load %arg11[%c1_392, %c8_393, %c0_394, %c0_395] : memref<2x10x10x32xf32, #tpu.memory_space<vmem>>, vector<1x1x8x32xf32>
    %562 = vector.shape_cast %561 : vector<1x1x8x32xf32> to vector<8x32xf32>
    %563 = vector.extract_strided_slice %82 {offsets = [6, 0], sizes = [1, 32], strides = [1, 1]} : vector<9x32xf32> to vector<1x32xf32>
    %564 = vector.broadcast %563 : vector<1x32xf32> to vector<8x32xf32>
    %565 = arith.mulf %562, %564 : vector<8x32xf32>
    %566 = arith.addf %560, %565 : vector<8x32xf32>
    %c1_396 = arith.constant 1 : index
    %c8_397 = arith.constant 8 : index
    %c1_398 = arith.constant 1 : index
    %c0_399 = arith.constant 0 : index
    %567 = vector.load %arg11[%c1_396, %c8_397, %c1_398, %c0_399] : memref<2x10x10x32xf32, #tpu.memory_space<vmem>>, vector<1x1x8x32xf32>
    %568 = vector.shape_cast %567 : vector<1x1x8x32xf32> to vector<8x32xf32>
    %569 = vector.extract_strided_slice %82 {offsets = [7, 0], sizes = [1, 32], strides = [1, 1]} : vector<9x32xf32> to vector<1x32xf32>
    %570 = vector.broadcast %569 : vector<1x32xf32> to vector<8x32xf32>
    %571 = arith.mulf %568, %570 : vector<8x32xf32>
    %572 = arith.addf %566, %571 : vector<8x32xf32>
    %c1_400 = arith.constant 1 : index
    %c8_401 = arith.constant 8 : index
    %c2_402 = arith.constant 2 : index
    %c0_403 = arith.constant 0 : index
    %573 = vector.load %arg11[%c1_400, %c8_401, %c2_402, %c0_403] : memref<2x10x10x32xf32, #tpu.memory_space<vmem>>, vector<1x1x8x32xf32>
    %574 = vector.shape_cast %573 : vector<1x1x8x32xf32> to vector<8x32xf32>
    %575 = vector.extract_strided_slice %82 {offsets = [8, 0], sizes = [1, 32], strides = [1, 1]} : vector<9x32xf32> to vector<1x32xf32>
    %576 = vector.broadcast %575 : vector<1x32xf32> to vector<8x32xf32>
    %577 = arith.mulf %574, %576 : vector<8x32xf32>
    %578 = arith.addf %572, %577 : vector<8x32xf32>
    %579 = vector.extract_strided_slice %578 {offsets = [0, 0], sizes = [1, 32], strides = [1, 1]} : vector<8x32xf32> to vector<1x32xf32>
    %c28 = arith.constant 28 : index
    %c0_404 = arith.constant 0 : index
    %580 = vector.load %arg12[%c28, %c0_404] : memref<32x32xf32, #tpu.memory_space<vmem>>, vector<1x32xf32>
    tpu.vector_store %arg12[%c28, %c0_404], %579 {strides = array<i32>} : memref<32x32xf32, #tpu.memory_space<vmem>>, vector<1x32xf32>,
    %581 = vector.extract_strided_slice %578 {offsets = [2, 0], sizes = [1, 32], strides = [1, 1]} : vector<8x32xf32> to vector<1x32xf32>
    %c29 = arith.constant 29 : index
    %c0_405 = arith.constant 0 : index
    %582 = vector.load %arg12[%c29, %c0_405] : memref<32x32xf32, #tpu.memory_space<vmem>>, vector<1x32xf32>
    tpu.vector_store %arg12[%c29, %c0_405], %581 {strides = array<i32>} : memref<32x32xf32, #tpu.memory_space<vmem>>, vector<1x32xf32>,
    %583 = vector.extract_strided_slice %578 {offsets = [4, 0], sizes = [1, 32], strides = [1, 1]} : vector<8x32xf32> to vector<1x32xf32>
    %c30 = arith.constant 30 : index
    %c0_406 = arith.constant 0 : index
    %584 = vector.load %arg12[%c30, %c0_406] : memref<32x32xf32, #tpu.memory_space<vmem>>, vector<1x32xf32>
    tpu.vector_store %arg12[%c30, %c0_406], %583 {strides = array<i32>} : memref<32x32xf32, #tpu.memory_space<vmem>>, vector<1x32xf32>,
    %585 = vector.extract_strided_slice %578 {offsets = [6, 0], sizes = [1, 32], strides = [1, 1]} : vector<8x32xf32> to vector<1x32xf32>
    %c31 = arith.constant 31 : index
    %c0_407 = arith.constant 0 : index
    %586 = vector.load %arg12[%c31, %c0_407] : memref<32x32xf32, #tpu.memory_space<vmem>>, vector<1x32xf32>
    tpu.vector_store %arg12[%c31, %c0_407], %585 {strides = array<i32>} : memref<32x32xf32, #tpu.memory_space<vmem>>, vector<1x32xf32>,
    %c0_408 = arith.constant 0 : index
    %c0_409 = arith.constant 0 : index
    %587 = vector.load %arg12[%c0_408, %c0_409] : memref<32x32xf32, #tpu.memory_space<vmem>>, vector<32x32xf32>
    %c0_410 = arith.constant 0 : index
    %c0_411 = arith.constant 0 : index
    %588 = vector.load %arg5[%c0_410, %c0_411] : memref<1x32xf32, #tpu.memory_space<vmem>>, vector<1x32xf32>
    %589 = vector.broadcast %588 : vector<1x32xf32> to vector<32x32xf32>
    %590 = arith.mulf %587, %589 : vector<32x32xf32>
    %c0_412 = arith.constant 0 : index
    %c0_413 = arith.constant 0 : index
    %591 = vector.load %arg6[%c0_412, %c0_413] : memref<1x32xf32, #tpu.memory_space<vmem>>, vector<1x32xf32>
    %592 = vector.broadcast %591 : vector<1x32xf32> to vector<32x32xf32>
    %593 = arith.addf %590, %592 : vector<32x32xf32>
    %594 = arith.negf %593 : vector<32x32xf32>
    %595 = math.exp %594 : vector<32x32xf32>
    %cst_414 = arith.constant 1.000000e+00 : f32
    %596 = vector.broadcast %cst_414 : f32 to vector<32x32xf32>
    %597 = arith.addf %596, %595 : vector<32x32xf32>
    %598 = arith.divf %596, %597 : vector<32x32xf32>
    %599 = arith.mulf %593, %598 : vector<32x32xf32>
    %600 = arith.truncf %599 : vector<32x32xf32> to vector<32x32xbf16>
    %c0_415 = arith.constant 0 : index
    %c0_416 = arith.constant 0 : index
    %601 = vector.load %arg7[%c0_415, %c0_416] : memref<32x24xbf16, #tpu.memory_space<vmem>>, vector<32x24xbf16>
    %cst_417 = arith.constant dense<0.000000e+00> : vector<32x24xf32>
    %602 = tpu.matmul %600, %601, %cst_417 {dimension_numbers = #tpu.dot_dimension_numbers<[1], [0], [0], [1], [0, 0, 1, 1], [], []>} : vector<32x32xbf16>, vector<32x24xbf16>, vector<32x24xf32> -> vector<32x24xf32>
    %c0_418 = arith.constant 0 : index
    %c0_419 = arith.constant 0 : index
    %603 = vector.load %arg8[%c0_418, %c0_419] : memref<1x24xf32, #tpu.memory_space<vmem>>, vector<1x24xf32>
    %604 = vector.broadcast %603 : vector<1x24xf32> to vector<32x24xf32>
    %605 = arith.mulf %602, %604 : vector<32x24xf32>
    %c0_420 = arith.constant 0 : index
    %c0_421 = arith.constant 0 : index
    %606 = vector.load %arg9[%c0_420, %c0_421] : memref<1x24xf32, #tpu.memory_space<vmem>>, vector<1x24xf32>
    %607 = vector.broadcast %606 : vector<1x24xf32> to vector<32x24xf32>
    %608 = arith.addf %605, %607 : vector<32x24xf32>
    %c0_422 = arith.constant 0 : index
    %c0_423 = arith.constant 0 : index
    %609 = vector.load %arg10[%c0_422, %c0_423] : memref<32x24xf32, #tpu.memory_space<vmem>>, vector<32x24xf32>
    tpu.vector_store %arg10[%c0_422, %c0_423], %608 {strides = array<i32>} : memref<32x24xf32, #tpu.memory_space<vmem>>, vector<32x24xf32>,
    return
  }
}

module attributes {stable_mosaic.version = 11 : i64} {
  func.func @_mbconv_kernel(%arg0: memref<32x24xf32, #tpu.memory_space<vmem>>, %arg1: memref<24x48xbf16, #tpu.memory_space<vmem>>, %arg2: memref<1x48xf32, #tpu.memory_space<vmem>>, %arg3: memref<1x48xf32, #tpu.memory_space<vmem>>, %arg4: memref<9x48xf32, #tpu.memory_space<vmem>>, %arg5: memref<1x48xf32, #tpu.memory_space<vmem>>, %arg6: memref<1x48xf32, #tpu.memory_space<vmem>>, %arg7: memref<48x32xbf16, #tpu.memory_space<vmem>>, %arg8: memref<1x32xf32, #tpu.memory_space<vmem>>, %arg9: memref<1x32xf32, #tpu.memory_space<vmem>>, %arg10: memref<8x32xf32, #tpu.memory_space<vmem>>, %arg11: memref<2x6x6x48xf32, #tpu.memory_space<vmem>>, %arg12: memref<8x48xf32, #tpu.memory_space<vmem>>) attributes {dimension_semantics = [], scalar_prefetch = 0 : i64, scratch_operands = 2 : i64, tpu.core_type = #tpu.core_type<tc>} {
    %c0 = arith.constant 0 : index
    %c0_0 = arith.constant 0 : index
    %0 = vector.load %arg0[%c0, %c0_0] : memref<32x24xf32, #tpu.memory_space<vmem>>, vector<32x24xf32>
    %1 = arith.truncf %0 : vector<32x24xf32> to vector<32x24xbf16>
    %c0_1 = arith.constant 0 : index
    %c0_2 = arith.constant 0 : index
    %2 = vector.load %arg1[%c0_1, %c0_2] : memref<24x48xbf16, #tpu.memory_space<vmem>>, vector<24x48xbf16>
    %cst = arith.constant dense<0.000000e+00> : vector<32x48xf32>
    %3 = tpu.matmul %1, %2, %cst {dimension_numbers = #tpu.dot_dimension_numbers<[1], [0], [0], [1], [0, 0, 1, 1], [], []>} : vector<32x24xbf16>, vector<24x48xbf16>, vector<32x48xf32> -> vector<32x48xf32>
    %c0_3 = arith.constant 0 : index
    %c0_4 = arith.constant 0 : index
    %4 = vector.load %arg2[%c0_3, %c0_4] : memref<1x48xf32, #tpu.memory_space<vmem>>, vector<1x48xf32>
    %5 = vector.broadcast %4 : vector<1x48xf32> to vector<32x48xf32>
    %6 = arith.mulf %3, %5 : vector<32x48xf32>
    %c0_5 = arith.constant 0 : index
    %c0_6 = arith.constant 0 : index
    %7 = vector.load %arg3[%c0_5, %c0_6] : memref<1x48xf32, #tpu.memory_space<vmem>>, vector<1x48xf32>
    %8 = vector.broadcast %7 : vector<1x48xf32> to vector<32x48xf32>
    %9 = arith.addf %6, %8 : vector<32x48xf32>
    %10 = arith.negf %9 : vector<32x48xf32>
    %11 = math.exp %10 : vector<32x48xf32>
    %cst_7 = arith.constant 1.000000e+00 : f32
    %12 = vector.broadcast %cst_7 : f32 to vector<32x48xf32>
    %13 = arith.addf %12, %11 : vector<32x48xf32>
    %14 = arith.divf %12, %13 : vector<32x48xf32>
    %15 = arith.mulf %9, %14 : vector<32x48xf32>
    %cst_8 = arith.constant 0.000000e+00 : f32
    %16 = vector.broadcast %cst_8 : f32 to vector<2x6x6x48xf32>
    %c0_9 = arith.constant 0 : index
    %c0_10 = arith.constant 0 : index
    %c0_11 = arith.constant 0 : index
    %c0_12 = arith.constant 0 : index
    %17 = vector.load %arg11[%c0_9, %c0_10, %c0_11, %c0_12] : memref<2x6x6x48xf32, #tpu.memory_space<vmem>>, vector<2x6x6x48xf32>
    tpu.vector_store %arg11[%c0_9, %c0_10, %c0_11, %c0_12], %16 {strides = array<i32>} : memref<2x6x6x48xf32, #tpu.memory_space<vmem>>, vector<2x6x6x48xf32>,
    %18 = vector.extract_strided_slice %15 {offsets = [0, 0], sizes = [4, 48], strides = [1, 1]} : vector<32x48xf32> to vector<4x48xf32>
    %c0_13 = arith.constant 0 : index
    %c1 = arith.constant 1 : index
    %c1_14 = arith.constant 1 : index
    %c0_15 = arith.constant 0 : index
    %19 = vector.load %arg11[%c0_13, %c1, %c1_14, %c0_15] : memref<2x6x6x48xf32, #tpu.memory_space<vmem>>, vector<1x1x4x48xf32>
    %20 = vector.shape_cast %19 : vector<1x1x4x48xf32> to vector<4x48xf32>
    %21 = vector.shape_cast %18 : vector<4x48xf32> to vector<1x1x4x48xf32>
    tpu.vector_store %arg11[%c0_13, %c1, %c1_14, %c0_15], %21 {strides = array<i32>} : memref<2x6x6x48xf32, #tpu.memory_space<vmem>>, vector<1x1x4x48xf32>,
    %22 = vector.extract_strided_slice %15 {offsets = [4, 0], sizes = [4, 48], strides = [1, 1]} : vector<32x48xf32> to vector<4x48xf32>
    %c0_16 = arith.constant 0 : index
    %c2 = arith.constant 2 : index
    %c1_17 = arith.constant 1 : index
    %c0_18 = arith.constant 0 : index
    %23 = vector.load %arg11[%c0_16, %c2, %c1_17, %c0_18] : memref<2x6x6x48xf32, #tpu.memory_space<vmem>>, vector<1x1x4x48xf32>
    %24 = vector.shape_cast %23 : vector<1x1x4x48xf32> to vector<4x48xf32>
    %25 = vector.shape_cast %22 : vector<4x48xf32> to vector<1x1x4x48xf32>
    tpu.vector_store %arg11[%c0_16, %c2, %c1_17, %c0_18], %25 {strides = array<i32>} : memref<2x6x6x48xf32, #tpu.memory_space<vmem>>, vector<1x1x4x48xf32>,
    %26 = vector.extract_strided_slice %15 {offsets = [8, 0], sizes = [4, 48], strides = [1, 1]} : vector<32x48xf32> to vector<4x48xf32>
    %c0_19 = arith.constant 0 : index
    %c3 = arith.constant 3 : index
    %c1_20 = arith.constant 1 : index
    %c0_21 = arith.constant 0 : index
    %27 = vector.load %arg11[%c0_19, %c3, %c1_20, %c0_21] : memref<2x6x6x48xf32, #tpu.memory_space<vmem>>, vector<1x1x4x48xf32>
    %28 = vector.shape_cast %27 : vector<1x1x4x48xf32> to vector<4x48xf32>
    %29 = vector.shape_cast %26 : vector<4x48xf32> to vector<1x1x4x48xf32>
    tpu.vector_store %arg11[%c0_19, %c3, %c1_20, %c0_21], %29 {strides = array<i32>} : memref<2x6x6x48xf32, #tpu.memory_space<vmem>>, vector<1x1x4x48xf32>,
    %30 = vector.extract_strided_slice %15 {offsets = [12, 0], sizes = [4, 48], strides = [1, 1]} : vector<32x48xf32> to vector<4x48xf32>
    %c0_22 = arith.constant 0 : index
    %c4 = arith.constant 4 : index
    %c1_23 = arith.constant 1 : index
    %c0_24 = arith.constant 0 : index
    %31 = vector.load %arg11[%c0_22, %c4, %c1_23, %c0_24] : memref<2x6x6x48xf32, #tpu.memory_space<vmem>>, vector<1x1x4x48xf32>
    %32 = vector.shape_cast %31 : vector<1x1x4x48xf32> to vector<4x48xf32>
    %33 = vector.shape_cast %30 : vector<4x48xf32> to vector<1x1x4x48xf32>
    tpu.vector_store %arg11[%c0_22, %c4, %c1_23, %c0_24], %33 {strides = array<i32>} : memref<2x6x6x48xf32, #tpu.memory_space<vmem>>, vector<1x1x4x48xf32>,
    %34 = vector.extract_strided_slice %15 {offsets = [16, 0], sizes = [4, 48], strides = [1, 1]} : vector<32x48xf32> to vector<4x48xf32>
    %c1_25 = arith.constant 1 : index
    %c1_26 = arith.constant 1 : index
    %c1_27 = arith.constant 1 : index
    %c0_28 = arith.constant 0 : index
    %35 = vector.load %arg11[%c1_25, %c1_26, %c1_27, %c0_28] : memref<2x6x6x48xf32, #tpu.memory_space<vmem>>, vector<1x1x4x48xf32>
    %36 = vector.shape_cast %35 : vector<1x1x4x48xf32> to vector<4x48xf32>
    %37 = vector.shape_cast %34 : vector<4x48xf32> to vector<1x1x4x48xf32>
    tpu.vector_store %arg11[%c1_25, %c1_26, %c1_27, %c0_28], %37 {strides = array<i32>} : memref<2x6x6x48xf32, #tpu.memory_space<vmem>>, vector<1x1x4x48xf32>,
    %38 = vector.extract_strided_slice %15 {offsets = [20, 0], sizes = [4, 48], strides = [1, 1]} : vector<32x48xf32> to vector<4x48xf32>
    %c1_29 = arith.constant 1 : index
    %c2_30 = arith.constant 2 : index
    %c1_31 = arith.constant 1 : index
    %c0_32 = arith.constant 0 : index
    %39 = vector.load %arg11[%c1_29, %c2_30, %c1_31, %c0_32] : memref<2x6x6x48xf32, #tpu.memory_space<vmem>>, vector<1x1x4x48xf32>
    %40 = vector.shape_cast %39 : vector<1x1x4x48xf32> to vector<4x48xf32>
    %41 = vector.shape_cast %38 : vector<4x48xf32> to vector<1x1x4x48xf32>
    tpu.vector_store %arg11[%c1_29, %c2_30, %c1_31, %c0_32], %41 {strides = array<i32>} : memref<2x6x6x48xf32, #tpu.memory_space<vmem>>, vector<1x1x4x48xf32>,
    %42 = vector.extract_strided_slice %15 {offsets = [24, 0], sizes = [4, 48], strides = [1, 1]} : vector<32x48xf32> to vector<4x48xf32>
    %c1_33 = arith.constant 1 : index
    %c3_34 = arith.constant 3 : index
    %c1_35 = arith.constant 1 : index
    %c0_36 = arith.constant 0 : index
    %43 = vector.load %arg11[%c1_33, %c3_34, %c1_35, %c0_36] : memref<2x6x6x48xf32, #tpu.memory_space<vmem>>, vector<1x1x4x48xf32>
    %44 = vector.shape_cast %43 : vector<1x1x4x48xf32> to vector<4x48xf32>
    %45 = vector.shape_cast %42 : vector<4x48xf32> to vector<1x1x4x48xf32>
    tpu.vector_store %arg11[%c1_33, %c3_34, %c1_35, %c0_36], %45 {strides = array<i32>} : memref<2x6x6x48xf32, #tpu.memory_space<vmem>>, vector<1x1x4x48xf32>,
    %46 = vector.extract_strided_slice %15 {offsets = [28, 0], sizes = [4, 48], strides = [1, 1]} : vector<32x48xf32> to vector<4x48xf32>
    %c1_37 = arith.constant 1 : index
    %c4_38 = arith.constant 4 : index
    %c1_39 = arith.constant 1 : index
    %c0_40 = arith.constant 0 : index
    %47 = vector.load %arg11[%c1_37, %c4_38, %c1_39, %c0_40] : memref<2x6x6x48xf32, #tpu.memory_space<vmem>>, vector<1x1x4x48xf32>
    %48 = vector.shape_cast %47 : vector<1x1x4x48xf32> to vector<4x48xf32>
    %49 = vector.shape_cast %46 : vector<4x48xf32> to vector<1x1x4x48xf32>
    tpu.vector_store %arg11[%c1_37, %c4_38, %c1_39, %c0_40], %49 {strides = array<i32>} : memref<2x6x6x48xf32, #tpu.memory_space<vmem>>, vector<1x1x4x48xf32>,
    %c0_41 = arith.constant 0 : index
    %c0_42 = arith.constant 0 : index
    %50 = vector.load %arg4[%c0_41, %c0_42] : memref<9x48xf32, #tpu.memory_space<vmem>>, vector<9x48xf32>
    %cst_43 = arith.constant 0.000000e+00 : f32
    %51 = vector.broadcast %cst_43 : f32 to vector<4x48xf32>
    %c0_44 = arith.constant 0 : index
    %c0_45 = arith.constant 0 : index
    %c0_46 = arith.constant 0 : index
    %c0_47 = arith.constant 0 : index
    %52 = vector.load %arg11[%c0_44, %c0_45, %c0_46, %c0_47] : memref<2x6x6x48xf32, #tpu.memory_space<vmem>>, vector<1x1x4x48xf32>
    %53 = vector.shape_cast %52 : vector<1x1x4x48xf32> to vector<4x48xf32>
    %54 = vector.extract_strided_slice %50 {offsets = [0, 0], sizes = [1, 48], strides = [1, 1]} : vector<9x48xf32> to vector<1x48xf32>
    %55 = vector.broadcast %54 : vector<1x48xf32> to vector<4x48xf32>
    %56 = arith.mulf %53, %55 : vector<4x48xf32>
    %57 = arith.addf %51, %56 : vector<4x48xf32>
    %c0_48 = arith.constant 0 : index
    %c0_49 = arith.constant 0 : index
    %c1_50 = arith.constant 1 : index
    %c0_51 = arith.constant 0 : index
    %58 = vector.load %arg11[%c0_48, %c0_49, %c1_50, %c0_51] : memref<2x6x6x48xf32, #tpu.memory_space<vmem>>, vector<1x1x4x48xf32>
    %59 = vector.shape_cast %58 : vector<1x1x4x48xf32> to vector<4x48xf32>
    %60 = vector.extract_strided_slice %50 {offsets = [1, 0], sizes = [1, 48], strides = [1, 1]} : vector<9x48xf32> to vector<1x48xf32>
    %61 = vector.broadcast %60 : vector<1x48xf32> to vector<4x48xf32>
    %62 = arith.mulf %59, %61 : vector<4x48xf32>
    %63 = arith.addf %57, %62 : vector<4x48xf32>
    %c0_52 = arith.constant 0 : index
    %c0_53 = arith.constant 0 : index
    %c2_54 = arith.constant 2 : index
    %c0_55 = arith.constant 0 : index
    %64 = vector.load %arg11[%c0_52, %c0_53, %c2_54, %c0_55] : memref<2x6x6x48xf32, #tpu.memory_space<vmem>>, vector<1x1x4x48xf32>
    %65 = vector.shape_cast %64 : vector<1x1x4x48xf32> to vector<4x48xf32>
    %66 = vector.extract_strided_slice %50 {offsets = [2, 0], sizes = [1, 48], strides = [1, 1]} : vector<9x48xf32> to vector<1x48xf32>
    %67 = vector.broadcast %66 : vector<1x48xf32> to vector<4x48xf32>
    %68 = arith.mulf %65, %67 : vector<4x48xf32>
    %69 = arith.addf %63, %68 : vector<4x48xf32>
    %c0_56 = arith.constant 0 : index
    %c1_57 = arith.constant 1 : index
    %c0_58 = arith.constant 0 : index
    %c0_59 = arith.constant 0 : index
    %70 = vector.load %arg11[%c0_56, %c1_57, %c0_58, %c0_59] : memref<2x6x6x48xf32, #tpu.memory_space<vmem>>, vector<1x1x4x48xf32>
    %71 = vector.shape_cast %70 : vector<1x1x4x48xf32> to vector<4x48xf32>
    %72 = vector.extract_strided_slice %50 {offsets = [3, 0], sizes = [1, 48], strides = [1, 1]} : vector<9x48xf32> to vector<1x48xf32>
    %73 = vector.broadcast %72 : vector<1x48xf32> to vector<4x48xf32>
    %74 = arith.mulf %71, %73 : vector<4x48xf32>
    %75 = arith.addf %69, %74 : vector<4x48xf32>
    %c0_60 = arith.constant 0 : index
    %c1_61 = arith.constant 1 : index
    %c1_62 = arith.constant 1 : index
    %c0_63 = arith.constant 0 : index
    %76 = vector.load %arg11[%c0_60, %c1_61, %c1_62, %c0_63] : memref<2x6x6x48xf32, #tpu.memory_space<vmem>>, vector<1x1x4x48xf32>
    %77 = vector.shape_cast %76 : vector<1x1x4x48xf32> to vector<4x48xf32>
    %78 = vector.extract_strided_slice %50 {offsets = [4, 0], sizes = [1, 48], strides = [1, 1]} : vector<9x48xf32> to vector<1x48xf32>
    %79 = vector.broadcast %78 : vector<1x48xf32> to vector<4x48xf32>
    %80 = arith.mulf %77, %79 : vector<4x48xf32>
    %81 = arith.addf %75, %80 : vector<4x48xf32>
    %c0_64 = arith.constant 0 : index
    %c1_65 = arith.constant 1 : index
    %c2_66 = arith.constant 2 : index
    %c0_67 = arith.constant 0 : index
    %82 = vector.load %arg11[%c0_64, %c1_65, %c2_66, %c0_67] : memref<2x6x6x48xf32, #tpu.memory_space<vmem>>, vector<1x1x4x48xf32>
    %83 = vector.shape_cast %82 : vector<1x1x4x48xf32> to vector<4x48xf32>
    %84 = vector.extract_strided_slice %50 {offsets = [5, 0], sizes = [1, 48], strides = [1, 1]} : vector<9x48xf32> to vector<1x48xf32>
    %85 = vector.broadcast %84 : vector<1x48xf32> to vector<4x48xf32>
    %86 = arith.mulf %83, %85 : vector<4x48xf32>
    %87 = arith.addf %81, %86 : vector<4x48xf32>
    %c0_68 = arith.constant 0 : index
    %c2_69 = arith.constant 2 : index
    %c0_70 = arith.constant 0 : index
    %c0_71 = arith.constant 0 : index
    %88 = vector.load %arg11[%c0_68, %c2_69, %c0_70, %c0_71] : memref<2x6x6x48xf32, #tpu.memory_space<vmem>>, vector<1x1x4x48xf32>
    %89 = vector.shape_cast %88 : vector<1x1x4x48xf32> to vector<4x48xf32>
    %90 = vector.extract_strided_slice %50 {offsets = [6, 0], sizes = [1, 48], strides = [1, 1]} : vector<9x48xf32> to vector<1x48xf32>
    %91 = vector.broadcast %90 : vector<1x48xf32> to vector<4x48xf32>
    %92 = arith.mulf %89, %91 : vector<4x48xf32>
    %93 = arith.addf %87, %92 : vector<4x48xf32>
    %c0_72 = arith.constant 0 : index
    %c2_73 = arith.constant 2 : index
    %c1_74 = arith.constant 1 : index
    %c0_75 = arith.constant 0 : index
    %94 = vector.load %arg11[%c0_72, %c2_73, %c1_74, %c0_75] : memref<2x6x6x48xf32, #tpu.memory_space<vmem>>, vector<1x1x4x48xf32>
    %95 = vector.shape_cast %94 : vector<1x1x4x48xf32> to vector<4x48xf32>
    %96 = vector.extract_strided_slice %50 {offsets = [7, 0], sizes = [1, 48], strides = [1, 1]} : vector<9x48xf32> to vector<1x48xf32>
    %97 = vector.broadcast %96 : vector<1x48xf32> to vector<4x48xf32>
    %98 = arith.mulf %95, %97 : vector<4x48xf32>
    %99 = arith.addf %93, %98 : vector<4x48xf32>
    %c0_76 = arith.constant 0 : index
    %c2_77 = arith.constant 2 : index
    %c2_78 = arith.constant 2 : index
    %c0_79 = arith.constant 0 : index
    %100 = vector.load %arg11[%c0_76, %c2_77, %c2_78, %c0_79] : memref<2x6x6x48xf32, #tpu.memory_space<vmem>>, vector<1x1x4x48xf32>
    %101 = vector.shape_cast %100 : vector<1x1x4x48xf32> to vector<4x48xf32>
    %102 = vector.extract_strided_slice %50 {offsets = [8, 0], sizes = [1, 48], strides = [1, 1]} : vector<9x48xf32> to vector<1x48xf32>
    %103 = vector.broadcast %102 : vector<1x48xf32> to vector<4x48xf32>
    %104 = arith.mulf %101, %103 : vector<4x48xf32>
    %105 = arith.addf %99, %104 : vector<4x48xf32>
    %106 = vector.extract_strided_slice %105 {offsets = [0, 0], sizes = [1, 48], strides = [1, 1]} : vector<4x48xf32> to vector<1x48xf32>
    %c0_80 = arith.constant 0 : index
    %c0_81 = arith.constant 0 : index
    %107 = vector.load %arg12[%c0_80, %c0_81] : memref<8x48xf32, #tpu.memory_space<vmem>>, vector<1x48xf32>
    tpu.vector_store %arg12[%c0_80, %c0_81], %106 {strides = array<i32>} : memref<8x48xf32, #tpu.memory_space<vmem>>, vector<1x48xf32>,
    %108 = vector.extract_strided_slice %105 {offsets = [2, 0], sizes = [1, 48], strides = [1, 1]} : vector<4x48xf32> to vector<1x48xf32>
    %c1_82 = arith.constant 1 : index
    %c0_83 = arith.constant 0 : index
    %109 = vector.load %arg12[%c1_82, %c0_83] : memref<8x48xf32, #tpu.memory_space<vmem>>, vector<1x48xf32>
    tpu.vector_store %arg12[%c1_82, %c0_83], %108 {strides = array<i32>} : memref<8x48xf32, #tpu.memory_space<vmem>>, vector<1x48xf32>,
    %cst_84 = arith.constant 0.000000e+00 : f32
    %110 = vector.broadcast %cst_84 : f32 to vector<4x48xf32>
    %c0_85 = arith.constant 0 : index
    %c2_86 = arith.constant 2 : index
    %c0_87 = arith.constant 0 : index
    %c0_88 = arith.constant 0 : index
    %111 = vector.load %arg11[%c0_85, %c2_86, %c0_87, %c0_88] : memref<2x6x6x48xf32, #tpu.memory_space<vmem>>, vector<1x1x4x48xf32>
    %112 = vector.shape_cast %111 : vector<1x1x4x48xf32> to vector<4x48xf32>
    %113 = vector.extract_strided_slice %50 {offsets = [0, 0], sizes = [1, 48], strides = [1, 1]} : vector<9x48xf32> to vector<1x48xf32>
    %114 = vector.broadcast %113 : vector<1x48xf32> to vector<4x48xf32>
    %115 = arith.mulf %112, %114 : vector<4x48xf32>
    %116 = arith.addf %110, %115 : vector<4x48xf32>
    %c0_89 = arith.constant 0 : index
    %c2_90 = arith.constant 2 : index
    %c1_91 = arith.constant 1 : index
    %c0_92 = arith.constant 0 : index
    %117 = vector.load %arg11[%c0_89, %c2_90, %c1_91, %c0_92] : memref<2x6x6x48xf32, #tpu.memory_space<vmem>>, vector<1x1x4x48xf32>
    %118 = vector.shape_cast %117 : vector<1x1x4x48xf32> to vector<4x48xf32>
    %119 = vector.extract_strided_slice %50 {offsets = [1, 0], sizes = [1, 48], strides = [1, 1]} : vector<9x48xf32> to vector<1x48xf32>
    %120 = vector.broadcast %119 : vector<1x48xf32> to vector<4x48xf32>
    %121 = arith.mulf %118, %120 : vector<4x48xf32>
    %122 = arith.addf %116, %121 : vector<4x48xf32>
    %c0_93 = arith.constant 0 : index
    %c2_94 = arith.constant 2 : index
    %c2_95 = arith.constant 2 : index
    %c0_96 = arith.constant 0 : index
    %123 = vector.load %arg11[%c0_93, %c2_94, %c2_95, %c0_96] : memref<2x6x6x48xf32, #tpu.memory_space<vmem>>, vector<1x1x4x48xf32>
    %124 = vector.shape_cast %123 : vector<1x1x4x48xf32> to vector<4x48xf32>
    %125 = vector.extract_strided_slice %50 {offsets = [2, 0], sizes = [1, 48], strides = [1, 1]} : vector<9x48xf32> to vector<1x48xf32>
    %126 = vector.broadcast %125 : vector<1x48xf32> to vector<4x48xf32>
    %127 = arith.mulf %124, %126 : vector<4x48xf32>
    %128 = arith.addf %122, %127 : vector<4x48xf32>
    %c0_97 = arith.constant 0 : index
    %c3_98 = arith.constant 3 : index
    %c0_99 = arith.constant 0 : index
    %c0_100 = arith.constant 0 : index
    %129 = vector.load %arg11[%c0_97, %c3_98, %c0_99, %c0_100] : memref<2x6x6x48xf32, #tpu.memory_space<vmem>>, vector<1x1x4x48xf32>
    %130 = vector.shape_cast %129 : vector<1x1x4x48xf32> to vector<4x48xf32>
    %131 = vector.extract_strided_slice %50 {offsets = [3, 0], sizes = [1, 48], strides = [1, 1]} : vector<9x48xf32> to vector<1x48xf32>
    %132 = vector.broadcast %131 : vector<1x48xf32> to vector<4x48xf32>
    %133 = arith.mulf %130, %132 : vector<4x48xf32>
    %134 = arith.addf %128, %133 : vector<4x48xf32>
    %c0_101 = arith.constant 0 : index
    %c3_102 = arith.constant 3 : index
    %c1_103 = arith.constant 1 : index
    %c0_104 = arith.constant 0 : index
    %135 = vector.load %arg11[%c0_101, %c3_102, %c1_103, %c0_104] : memref<2x6x6x48xf32, #tpu.memory_space<vmem>>, vector<1x1x4x48xf32>
    %136 = vector.shape_cast %135 : vector<1x1x4x48xf32> to vector<4x48xf32>
    %137 = vector.extract_strided_slice %50 {offsets = [4, 0], sizes = [1, 48], strides = [1, 1]} : vector<9x48xf32> to vector<1x48xf32>
    %138 = vector.broadcast %137 : vector<1x48xf32> to vector<4x48xf32>
    %139 = arith.mulf %136, %138 : vector<4x48xf32>
    %140 = arith.addf %134, %139 : vector<4x48xf32>
    %c0_105 = arith.constant 0 : index
    %c3_106 = arith.constant 3 : index
    %c2_107 = arith.constant 2 : index
    %c0_108 = arith.constant 0 : index
    %141 = vector.load %arg11[%c0_105, %c3_106, %c2_107, %c0_108] : memref<2x6x6x48xf32, #tpu.memory_space<vmem>>, vector<1x1x4x48xf32>
    %142 = vector.shape_cast %141 : vector<1x1x4x48xf32> to vector<4x48xf32>
    %143 = vector.extract_strided_slice %50 {offsets = [5, 0], sizes = [1, 48], strides = [1, 1]} : vector<9x48xf32> to vector<1x48xf32>
    %144 = vector.broadcast %143 : vector<1x48xf32> to vector<4x48xf32>
    %145 = arith.mulf %142, %144 : vector<4x48xf32>
    %146 = arith.addf %140, %145 : vector<4x48xf32>
    %c0_109 = arith.constant 0 : index
    %c4_110 = arith.constant 4 : index
    %c0_111 = arith.constant 0 : index
    %c0_112 = arith.constant 0 : index
    %147 = vector.load %arg11[%c0_109, %c4_110, %c0_111, %c0_112] : memref<2x6x6x48xf32, #tpu.memory_space<vmem>>, vector<1x1x4x48xf32>
    %148 = vector.shape_cast %147 : vector<1x1x4x48xf32> to vector<4x48xf32>
    %149 = vector.extract_strided_slice %50 {offsets = [6, 0], sizes = [1, 48], strides = [1, 1]} : vector<9x48xf32> to vector<1x48xf32>
    %150 = vector.broadcast %149 : vector<1x48xf32> to vector<4x48xf32>
    %151 = arith.mulf %148, %150 : vector<4x48xf32>
    %152 = arith.addf %146, %151 : vector<4x48xf32>
    %c0_113 = arith.constant 0 : index
    %c4_114 = arith.constant 4 : index
    %c1_115 = arith.constant 1 : index
    %c0_116 = arith.constant 0 : index
    %153 = vector.load %arg11[%c0_113, %c4_114, %c1_115, %c0_116] : memref<2x6x6x48xf32, #tpu.memory_space<vmem>>, vector<1x1x4x48xf32>
    %154 = vector.shape_cast %153 : vector<1x1x4x48xf32> to vector<4x48xf32>
    %155 = vector.extract_strided_slice %50 {offsets = [7, 0], sizes = [1, 48], strides = [1, 1]} : vector<9x48xf32> to vector<1x48xf32>
    %156 = vector.broadcast %155 : vector<1x48xf32> to vector<4x48xf32>
    %157 = arith.mulf %154, %156 : vector<4x48xf32>
    %158 = arith.addf %152, %157 : vector<4x48xf32>
    %c0_117 = arith.constant 0 : index
    %c4_118 = arith.constant 4 : index
    %c2_119 = arith.constant 2 : index
    %c0_120 = arith.constant 0 : index
    %159 = vector.load %arg11[%c0_117, %c4_118, %c2_119, %c0_120] : memref<2x6x6x48xf32, #tpu.memory_space<vmem>>, vector<1x1x4x48xf32>
    %160 = vector.shape_cast %159 : vector<1x1x4x48xf32> to vector<4x48xf32>
    %161 = vector.extract_strided_slice %50 {offsets = [8, 0], sizes = [1, 48], strides = [1, 1]} : vector<9x48xf32> to vector<1x48xf32>
    %162 = vector.broadcast %161 : vector<1x48xf32> to vector<4x48xf32>
    %163 = arith.mulf %160, %162 : vector<4x48xf32>
    %164 = arith.addf %158, %163 : vector<4x48xf32>
    %165 = vector.extract_strided_slice %164 {offsets = [0, 0], sizes = [1, 48], strides = [1, 1]} : vector<4x48xf32> to vector<1x48xf32>
    %c2_121 = arith.constant 2 : index
    %c0_122 = arith.constant 0 : index
    %166 = vector.load %arg12[%c2_121, %c0_122] : memref<8x48xf32, #tpu.memory_space<vmem>>, vector<1x48xf32>
    tpu.vector_store %arg12[%c2_121, %c0_122], %165 {strides = array<i32>} : memref<8x48xf32, #tpu.memory_space<vmem>>, vector<1x48xf32>,
    %167 = vector.extract_strided_slice %164 {offsets = [2, 0], sizes = [1, 48], strides = [1, 1]} : vector<4x48xf32> to vector<1x48xf32>
    %c3_123 = arith.constant 3 : index
    %c0_124 = arith.constant 0 : index
    %168 = vector.load %arg12[%c3_123, %c0_124] : memref<8x48xf32, #tpu.memory_space<vmem>>, vector<1x48xf32>
    tpu.vector_store %arg12[%c3_123, %c0_124], %167 {strides = array<i32>} : memref<8x48xf32, #tpu.memory_space<vmem>>, vector<1x48xf32>,
    %cst_125 = arith.constant 0.000000e+00 : f32
    %169 = vector.broadcast %cst_125 : f32 to vector<4x48xf32>
    %c1_126 = arith.constant 1 : index
    %c0_127 = arith.constant 0 : index
    %c0_128 = arith.constant 0 : index
    %c0_129 = arith.constant 0 : index
    %170 = vector.load %arg11[%c1_126, %c0_127, %c0_128, %c0_129] : memref<2x6x6x48xf32, #tpu.memory_space<vmem>>, vector<1x1x4x48xf32>
    %171 = vector.shape_cast %170 : vector<1x1x4x48xf32> to vector<4x48xf32>
    %172 = vector.extract_strided_slice %50 {offsets = [0, 0], sizes = [1, 48], strides = [1, 1]} : vector<9x48xf32> to vector<1x48xf32>
    %173 = vector.broadcast %172 : vector<1x48xf32> to vector<4x48xf32>
    %174 = arith.mulf %171, %173 : vector<4x48xf32>
    %175 = arith.addf %169, %174 : vector<4x48xf32>
    %c1_130 = arith.constant 1 : index
    %c0_131 = arith.constant 0 : index
    %c1_132 = arith.constant 1 : index
    %c0_133 = arith.constant 0 : index
    %176 = vector.load %arg11[%c1_130, %c0_131, %c1_132, %c0_133] : memref<2x6x6x48xf32, #tpu.memory_space<vmem>>, vector<1x1x4x48xf32>
    %177 = vector.shape_cast %176 : vector<1x1x4x48xf32> to vector<4x48xf32>
    %178 = vector.extract_strided_slice %50 {offsets = [1, 0], sizes = [1, 48], strides = [1, 1]} : vector<9x48xf32> to vector<1x48xf32>
    %179 = vector.broadcast %178 : vector<1x48xf32> to vector<4x48xf32>
    %180 = arith.mulf %177, %179 : vector<4x48xf32>
    %181 = arith.addf %175, %180 : vector<4x48xf32>
    %c1_134 = arith.constant 1 : index
    %c0_135 = arith.constant 0 : index
    %c2_136 = arith.constant 2 : index
    %c0_137 = arith.constant 0 : index
    %182 = vector.load %arg11[%c1_134, %c0_135, %c2_136, %c0_137] : memref<2x6x6x48xf32, #tpu.memory_space<vmem>>, vector<1x1x4x48xf32>
    %183 = vector.shape_cast %182 : vector<1x1x4x48xf32> to vector<4x48xf32>
    %184 = vector.extract_strided_slice %50 {offsets = [2, 0], sizes = [1, 48], strides = [1, 1]} : vector<9x48xf32> to vector<1x48xf32>
    %185 = vector.broadcast %184 : vector<1x48xf32> to vector<4x48xf32>
    %186 = arith.mulf %183, %185 : vector<4x48xf32>
    %187 = arith.addf %181, %186 : vector<4x48xf32>
    %c1_138 = arith.constant 1 : index
    %c1_139 = arith.constant 1 : index
    %c0_140 = arith.constant 0 : index
    %c0_141 = arith.constant 0 : index
    %188 = vector.load %arg11[%c1_138, %c1_139, %c0_140, %c0_141] : memref<2x6x6x48xf32, #tpu.memory_space<vmem>>, vector<1x1x4x48xf32>
    %189 = vector.shape_cast %188 : vector<1x1x4x48xf32> to vector<4x48xf32>
    %190 = vector.extract_strided_slice %50 {offsets = [3, 0], sizes = [1, 48], strides = [1, 1]} : vector<9x48xf32> to vector<1x48xf32>
    %191 = vector.broadcast %190 : vector<1x48xf32> to vector<4x48xf32>
    %192 = arith.mulf %189, %191 : vector<4x48xf32>
    %193 = arith.addf %187, %192 : vector<4x48xf32>
    %c1_142 = arith.constant 1 : index
    %c1_143 = arith.constant 1 : index
    %c1_144 = arith.constant 1 : index
    %c0_145 = arith.constant 0 : index
    %194 = vector.load %arg11[%c1_142, %c1_143, %c1_144, %c0_145] : memref<2x6x6x48xf32, #tpu.memory_space<vmem>>, vector<1x1x4x48xf32>
    %195 = vector.shape_cast %194 : vector<1x1x4x48xf32> to vector<4x48xf32>
    %196 = vector.extract_strided_slice %50 {offsets = [4, 0], sizes = [1, 48], strides = [1, 1]} : vector<9x48xf32> to vector<1x48xf32>
    %197 = vector.broadcast %196 : vector<1x48xf32> to vector<4x48xf32>
    %198 = arith.mulf %195, %197 : vector<4x48xf32>
    %199 = arith.addf %193, %198 : vector<4x48xf32>
    %c1_146 = arith.constant 1 : index
    %c1_147 = arith.constant 1 : index
    %c2_148 = arith.constant 2 : index
    %c0_149 = arith.constant 0 : index
    %200 = vector.load %arg11[%c1_146, %c1_147, %c2_148, %c0_149] : memref<2x6x6x48xf32, #tpu.memory_space<vmem>>, vector<1x1x4x48xf32>
    %201 = vector.shape_cast %200 : vector<1x1x4x48xf32> to vector<4x48xf32>
    %202 = vector.extract_strided_slice %50 {offsets = [5, 0], sizes = [1, 48], strides = [1, 1]} : vector<9x48xf32> to vector<1x48xf32>
    %203 = vector.broadcast %202 : vector<1x48xf32> to vector<4x48xf32>
    %204 = arith.mulf %201, %203 : vector<4x48xf32>
    %205 = arith.addf %199, %204 : vector<4x48xf32>
    %c1_150 = arith.constant 1 : index
    %c2_151 = arith.constant 2 : index
    %c0_152 = arith.constant 0 : index
    %c0_153 = arith.constant 0 : index
    %206 = vector.load %arg11[%c1_150, %c2_151, %c0_152, %c0_153] : memref<2x6x6x48xf32, #tpu.memory_space<vmem>>, vector<1x1x4x48xf32>
    %207 = vector.shape_cast %206 : vector<1x1x4x48xf32> to vector<4x48xf32>
    %208 = vector.extract_strided_slice %50 {offsets = [6, 0], sizes = [1, 48], strides = [1, 1]} : vector<9x48xf32> to vector<1x48xf32>
    %209 = vector.broadcast %208 : vector<1x48xf32> to vector<4x48xf32>
    %210 = arith.mulf %207, %209 : vector<4x48xf32>
    %211 = arith.addf %205, %210 : vector<4x48xf32>
    %c1_154 = arith.constant 1 : index
    %c2_155 = arith.constant 2 : index
    %c1_156 = arith.constant 1 : index
    %c0_157 = arith.constant 0 : index
    %212 = vector.load %arg11[%c1_154, %c2_155, %c1_156, %c0_157] : memref<2x6x6x48xf32, #tpu.memory_space<vmem>>, vector<1x1x4x48xf32>
    %213 = vector.shape_cast %212 : vector<1x1x4x48xf32> to vector<4x48xf32>
    %214 = vector.extract_strided_slice %50 {offsets = [7, 0], sizes = [1, 48], strides = [1, 1]} : vector<9x48xf32> to vector<1x48xf32>
    %215 = vector.broadcast %214 : vector<1x48xf32> to vector<4x48xf32>
    %216 = arith.mulf %213, %215 : vector<4x48xf32>
    %217 = arith.addf %211, %216 : vector<4x48xf32>
    %c1_158 = arith.constant 1 : index
    %c2_159 = arith.constant 2 : index
    %c2_160 = arith.constant 2 : index
    %c0_161 = arith.constant 0 : index
    %218 = vector.load %arg11[%c1_158, %c2_159, %c2_160, %c0_161] : memref<2x6x6x48xf32, #tpu.memory_space<vmem>>, vector<1x1x4x48xf32>
    %219 = vector.shape_cast %218 : vector<1x1x4x48xf32> to vector<4x48xf32>
    %220 = vector.extract_strided_slice %50 {offsets = [8, 0], sizes = [1, 48], strides = [1, 1]} : vector<9x48xf32> to vector<1x48xf32>
    %221 = vector.broadcast %220 : vector<1x48xf32> to vector<4x48xf32>
    %222 = arith.mulf %219, %221 : vector<4x48xf32>
    %223 = arith.addf %217, %222 : vector<4x48xf32>
    %224 = vector.extract_strided_slice %223 {offsets = [0, 0], sizes = [1, 48], strides = [1, 1]} : vector<4x48xf32> to vector<1x48xf32>
    %c4_162 = arith.constant 4 : index
    %c0_163 = arith.constant 0 : index
    %225 = vector.load %arg12[%c4_162, %c0_163] : memref<8x48xf32, #tpu.memory_space<vmem>>, vector<1x48xf32>
    tpu.vector_store %arg12[%c4_162, %c0_163], %224 {strides = array<i32>} : memref<8x48xf32, #tpu.memory_space<vmem>>, vector<1x48xf32>,
    %226 = vector.extract_strided_slice %223 {offsets = [2, 0], sizes = [1, 48], strides = [1, 1]} : vector<4x48xf32> to vector<1x48xf32>
    %c5 = arith.constant 5 : index
    %c0_164 = arith.constant 0 : index
    %227 = vector.load %arg12[%c5, %c0_164] : memref<8x48xf32, #tpu.memory_space<vmem>>, vector<1x48xf32>
    tpu.vector_store %arg12[%c5, %c0_164], %226 {strides = array<i32>} : memref<8x48xf32, #tpu.memory_space<vmem>>, vector<1x48xf32>,
    %cst_165 = arith.constant 0.000000e+00 : f32
    %228 = vector.broadcast %cst_165 : f32 to vector<4x48xf32>
    %c1_166 = arith.constant 1 : index
    %c2_167 = arith.constant 2 : index
    %c0_168 = arith.constant 0 : index
    %c0_169 = arith.constant 0 : index
    %229 = vector.load %arg11[%c1_166, %c2_167, %c0_168, %c0_169] : memref<2x6x6x48xf32, #tpu.memory_space<vmem>>, vector<1x1x4x48xf32>
    %230 = vector.shape_cast %229 : vector<1x1x4x48xf32> to vector<4x48xf32>
    %231 = vector.extract_strided_slice %50 {offsets = [0, 0], sizes = [1, 48], strides = [1, 1]} : vector<9x48xf32> to vector<1x48xf32>
    %232 = vector.broadcast %231 : vector<1x48xf32> to vector<4x48xf32>
    %233 = arith.mulf %230, %232 : vector<4x48xf32>
    %234 = arith.addf %228, %233 : vector<4x48xf32>
    %c1_170 = arith.constant 1 : index
    %c2_171 = arith.constant 2 : index
    %c1_172 = arith.constant 1 : index
    %c0_173 = arith.constant 0 : index
    %235 = vector.load %arg11[%c1_170, %c2_171, %c1_172, %c0_173] : memref<2x6x6x48xf32, #tpu.memory_space<vmem>>, vector<1x1x4x48xf32>
    %236 = vector.shape_cast %235 : vector<1x1x4x48xf32> to vector<4x48xf32>
    %237 = vector.extract_strided_slice %50 {offsets = [1, 0], sizes = [1, 48], strides = [1, 1]} : vector<9x48xf32> to vector<1x48xf32>
    %238 = vector.broadcast %237 : vector<1x48xf32> to vector<4x48xf32>
    %239 = arith.mulf %236, %238 : vector<4x48xf32>
    %240 = arith.addf %234, %239 : vector<4x48xf32>
    %c1_174 = arith.constant 1 : index
    %c2_175 = arith.constant 2 : index
    %c2_176 = arith.constant 2 : index
    %c0_177 = arith.constant 0 : index
    %241 = vector.load %arg11[%c1_174, %c2_175, %c2_176, %c0_177] : memref<2x6x6x48xf32, #tpu.memory_space<vmem>>, vector<1x1x4x48xf32>
    %242 = vector.shape_cast %241 : vector<1x1x4x48xf32> to vector<4x48xf32>
    %243 = vector.extract_strided_slice %50 {offsets = [2, 0], sizes = [1, 48], strides = [1, 1]} : vector<9x48xf32> to vector<1x48xf32>
    %244 = vector.broadcast %243 : vector<1x48xf32> to vector<4x48xf32>
    %245 = arith.mulf %242, %244 : vector<4x48xf32>
    %246 = arith.addf %240, %245 : vector<4x48xf32>
    %c1_178 = arith.constant 1 : index
    %c3_179 = arith.constant 3 : index
    %c0_180 = arith.constant 0 : index
    %c0_181 = arith.constant 0 : index
    %247 = vector.load %arg11[%c1_178, %c3_179, %c0_180, %c0_181] : memref<2x6x6x48xf32, #tpu.memory_space<vmem>>, vector<1x1x4x48xf32>
    %248 = vector.shape_cast %247 : vector<1x1x4x48xf32> to vector<4x48xf32>
    %249 = vector.extract_strided_slice %50 {offsets = [3, 0], sizes = [1, 48], strides = [1, 1]} : vector<9x48xf32> to vector<1x48xf32>
    %250 = vector.broadcast %249 : vector<1x48xf32> to vector<4x48xf32>
    %251 = arith.mulf %248, %250 : vector<4x48xf32>
    %252 = arith.addf %246, %251 : vector<4x48xf32>
    %c1_182 = arith.constant 1 : index
    %c3_183 = arith.constant 3 : index
    %c1_184 = arith.constant 1 : index
    %c0_185 = arith.constant 0 : index
    %253 = vector.load %arg11[%c1_182, %c3_183, %c1_184, %c0_185] : memref<2x6x6x48xf32, #tpu.memory_space<vmem>>, vector<1x1x4x48xf32>
    %254 = vector.shape_cast %253 : vector<1x1x4x48xf32> to vector<4x48xf32>
    %255 = vector.extract_strided_slice %50 {offsets = [4, 0], sizes = [1, 48], strides = [1, 1]} : vector<9x48xf32> to vector<1x48xf32>
    %256 = vector.broadcast %255 : vector<1x48xf32> to vector<4x48xf32>
    %257 = arith.mulf %254, %256 : vector<4x48xf32>
    %258 = arith.addf %252, %257 : vector<4x48xf32>
    %c1_186 = arith.constant 1 : index
    %c3_187 = arith.constant 3 : index
    %c2_188 = arith.constant 2 : index
    %c0_189 = arith.constant 0 : index
    %259 = vector.load %arg11[%c1_186, %c3_187, %c2_188, %c0_189] : memref<2x6x6x48xf32, #tpu.memory_space<vmem>>, vector<1x1x4x48xf32>
    %260 = vector.shape_cast %259 : vector<1x1x4x48xf32> to vector<4x48xf32>
    %261 = vector.extract_strided_slice %50 {offsets = [5, 0], sizes = [1, 48], strides = [1, 1]} : vector<9x48xf32> to vector<1x48xf32>
    %262 = vector.broadcast %261 : vector<1x48xf32> to vector<4x48xf32>
    %263 = arith.mulf %260, %262 : vector<4x48xf32>
    %264 = arith.addf %258, %263 : vector<4x48xf32>
    %c1_190 = arith.constant 1 : index
    %c4_191 = arith.constant 4 : index
    %c0_192 = arith.constant 0 : index
    %c0_193 = arith.constant 0 : index
    %265 = vector.load %arg11[%c1_190, %c4_191, %c0_192, %c0_193] : memref<2x6x6x48xf32, #tpu.memory_space<vmem>>, vector<1x1x4x48xf32>
    %266 = vector.shape_cast %265 : vector<1x1x4x48xf32> to vector<4x48xf32>
    %267 = vector.extract_strided_slice %50 {offsets = [6, 0], sizes = [1, 48], strides = [1, 1]} : vector<9x48xf32> to vector<1x48xf32>
    %268 = vector.broadcast %267 : vector<1x48xf32> to vector<4x48xf32>
    %269 = arith.mulf %266, %268 : vector<4x48xf32>
    %270 = arith.addf %264, %269 : vector<4x48xf32>
    %c1_194 = arith.constant 1 : index
    %c4_195 = arith.constant 4 : index
    %c1_196 = arith.constant 1 : index
    %c0_197 = arith.constant 0 : index
    %271 = vector.load %arg11[%c1_194, %c4_195, %c1_196, %c0_197] : memref<2x6x6x48xf32, #tpu.memory_space<vmem>>, vector<1x1x4x48xf32>
    %272 = vector.shape_cast %271 : vector<1x1x4x48xf32> to vector<4x48xf32>
    %273 = vector.extract_strided_slice %50 {offsets = [7, 0], sizes = [1, 48], strides = [1, 1]} : vector<9x48xf32> to vector<1x48xf32>
    %274 = vector.broadcast %273 : vector<1x48xf32> to vector<4x48xf32>
    %275 = arith.mulf %272, %274 : vector<4x48xf32>
    %276 = arith.addf %270, %275 : vector<4x48xf32>
    %c1_198 = arith.constant 1 : index
    %c4_199 = arith.constant 4 : index
    %c2_200 = arith.constant 2 : index
    %c0_201 = arith.constant 0 : index
    %277 = vector.load %arg11[%c1_198, %c4_199, %c2_200, %c0_201] : memref<2x6x6x48xf32, #tpu.memory_space<vmem>>, vector<1x1x4x48xf32>
    %278 = vector.shape_cast %277 : vector<1x1x4x48xf32> to vector<4x48xf32>
    %279 = vector.extract_strided_slice %50 {offsets = [8, 0], sizes = [1, 48], strides = [1, 1]} : vector<9x48xf32> to vector<1x48xf32>
    %280 = vector.broadcast %279 : vector<1x48xf32> to vector<4x48xf32>
    %281 = arith.mulf %278, %280 : vector<4x48xf32>
    %282 = arith.addf %276, %281 : vector<4x48xf32>
    %283 = vector.extract_strided_slice %282 {offsets = [0, 0], sizes = [1, 48], strides = [1, 1]} : vector<4x48xf32> to vector<1x48xf32>
    %c6 = arith.constant 6 : index
    %c0_202 = arith.constant 0 : index
    %284 = vector.load %arg12[%c6, %c0_202] : memref<8x48xf32, #tpu.memory_space<vmem>>, vector<1x48xf32>
    tpu.vector_store %arg12[%c6, %c0_202], %283 {strides = array<i32>} : memref<8x48xf32, #tpu.memory_space<vmem>>, vector<1x48xf32>,
    %285 = vector.extract_strided_slice %282 {offsets = [2, 0], sizes = [1, 48], strides = [1, 1]} : vector<4x48xf32> to vector<1x48xf32>
    %c7 = arith.constant 7 : index
    %c0_203 = arith.constant 0 : index
    %286 = vector.load %arg12[%c7, %c0_203] : memref<8x48xf32, #tpu.memory_space<vmem>>, vector<1x48xf32>
    tpu.vector_store %arg12[%c7, %c0_203], %285 {strides = array<i32>} : memref<8x48xf32, #tpu.memory_space<vmem>>, vector<1x48xf32>,
    %c0_204 = arith.constant 0 : index
    %c0_205 = arith.constant 0 : index
    %287 = vector.load %arg12[%c0_204, %c0_205] : memref<8x48xf32, #tpu.memory_space<vmem>>, vector<8x48xf32>
    %c0_206 = arith.constant 0 : index
    %c0_207 = arith.constant 0 : index
    %288 = vector.load %arg5[%c0_206, %c0_207] : memref<1x48xf32, #tpu.memory_space<vmem>>, vector<1x48xf32>
    %289 = vector.broadcast %288 : vector<1x48xf32> to vector<8x48xf32>
    %290 = arith.mulf %287, %289 : vector<8x48xf32>
    %c0_208 = arith.constant 0 : index
    %c0_209 = arith.constant 0 : index
    %291 = vector.load %arg6[%c0_208, %c0_209] : memref<1x48xf32, #tpu.memory_space<vmem>>, vector<1x48xf32>
    %292 = vector.broadcast %291 : vector<1x48xf32> to vector<8x48xf32>
    %293 = arith.addf %290, %292 : vector<8x48xf32>
    %294 = arith.negf %293 : vector<8x48xf32>
    %295 = math.exp %294 : vector<8x48xf32>
    %cst_210 = arith.constant 1.000000e+00 : f32
    %296 = vector.broadcast %cst_210 : f32 to vector<8x48xf32>
    %297 = arith.addf %296, %295 : vector<8x48xf32>
    %298 = arith.divf %296, %297 : vector<8x48xf32>
    %299 = arith.mulf %293, %298 : vector<8x48xf32>
    %300 = arith.truncf %299 : vector<8x48xf32> to vector<8x48xbf16>
    %c0_211 = arith.constant 0 : index
    %c0_212 = arith.constant 0 : index
    %301 = vector.load %arg7[%c0_211, %c0_212] : memref<48x32xbf16, #tpu.memory_space<vmem>>, vector<48x32xbf16>
    %cst_213 = arith.constant dense<0.000000e+00> : vector<8x32xf32>
    %302 = tpu.matmul %300, %301, %cst_213 {dimension_numbers = #tpu.dot_dimension_numbers<[1], [0], [0], [1], [0, 0, 1, 1], [], []>} : vector<8x48xbf16>, vector<48x32xbf16>, vector<8x32xf32> -> vector<8x32xf32>
    %c0_214 = arith.constant 0 : index
    %c0_215 = arith.constant 0 : index
    %303 = vector.load %arg8[%c0_214, %c0_215] : memref<1x32xf32, #tpu.memory_space<vmem>>, vector<1x32xf32>
    %304 = vector.broadcast %303 : vector<1x32xf32> to vector<8x32xf32>
    %305 = arith.mulf %302, %304 : vector<8x32xf32>
    %c0_216 = arith.constant 0 : index
    %c0_217 = arith.constant 0 : index
    %306 = vector.load %arg9[%c0_216, %c0_217] : memref<1x32xf32, #tpu.memory_space<vmem>>, vector<1x32xf32>
    %307 = vector.broadcast %306 : vector<1x32xf32> to vector<8x32xf32>
    %308 = arith.addf %305, %307 : vector<8x32xf32>
    %c0_218 = arith.constant 0 : index
    %c0_219 = arith.constant 0 : index
    %309 = vector.load %arg10[%c0_218, %c0_219] : memref<8x32xf32, #tpu.memory_space<vmem>>, vector<8x32xf32>
    tpu.vector_store %arg10[%c0_218, %c0_219], %308 {strides = array<i32>} : memref<8x32xf32, #tpu.memory_space<vmem>>, vector<8x32xf32>,
    return
  }
}

module attributes {stable_mosaic.version = 11 : i64} {
  func.func @_matmul_bn_silu_kernel(%arg0: memref<8x32xf32, #tpu.memory_space<vmem>>, %arg1: memref<32x64xbf16, #tpu.memory_space<vmem>>, %arg2: memref<1x64xf32, #tpu.memory_space<vmem>>, %arg3: memref<1x64xf32, #tpu.memory_space<vmem>>, %arg4: memref<8x64xf32, #tpu.memory_space<vmem>>, %arg5: memref<8x64xf32, #tpu.memory_space<vmem>>, %arg6: memref<8x64xf32, #tpu.memory_space<vmem>>) attributes {dimension_semantics = [], scalar_prefetch = 0 : i64, scratch_operands = 0 : i64, tpu.core_type = #tpu.core_type<tc>} {
    %c0 = arith.constant 0 : index
    %c0_0 = arith.constant 0 : index
    %0 = vector.load %arg0[%c0, %c0_0] : memref<8x32xf32, #tpu.memory_space<vmem>>, vector<8x32xf32>
    %1 = arith.truncf %0 : vector<8x32xf32> to vector<8x32xbf16>
    %c0_1 = arith.constant 0 : index
    %c0_2 = arith.constant 0 : index
    %2 = vector.load %arg1[%c0_1, %c0_2] : memref<32x64xbf16, #tpu.memory_space<vmem>>, vector<32x64xbf16>
    %cst = arith.constant dense<0.000000e+00> : vector<8x64xf32>
    %3 = tpu.matmul %1, %2, %cst {dimension_numbers = #tpu.dot_dimension_numbers<[1], [0], [0], [1], [0, 0, 1, 1], [], []>} : vector<8x32xbf16>, vector<32x64xbf16>, vector<8x64xf32> -> vector<8x64xf32>
    %c0_3 = arith.constant 0 : index
    %c0_4 = arith.constant 0 : index
    %4 = vector.load %arg4[%c0_3, %c0_4] : memref<8x64xf32, #tpu.memory_space<vmem>>, vector<8x64xf32>
    tpu.vector_store %arg4[%c0_3, %c0_4], %3 {strides = array<i32>} : memref<8x64xf32, #tpu.memory_space<vmem>>, vector<8x64xf32>,
    %c0_5 = arith.constant 0 : index
    %c0_6 = arith.constant 0 : index
    %5 = vector.load %arg2[%c0_5, %c0_6] : memref<1x64xf32, #tpu.memory_space<vmem>>, vector<1x64xf32>
    %6 = vector.broadcast %5 : vector<1x64xf32> to vector<8x64xf32>
    %7 = arith.mulf %3, %6 : vector<8x64xf32>
    %c0_7 = arith.constant 0 : index
    %c0_8 = arith.constant 0 : index
    %8 = vector.load %arg3[%c0_7, %c0_8] : memref<1x64xf32, #tpu.memory_space<vmem>>, vector<1x64xf32>
    %9 = vector.broadcast %8 : vector<1x64xf32> to vector<8x64xf32>
    %10 = arith.addf %7, %9 : vector<8x64xf32>
    %c0_9 = arith.constant 0 : index
    %c0_10 = arith.constant 0 : index
    %11 = vector.load %arg5[%c0_9, %c0_10] : memref<8x64xf32, #tpu.memory_space<vmem>>, vector<8x64xf32>
    tpu.vector_store %arg5[%c0_9, %c0_10], %10 {strides = array<i32>} : memref<8x64xf32, #tpu.memory_space<vmem>>, vector<8x64xf32>,
    %12 = arith.negf %10 : vector<8x64xf32>
    %13 = math.exp %12 : vector<8x64xf32>
    %cst_11 = arith.constant 1.000000e+00 : f32
    %14 = vector.broadcast %cst_11 : f32 to vector<8x64xf32>
    %15 = arith.addf %14, %13 : vector<8x64xf32>
    %16 = arith.divf %14, %15 : vector<8x64xf32>
    %17 = arith.mulf %10, %16 : vector<8x64xf32>
    %c0_12 = arith.constant 0 : index
    %c0_13 = arith.constant 0 : index
    %18 = vector.load %arg6[%c0_12, %c0_13] : memref<8x64xf32, #tpu.memory_space<vmem>>, vector<8x64xf32>
    tpu.vector_store %arg6[%c0_12, %c0_13], %17 {strides = array<i32>} : memref<8x64xf32, #tpu.memory_space<vmem>>, vector<8x64xf32>,
    return
  }
}

</mosaic_0001>

<bundles_post_ra>
// kernel: encoder_forward.5
= control target key start
LH: loop header
LB: loop body
LE: loop exit
PB: predicated region body
PF: predicated region fallthrough
CT: control target
= control target key end

     0   :  { %12 = vsyncpa [#allocation3], 0  ;;  %vm87_vm0 = vcmask 1044480   ;;  %vm88_vm1 = vcmask 1045504   ;;  %vm62_vm2 = vcmask 220160   ;;  %v615_v5 = vmov 65535   ;;  %s972_s0 = inlined_call_operand.vmem [shape: f32[128,27], index: 0, kind: input, shape index: {}]   ;;  %s973_s1 = inlined_call_operand.vmem [shape: bf16[27,16], index: 1, kind: input, shape index: {}]   ;;  %s974_s2 = inlined_call_operand.vmem [shape: f32[1,16], index: 2, kind: input, shape index: {}]   ;;  %s975_s3 = inlined_call_operand.vmem [shape: f32[1,16], index: 3, kind: input, shape index: {}]   ;;  %s976_s4 = inlined_call_operand.hbm [shape: f32[128,16], index: 4, kind: output, shape index: {0}]   ;;  %s977_s5 = inlined_call_operand.hbm [shape: f32[128,16], index: 5, kind: output, shape index: {1}]   ;;  %s978_s6 = inlined_call_operand.vmem [shape: f32[128,16], index: 6, kind: output, shape index: {2}]  }
   0x1   :  { %v501_v0 = vld [vmem:[%s973_s1] sm:$0xff]   ;;  %v502_v1 = vld [vmem:[%s973_s1 + $0x8] sm:$0x3f]   ;;  %v89_v6 = vsel %vm87_vm0, 4294967295, %v615_v5  ;;  %v25_v9 = vld [vmem:[%s972_s0 + $0x10] sm:$0xff] }
   0x2   :  { %472 = vmatprep.subr.bf16.mxu0 %v501_v0  ;;  %492 = vmatprep.subr.bf16.mxu1 %v501_v0  ;;  %v23_v2 = vld [vmem:[%s972_s0] sm:$0xff]  ;;  %v24_v3 = vld [vmem:[%s972_s0 + $0x8] sm:$0xff]  ;;  %v26_v10 = vld [vmem:[%s972_s0 + $0x18] sm:$0xff]  ;;  %v90_v11 = vsel %vm88_vm1, %v89_v6, 0 }
   0x3   :  { %v31_v4 = vld [vmem:[%s972_s0 + $0x40] sm:$0xff]  ;;  %473 = vmatpush3.bf16.msra.mxu0 %v501_v0  ;;  %494 = vmatpush3.bf16.msra.mxu1 %v501_v0  ;;  %v39_v7 = vpack.c.bf16 %v24_v3, %v23_v2  ;;  %v32_v8 = vld [vmem:[%s972_s0 + $0x48] sm:$0xff]  ;;  %v33_v13 = vld [vmem:[%s972_s0 + $0x50] sm:$0xff]  ;;  %v92_v16 = vand.u32 %v502_v1, %v90_v11  ;;  %v40_v20 = vpack.c.bf16 %v26_v10, %v25_v9 }
   0x4   :  { %v43_v12 = vpack.c.bf16 %v32_v8, %v31_v4  ;;  %v34_v14 = vld [vmem:[%s972_s0 + $0x58] sm:$0xff]  ;;  %v27_v15 = vld [vmem:[%s972_s0 + $0x20] sm:$0xff]  ;;  %v28_v17 = vld [vmem:[%s972_s0 + $0x28] sm:$0xff] }
   0x5   :  { %476 = vmatprep.mubr.msk.bf16.mxu0 %vm62_vm2, %v39_v7  ;;  %v35_v18 = vld [vmem:[%s972_s0 + $0x60] sm:$0xff]  ;;  %v36_v19 = vld [vmem:[%s972_s0 + $0x68] sm:$0xff]  ;;  %474 = vmatprep.subr.bf16.mxu0 %v92_v16  ;;  %v44_v21 = vpack.c.bf16 %v34_v14, %v33_v13 }
   0x6   :  { %484 = vmatprep.mubr.msk.bf16.mxu1 %vm62_vm2, %v43_v12  ;;  %493 = vmatprep.subr.bf16.mxu1 %v92_v16 }
   0x7   :  { %13 = vsyncpa [#allocation5], 0  ;;  %475 = vmatpush3.bf16.msra.mxu0 %v92_v16  ;;  %495 = vmatpush3.bf16.msra.mxu1 %v92_v16  ;;  %v41_v22 = vpack.c.bf16 %v28_v17, %v27_v15  ;;  %v45_v23 = vpack.c.bf16 %v36_v19, %v35_v18  ;;  %v29_v24 = vld [vmem:[%s972_s0 + $0x30] sm:$0xff]  ;;  %v30_v25 = vld [vmem:[%s972_s0 + $0x38] sm:$0xff]  ;;  %vm191_vm3 = vcmask 130048  }
   0x8   :  { %v37_v26 = vld [vmem:[%s972_s0 + $0x70] sm:$0xff]  ;;  %v38_v27 = vld [vmem:[%s972_s0 + $0x78] sm:$0xff]  ;;  %v42_v28 = vpack.c.bf16 %v30_v25, %v29_v24  ;;  %v720_v30 = vld [vmem:[%s974_s2] ss:$0 sm:$0xff]  ;;  %s616_s0 = smov [#allocation2]  }
   0x9   :  { %v46_v29 = vpack.c.bf16 %v38_v27, %v37_v26  ;;  %v725_v32 = vld [vmem:[%s975_s3] ss:$0 sm:$0xff]  ;;  %s403_s2 = sshll.u32 %s616_s0, 4  ;;  %s794_s2 = int_to_ptr.vmem [resolvable:$true] %s403_s2 }
   0xa   :  { %477 = vmatmul.mubr.msk.bf16.vlgmr.msra.gmra.mrb[0].mxu0 %vm62_vm2, %v40_v20  ;;  %485 = vmatmul.mubr.msk.bf16.vlgmr.msra.gmra.mrb[0].mxu1 %vm62_vm2, %v44_v21  ;;  %s567_s3 = scalar_lea.vmem %s794_s2, 2048  ;;  %p572_p1 = scmp.lt.s32.totalorder %s794_s2, %s794_s2 }
   0xb   :  { %480 = vmatprep.mubr.msk.bf16.mxu0 %vm62_vm2, %v41_v22  ;;  %488 = vmatprep.mubr.msk.bf16.mxu1 %vm62_vm2, %v45_v23  ;;  %p568_p0 = scmp.ne.s32.totalorder %s794_s2, %s567_s3  ;;  %p573_p2 = scmp.lt.s32.totalorder %s567_s3, %s567_s3 }
   0xd   :  { %p574_p3 = por %p573_p2, %p572_p1 }
   0xf   :  { %p575_p4 = pnand %p574_p3, %p568_p0 }
  0x12   :  { %481 = vmatmul.mubr.msk.bf16.gmra.mrb[4].mxu0 %vm62_vm2, %v42_v28  ;;  %489 = vmatmul.mubr.msk.bf16.gmra.mrb[4].mxu1 %vm62_vm2, %v46_v29 }
  0xdd   :  { %v478_v31 = vpop.f32.mrb[0].mxu0  ;;  %v486_v33 = vpop.f32.mrb[0].mxu1 }
  0xde   :  { %194 = vst.msk [vmem:[#allocation2 + $0x10] sm:$0xff] %vm191_vm3, %v478_v31  ;;  %v217_v34 = vmul.f32 %v478_v31, %v720_v30  ;;  %202 = vst.msk [vmem:[#allocation2 + $0x50] sm:$0xff] %vm191_vm3, %v486_v33  ;;  %v225_v35 = vmul.f32 %v486_v33, %v720_v30  ;;  %v128_v36 = vpop.f32.mrb[1].mxu0  ;;  %v160_v37 = vpop.f32.mrb[1].mxu1 }
  0xdf   :  { %192 = vst.msk [vmem:[#allocation2] sm:$0xff] %vm191_vm3, %v128_v36  ;;  %v215_v38 = vmul.f32 %v720_v30, %v128_v36  ;;  %200 = vst.msk [vmem:[#allocation2 + $0x40] sm:$0xff] %vm191_vm3, %v160_v37  ;;  %v223_v39 = vmul.f32 %v720_v30, %v160_v37  ;;  %v479_v40 = vpop.f32.mrb[2].mxu0  ;;  %v487_v41 = vpop.f32.mrb[2].mxu1 }
  0xe0   :  { %v736_v42 = vadd.f32 %v725_v32, %v217_v34  ;;  %v739_v43 = vadd.f32 %v725_v32, %v225_v35  ;;  %195 = vst.msk [vmem:[#allocation2 + $0x18] sm:$0xff] %vm191_vm3, %v479_v40  ;;  %v218_v44 = vmul.f32 %v479_v40, %v720_v30  ;;  %203 = vst.msk [vmem:[#allocation2 + $0x58] sm:$0xff] %vm191_vm3, %v487_v41  ;;  %v131_v46 = vpop.f32.mrb[3].mxu0  ;;  %v163_v47 = vpop.f32.mrb[3].mxu1 }
  0xe1   :  { %v226_v45 = vmul.f32 %v487_v41, %v720_v30  ;;  %v746_v48 = vadd.f32 %v725_v32, %v215_v38  ;;  %v749_v49 = vadd.f32 %v725_v32, %v223_v39  ;;  %193 = vst.msk [vmem:[#allocation2 + $0x8] sm:$0xff] %vm191_vm3, %v131_v46  ;;  %v216_v50 = vmul.f32 %v720_v30, %v131_v46 }
  0xe2   :  { %201 = vst.msk [vmem:[#allocation2 + $0x48] sm:$0xff] %vm191_vm3, %v163_v47  ;;  %v224_v51 = vmul.f32 %v720_v30, %v163_v47  ;;  %256 = vst.msk [vmem:[#allocation4 + $0x10] sm:$0xff] %vm191_vm3, %v736_v42  ;;  %v448_v52 = vmul.f32 -1.442695, %v736_v42  ;;  %v456_v53 = vmul.f32 -1.442695, %v739_v43  ;;  %v762_v54 = vadd.f32 %v725_v32, %v218_v44 }
  0xe3   :  { %264 = vst.msk [vmem:[#allocation4 + $0x50] sm:$0xff] %vm191_vm3, %v739_v43  ;;  %v765_v55 = vadd.f32 %v725_v32, %v226_v45  ;;  %254 = vst.msk [vmem:[#allocation4] sm:$0xff] %vm191_vm3, %v746_v48  ;;  %v446_v56 = vmul.f32 -1.442695, %v746_v48  ;;  %v454_v57 = vmul.f32 -1.442695, %v749_v49  ;;  %v774_v58 = vadd.f32 %v725_v32, %v216_v50 }
  0xe4   :  { %262 = vst.msk [vmem:[#allocation4 + $0x40] sm:$0xff] %vm191_vm3, %v749_v49  ;;  %v777_v59 = vadd.f32 %v725_v32, %v224_v51  ;;  %503 = vpow2.f32 %v448_v52  ;;  %257 = vst.msk [vmem:[#allocation4 + $0x18] sm:$0xff] %vm191_vm3, %v762_v54  ;;  %v449_v60 = vmul.f32 -1.442695, %v762_v54 }
  0xe5   :  { %265 = vst.msk [vmem:[#allocation4 + $0x58] sm:$0xff] %vm191_vm3, %v765_v55  ;;  %505 = vpow2.f32 %v456_v53  ;;  %v457_v61 = vmul.f32 -1.442695, %v765_v55  ;;  %255 = vst.msk [vmem:[#allocation4 + $0x8] sm:$0xff] %vm191_vm3, %v774_v58  ;;  %v482_v62 = vpop.f32.mrb[4].mxu0  ;;  %v490_v63 = vpop.f32.mrb[4].mxu1 }
  0xe6   :  { %263 = vst.msk [vmem:[#allocation4 + $0x48] sm:$0xff] %vm191_vm3, %v777_v59  ;;  %507 = vpow2.f32 %v446_v56  ;;  %v447_v0 = vmul.f32 -1.442695, %v774_v58  ;;  %198 = vst.msk [vmem:[#allocation2 + $0x30] sm:$0xff] %vm191_vm3, %v482_v62  ;;  %v221_v1 = vmul.f32 %v482_v62, %v720_v30  ;;  %v229_v2 = vmul.f32 %v490_v63, %v720_v30  ;;  %v144_v3 = vpop.f32.mrb[5].mxu0  ;;  %v176_v4 = vpop.f32.mrb[5].mxu1 }
  0xe7   :  { %206 = vst.msk [vmem:[#allocation2 + $0x70] sm:$0xff] %vm191_vm3, %v490_v63  ;;  %509 = vpow2.f32 %v454_v57  ;;  %v455_v5 = vmul.f32 -1.442695, %v777_v59  ;;  %196 = vst.msk [vmem:[#allocation2 + $0x20] sm:$0xff] %vm191_vm3, %v144_v3  ;;  %v219_v6 = vmul.f32 %v720_v30, %v144_v3  ;;  %v227_v7 = vmul.f32 %v720_v30, %v176_v4  ;;  %v483_v8 = vpop.f32.mrb[6].mxu0  ;;  %v491_v9 = vpop.f32.mrb[6].mxu1 }
  0xe8   :  { %204 = vst.msk [vmem:[#allocation2 + $0x60] sm:$0xff] %vm191_vm3, %v176_v4  ;;  %511 = vpow2.f32 %v449_v60  ;;  %v802_v10 = vadd.f32 %v725_v32, %v221_v1  ;;  %v805_v11 = vadd.f32 %v725_v32, %v229_v2  ;;  %199 = vst.msk [vmem:[#allocation2 + $0x38] sm:$0xff] %vm191_vm3, %v483_v8  ;;  %v222_v12 = vmul.f32 %v483_v8, %v720_v30  ;;  %v147_v13 = vpop.f32.mrb[7].mxu0  ;;  %v179_v14 = vpop.f32.mrb[7].mxu1 }
  0xe9   :  { %207 = vst.msk [vmem:[#allocation2 + $0x78] sm:$0xff] %vm191_vm3, %v491_v9  ;;  %513 = vpow2.f32 %v457_v61  ;;  %v811_v15 = vadd.f32 %v725_v32, %v219_v6  ;;  %v814_v16 = vadd.f32 %v725_v32, %v227_v7  ;;  %v230_v17 = vmul.f32 %v491_v9, %v720_v30  ;;  %197 = vst.msk [vmem:[#allocation2 + $0x28] sm:$0xff] %vm191_vm3, %v147_v13 }
  0xea   :  { %205 = vst.msk [vmem:[#allocation2 + $0x68] sm:$0xff] %vm191_vm3, %v179_v14  ;;  %515 = vpow2.f32 %v447_v0  ;;  %260 = vst.msk [vmem:[#allocation4 + $0x30] sm:$0xff] %vm191_vm3, %v802_v10  ;;  %v452_v18 = vmul.f32 -1.442695, %v802_v10  ;;  %v460_v19 = vmul.f32 -1.442695, %v805_v11  ;;  %v826_v20 = vadd.f32 %v725_v32, %v222_v12 }
  0xeb   :  { %268 = vst.msk [vmem:[#allocation4 + $0x70] sm:$0xff] %vm191_vm3, %v805_v11 }
  0xec   :  { %578 = shalt.err (!%p575_p4)
}
  0xed   :  { %s579_s13 = scalar_lea.hbm %s976_s4, 2048 }
  0xee   :  { %p580_p5 = scmp.ne.s32.totalorder %s976_s4, %s579_s13  ;;  %p583_p6 = scmp.lt.u32.totalorder %s579_s13, %s976_s4 }
  0xf0   :  { %p585_p7 = pnand %p583_p6, %p580_p5 }
  0xf2   :  { %588 = shalt.err (!%p585_p7)
}
  0xf3   :  { %s617_s18 = smov 128   ;;  %s618_s19 = smov 8   ;;  %517 = vpow2.f32 %v455_v5  ;;  %258 = vst.msk [vmem:[#allocation4 + $0x20] sm:$0xff] %vm191_vm3, %v811_v15  ;;  %v450_v21 = vmul.f32 -1.442695, %v811_v15  ;;  %266 = vst.msk [vmem:[#allocation4 + $0x60] sm:$0xff] %vm191_vm3, %v814_v16  ;;  %v855_v23 = vadd.f32 %v725_v32, %v230_v17  ;;  %v220_v25 = vmul.f32 %v720_v30, %v147_v13  ;;  %v504_v27 = vpop.eup %503 }
  0xf4   :  { %409 = dma.vmem_to_hbm [thread:$0]  %s794_s2, 2048, %s976_s4, [#allocation3], %s617_s18, %s617_s18, %s618_s19   ;;  %v458_v22 = vmul.f32 -1.442695, %v814_v16  ;;  %519 = vpow2.f32 %v452_v18  ;;  %261 = vst.msk [vmem:[#allocation4 + $0x38] sm:$0xff] %vm191_vm3, %v826_v20  ;;  %v228_v26 = vmul.f32 %v720_v30, %v179_v14  ;;  %v506_v31 = vpop.eup %505  ;;  %v320_v33 = vadd.f32 1.0, %v504_v27 }
  0xf5   :  { %s619_s22 = smov [#allocation4]   ;;  %v453_v24 = vmul.f32 -1.442695, %v826_v20  ;;  %521 = vpow2.f32 %v460_v19  ;;  %269 = vst.msk [vmem:[#allocation4 + $0x78] sm:$0xff] %vm191_vm3, %v855_v23  ;;  %v865_v28 = vadd.f32 %v725_v32, %v220_v25  ;;  %v508_v34 = vpop.eup %507  ;;  %v328_v35 = vadd.f32 1.0, %v506_v31 }
  0xf6   :  { %s415_s23 = sshll.u32 %s619_s22, 4  ;;  %523 = vpow2.f32 %v450_v21  ;;  %v868_v29 = vadd.f32 %v725_v32, %v228_v26  ;;  %v510_v30 = vpop.eup %509  ;;  %v318_v36 = vadd.f32 1.0, %v508_v34  ;;  %s416_s23 = int_to_ptr.vmem [resolvable:$true] %s415_s23 }
  0xf7   :  { %525 = vpow2.f32 %v458_v22  ;;  %259 = vst.msk [vmem:[#allocation4 + $0x28] sm:$0xff] %vm191_vm3, %v865_v28  ;;  %s589_s4 = scalar_lea.vmem %s416_s23, 2048  ;;  %p594_p9 = scmp.lt.s32.totalorder %s416_s23, %s416_s23 }
  0xf8   :  { %527 = vpow2.f32 %v453_v24  ;;  %267 = vst.msk [vmem:[#allocation4 + $0x68] sm:$0xff] %vm191_vm3, %v868_v29  ;;  %p590_p8 = scmp.ne.s32.totalorder %s416_s23, %s589_s4  ;;  %p595_p10 = scmp.lt.s32.totalorder %s589_s4, %s589_s4 }
  0xf9   :  { %529 = vrcp.f32 %v320_v33 }
  0xfa   :  { %p596_p11 = por %p595_p10, %p594_p9 }
  0xfc   :  { %p597_p12 = pnand %p596_p11, %p590_p8 }
  0xfe   :  { %600 = shalt.err (!%p597_p12)
}
  0xff   :  { %s601_s26 = scalar_lea.hbm %s977_s5, 2048 }
 0x100   :  { %p602_p13 = scmp.ne.s32.totalorder %s977_s5, %s601_s26  ;;  %p605_p0 = scmp.lt.u32.totalorder %s601_s26, %s977_s5 }
 0x102   :  { %p607_p1 = pnand %p605_p0, %p602_p13 }
 0x104   :  { %610 = shalt.err (!%p607_p1)
}
 0x105   :  { %421 = dma.vmem_to_hbm [thread:$0]  %s416_s23, 2048, %s977_s5, [#allocation5], %s617_s18, %s617_s18, %s618_s19   ;;  %v512_v32 = vpop.eup %511  ;;  %531 = vrcp.f32 %v328_v35  ;;  %v326_v37 = vadd.f32 1.0, %v510_v30  ;;  %v461_v62 = vmul.f32 -1.442695, %v855_v23 }
 0x106   :  { %v514_v38 = vpop.eup %513  ;;  %533 = vrcp.f32 %v318_v36  ;;  %v321_v39 = vadd.f32 1.0, %v512_v32  ;;  %v451_v1 = vmul.f32 -1.442695, %v865_v28  ;;  %v459_v4 = vmul.f32 -1.442695, %v868_v29 }
 0x107   :  { %v516_v40 = vpop.eup %515  ;;  %535 = vrcp.f32 %v326_v37  ;;  %v329_v41 = vadd.f32 1.0, %v514_v38 }
 0x108   :  { %v518_v44 = vpop.eup %517  ;;  %537 = vrcp.f32 %v321_v39  ;;  %v319_v45 = vadd.f32 1.0, %v516_v40 }
 0x109   :  { %v520_v46 = vpop.eup %519  ;;  %539 = vrcp.f32 %v329_v41  ;;  %v327_v47 = vadd.f32 1.0, %v518_v44 }
 0x10a   :  { %v522_v50 = vpop.eup %521  ;;  %541 = vrcp.f32 %v319_v45  ;;  %v324_v51 = vadd.f32 1.0, %v520_v46 }
 0x10b   :  { %v524_v52 = vpop.eup %523  ;;  %543 = vrcp.f32 %v327_v47  ;;  %v332_v53 = vadd.f32 1.0, %v522_v50 }
 0x10c   :  { %v526_v56 = vpop.eup %525  ;;  %545 = vrcp.f32 %v324_v51  ;;  %v322_v57 = vadd.f32 1.0, %v524_v52 }
 0x10d   :  { %v528_v60 = vpop.eup %527  ;;  %547 = vrcp.f32 %v332_v53  ;;  %v330_v61 = vadd.f32 1.0, %v526_v56 }
 0x10e   :  { %v530_v63 = vpop.eup %529  ;;  %549 = vrcp.f32 %v322_v57  ;;  %v325_v0 = vadd.f32 1.0, %v528_v60 }
 0x10f   :  { %v532_v2 = vpop.eup %531  ;;  %v368_v3 = vmul.f32 %v530_v63, %v736_v42  ;;  %551 = vrcp.f32 %v330_v61 }
 0x110   :  { %v534_v5 = vpop.eup %533  ;;  %v376_v6 = vmul.f32 %v532_v2, %v739_v43  ;;  %553 = vrcp.f32 %v325_v0 }
 0x111   :  { %v536_v7 = vpop.eup %535  ;;  %384 = vst.msk [vmem:[%s978_s6 + $0x10] sm:$0xff] %vm191_vm3, %v368_v3  ;;  %v366_v8 = vmul.f32 %v534_v5, %v746_v48  ;;  %555 = vpow2.f32 %v461_v62 }
 0x112   :  { %v538_v9 = vpop.eup %537  ;;  %392 = vst.msk [vmem:[%s978_s6 + $0x50] sm:$0xff] %vm191_vm3, %v376_v6  ;;  %v374_v42 = vmul.f32 %v536_v7, %v749_v49  ;;  %557 = vpow2.f32 %v451_v1 }
 0x113   :  { %v540_v43 = vpop.eup %539  ;;  %382 = vst.msk [vmem:[%s978_s6] sm:$0xff] %vm191_vm3, %v366_v8  ;;  %v369_v12 = vmul.f32 %v538_v9, %v762_v54  ;;  %559 = vpow2.f32 %v459_v4 }
 0x114   :  { %v542_v48 = vpop.eup %541  ;;  %390 = vst.msk [vmem:[%s978_s6 + $0x40] sm:$0xff] %vm191_vm3, %v374_v42  ;;  %v377_v13 = vmul.f32 %v540_v43, %v765_v55 }
 0x115   :  { %v544_v14 = vpop.eup %543  ;;  %385 = vst.msk [vmem:[%s978_s6 + $0x18] sm:$0xff] %vm191_vm3, %v369_v12  ;;  %v367_v49 = vmul.f32 %v542_v48, %v774_v58 }
 0x116   :  { %v546_v17 = vpop.eup %545  ;;  %393 = vst.msk [vmem:[%s978_s6 + $0x58] sm:$0xff] %vm191_vm3, %v377_v13  ;;  %v375_v54 = vmul.f32 %v544_v14, %v777_v59 }
 0x117   :  { %v548_v18 = vpop.eup %547  ;;  %383 = vst.msk [vmem:[%s978_s6 + $0x8] sm:$0xff] %vm191_vm3, %v367_v49  ;;  %v372_v55 = vmul.f32 %v546_v17, %v802_v10 }
 0x118   :  { %v550_v19 = vpop.eup %549  ;;  %391 = vst.msk [vmem:[%s978_s6 + $0x48] sm:$0xff] %vm191_vm3, %v375_v54  ;;  %v380_v58 = vmul.f32 %v548_v18, %v805_v11 }
 0x119   :  { %v552_v21 = vpop.eup %551  ;;  %388 = vst.msk [vmem:[%s978_s6 + $0x30] sm:$0xff] %vm191_vm3, %v372_v55  ;;  %v370_v59 = vmul.f32 %v550_v19, %v811_v15 }
 0x11a   :  { %v554_v22 = vpop.eup %553  ;;  %396 = vst.msk [vmem:[%s978_s6 + $0x70] sm:$0xff] %vm191_vm3, %v380_v58  ;;  %v378_v10 = vmul.f32 %v552_v21, %v814_v16 }
 0x11b   :  { %v556_v24 = vpop.eup %555  ;;  %386 = vst.msk [vmem:[%s978_s6 + $0x20] sm:$0xff] %vm191_vm3, %v370_v59  ;;  %v373_v11 = vmul.f32 %v554_v22, %v826_v20 }
 0x11c   :  { %v558_v25 = vpop.eup %557  ;;  %394 = vst.msk [vmem:[%s978_s6 + $0x60] sm:$0xff] %vm191_vm3, %v378_v10  ;;  %v333_v15 = vadd.f32 1.0, %v556_v24 }
 0x11d   :  { %v560_v26 = vpop.eup %559  ;;  %389 = vst.msk [vmem:[%s978_s6 + $0x38] sm:$0xff] %vm191_vm3, %v373_v11  ;;  %v323_v16 = vadd.f32 1.0, %v558_v25 }
 0x11e   :  { %561 = vrcp.f32 %v333_v15  ;;  %v331_v27 = vadd.f32 1.0, %v560_v26 }
 0x11f   :  { %563 = vrcp.f32 %v323_v16 }
 0x120   :  { %565 = vrcp.f32 %v331_v27 }
 0x128   :  { %v562_v31 = vpop.eup %561 }
 0x129   :  { %v564_v20 = vpop.eup %563  ;;  %v381_v33 = vmul.f32 %v562_v31, %v855_v23 }
 0x12a   :  { %v566_v34 = vpop.eup %565  ;;  %v371_v35 = vmul.f32 %v564_v20, %v865_v28 }
 0x12b   :  { %397 = vst.msk [vmem:[%s978_s6 + $0x78] sm:$0xff] %vm191_vm3, %v381_v33  ;;  %v379_v30 = vmul.f32 %v566_v34, %v868_v29 }
 0x12c   :  { %387 = vst.msk [vmem:[%s978_s6 + $0x28] sm:$0xff] %vm191_vm3, %v371_v35 }
 0x12d   :  { %395 = vst.msk [vmem:[%s978_s6 + $0x68] sm:$0xff] %vm191_vm3, %v379_v30 }
 0x12e   :  { %611 = dma.done.wait [#allocation3], 2048  }
 0x12f   :  { %612 = vsyncadd [#allocation3], 4294965248 }
 0x130   :  { %613 = dma.done.wait [#allocation5], 2048  }
 0x131   :  { %614 = vsyncadd [#allocation5], 4294965248 }
 0x132   :  { %432 = vsyncpa [#allocation3], 1 }
 0x133   :  { %433 = vsyncpa [#allocation5], 1 }

// kernel: encoder_forward.8
= control target key start
LH: loop header
LB: loop body
LE: loop exit
PB: predicated region body
PF: predicated region fallthrough
CT: control target
= control target key end

     0   :  { %vm61_vm0 = vcmask 1043456   ;;  %vm54_vm1 = vcmask 195584   ;;  %vm164_vm2 = vcmask 390144   ;;  %v541_v9 = vmov 0.0   ;;  %s726_s1 = inlined_call_operand.vmem [shape: bf16[24,48], index: 1, kind: input, shape index: {}]   ;;  %s727_s0 = inlined_call_operand.vmem [shape: f32[32,24], index: 0, kind: input, shape index: {}]   ;;  %s728_s7 = inlined_call_operand.vmem [shape: bf16[48,32], index: 7, kind: input, shape index: {}]   ;;  %s729_s2 = inlined_call_operand.vmem [shape: f32[1,48], index: 2, kind: input, shape index: {}]   ;;  %s730_s3 = inlined_call_operand.vmem [shape: f32[1,48], index: 3, kind: input, shape index: {}]   ;;  %s731_s4 = inlined_call_operand.vmem [shape: f32[9,48], index: 4, kind: input, shape index: {}]   ;;  %s732_s5 = inlined_call_operand.vmem [shape: f32[1,48], index: 5, kind: input, shape index: {}]   ;;  %s733_s6 = inlined_call_operand.vmem [shape: f32[1,48], index: 6, kind: input, shape index: {}]   ;;  %s734_s8 = inlined_call_operand.vmem [shape: f32[1,32], index: 8, kind: input, shape index: {}]   ;;  %s735_s9 = inlined_call_operand.vmem [shape: f32[1,32], index: 9, kind: input, shape index: {}]   ;;  %s736_s10 = inlined_call_operand.vmem [shape: f32[8,32], index: 10, kind: output, shape index: {}]  }
   0x1   :  { %v516_v0 = vld [vmem:[%s726_s1] sm:$0xff]   ;;  %v517_v1 = vld [vmem:[%s726_s1 + $0x8] ss:$0 sps:$4 sm:$0xff]   ;;  %v38_v5 = vld [vmem:[%s727_s0 + $0x10] sm:$0xff]  ;;  %171 = vst.msk [vmem:[#allocation2 + $0x30] sm:$0x3f] %vm164_vm2, %v541_v9  ;;  %503 = vmatprep.subr.bf16.mxu1 %v541_v9  ;;  %v198_v31 = vlaneseq }
   0x2   :  { %v36_v2 = vld [vmem:[%s727_s0] sm:$0xff]  ;;  %v37_v3 = vld [vmem:[%s727_s0 + $0x8] sm:$0xff]  ;;  %495 = vmatprep.subr.bf16.mxu0 %v516_v0  ;;  %v39_v6 = vld [vmem:[%s727_s0 + $0x18] sm:$0xff]  ;;  %v63_v7 = vsel %vm61_vm0, %v517_v1, 0  ;;  %172 = vst.msk [vmem:[#allocation2 + $0x38] sm:$0x3f] %vm164_vm2, %v541_v9 }
   0x3   :  { %v40_v4 = vpack.c.bf16 %v37_v3, %v36_v2  ;;  %496 = vmatpush3.bf16.msra.mxu0 %v516_v0  ;;  %v41_v8 = vpack.c.bf16 %v39_v6, %v38_v5  ;;  %173 = vst.msk [vmem:[#allocation2 + $0x40] sm:$0x3f] %vm164_vm2, %v541_v9  ;;  %165 = vst.msk [vmem:[#allocation2] sm:$0x3f] %vm164_vm2, %v541_v9  ;;  %v518_v10 = vld [vmem:[%s728_s7] sm:$0xff]   ;;  %vm542_vm3 = vmmov 0  }
   0x4   :  { %513 = vmatprep.subr.msk.bf16.mxu0 %vm61_vm0, %v517_v1  ;;  %166 = vst.msk [vmem:[#allocation2 + $0x8] sm:$0x3f] %vm164_vm2, %v541_v9  ;;  %167 = vst.msk [vmem:[#allocation2 + $0x10] sm:$0x3f] %vm164_vm2, %v541_v9  ;;  %509 = vmatprep.mubr.msk.bf16.mxu1 %vm542_vm3, %v541_v9  ;;  %v519_v11 = vld [vmem:[%s728_s7 + $0x8] sm:$0xff]   ;;  %v520_v12 = vld [vmem:[%s728_s7 + $0x10] sm:$0xff]  }
   0x5   :  { %499 = vmatprep.mubr.msk.bf16.mxu0 %vm54_vm1, %v40_v4  ;;  %168 = vst.msk [vmem:[#allocation2 + $0x18] sm:$0x3f] %vm164_vm2, %v541_v9  ;;  %169 = vst.msk [vmem:[#allocation2 + $0x20] sm:$0x3f] %vm164_vm2, %v541_v9  ;;  %504 = vmatpush3.bf16.msra.mxu1 %v518_v10  ;;  %v471_v13 = vld [vmem:[%s729_s2] ss:$0 sm:$0xff] }
   0x6   :  { %174 = vst.msk [vmem:[#allocation2 + $0x48] sm:$0x3f] %vm164_vm2, %v541_v9  ;;  %175 = vst.msk [vmem:[#allocation2 + $0x50] sm:$0x3f] %vm164_vm2, %v541_v9  ;;  %505 = vmatprep.subr.bf16.mxu1 %v541_v9  ;;  %v472_v15 = vld [vmem:[%s730_s3] ss:$0 sm:$0xff] }
   0x7   :  { %498 = vmatpush3.bf16.msra.mxu0 %v63_v7  ;;  %v631_v36 = vshrl.u32 %v198_v31, 7  ;;  %v195_v43 = vld [vmem:[%s731_s4] sm:$0xff]  ;;  %vm178_vm4 = vcmask 388096   ;;  %vm181_vm5 = vcmask 392196   ;;  %vm260_vm6 = vcmask 385024  }
   0x8   :  { %v294_v47 = vld [vmem:[#allocation2 + $0x30] sm:$0xf]  ;;  %vm262_vm7 = vcmask 387074   ;;  %vm401_vm8 = vcmask 392192   ;;  %vm461_vm9 = vcmask 261120  }
   0x9   :  { %506 = vmatpush3.bf16.msra.mxu1 %v519_v11  ;;  %v200_v41 = vsub.s32 0, %v631_v36  ;;  %v207_v42 = vsub.s32 1, %v631_v36  ;;  %v214_v46 = vsub.s32 2, %v631_v36  ;;  %v297_v48 = vld [vmem:[#allocation2 + $0x31] sm:$0xf]  ;;  %v221_v61 = vsub.s32 3, %v631_v36 }
   0xa   :  { %500 = vmatmul.mubr.msk.bf16.vlgmr.msra.gmra.mrb[0].mxu0 %vm54_vm1, %v41_v8  ;;  %507 = vmatprep.subr.bf16.mxu1 %v541_v9  ;;  %v197_v55 = vld [vmem:[#allocation2] sm:$0xf]  ;;  %v300_v58 = vld [vmem:[#allocation2 + $0x32] sm:$0xf]  ;;  %v228_v2 = vsub.s32 4, %v631_v36  ;;  %v235_v7 = vsub.s32 5, %v631_v36 }
   0xb   :  { %v638_v44 = vrot.slane %v195_v43, %v200_v41  ;;  %v640_v45 = vrot.slane %v195_v43, %v207_v42  ;;  %v643_v52 = vrot.slane %v195_v43, %v214_v46  ;;  %v204_v56 = vld [vmem:[#allocation2 + $0x1] sm:$0xf]  ;;  %v660_v6 = vrot.slane %v195_v43, %v221_v61 }
   0xc   :  { %v211_v5 = vld [vmem:[#allocation2 + $0x2] sm:$0xf]  ;;  %v242_v8 = vsub.s32 6, %v631_v36  ;;  %v665_v11 = vrot.slane %v195_v43, %v228_v2 }
   0xd   :  { %508 = vmatpush3.bf16.msra.mxu1 %v520_v12  ;;  %v295_v53 = vmul.f32 %v294_v47, %v638_v44  ;;  %v298_v54 = vmul.f32 %v297_v48, %v640_v45  ;;  %v202_v63 = vmul.f32 %v638_v44, %v197_v55  ;;  %v209_v0 = vmul.f32 %v640_v45, %v204_v56 }
   0xe   :  { %v301_v4 = vmul.f32 %v300_v58, %v643_v52  ;;  %v216_v10 = vmul.f32 %v643_v52, %v211_v5 }
   0xf   :  { %v299_v3 = vadd.f32 %v298_v54, %v295_v53  ;;  %v210_v9 = vadd.f32 %v209_v0, %v202_v63 }
  0x11   :  { %v302_v12 = vadd.f32 %v301_v4, %v299_v3 }
  0xdd   :  { %v501_v14 = vpop.f32.mrb[0].mxu0 }
  0xde   :  { %v123_v16 = vmul.f32 %v501_v14, %v471_v13  ;;  %v99_v17 = vpop.f32.mrb[1].mxu0 }
  0xdf   :  { %v121_v18 = vmul.f32 %v471_v13, %v99_v17  ;;  %v502_v19 = vpop.f32.mrb[2].mxu0 }
  0xe0   :  { %v134_v20 = vadd.f32 %v472_v15, %v123_v16  ;;  %v124_v21 = vmul.f32 %v502_v19, %v471_v13  ;;  %v102_v22 = vpop.f32.mrb[3].mxu0  ;;  %v668_v16 = vrot.slane %v195_v43, %v235_v7  ;;  %v671_v19 = vrot.slane %v195_v43, %v242_v8 }
  0xe1   :  { %v132_v23 = vadd.f32 %v472_v15, %v121_v18  ;;  %v122_v24 = vmul.f32 %v471_v13, %v102_v22  ;;  %v249_v13 = vsub.s32 7, %v631_v36 }
  0xe2   :  { %v475_v25 = vmul.f32 -1.442695, %v134_v20  ;;  %v135_v26 = vadd.f32 %v472_v15, %v124_v21 }
  0xe3   :  { %v473_v27 = vmul.f32 -1.442695, %v132_v23  ;;  %v133_v28 = vadd.f32 %v472_v15, %v122_v24 }
  0xe4   :  { %521 = vpow2.f32 %v475_v25  ;;  %v476_v29 = vmul.f32 -1.442695, %v135_v26 }
  0xe5   :  { %523 = vpow2.f32 %v473_v27  ;;  %v474_v30 = vmul.f32 -1.442695, %v133_v28 }
  0xe6   :  { %525 = vpow2.f32 %v476_v29 }
  0xe7   :  { %527 = vpow2.f32 %v474_v30  ;;  %v676_v30 = vrot.slane %v195_v43, %v249_v13 }
  0xee   :  { %v522_v32 = vpop.eup %521 }
  0xef   :  { %v524_v33 = vpop.eup %523  ;;  %v150_v34 = vadd.f32 1.0, %v522_v32 }
  0xf0   :  { %v526_v35 = vpop.eup %525  ;;  %v148_v37 = vadd.f32 1.0, %v524_v33 }
  0xf1   :  { %v528_v38 = vpop.eup %527  ;;  %529 = vrcp.f32 %v150_v34  ;;  %v151_v39 = vadd.f32 1.0, %v526_v35 }
  0xf2   :  { %531 = vrcp.f32 %v148_v37  ;;  %v149_v40 = vadd.f32 1.0, %v528_v38 }
  0xf3   :  { %533 = vrcp.f32 %v151_v39 }
  0xf4   :  { %535 = vrcp.f32 %v149_v40 }
  0xfb   :  { %v530_v49 = vpop.eup %529 }
  0xfc   :  { %v532_v50 = vpop.eup %531  ;;  %v162_v51 = vmul.f32 %v530_v49, %v134_v20 }
  0xfd   :  { %v534_v57 = vpop.eup %533  ;;  %v160_v59 = vmul.f32 %v532_v50, %v132_v23  ;;  %v217_v23 = vadd.f32 %v216_v10, %v210_v9  ;;  %v477_v50 = vld [vmem:[%s731_s4 + $0x8] ss:$0 sm:$0xff] }
  0xfe   :  { %v536_v60 = vpop.eup %535  ;;  %188 = vst.msk [vmem:[#allocation2 + $0x39] sm:$0xf] %vm178_vm4, %v162_v51  ;;  %v163_v62 = vmul.f32 %v534_v57, %v135_v26 }
  0xff   :  { %190 = vst.msk [vmem:[#allocation2 + $0x3d] sm:$0xf0] %vm181_vm5, %v162_v51  ;;  %182 = vst.msk [vmem:[#allocation2 + $0xd] sm:$0xf0] %vm181_vm5, %v160_v59  ;;  %v161_v1 = vmul.f32 %v536_v60, %v133_v28 }
 0x100   :  { %179 = vst.msk [vmem:[#allocation2 + $0x9] sm:$0xf] %vm178_vm4, %v160_v59  ;;  %192 = vst.msk [vmem:[#allocation2 + $0x49] sm:$0xf] %vm178_vm4, %v163_v62 }
 0x101   :  { %194 = vst.msk [vmem:[#allocation2 + $0x4d] sm:$0xf0] %vm181_vm5, %v163_v62  ;;  %186 = vst.msk [vmem:[#allocation2 + $0x1d] sm:$0xf0] %vm181_vm5, %v161_v1 }
 0x102   :  { %184 = vst.msk [vmem:[#allocation2 + $0x19] sm:$0xf] %vm178_vm4, %v161_v1 }
 0x105   :  { %v303_v14 = vld [vmem:[#allocation2 + $0x38] sm:$0xf] }
 0x106   :  { %v306_v15 = vld [vmem:[#allocation2 + $0x39] sm:$0xf]  ;;  %v304_v17 = vmul.f32 %v303_v14, %v660_v6  ;;  %v323_v20 = vld [vmem:[#allocation2 + $0x40] sm:$0xf]  ;;  %v264_v38 = vld [vmem:[#allocation2 + $0x10] sm:$0xf] }
 0x107   :  { %v309_v18 = vld [vmem:[#allocation2 + $0x3a] sm:$0xf]  ;;  %v326_v21 = vld [vmem:[#allocation2 + $0x41] sm:$0xf]  ;;  %v307_v25 = vmul.f32 %v306_v15, %v665_v11  ;;  %v324_v26 = vmul.f32 %v323_v20, %v638_v44  ;;  %v218_v28 = vld [vmem:[#allocation2 + $0x8] sm:$0xf]  ;;  %v265_v46 = vmul.f32 %v264_v38, %v638_v44 }
 0x108   :  { %v329_v22 = vld [vmem:[#allocation2 + $0x42] sm:$0xf]  ;;  %v305_v24 = vadd.f32 %v304_v17, %v302_v12  ;;  %v327_v27 = vmul.f32 %v326_v21, %v640_v45  ;;  %v225_v29 = vld [vmem:[#allocation2 + $0x9] sm:$0xf]  ;;  %v223_v32 = vmul.f32 %v660_v6, %v218_v28  ;;  %v310_v35 = vmul.f32 %v309_v18, %v668_v16  ;;  %v267_v39 = vld [vmem:[#allocation2 + $0x11] sm:$0xf] }
 0x109   :  { %v312_v31 = vld [vmem:[#allocation2 + $0x40] sm:$0xf]  ;;  %v232_v33 = vld [vmem:[#allocation2 + $0xa] sm:$0xf]  ;;  %v330_v37 = vmul.f32 %v329_v22, %v643_v52  ;;  %v270_v40 = vld [vmem:[#allocation2 + $0x12] sm:$0xf]  ;;  %v230_v43 = vmul.f32 %v665_v11, %v225_v29  ;;  %v268_v47 = vmul.f32 %v267_v39, %v640_v45 }
 0x10a   :  { %v308_v34 = vadd.f32 %v307_v25, %v305_v24  ;;  %v328_v36 = vadd.f32 %v327_v27, %v324_v26  ;;  %v315_v41 = vld [vmem:[#allocation2 + $0x41] sm:$0xf]  ;;  %v224_v42 = vadd.f32 %v223_v32, %v217_v23  ;;  %v332_v48 = vld [vmem:[#allocation2 + $0x48] sm:$0xf]  ;;  %v313_v53 = vmul.f32 %v312_v31, %v671_v19  ;;  %v239_v55 = vld [vmem:[#allocation2 + $0x10] sm:$0xf] }
 0x10b   :  { %v335_v49 = vld [vmem:[#allocation2 + $0x49] sm:$0xf]  ;;  %v333_v56 = vmul.f32 %v332_v48, %v660_v6  ;;  %v318_v57 = vld [vmem:[#allocation2 + $0x42] sm:$0xf]  ;;  %v237_v59 = vmul.f32 %v668_v16, %v232_v33  ;;  %v269_v44 = vadd.f32 %v268_v47, %v265_v46  ;;  %v271_v45 = vmul.f32 %v270_v40, %v643_v52  ;;  %v273_v61 = vld [vmem:[#allocation2 + $0x18] sm:$0xf] }
 0x10c   :  { %v311_v51 = vadd.f32 %v310_v35, %v308_v34  ;;  %v331_v54 = vadd.f32 %v330_v37, %v328_v36  ;;  %v231_v58 = vadd.f32 %v230_v43, %v224_v42  ;;  %v338_v60 = vld [vmem:[#allocation2 + $0x4a] sm:$0xf]  ;;  %v316_v63 = vmul.f32 %v315_v41, %v676_v30  ;;  %v246_v0 = vld [vmem:[#allocation2 + $0x11] sm:$0xf]  ;;  %v276_v3 = vld [vmem:[#allocation2 + $0x19] sm:$0xf] }
 0x10d   :  { %v336_v2 = vmul.f32 %v335_v49, %v665_v11  ;;  %v244_v5 = vmul.f32 %v671_v19, %v239_v55  ;;  %v272_v7 = vadd.f32 %v271_v45, %v269_v44  ;;  %v341_v8 = vld [vmem:[#allocation2 + $0x50] sm:$0xf]  ;;  %v274_v9 = vmul.f32 %v273_v61, %v660_v6  ;;  %v279_v15 = vld [vmem:[#allocation2 + $0x1a] sm:$0xf]  ;;  %v282_v26 = vld [vmem:[#allocation2 + $0x20] sm:$0xf] }
 0x10e   :  { %v314_v62 = vadd.f32 %v313_v53, %v311_v51  ;;  %v334_v1 = vadd.f32 %v333_v56, %v331_v54  ;;  %v238_v4 = vadd.f32 %v237_v59, %v231_v58  ;;  %v319_v12 = vmul.f32 %v477_v50, %v318_v57  ;;  %v253_v52 = vld [vmem:[#allocation2 + $0x12] sm:$0xf]  ;;  %v285_v34 = vld [vmem:[#allocation2 + $0x21] sm:$0xf]  ;;  %v479_v47 = vld [vmem:[%s733_s6] ss:$0 sm:$0xff] }
 0x10f   :  { %v339_v14 = vmul.f32 %v338_v60, %v668_v16  ;;  %v251_v18 = vmul.f32 %v676_v30, %v246_v0  ;;  %v344_v20 = vld [vmem:[#allocation2 + $0x51] sm:$0xf]  ;;  %v275_v21 = vadd.f32 %v274_v9, %v272_v7  ;;  %v277_v22 = vmul.f32 %v276_v3, %v665_v11  ;;  %v288_v39 = vld [vmem:[#allocation2 + $0x22] sm:$0xf]  ;;  %v485_v57 = vld [vmem:[%s734_s8] ss:$0 sm:$0xff] }
 0x110   :  { %v317_v10 = vadd.f32 %v316_v63, %v314_v62  ;;  %v337_v13 = vadd.f32 %v336_v2, %v334_v1  ;;  %v245_v17 = vadd.f32 %v244_v5, %v238_v4  ;;  %v342_v25 = vmul.f32 %v341_v8, %v671_v19  ;;  %v347_v28 = vld [vmem:[#allocation2 + $0x52] sm:$0xf]  ;;  %v486_v59 = vld [vmem:[%s735_s9] ss:$0 sm:$0xff] }
 0x111   :  { %v258_v27 = vmul.f32 %v477_v50, %v253_v52  ;;  %v278_v29 = vadd.f32 %v277_v22, %v275_v21  ;;  %v280_v31 = vmul.f32 %v279_v15, %v668_v16  ;;  %v345_v33 = vmul.f32 %v344_v20, %v676_v30 }
 0x112   :  { %v320_v23 = vadd.f32 %v319_v12, %v317_v10  ;;  %v340_v24 = vadd.f32 %v339_v14, %v337_v13  ;;  %v252_v6 = vadd.f32 %v251_v18, %v245_v17  ;;  %v283_v36 = vmul.f32 %v282_v26, %v671_v19  ;;  %v478_v19 = vld [vmem:[%s732_s5] ss:$0 sm:$0xff] }
 0x113   :  { %v281_v35 = vadd.f32 %v280_v31, %v278_v29  ;;  %v348_v38 = vmul.f32 %v477_v50, %v347_v28  ;;  %v286_v41 = vmul.f32 %v285_v34, %v676_v30  ;;  %v289_v43 = vmul.f32 %v477_v50, %v288_v39 }
 0x114   :  { %v343_v32 = vadd.f32 %v342_v25, %v340_v24  ;;  %321 = vst.msk [vmem:[#allocation3 + $0x4] sm:$0x1] %vm260_vm6, %v320_v23  ;;  %v259_v11 = vadd.f32 %v258_v27, %v252_v6 }
 0x115   :  { %322 = vst.msk [vmem:[#allocation3 + $0x3] sm:$0x4] %vm262_vm7, %v320_v23  ;;  %v284_v40 = vadd.f32 %v283_v36, %v281_v35 }
 0x116   :  { %v346_v37 = vadd.f32 %v345_v33, %v343_v32  ;;  %261 = vst.msk [vmem:[#allocation3] sm:$0x1] %vm260_vm6, %v259_v11 }
 0x117   :  { %263 = vst.msk [vmem:[#allocation3 - $0x1] sm:$0x4] %vm262_vm7, %v259_v11  ;;  %v287_v42 = vadd.f32 %v286_v41, %v284_v40 }
 0x118   :  { %v349_v16 = vadd.f32 %v348_v38, %v346_v37 }
 0x119   :  { %v290_v46 = vadd.f32 %v289_v43, %v287_v42 }
 0x11a   :  { %350 = vst.msk [vmem:[#allocation3 + $0x6] sm:$0x1] %vm260_vm6, %v349_v16 }
 0x11b   :  { %351 = vst.msk [vmem:[#allocation3 + $0x5] sm:$0x4] %vm262_vm7, %v349_v16  ;;  %292 = vst.msk [vmem:[#allocation3 + $0x1] sm:$0x4] %vm262_vm7, %v290_v46 }
 0x11c   :  { %291 = vst.msk [vmem:[#allocation3 + $0x2] sm:$0x1] %vm260_vm6, %v290_v46 }
 0x123   :  { %v352_v30 = vld [vmem:[#allocation3] sm:$0xff] }
 0x124   :  { %v360_v48 = vmul.f32 %v478_v19, %v352_v30 }
 0x126   :  { %v368_v49 = vadd.f32 %v479_v47, %v360_v48 }
 0x128   :  { %v480_v50 = vmul.f32 -1.442695, %v368_v49 }
 0x12a   :  { %537 = vpow2.f32 %v480_v50 }
 0x134   :  { %v538_v51 = vpop.eup %537 }
 0x135   :  { %v372_v53 = vadd.f32 1.0, %v538_v51 }
 0x137   :  { %539 = vrcp.f32 %v372_v53 }
 0x141   :  { %v540_v54 = vpop.eup %539 }
 0x142   :  { %v375_v55 = vmul.f32 %v540_v54, %v368_v49 }
 0x144   :  { %v376_v56 = vpack.c.bf16 %v375_v55, %v375_v55 }
 0x146   :  { %510 = vmatmul.mubr.msk.bf16.vlgmr.msra.gmra.mrb[0].mxu1 %vm401_vm8, %v376_v56 }
 0x219   :  { %v439_v58 = vpop.f32.mrb[0].mxu1 }
 0x21a   :  { %v452_v44 = vmul.f32 %v485_v57, %v439_v58  ;;  %v511_v45 = vpop.f32.mrb[1].mxu1 }
 0x21b   :  { %v442_v60 = vpop.f32.mrb[2].mxu1 }
 0x21c   :  { %v460_v61 = vadd.f32 %v486_v59, %v452_v44  ;;  %v512_v62 = vpop.f32.mrb[3].mxu1 }
 0x21e   :  { %462 = vst.msk [vmem:[%s736_s10] sm:$0xff] %vm461_vm9, %v460_v61 }

// kernel: encoder_forward.9
= control target key start
LH: loop header
LB: loop body
LE: loop exit
PB: predicated region body
PF: predicated region fallthrough
CT: control target
= control target key end

     0   :  { %12 = vsyncpa [#allocation3], 0  ;;  %v219_v1 = vmov 0.0   ;;  %vm220_vm0 = vmmov 0   ;;  %s303_s0 = inlined_call_operand.vmem [shape: f32[8,32], index: 0, kind: input, shape index: {}]   ;;  %s304_s1 = inlined_call_operand.vmem [shape: bf16[32,64], index: 1, kind: input, shape index: {}]   ;;  %s305_s2 = inlined_call_operand.vmem [shape: f32[1,64], index: 2, kind: input, shape index: {}]   ;;  %s306_s3 = inlined_call_operand.vmem [shape: f32[1,64], index: 3, kind: input, shape index: {}]   ;;  %s307_s4 = inlined_call_operand.hbm [shape: f32[8,64], index: 4, kind: output, shape index: {0}]   ;;  %s308_s5 = inlined_call_operand.hbm [shape: f32[8,64], index: 5, kind: output, shape index: {1}]   ;;  %s309_s6 = inlined_call_operand.vmem [shape: f32[8,64], index: 6, kind: output, shape index: {2}]  }
   0x1   :  { %v165_v0 = vld [vmem:[%s304_s1] sm:$0xff]   ;;  %153 = vmatprep.subr.bf16.mxu0 %v219_v1  ;;  %v166_v2 = vld [vmem:[%s304_s1 + $0x8] sm:$0xff]   ;;  %157 = vmatprep.mubr.msk.bf16.mxu0 %vm220_vm0, %v219_v1 }
   0x2   :  { %154 = vmatpush3.bf16.msra.mxu0 %v165_v0  ;;  %v23_v3 = vld [vmem:[%s303_s0] sm:$0xff] }
   0x3   :  { %13 = vsyncpa [#allocation5], 0  ;;  %155 = vmatprep.subr.bf16.mxu0 %v219_v1  ;;  %v24_v4 = vpack.c.bf16 %v23_v3, %v23_v3  ;;  %vm41_vm1 = vcmask 261120   ;;  %s221_s27 = smov [#allocation2]   ;;  %v147_v5 = vld [vmem:[%s305_s2] ss:$0 sm:$0xff] }
   0x4   :  { %s118_s28 = sshll.u32 %s221_s27, 4  ;;  %vm85_vm2 = vcmask 523264   ;;  %v148_v7 = vld [vmem:[%s306_s3] ss:$0 sm:$0xff]  ;;  %s222_s0 = smov [#allocation4]   ;;  %s119_s28 = int_to_ptr.vmem [resolvable:$true] %s118_s28 }
   0x5   :  { %s128_s8 = sshll.u32 %s222_s0, 4  ;;  %s171_s9 = scalar_lea.vmem %s119_s28, 128  ;;  %s129_s8 = int_to_ptr.vmem [resolvable:$true] %s128_s8 }
   0x6   :  { %156 = vmatpush3.bf16.msra.mxu0 %v166_v2  ;;  %p172_p0 = scmp.ne.s32.totalorder %s119_s28, %s171_s9  ;;  %p176_p1 = scmp.lt.s32.totalorder %s119_s28, %s119_s28 }
   0x7   :  { %p177_p2 = scmp.lt.s32.totalorder %s171_s9, %s171_s9 }
   0x9   :  { %158 = vmatmul.mubr.msk.bf16.vlgmr.msra.gmra.mrb[0].mxu0 %vm41_vm1, %v24_v4  ;;  %p178_p3 = por %p177_p2, %p176_p1 }
   0xb   :  { %p179_p4 = pnand %p178_p3, %p172_p0 }
  0xdc   :  { %v79_v6 = vpop.f32.mrb[0].mxu0 }
  0xdd   :  { %v94_v8 = vmul.f32 %v147_v5, %v79_v6  ;;  %v159_v9 = vpop.f32.mrb[1].mxu0  ;;  %86 = vst.msk [vmem:[#allocation2] sm:$0xff] %vm85_vm2, %v79_v6 }
  0xde   :  { %v82_v10 = vpop.f32.mrb[2].mxu0 }
  0xdf   :  { %182 = shalt.err (!%p179_p4)
}
  0xe0   :  { %s183_s11 = scalar_lea.hbm %s307_s4, 128 }
  0xe1   :  { %p184_p5 = scmp.ne.s32.totalorder %s307_s4, %s183_s11  ;;  %p187_p6 = scmp.lt.u32.totalorder %s183_s11, %s307_s4 }
  0xe3   :  { %p189_p7 = pnand %p187_p6, %p184_p5 }
  0xe5   :  { %192 = shalt.err (!%p189_p7)
}
  0xe6   :  { %121 = dma.vmem_to_hbm [thread:$0]  %s119_s28, 128, %s307_s4, [#allocation3]   ;;  %v102_v11 = vadd.f32 %v148_v7, %v94_v8  ;;  %v160_v12 = vpop.f32.mrb[3].mxu0 }
  0xe7   :  { %s193_s17 = scalar_lea.vmem %s129_s8, 128  ;;  %p198_p9 = scmp.lt.s32.totalorder %s129_s8, %s129_s8 }
  0xe8   :  { %v149_v13 = vmul.f32 -1.442695, %v102_v11  ;;  %103 = vst.msk [vmem:[#allocation4] sm:$0xff] %vm85_vm2, %v102_v11  ;;  %p194_p8 = scmp.ne.s32.totalorder %s129_s8, %s193_s17  ;;  %p199_p10 = scmp.lt.s32.totalorder %s193_s17, %s193_s17 }
  0xea   :  { %p200_p11 = por %p199_p10, %p198_p9 }
  0xec   :  { %p201_p12 = pnand %p200_p11, %p194_p8 }
  0xee   :  { %204 = shalt.err (!%p201_p12)
}
  0xef   :  { %s205_s20 = scalar_lea.hbm %s308_s5, 128 }
  0xf0   :  { %p206_p13 = scmp.ne.s32.totalorder %s308_s5, %s205_s20  ;;  %p209_p0 = scmp.lt.u32.totalorder %s205_s20, %s308_s5 }
  0xf2   :  { %p211_p1 = pnand %p209_p0, %p206_p13 }
  0xf4   :  { %214 = shalt.err (!%p211_p1)
}
  0xf5   :  { %131 = dma.vmem_to_hbm [thread:$0]  %s129_s8, 128, %s308_s5, [#allocation5]   ;;  %167 = vpow2.f32 %v149_v13 }
  0xff   :  { %v168_v14 = vpop.eup %167 }
 0x100   :  { %v107_v15 = vadd.f32 1.0, %v168_v14 }
 0x102   :  { %169 = vrcp.f32 %v107_v15 }
 0x10c   :  { %v170_v16 = vpop.eup %169 }
 0x10d   :  { %v110_v17 = vmul.f32 %v170_v16, %v102_v11 }
 0x10f   :  { %111 = vst.msk [vmem:[%s309_s6] sm:$0xff] %vm85_vm2, %v110_v17 }
 0x110   :  { %215 = dma.done.wait [#allocation3], 128  }
 0x111   :  { %216 = vsyncadd [#allocation3], 4294967168 }
 0x112   :  { %217 = dma.done.wait [#allocation5], 128  }
 0x113   :  { %218 = vsyncadd [#allocation5], 4294967168 }
 0x114   :  { %142 = vsyncpa [#allocation3], 1 }
 0x115   :  { %143 = vsyncpa [#allocation5], 1 }

// kernel: encoder_forward.6
= control target key start
LH: loop header
LB: loop body
LE: loop exit
PB: predicated region body
PF: predicated region fallthrough
CT: control target
= control target key end

     0   :  { %vm68_vm0 = vcmask 130048   ;;  %vm348_vm1 = vcmask 261120   ;;  %vm350_vm2 = vcmask 254976   ;;  %v1575_v25 = vmov 0.0   ;;  %s2514_s1 = inlined_call_operand.vmem [shape: bf16[16,32], index: 1, kind: input, shape index: {}]   ;;  %s2515_s0 = inlined_call_operand.vmem [shape: f32[128,16], index: 0, kind: input, shape index: {}]   ;;  %s2516_s7 = inlined_call_operand.vmem [shape: bf16[32,16], index: 7, kind: input, shape index: {}]   ;;  %s2517_s2 = inlined_call_operand.vmem [shape: f32[1,32], index: 2, kind: input, shape index: {}]   ;;  %s2518_s3 = inlined_call_operand.vmem [shape: f32[1,32], index: 3, kind: input, shape index: {}]   ;;  %s2519_s4 = inlined_call_operand.vmem [shape: f32[9,32], index: 4, kind: input, shape index: {}]   ;;  %s2520_s5 = inlined_call_operand.vmem [shape: f32[1,32], index: 5, kind: input, shape index: {}]   ;;  %s2521_s6 = inlined_call_operand.vmem [shape: f32[1,32], index: 6, kind: input, shape index: {}]   ;;  %s2522_s8 = inlined_call_operand.vmem [shape: f32[1,16], index: 8, kind: input, shape index: {}]   ;;  %s2523_s9 = inlined_call_operand.vmem [shape: f32[1,16], index: 9, kind: input, shape index: {}]   ;;  %s2524_s10 = inlined_call_operand.vmem [shape: f32[128,16], index: 10, kind: output, shape index: {}]  }
   0x1   :  { %v1428_v0 = vld [vmem:[%s2514_s1] sm:$0xff]   ;;  %v37_v2 = vld [vmem:[%s2515_s0 + $0x8] sm:$0xff]  ;;  %v38_v3 = vld [vmem:[%s2515_s0 + $0x10] sm:$0xff]  ;;  %356 = vst.msk [vmem:[#allocation2 + $0x30] sm:$0xff] %vm348_vm1, %v1575_v25  ;;  %v425_v58 = vlaneseq }
   0x2   :  { %v36_v1 = vld [vmem:[%s2515_s0] sm:$0xff]  ;;  %1389 = vmatprep.subr.bf16.mxu0 %v1428_v0  ;;  %v39_v5 = vld [vmem:[%s2515_s0 + $0x18] sm:$0xff]  ;;  %v41_v7 = vld [vmem:[%s2515_s0 + $0x28] sm:$0xff]  ;;  %357 = vst.msk [vmem:[#allocation2 + $0x38] sm:$0x3] %vm350_vm2, %v1575_v25 }
   0x3   :  { %v52_v4 = vpack.c.bf16 %v37_v2, %v36_v1  ;;  %v40_v6 = vld [vmem:[%s2515_s0 + $0x20] sm:$0xff]  ;;  %1390 = vmatpush3.bf16.msra.mxu0 %v1428_v0  ;;  %v53_v8 = vpack.c.bf16 %v39_v5, %v38_v3  ;;  %v42_v10 = vld [vmem:[%s2515_s0 + $0x30] sm:$0xff]  ;;  %v43_v11 = vld [vmem:[%s2515_s0 + $0x38] sm:$0xff]  ;;  %349 = vst.msk [vmem:[#allocation2] sm:$0xff] %vm348_vm1, %v1575_v25  ;;  %v1787_v5 = vshrl.u32 %v425_v58, 7 }
   0x4   :  { %v54_v9 = vpack.c.bf16 %v41_v7, %v40_v6  ;;  %v44_v12 = vld [vmem:[%s2515_s0 + $0x40] sm:$0xff]  ;;  %v45_v13 = vld [vmem:[%s2515_s0 + $0x48] sm:$0xff]  ;;  %v55_v14 = vpack.c.bf16 %v43_v11, %v42_v10  ;;  %v46_v16 = vld [vmem:[%s2515_s0 + $0x50] sm:$0xff]  ;;  %351 = vst.msk [vmem:[#allocation2 + $0x8] sm:$0x3] %vm350_vm2, %v1575_v25 }
   0x5   :  { %1391 = vmatprep.mubr.msk.bf16.mxu0 %vm68_vm0, %v52_v4  ;;  %v56_v15 = vpack.c.bf16 %v45_v13, %v44_v12  ;;  %v47_v17 = vld [vmem:[%s2515_s0 + $0x58] sm:$0xff]  ;;  %v48_v18 = vld [vmem:[%s2515_s0 + $0x60] sm:$0xff]  ;;  %v49_v19 = vld [vmem:[%s2515_s0 + $0x68] sm:$0xff]  ;;  %352 = vst.msk [vmem:[#allocation2 + $0x10] sm:$0xff] %vm348_vm1, %v1575_v25  ;;  %v448_v58 = vsub.s32 3, %v1787_v5 }
   0x6   :  { %1392 = vmatmul.mubr.msk.bf16.vlgmr.msra.gmra.mrb[0].mxu0 %vm68_vm0, %v53_v8  ;;  %v57_v20 = vpack.c.bf16 %v47_v17, %v46_v16  ;;  %v58_v21 = vpack.c.bf16 %v49_v19, %v48_v18  ;;  %v50_v22 = vld [vmem:[%s2515_s0 + $0x70] sm:$0xff]  ;;  %v51_v23 = vld [vmem:[%s2515_s0 + $0x78] sm:$0xff]  ;;  %353 = vst.msk [vmem:[#allocation2 + $0x18] sm:$0x3] %vm350_vm2, %v1575_v25  ;;  %355 = vst.msk [vmem:[#allocation2 + $0x28] sm:$0x3] %vm350_vm2, %v1575_v25 }
   0x7   :  { %1395 = vmatprep.mubr.msk.bf16.mxu0 %vm68_vm0, %v54_v9  ;;  %v59_v24 = vpack.c.bf16 %v51_v23, %v50_v22  ;;  %354 = vst.msk [vmem:[#allocation2 + $0x20] sm:$0xff] %vm348_vm1, %v1575_v25  ;;  %358 = vst.msk [vmem:[#allocation2 + $0x40] sm:$0xff] %vm348_vm1, %v1575_v25  ;;  %v1429_v26 = vld [vmem:[%s2516_s7] sm:$0xff]   ;;  %v1430_v27 = vld [vmem:[%s2516_s7 + $0x8] sm:$0xff]  }
   0x8   :  { %359 = vst.msk [vmem:[#allocation2 + $0x48] sm:$0x3] %vm350_vm2, %v1575_v25  ;;  %361 = vst.msk [vmem:[#allocation2 + $0x58] sm:$0x3] %vm350_vm2, %v1575_v25  ;;  %1407 = vmatprep.subr.bf16.mxu1 %v1429_v26  ;;  %v1739_v28 = vld [vmem:[%s2517_s2] ss:$0 sm:$0xff] }
   0x9   :  { %360 = vst.msk [vmem:[#allocation2 + $0x50] sm:$0xff] %vm348_vm1, %v1575_v25  ;;  %362 = vst.msk [vmem:[#allocation2 + $0x60] sm:$0xff] %vm348_vm1, %v1575_v25  ;;  %1408 = vmatpush3.bf16.msra.mxu1 %v1429_v26  ;;  %v1744_v30 = vld [vmem:[%s2518_s3] ss:$0 sm:$0xff] }
   0xa   :  { %363 = vst.msk [vmem:[#allocation2 + $0x68] sm:$0x3] %vm350_vm2, %v1575_v25  ;;  %365 = vst.msk [vmem:[#allocation2 + $0x78] sm:$0x3] %vm350_vm2, %v1575_v25  ;;  %1409 = vmatprep.subr.bf16.mxu1 %v1430_v27  ;;  %v1810_v23 = vld [vmem:[%s2519_s4] sm:$0xff] }
   0xb   :  { %364 = vst.msk [vmem:[#allocation2 + $0x70] sm:$0xff] %vm348_vm1, %v1575_v25  ;;  %366 = vst.msk [vmem:[#allocation2 + $0x80] sm:$0xff] %vm348_vm1, %v1575_v25 }
   0xc   :  { %367 = vst.msk [vmem:[#allocation2 + $0x88] sm:$0x3] %vm350_vm2, %v1575_v25  ;;  %369 = vst.msk [vmem:[#allocation2 + $0x98] sm:$0x3] %vm350_vm2, %v1575_v25 }
   0xd   :  { %368 = vst.msk [vmem:[#allocation2 + $0x90] sm:$0xff] %vm348_vm1, %v1575_v25  ;;  %370 = vst.msk [vmem:[#allocation2 + $0xa0] sm:$0xff] %vm348_vm1, %v1575_v25  ;;  %1410 = vmatpush3.bf16.msra.mxu1 %v1430_v27 }
   0xe   :  { %1396 = vmatmul.mubr.msk.bf16.gmra.mrb[4].mxu0 %vm68_vm0, %v55_v14  ;;  %371 = vst.msk [vmem:[#allocation2 + $0xa8] sm:$0x3] %vm350_vm2, %v1575_v25  ;;  %373 = vst.msk [vmem:[#allocation2 + $0xb8] sm:$0x3] %vm350_vm2, %v1575_v25 }
   0xf   :  { %1399 = vmatprep.mubr.msk.bf16.mxu0 %vm68_vm0, %v56_v15  ;;  %372 = vst.msk [vmem:[#allocation2 + $0xb0] sm:$0xff] %vm348_vm1, %v1575_v25  ;;  %374 = vst.msk [vmem:[#allocation2 + $0xc0] sm:$0xff] %vm348_vm1, %v1575_v25 }
  0x10   :  { %375 = vst.msk [vmem:[#allocation2 + $0xc8] sm:$0x3] %vm350_vm2, %v1575_v25  ;;  %377 = vst.msk [vmem:[#allocation2 + $0xd8] sm:$0x3] %vm350_vm2, %v1575_v25 }
  0x11   :  { %376 = vst.msk [vmem:[#allocation2 + $0xd0] sm:$0xff] %vm348_vm1, %v1575_v25  ;;  %378 = vst.msk [vmem:[#allocation2 + $0xe0] sm:$0xff] %vm348_vm1, %v1575_v25 }
  0x12   :  { %379 = vst.msk [vmem:[#allocation2 + $0xe8] sm:$0x3] %vm350_vm2, %v1575_v25  ;;  %381 = vst.msk [vmem:[#allocation2 + $0xf8] sm:$0x3] %vm350_vm2, %v1575_v25 }
  0x13   :  { %380 = vst.msk [vmem:[#allocation2 + $0xf0] sm:$0xff] %vm348_vm1, %v1575_v25  ;;  %382 = vst.msk [vmem:[#allocation2 + $0x100] sm:$0xff] %vm348_vm1, %v1575_v25 }
  0x14   :  { %383 = vst.msk [vmem:[#allocation2 + $0x108] sm:$0x3] %vm350_vm2, %v1575_v25  ;;  %385 = vst.msk [vmem:[#allocation2 + $0x118] sm:$0x3] %vm350_vm2, %v1575_v25 }
  0x15   :  { %384 = vst.msk [vmem:[#allocation2 + $0x110] sm:$0xff] %vm348_vm1, %v1575_v25  ;;  %386 = vst.msk [vmem:[#allocation2 + $0x120] sm:$0xff] %vm348_vm1, %v1575_v25 }
  0x16   :  { %1400 = vmatmul.mubr.msk.bf16.gmra.mrb[8].mxu0 %vm68_vm0, %v57_v20  ;;  %387 = vst.msk [vmem:[#allocation2 + $0x128] sm:$0x3] %vm350_vm2, %v1575_v25  ;;  %389 = vst.msk [vmem:[#allocation2 + $0x138] sm:$0x3] %vm350_vm2, %v1575_v25  ;;  %v427_v20 = vsub.s32 0, %v1787_v5 }
  0x17   :  { %1403 = vmatprep.mubr.msk.bf16.mxu0 %vm68_vm0, %v58_v21  ;;  %388 = vst.msk [vmem:[#allocation2 + $0x130] sm:$0xff] %vm348_vm1, %v1575_v25 }
  0x1e   :  { %1404 = vmatmul.mubr.msk.bf16.gmra.mrb[12].mxu0 %vm68_vm0, %v59_v24  ;;  %v434_v24 = vsub.s32 1, %v1787_v5 }
  0xd9   :  { %v1393_v29 = vpop.f32.mrb[0].mxu0 }
  0xda   :  { %v199_v31 = vmul.f32 %v1393_v29, %v1739_v28  ;;  %v127_v32 = vpop.f32.mrb[1].mxu0 }
  0xdb   :  { %v197_v33 = vmul.f32 %v1739_v28, %v127_v32  ;;  %v1394_v34 = vpop.f32.mrb[2].mxu0 }
  0xdc   :  { %v1749_v35 = vadd.f32 %v1744_v30, %v199_v31  ;;  %v200_v36 = vmul.f32 %v1394_v34, %v1739_v28  ;;  %v130_v37 = vpop.f32.mrb[3].mxu0  ;;  %v441_v31 = vsub.s32 2, %v1787_v5  ;;  %v1817_v34 = vrot.slane %v1810_v23, %v427_v20  ;;  %v692_v20 = vld [vmem:[#allocation2 + $0xa2] sm:$0xff] }
  0xdd   :  { %v1753_v38 = vadd.f32 %v1744_v30, %v197_v33  ;;  %v198_v39 = vmul.f32 %v1739_v28, %v130_v37 }
  0xde   :  { %v1325_v40 = vmul.f32 -1.442695, %v1749_v35  ;;  %v1758_v41 = vadd.f32 %v1744_v30, %v200_v36 }
  0xdf   :  { %v1323_v42 = vmul.f32 -1.442695, %v1753_v38  ;;  %v1762_v43 = vadd.f32 %v1744_v30, %v198_v39 }
  0xe0   :  { %1431 = vpow2.f32 %v1325_v40  ;;  %v1326_v44 = vmul.f32 -1.442695, %v1758_v41  ;;  %v1821_v40 = vrot.slane %v1810_v23, %v434_v24 }
  0xe1   :  { %1433 = vpow2.f32 %v1323_v42  ;;  %v1324_v45 = vmul.f32 -1.442695, %v1762_v43  ;;  %v1397_v46 = vpop.f32.mrb[4].mxu0 }
  0xe2   :  { %1435 = vpow2.f32 %v1326_v44  ;;  %v203_v47 = vmul.f32 %v1397_v46, %v1739_v28  ;;  %v143_v48 = vpop.f32.mrb[5].mxu0 }
  0xe3   :  { %1437 = vpow2.f32 %v1324_v45  ;;  %v201_v49 = vmul.f32 %v1739_v28, %v143_v48  ;;  %v1398_v50 = vpop.f32.mrb[6].mxu0  ;;  %v431_v48 = vld [vmem:[#allocation2 + $0x1] sm:$0xff] }
  0xe4   :  { %v1769_v51 = vadd.f32 %v1744_v30, %v203_v47  ;;  %v204_v52 = vmul.f32 %v1398_v50, %v1739_v28  ;;  %v146_v53 = vpop.f32.mrb[7].mxu0  ;;  %v424_v47 = vld [vmem:[#allocation2] sm:$0xff] }
  0xe5   :  { %v1773_v54 = vadd.f32 %v1744_v30, %v201_v49  ;;  %v202_v55 = vmul.f32 %v1739_v28, %v146_v53 }
  0xe6   :  { %v1329_v56 = vmul.f32 -1.442695, %v1769_v51  ;;  %v1778_v57 = vadd.f32 %v1744_v30, %v204_v52  ;;  %v686_v52 = vld [vmem:[#allocation2 + $0xa0] sm:$0xff] }
  0xe7   :  { %v1327_v59 = vmul.f32 -1.442695, %v1773_v54  ;;  %v1782_v60 = vadd.f32 %v1744_v30, %v202_v55 }
  0xe8   :  { %1439 = vpow2.f32 %v1329_v56  ;;  %v1330_v61 = vmul.f32 -1.442695, %v1778_v57  ;;  %v1827_v56 = vrot.slane %v1810_v23, %v441_v31 }
  0xe9   :  { %1441 = vpow2.f32 %v1327_v59  ;;  %v1328_v62 = vmul.f32 -1.442695, %v1782_v60  ;;  %v1401_v63 = vpop.f32.mrb[8].mxu0  ;;  %v455_v59 = vsub.s32 4, %v1787_v5 }
  0xea   :  { %v1432_v0 = vpop.eup %1431  ;;  %v207_v1 = vmul.f32 %v1401_v63, %v1739_v28  ;;  %v159_v2 = vpop.f32.mrb[9].mxu0  ;;  %1443 = vpow2.f32 %v1330_v61  ;;  %v689_v61 = vld [vmem:[#allocation2 + $0xa1] sm:$0xff] }
  0xeb   :  { %v1434_v3 = vpop.eup %1433  ;;  %v286_v4 = vadd.f32 1.0, %v1432_v0  ;;  %v205_v6 = vmul.f32 %v1739_v28, %v159_v2  ;;  %v1402_v7 = vpop.f32.mrb[10].mxu0  ;;  %1445 = vpow2.f32 %v1328_v62  ;;  %v436_v2 = vmul.f32 %v1821_v40, %v431_v48 }
  0xec   :  { %v1436_v8 = vpop.eup %1435  ;;  %v284_v9 = vadd.f32 1.0, %v1434_v3  ;;  %v1791_v10 = vadd.f32 %v1744_v30, %v207_v1  ;;  %v208_v11 = vmul.f32 %v1402_v7, %v1739_v28  ;;  %v162_v12 = vpop.f32.mrb[11].mxu0  ;;  %v429_v1 = vmul.f32 %v1817_v34, %v424_v47 }
  0xed   :  { %v1438_v13 = vpop.eup %1437  ;;  %1447 = vrcp.f32 %v286_v4  ;;  %v287_v14 = vadd.f32 1.0, %v1436_v8  ;;  %v1795_v15 = vadd.f32 %v1744_v30, %v205_v6  ;;  %v206_v16 = vmul.f32 %v1739_v28, %v162_v12 }
  0xee   :  { %1449 = vrcp.f32 %v284_v9  ;;  %v285_v17 = vadd.f32 1.0, %v1438_v13  ;;  %v1333_v18 = vmul.f32 -1.442695, %v1791_v10  ;;  %v1800_v19 = vadd.f32 %v1744_v30, %v208_v11 }
  0xef   :  { %1451 = vrcp.f32 %v287_v14  ;;  %v1331_v21 = vmul.f32 -1.442695, %v1795_v15  ;;  %v1805_v22 = vadd.f32 %v1744_v30, %v206_v16  ;;  %v687_v7 = vmul.f32 %v686_v52, %v1817_v34 }
  0xf0   :  { %1453 = vrcp.f32 %v285_v17  ;;  %v1334_v25 = vmul.f32 -1.442695, %v1800_v19  ;;  %v690_v13 = vmul.f32 %v689_v61, %v1821_v40  ;;  %v469_v17 = vsub.s32 6, %v1787_v5 }
  0xf1   :  { %1455 = vpow2.f32 %v1333_v18  ;;  %v1332_v26 = vmul.f32 -1.442695, %v1805_v22  ;;  %v1405_v27 = vpop.f32.mrb[12].mxu0 }
  0xf2   :  { %v1440_v29 = vpop.eup %1439  ;;  %1457 = vpow2.f32 %v1331_v21  ;;  %v175_v32 = vpop.f32.mrb[13].mxu0  ;;  %v211_v37 = vmul.f32 %v1405_v27, %v1739_v28 }
  0xf3   :  { %v1442_v33 = vpop.eup %1441  ;;  %v290_v36 = vadd.f32 1.0, %v1440_v29  ;;  %1459 = vpow2.f32 %v1334_v25  ;;  %v1406_v39 = vpop.f32.mrb[14].mxu0  ;;  %v209_v44 = vmul.f32 %v1739_v28, %v175_v32  ;;  %v1860_v25 = vrot.slane %v1810_v23, %v455_v59 }
  0xf4   :  { %v288_v42 = vadd.f32 1.0, %v1442_v33  ;;  %1461 = vpow2.f32 %v1332_v26  ;;  %v178_v45 = vpop.f32.mrb[15].mxu0  ;;  %v1444_v46 = vpop.eup %1443  ;;  %v212_v49 = vmul.f32 %v1406_v39, %v1739_v28  ;;  %v1832_v62 = vadd.f32 %v1744_v30, %v211_v37 }
  0xf5   :  { %1463 = vrcp.f32 %v290_v36  ;;  %v1446_v50 = vpop.eup %1445  ;;  %v210_v53 = vmul.f32 %v1739_v28, %v178_v45  ;;  %v1838_v28 = vadd.f32 %v1744_v30, %v209_v44  ;;  %v291_v6 = vadd.f32 1.0, %v1444_v46  ;;  %v675_v44 = vld [vmem:[#allocation2 + $0x90] sm:$0xff] }
  0xf6   :  { %1465 = vrcp.f32 %v288_v42  ;;  %2529 = vst [vmem:[#allocation4_spill] sm:$0xff] %v1832_v62  ;;  %v1843_v8 = vadd.f32 %v1744_v30, %v212_v49  ;;  %v289_v12 = vadd.f32 1.0, %v1446_v50  ;;  %v1337_v21 = vmul.f32 -1.442695, %v1832_v62  ;;  %v678_v50 = vld [vmem:[#allocation2 + $0x91] sm:$0xff] }
  0xf7   :  { %v1448_v55 = vpop.eup %1447  ;;  %2530 = vst [vmem:[#allocation5_spill] sm:$0xff] %v1838_v28  ;;  %v1849_v14 = vadd.f32 %v1744_v30, %v210_v53  ;;  %v476_v30 = vsub.s32 7, %v1787_v5  ;;  %v1335_v26 = vmul.f32 -1.442695, %v1838_v28  ;;  %v437_v29 = vadd.f32 %v436_v2, %v429_v1 }
  0xf8   :  { %v1450_v63 = vpop.eup %1449  ;;  %v334_v0 = vmul.f32 %v1448_v55, %v1749_v35  ;;  %2531 = vst [vmem:[#allocation6_spill] sm:$0xff] %v1843_v8  ;;  %v438_v35 = vld [vmem:[#allocation2 + $0x2] sm:$0xff]  ;;  %1467 = vrcp.f32 %v291_v6  ;;  %v1338_v31 = vmul.f32 -1.442695, %v1843_v8  ;;  %v691_v33 = vadd.f32 %v690_v13, %v687_v7  ;;  %v901_v6 = vld [vmem:[#allocation2 + $0x130] sm:$0xff] }
  0xf9   :  { %v1452_v3 = vpop.eup %1451  ;;  %v332_v4 = vmul.f32 %v1450_v63, %v1753_v38  ;;  %2532 = vst [vmem:[#allocation7_spill] sm:$0xff] %v1849_v14  ;;  %v462_v38 = vsub.s32 5, %v1787_v5  ;;  %1469 = vrcp.f32 %v289_v12  ;;  %v693_v36 = vmul.f32 %v692_v20, %v1827_v56  ;;  %v681_v63 = vld [vmem:[#allocation2 + $0x92] sm:$0xff] }
  0xfa   :  { %v1454_v9 = vpop.eup %1453  ;;  %395 = vst.msk [vmem:[#allocation2 + $0x31] sm:$0xff] %vm348_vm1, %v334_v0  ;;  %v335_v11 = vmul.f32 %v1452_v3, %v1758_v41  ;;  %v1857_v41 = vrot.slane %v1810_v23, %v448_v58  ;;  %v1336_v5 = vmul.f32 -1.442695, %v1849_v14  ;;  %v1874_v42 = vrot.slane %v1810_v23, %v469_v17  ;;  %v1883_v58 = vld [vmem:[%s2519_s4 + $0x8] ss:$0 sm:$0xff] }
  0xfb   :  { %v1456_v16 = vpop.eup %1455  ;;  %391 = vst.msk [vmem:[#allocation2 + $0x11] sm:$0xff] %vm348_vm1, %v332_v4  ;;  %v333_v18 = vmul.f32 %v1454_v9, %v1762_v43  ;;  %v443_v43 = vmul.f32 %v1827_v56, %v438_v35  ;;  %v1871_v39 = vrot.slane %v1810_v23, %v462_v38  ;;  %1471 = vpow2.f32 %v1337_v21  ;;  %v904_v9 = vld [vmem:[#allocation2 + $0x131] sm:$0xff] }
  0xfc   :  { %v1458_v24 = vpop.eup %1457  ;;  %397 = vst.msk [vmem:[#allocation2 + $0x41] sm:$0xff] %vm348_vm1, %v335_v11  ;;  %v294_v45 = vadd.f32 1.0, %v1456_v16  ;;  %v1877_v47 = vrot.slane %v1810_v23, %v476_v30  ;;  %1473 = vpow2.f32 %v1335_v26  ;;  %v1890_v1 = vmul.f32 %v675_v44, %v1874_v42  ;;  %v907_v35 = vld [vmem:[#allocation2 + $0x132] sm:$0xff] }
  0xfd   :  { %v1460_v27 = vpop.eup %1459  ;;  %393 = vst.msk [vmem:[#allocation2 + $0x21] sm:$0xff] %vm348_vm1, %v333_v18  ;;  %v292_v49 = vadd.f32 1.0, %v1458_v24  ;;  %v444_v55 = vadd.f32 %v443_v43, %v437_v29  ;;  %1475 = vpow2.f32 %v1338_v31  ;;  %v1892_v2 = vadd.f32 %v693_v36, %v691_v33 }
  0xfe   :  { %v1462_v32 = vpop.eup %1461  ;;  %v295_v61 = vadd.f32 1.0, %v1460_v27  ;;  %1477 = vpow2.f32 %v1336_v5  ;;  %v1898_v7 = vmul.f32 %v678_v50, %v1877_v47  ;;  %v1903_v38 = vmul.f32 %v1883_v58, %v681_v63 }
  0xff   :  { %v1464_v37 = vpop.eup %1463  ;;  %2533 = vst [vmem:[#allocation8_spill] sm:$0xff] %v1892_v2  ;;  %v293_v3 = vadd.f32 1.0, %v1462_v32  ;;  %1479 = vrcp.f32 %v294_v45  ;;  %v1909_v24 = vmul.f32 %v901_v6, %v1874_v42  ;;  %v1912_v30 = vmul.f32 %v904_v9, %v1877_v47 }
 0x100   :  { %v1466_v46 = vpop.eup %1465  ;;  %v338_v48 = vmul.f32 %v1464_v37, %v1769_v51  ;;  %2534 = vst [vmem:[#allocation9_spill] sm:$0xff] %v1898_v7  ;;  %1481 = vrcp.f32 %v292_v49  ;;  %2535 = vst [vmem:[#allocation10_spill] sm:$0xff] %v1903_v38  ;;  %v1915_v26 = vmul.f32 %v1883_v58, %v907_v35 }
 0x101   :  { %v506_v52 = vld [vmem:[#allocation2 + $0x30] sm:$0xff]  ;;  %v336_v59 = vmul.f32 %v1466_v46, %v1773_v54  ;;  %1483 = vrcp.f32 %v295_v61  ;;  %2536 = vst [vmem:[#allocation11_spill] sm:$0xff] %v1909_v24  ;;  %2537 = vst [vmem:[#allocation12_spill] sm:$0xff] %v1912_v30 }
 0x102   :  { %v509_v53 = vld [vmem:[#allocation2 + $0x31] sm:$0xff]  ;;  %403 = vst.msk [vmem:[#allocation2 + $0x71] sm:$0xff] %vm348_vm1, %v338_v48  ;;  %v545_v4 = vmul.f32 %v506_v52, %v1817_v34  ;;  %1485 = vrcp.f32 %v293_v3  ;;  %2538 = vst [vmem:[#allocation13_spill] sm:$0xff] %v1915_v26  ;;  %v1917_v27 = vpop.eup %1467  ;;  %v1924_v5 = vmul.f32 %v506_v52, %v1874_v42  ;;  %v526_v3 = vmul.f32 %v506_v52, %v1857_v41 }
 0x103   :  { %v1886_v23 = vld [vmem:[#allocation2 + $0x32] sm:$0xff]  ;;  %v548_v54 = vmul.f32 %v509_v53, %v1821_v40  ;;  %399 = vst.msk [vmem:[#allocation2 + $0x51] sm:$0xff] %vm348_vm1, %v336_v59  ;;  %v534_v16 = vld [vmem:[#allocation2 + $0x40] sm:$0xff]  ;;  %v1921_v36 = vpop.eup %1469  ;;  %v1927_v37 = vmul.f32 %v509_v53, %v1877_v47  ;;  %v339_v62 = vmul.f32 %v1917_v27, %v1778_v57 }
 0x104   :  { %v445_v0 = vld [vmem:[#allocation2 + $0x10] sm:$0xff]  ;;  %v551_v18 = vmul.f32 %v1886_v23, %v1827_v56  ;;  %v537_v21 = vld [vmem:[#allocation2 + $0x41] sm:$0xff]  ;;  %v554_v32 = vmul.f32 %v534_v16, %v1857_v41  ;;  %v573_v61 = vmul.f32 %v534_v16, %v1817_v34  ;;  %v532_v35 = vmul.f32 %v1886_v23, %v1871_v39 }
 0x105   :  { %v452_v51 = vld [vmem:[#allocation2 + $0x11] sm:$0xff]  ;;  %v450_v11 = vmul.f32 %v1857_v41, %v445_v0  ;;  %v489_v13 = vmul.f32 %v445_v0, %v1817_v34  ;;  %v549_v17 = vadd.f32 %v548_v54, %v545_v4  ;;  %v466_v33 = vld [vmem:[#allocation2 + $0x20] sm:$0xff]  ;;  %v557_v45 = vmul.f32 %v537_v21, %v1860_v25  ;;  %v1930_v48 = vpop.eup %1471  ;;  %405 = vst.msk [vmem:[#allocation2 + $0x81] sm:$0xff] %vm348_vm1, %v339_v62 }
 0x106   :  { %v459_v12 = vld [vmem:[#allocation2 + $0x12] sm:$0xff]  ;;  %v492_v20 = vmul.f32 %v452_v51, %v1821_v40  ;;  %v473_v46 = vld [vmem:[#allocation2 + $0x21] sm:$0xff]  ;;  %v576_v63 = vmul.f32 %v537_v21, %v1821_v40  ;;  %v1934_v0 = vpop.eup %1473  ;;  %v529_v4 = vmul.f32 %v509_v53, %v1860_v25  ;;  %v498_v6 = vmul.f32 %v466_v33, %v1857_v41 }
 0x107   :  { %v552_v29 = vadd.f32 %v551_v18, %v549_v17  ;;  %v495_v31 = vmul.f32 %v459_v12, %v1827_v56  ;;  %v451_v44 = vadd.f32 %v450_v11, %v444_v55  ;;  %v540_v50 = vld [vmem:[#allocation2 + $0x42] sm:$0xff]  ;;  %v457_v55 = vmul.f32 %v1860_v25, %v452_v51  ;;  %v1942_v9 = vpop.eup %1475 }
 0x108   :  { %v493_v43 = vadd.f32 %v492_v20, %v489_v13  ;;  %v1939_v54 = vld [vmem:[#allocation2 + $0x22] sm:$0xff]  ;;  %v517_v13 = vmul.f32 %v466_v33, %v1817_v34  ;;  %v520_v17 = vmul.f32 %v473_v46, %v1821_v40  ;;  %v1948_v18 = vpop.eup %1477  ;;  %v464_v53 = vmul.f32 %v1871_v39, %v459_v12 }
 0x109   :  { %v555_v59 = vadd.f32 %v554_v32, %v552_v29  ;;  %v458_v52 = vadd.f32 %v457_v55, %v451_v44  ;;  %v560_v51 = vmul.f32 %v540_v50, %v1871_v39  ;;  %v1480_v29 = vpop.eup %1479  ;;  %v535_v30 = vmul.f32 %v534_v16, %v1874_v42 }
 0x10a   :  { %v496_v49 = vadd.f32 %v495_v31, %v493_v43  ;;  %v577_v43 = vadd.f32 %v576_v63, %v573_v61  ;;  %v501_v31 = vmul.f32 %v473_v46, %v1860_v25  ;;  %v521_v32 = vadd.f32 %v520_v17, %v517_v13  ;;  %v1482_v26 = vpop.eup %1481  ;;  %v1966_v17 = vld [vmem:[#allocation2 + $0x71] sm:$0xff] }
 0x10b   :  { %v558_v11 = vadd.f32 %v557_v45, %v555_v59  ;;  %v523_v45 = vmul.f32 %v1939_v54, %v1827_v56  ;;  %v562_v59 = vld [vmem:[#allocation2 + $0x50] sm:$0xff]  ;;  %v1957_v38 = vmul.f32 %v537_v21, %v1877_v47  ;;  %v1960_v12 = vmul.f32 %v1883_v58, %v540_v50  ;;  %v1484_v61 = vpop.eup %1483 }
 0x10c   :  { %v499_v20 = vadd.f32 %v498_v6, %v496_v49  ;;  %v1962_v49 = vld [vmem:[#allocation2 + $0x70] sm:$0xff]  ;;  %v579_v63 = vmul.f32 %v540_v50, %v1827_v56  ;;  %v471_v55 = vmul.f32 %v1874_v42, %v466_v33  ;;  %v1486_v16 = vpop.eup %1485  ;;  %v465_v7 = vadd.f32 %v464_v53, %v458_v52 }
 0x10d   :  { %v561_v44 = vadd.f32 %v560_v51, %v558_v11  ;;  %v524_v13 = vadd.f32 %v523_v45, %v521_v32  ;;  %v565_v24 = vld [vmem:[#allocation2 + $0x51] sm:$0xff]  ;;  %v478_v21 = vmul.f32 %v1877_v47, %v473_v46  ;;  %v504_v14 = vmul.f32 %v1939_v54, %v1871_v39 }
 0x10e   :  { %v502_v6 = vadd.f32 %v501_v31, %v499_v20  ;;  %v563_v11 = vmul.f32 %v562_v59, %v1874_v42  ;;  %v568_v51 = vld [vmem:[#allocation2 + $0x52] sm:$0xff]  ;;  %v580_v8 = vadd.f32 %v579_v63, %v577_v43  ;;  %v1974_v33 = vmul.f32 %v1962_v49, %v1874_v42 }
 0x10f   :  { %v527_v28 = vadd.f32 %v526_v3, %v524_v13  ;;  %v582_v50 = vmul.f32 %v562_v59, %v1857_v41  ;;  %v657_v20 = vmul.f32 %v1962_v49, %v1817_v34  ;;  %v660_v46 = vmul.f32 %v1966_v17, %v1821_v40  ;;  %v624_v45 = vld [vmem:[#allocation2 + $0x72] sm:$0xff] }
 0x110   :  { %2539 = vst [vmem:[#allocation14_spill] sm:$0xff] %v1974_v33  ;;  %v564_v52 = vadd.f32 %v563_v11, %v561_v44  ;;  %v566_v53 = vmul.f32 %v565_v24, %v1877_v47  ;;  %v505_v31 = vadd.f32 %v504_v14, %v502_v6  ;;  %v569_v43 = vmul.f32 %v1883_v58, %v568_v51 }
 0x111   :  { %v530_v32 = vadd.f32 %v529_v4, %v527_v28  ;;  %v601_v3 = vmul.f32 %v562_v59, %v1817_v34  ;;  %v604_v13 = vmul.f32 %v565_v24, %v1821_v40  ;;  %v337_v33 = vmul.f32 %v1921_v36, %v1782_v60 }
 0x112   :  { %v567_v63 = vadd.f32 %v566_v53, %v564_v52  ;;  %v583_v44 = vadd.f32 %v582_v50, %v580_v8  ;;  %v342_v11 = vmul.f32 %v1480_v29, %v1791_v10  ;;  %v340_v28 = vmul.f32 %v1482_v26, %v1795_v15 }
 0x113   :  { %v533_v2 = vadd.f32 %v532_v35, %v530_v32  ;;  %v1993_v14 = vmul.f32 %v1966_v17, %v1877_v47  ;;  %401 = vst.msk [vmem:[#allocation2 + $0x61] sm:$0xff] %vm348_vm1, %v337_v33  ;;  %v343_v57 = vmul.f32 %v1484_v61, %v1800_v19  ;;  %v341_v27 = vmul.f32 %v1486_v16, %v1805_v22 }
 0x114   :  { %v570_v4 = vadd.f32 %v569_v43, %v567_v63  ;;  %v2000_v60 = vmul.f32 %v1883_v58, %v624_v45  ;;  %v661_v8 = vadd.f32 %v660_v46, %v657_v20  ;;  %v663_v10 = vmul.f32 %v624_v45, %v1827_v56  ;;  %411 = vst.msk [vmem:[#allocation2 + $0xd1] sm:$0xff] %vm348_vm1, %v342_v11 }
 0x115   :  { %v585_v15 = vmul.f32 %v565_v24, %v1860_v25  ;;  %407 = vst.msk [vmem:[#allocation2 + $0xb1] sm:$0xff] %vm348_vm1, %v340_v28  ;;  %v605_v26 = vadd.f32 %v604_v13, %v601_v3  ;;  %413 = vst.msk [vmem:[#allocation2 + $0xe1] sm:$0xff] %vm348_vm1, %v343_v57  ;;  %v298_v19 = vadd.f32 1.0, %v1930_v48  ;;  %v472_v22 = vadd.f32 %v471_v55, %v465_v7  ;;  %v649_v55 = vld [vmem:[#allocation2 + $0x81] sm:$0xff] }
 0x116   :  { %571 = vst.msk [vmem:[#allocation3 + $0x18] sm:$0xff] %vm348_vm1, %v570_v4  ;;  %409 = vst.msk [vmem:[#allocation2 + $0xc1] sm:$0xff] %vm348_vm1, %v341_v27  ;;  %v508_v62 = vadd.f32 %v1924_v5, %v505_v31  ;;  %v296_v35 = vadd.f32 1.0, %v1934_v0  ;;  %v299_v24 = vadd.f32 1.0, %v1942_v9  ;;  %v536_v29 = vadd.f32 %v535_v30, %v533_v2 }
 0x117   :  { %v586_v36 = vadd.f32 %v585_v15, %v583_v44  ;;  %v479_v59 = vadd.f32 %v478_v21, %v472_v22  ;;  %v485_v61 = vmul.f32 %v1883_v58, %v1939_v54  ;;  %v513_v16 = vmul.f32 %v1883_v58, %v1886_v23 }
 0x118   :  { %v511_v6 = vadd.f32 %v1927_v37, %v508_v62  ;;  %v664_v33 = vadd.f32 %v663_v10, %v661_v8  ;;  %v588_v7 = vmul.f32 %v568_v51, %v1871_v39  ;;  %v297_v5 = vadd.f32 1.0, %v1948_v18  ;;  %v646_v37 = vld [vmem:[#allocation2 + $0x80] sm:$0xff] }
 0x119   :  { %v539_v48 = vadd.f32 %v1957_v38, %v536_v29  ;;  %v607_v0 = vmul.f32 %v568_v51, %v1827_v56  ;;  %1487 = vrcp.f32 %v298_v19  ;;  %v486_v2 = vadd.f32 %v485_v61, %v479_v59 }
 0x11a   :  { %v514_v30 = vadd.f32 %v513_v16, %v511_v6  ;;  %v638_v54 = vmul.f32 %v1962_v49, %v1857_v41  ;;  %v589_v9 = vadd.f32 %v588_v7, %v586_v36  ;;  %1489 = vrcp.f32 %v296_v35  ;;  %v590_v51 = vld [vmem:[#allocation2 + $0x60] sm:$0xff] }
 0x11b   :  { %v542_v23 = vadd.f32 %v1960_v12, %v539_v48  ;;  %v2027_v21 = vmul.f32 %v1966_v17, %v1860_v25  ;;  %v608_v18 = vadd.f32 %v607_v0, %v605_v26  ;;  %v666_v38 = vmul.f32 %v646_v37, %v1857_v41  ;;  %v593_v50 = vld [vmem:[#allocation2 + $0x61] sm:$0xff]  ;;  %487 = vst.msk [vmem:[#allocation3] sm:$0xff] %vm348_vm1, %v486_v2  ;;  %v732_v13 = vld [vmem:[#allocation2 + $0xd0] sm:$0xff] }
 0x11c   :  { %1491 = vrcp.f32 %v299_v24  ;;  %515 = vst.msk [vmem:[#allocation3 + $0x8] sm:$0xff] %vm348_vm1, %v514_v30  ;;  %v2033_v49 = vmul.f32 %v624_v45, %v1871_v39  ;;  %v2036_v20 = vmul.f32 %v646_v37, %v1874_v42  ;;  %v652_v12 = vld [vmem:[#allocation2 + $0x82] sm:$0xff]  ;;  %v591_v17 = vmul.f32 %v590_v51, %v1874_v42  ;;  %v735_v15 = vld [vmem:[#allocation2 + $0xd1] sm:$0xff] }
 0x11d   :  { %1493 = vrcp.f32 %v297_v5  ;;  %543 = vst.msk [vmem:[#allocation3 + $0x10] sm:$0xff] %vm348_vm1, %v542_v23  ;;  %v2041_v46 = vmul.f32 %v649_v55, %v1877_v47  ;;  %v667_v52 = vadd.f32 %v666_v38, %v664_v33  ;;  %v669_v53 = vmul.f32 %v649_v55, %v1860_v25  ;;  %v596_v31 = vld [vmem:[#allocation2 + $0x62] sm:$0xff]  ;;  %v738_v26 = vld [vmem:[#allocation2 + $0xd2] sm:$0xff] }
 0x11e   :  { %v610_v32 = vmul.f32 %v590_v51, %v1857_v41  ;;  %v592_v43 = vadd.f32 %v591_v17, %v589_v9  ;;  %v594_v3 = vmul.f32 %v593_v50, %v1877_v47  ;;  %v629_v45 = vmul.f32 %v590_v51, %v1817_v34  ;;  %v695_v35 = vld [vmem:[#allocation2 + $0xb0] sm:$0xff] }
 0x11f   :  { %v632_v63 = vmul.f32 %v593_v50, %v1821_v40  ;;  %v670_v44 = vadd.f32 %v669_v53, %v667_v52  ;;  %v672_v11 = vmul.f32 %v652_v12, %v1871_v39  ;;  %v613_v4 = vmul.f32 %v593_v50, %v1860_v25  ;;  %v698_v6 = vld [vmem:[#allocation2 + $0xb1] sm:$0xff]  ;;  %v2540_v53 = vld [vmem:[#allocation8_spill] sm:$0xff] }
 0x120   :  { %v611_v28 = vadd.f32 %v610_v32, %v608_v18  ;;  %v595_v57 = vadd.f32 %v594_v3, %v592_v43  ;;  %v597_v27 = vmul.f32 %v1883_v58, %v596_v31  ;;  %v635_v10 = vmul.f32 %v596_v31, %v1827_v56  ;;  %v701_v55 = vld [vmem:[#allocation2 + $0xb2] sm:$0xff]  ;;  %v763_v43 = vld [vmem:[#allocation2 + $0xe1] sm:$0xff] }
 0x121   :  { %v633_v8 = vadd.f32 %v632_v63, %v629_v45  ;;  %v2053_v19 = vmul.f32 %v1883_v58, %v652_v12  ;;  %v616_v62 = vmul.f32 %v596_v31, %v1871_v39  ;;  %v2057_v36 = vmul.f32 %v732_v13, %v1874_v42  ;;  %v760_v12 = vld [vmem:[#allocation2 + $0xe0] sm:$0xff] }
 0x122   :  { %v614_v22 = vadd.f32 %v613_v4, %v611_v28  ;;  %v673_v24 = vadd.f32 %v672_v11, %v670_v44  ;;  %v598_v29 = vadd.f32 %v597_v27, %v595_v57  ;;  %v771_v61 = vmul.f32 %v732_v13, %v1817_v34  ;;  %v704_v44 = vld [vmem:[#allocation2 + $0xc0] sm:$0xff]  ;;  %v2541_v11 = vld [vmem:[#allocation14_spill] sm:$0xff] }
 0x123   :  { %v636_v59 = vadd.f32 %v635_v10, %v633_v8  ;;  %v2060_v16 = vpop.eup %1487  ;;  %v2063_v33 = vmul.f32 %v735_v15, %v1877_v47  ;;  %v2066_v7 = vmul.f32 %v1883_v58, %v738_v26  ;;  %v2069_v5 = vmul.f32 %v732_v13, %v1857_v41 }
 0x124   :  { %v774_v48 = vmul.f32 %v735_v15, %v1821_v40  ;;  %v2072_v0 = vpop.eup %1489  ;;  %v617_v2 = vadd.f32 %v616_v62, %v614_v22  ;;  %599 = vst.msk [vmem:[#allocation3 + $0x20] sm:$0xff] %vm348_vm1, %v598_v29  ;;  %v2076_v9 = vmul.f32 %v735_v15, %v1860_v25  ;;  %v696_v37 = vmul.f32 %v695_v35, %v1857_v41  ;;  %v707_v15 = vld [vmem:[#allocation2 + $0xc1] sm:$0xff] }
 0x125   :  { %v639_v30 = vadd.f32 %v638_v54, %v636_v59  ;;  %v777_v38 = vmul.f32 %v738_v26, %v1827_v56  ;;  %v715_v51 = vmul.f32 %v695_v35, %v1817_v34  ;;  %v718_v50 = vmul.f32 %v698_v6, %v1821_v40 }
 0x126   :  { %v1492_v23 = vpop.eup %1491  ;;  %v775_v18 = vadd.f32 %v774_v48, %v771_v61  ;;  %v2083_v54 = vadd.f32 %v1890_v1, %v673_v24  ;;  %v2086_v52 = vmul.f32 %v738_v26, %v1871_v39  ;;  %v697_v31 = vadd.f32 %v696_v37, %v2540_v53  ;;  %v710_v26 = vld [vmem:[#allocation2 + $0xc2] sm:$0xff] }
 0x127   :  { %v1494_v17 = vpop.eup %1493  ;;  %v699_v32 = vmul.f32 %v698_v6, %v1860_v25  ;;  %v642_v3 = vadd.f32 %v2027_v21, %v639_v30  ;;  %v719_v63 = vadd.f32 %v718_v50, %v715_v51  ;;  %v721_v13 = vmul.f32 %v701_v55, %v1827_v56  ;;  %v912_v50 = vld [vmem:[#allocation3 + $0x8] sm:$0xff] }
 0x128   :  { %v778_v45 = vadd.f32 %v777_v38, %v775_v18  ;;  %v620_v28 = vadd.f32 %v2541_v11, %v617_v2  ;;  %v702_v1 = vmul.f32 %v701_v55, %v1871_v39  ;;  %v780_v57 = vmul.f32 %v760_v12, %v1857_v41  ;;  %v2543_v11 = vld [vmem:[#allocation5_spill] sm:$0xff] }
 0x129   :  { %v700_v4 = vadd.f32 %v699_v32, %v697_v31  ;;  %v722_v27 = vadd.f32 %v721_v13, %v719_v63  ;;  %v2096_v8 = vmul.f32 %v760_v12, %v1874_v42  ;;  %v799_v10 = vmul.f32 %v760_v12, %v1817_v34  ;;  %v2115_v12 = vld [vmem:[%s2520_s5] ss:$0 sm:$0xff]  ;;  %v914_v63 = vld [vmem:[#allocation3 + $0x18] sm:$0xff] }
 0x12a   :  { %v802_v21 = vmul.f32 %v763_v43, %v1821_v40  ;;  %v781_v62 = vadd.f32 %v780_v57, %v778_v45  ;;  %v783_v35 = vmul.f32 %v763_v43, %v1860_v25  ;;  %v705_v24 = vmul.f32 %v704_v44, %v1874_v42  ;;  %v913_v45 = vld [vmem:[#allocation3 + $0x10] sm:$0xff] }
 0x12b   :  { %v703_v22 = vadd.f32 %v702_v1, %v700_v4  ;;  %v645_v29 = vadd.f32 %v2033_v49, %v642_v3  ;;  %v2104_v59 = vmul.f32 %v763_v43, %v1877_v47  ;;  %v724_v6 = vmul.f32 %v704_v44, %v1857_v41  ;;  %v911_v49 = vld [vmem:[#allocation3] sm:$0xff]  ;;  %v2544_v1 = vld [vmem:[#allocation6_spill] sm:$0xff] }
 0x12c   :  { %v803_v61 = vadd.f32 %v802_v21, %v799_v10  ;;  %v784_v48 = vadd.f32 %v783_v35, %v781_v62  ;;  %v708_v30 = vmul.f32 %v707_v15, %v1877_v47  ;;  %v711_v37 = vmul.f32 %v1883_v58, %v710_v26  ;;  %v2542_v43 = vld [vmem:[#allocation4_spill] sm:$0xff] }
 0x12d   :  { %v706_v2 = vadd.f32 %v705_v24, %v703_v22  ;;  %v725_v55 = vadd.f32 %v724_v6, %v722_v27  ;;  %v727_v18 = vmul.f32 %v707_v15, %v1860_v25  ;;  %v743_v38 = vmul.f32 %v704_v44, %v1817_v34  ;;  %v2127_v27 = vld [vmem:[%s2521_s6] ss:$0 sm:$0xff]  ;;  %v766_v24 = vld [vmem:[#allocation2 + $0xe2] sm:$0xff] }
 0x12e   :  { %v746_v51 = vmul.f32 %v707_v15, %v1821_v40  ;;  %v730_v31 = vmul.f32 %v710_v26, %v1871_v39  ;;  %v749_v32 = vmul.f32 %v710_v26, %v1827_v56  ;;  %v346_v3 = vmul.f32 %v2060_v16, %v2542_v43  ;;  %v915_v10 = vld [vmem:[#allocation3 + $0x20] sm:$0xff]  ;;  %v2545_v15 = vld [vmem:[#allocation7_spill] sm:$0xff] }
 0x12f   :  { %v709_v53 = vadd.f32 %v708_v30, %v706_v2  ;;  %v728_v13 = vadd.f32 %v727_v18, %v725_v55  ;;  %v344_v4 = vmul.f32 %v2072_v0, %v2543_v11  ;;  %v347_v57 = vmul.f32 %v1492_v23, %v2544_v1 }
 0x130   :  { %v747_v44 = vadd.f32 %v746_v51, %v743_v38  ;;  %419 = vst.msk [vmem:[#allocation2 + $0x111] sm:$0xff] %vm348_vm1, %v346_v3  ;;  %v345_v16 = vmul.f32 %v1494_v17, %v2545_v15  ;;  %v934_v26 = vmul.f32 %v2115_v12, %v911_v49  ;;  %v935_v22 = vmul.f32 %v2115_v12, %v912_v50 }
 0x131   :  { %v712_v21 = vadd.f32 %v711_v37, %v709_v53  ;;  %v731_v62 = vadd.f32 %v730_v31, %v728_v13  ;;  %415 = vst.msk [vmem:[#allocation2 + $0xf1] sm:$0xff] %vm348_vm1, %v344_v4  ;;  %421 = vst.msk [vmem:[#allocation2 + $0x121] sm:$0xff] %vm348_vm1, %v347_v57  ;;  %v936_v0 = vmul.f32 %v2115_v12, %v913_v45  ;;  %v2546_v4 = vld [vmem:[#allocation9_spill] sm:$0xff] }
 0x132   :  { %v750_v35 = vadd.f32 %v749_v32, %v747_v44  ;;  %v937_v23 = vmul.f32 %v2115_v12, %v914_v63  ;;  %417 = vst.msk [vmem:[#allocation2 + $0x101] sm:$0xff] %vm348_vm1, %v345_v16  ;;  %v2140_v17 = vadd.f32 %v2127_v27, %v934_v26  ;;  %v2143_v6 = vadd.f32 %v2127_v27, %v935_v22 }
 0x133   :  { %713 = vst.msk [vmem:[#allocation3 + $0x40] sm:$0xff] %vm348_vm1, %v712_v21  ;;  %v623_v2 = vadd.f32 %v1993_v14, %v620_v28  ;;  %v938_v30 = vmul.f32 %v2115_v12, %v915_v10  ;;  %v734_v37 = vadd.f32 %v2057_v36, %v731_v62  ;;  %v2150_v18 = vadd.f32 %v2127_v27, %v936_v0 }
 0x134   :  { %v753_v55 = vadd.f32 %v2069_v5, %v750_v35  ;;  %v2153_v38 = vadd.f32 %v2127_v27, %v937_v23  ;;  %v1342_v51 = vmul.f32 -1.442695, %v2140_v17  ;;  %v1343_v49 = vmul.f32 -1.442695, %v2143_v6 }
 0x135   :  { %v626_v50 = vadd.f32 %v2000_v60, %v623_v2  ;;  %v2159_v14 = vadd.f32 %v2127_v27, %v938_v30  ;;  %v786_v28 = vmul.f32 %v766_v24, %v1871_v39  ;;  %v805_v36 = vmul.f32 %v766_v24, %v1827_v56 }
 0x136   :  { %v756_v5 = vadd.f32 %v2076_v9, %v753_v55  ;;  %v648_v53 = vadd.f32 %v2036_v20, %v645_v29  ;;  %v2166_v31 = vmul.f32 %v1883_v58, %v766_v24  ;;  %1495 = vpow2.f32 %v1342_v51 }
 0x137   :  { %v2169_v32 = vmul.f32 -1.442695, %v2150_v18  ;;  %v2172_v60 = vmul.f32 -1.442695, %v2153_v38  ;;  %627 = vst.msk [vmem:[#allocation3 + $0x28] sm:$0xff] %vm348_vm1, %v626_v50  ;;  %v787_v43 = vadd.f32 %v786_v28, %v784_v48  ;;  %v806_v3 = vadd.f32 %v805_v36, %v803_v61  ;;  %v844_v45 = vld [vmem:[#allocation2 + $0x110] sm:$0xff] }
 0x138   :  { %v847_v63 = vld [vmem:[#allocation2 + $0x111] sm:$0xff]  ;;  %1497 = vpow2.f32 %v1343_v49  ;;  %v2178_v20 = vmul.f32 -1.442695, %v2159_v14  ;;  %v2181_v9 = vadd.f32 %v2086_v52, %v756_v5  ;;  %v2184_v11 = vadd.f32 %v2041_v46, %v648_v53  ;;  %v2216_v35 = vld [vmem:[#allocation2 + $0x120] sm:$0xff] }
 0x139   :  { %v2175_v13 = vld [vmem:[#allocation2 + $0x112] sm:$0xff]  ;;  %v2188_v48 = vadd.f32 %v2546_v4, %v2083_v54  ;;  %v2191_v61 = vadd.f32 %v2063_v33, %v734_v37  ;;  %v2194_v1 = vmul.f32 %v844_v45, %v1874_v42  ;;  %v2197_v57 = vmul.f32 %v847_v63, %v1877_v47  ;;  %v2221_v30 = vld [vmem:[#allocation2 + $0x121] sm:$0xff] }
 0x13a   :  { %v788_v29 = vld [vmem:[#allocation2 + $0xf0] sm:$0xff]  ;;  %v883_v52 = vmul.f32 %v844_v45, %v1817_v34  ;;  %v886_v10 = vmul.f32 %v847_v63, %v1821_v40  ;;  %v2203_v46 = vmul.f32 %v1883_v58, %v2175_v13  ;;  %v2206_v54 = vmul.f32 %v844_v45, %v1857_v41  ;;  %v2223_v37 = vld [vmem:[#allocation2 + $0x122] sm:$0xff] }
 0x13b   :  { %v791_v44 = vld [vmem:[#allocation2 + $0xf1] sm:$0xff]  ;;  %v2209_v33 = vmul.f32 %v847_v63, %v1860_v25  ;;  %v789_v15 = vmul.f32 %v788_v29, %v1874_v42  ;;  %v889_v26 = vmul.f32 %v2175_v13, %v1827_v56  ;;  %v808_v62 = vmul.f32 %v788_v29, %v1857_v41  ;;  %v816_v55 = vld [vmem:[#allocation2 + $0x100] sm:$0xff] }
 0x13c   :  { %v794_v21 = vld [vmem:[#allocation2 + $0xf2] sm:$0xff]  ;;  %v887_v16 = vadd.f32 %v886_v10, %v883_v52  ;;  %v792_v22 = vmul.f32 %v791_v44, %v1877_v47  ;;  %v827_v24 = vmul.f32 %v788_v29, %v1817_v34  ;;  %v830_v2 = vmul.f32 %v791_v44, %v1821_v40  ;;  %v819_v36 = vld [vmem:[#allocation2 + $0x101] sm:$0xff] }
 0x13d   :  { %v790_v0 = vadd.f32 %v789_v15, %v787_v43  ;;  %v795_v23 = vmul.f32 %v1883_v58, %v794_v21  ;;  %v809_v49 = vadd.f32 %v808_v62, %v806_v3  ;;  %v811_v50 = vmul.f32 %v791_v44, %v1860_v25  ;;  %v822_v63 = vld [vmem:[#allocation2 + $0x102] sm:$0xff] }
 0x13e   :  { %v890_v51 = vadd.f32 %v889_v26, %v887_v16  ;;  %v814_v28 = vmul.f32 %v794_v21, %v1871_v39  ;;  %v831_v53 = vadd.f32 %v830_v2, %v827_v24  ;;  %v833_v43 = vmul.f32 %v794_v21, %v1827_v56 }
 0x13f   :  { %v793_v5 = vadd.f32 %v792_v22, %v790_v0  ;;  %v892_v45 = vmul.f32 %v2216_v35, %v1857_v41  ;;  %v812_v29 = vadd.f32 %v811_v50, %v809_v49  ;;  %v895_v4 = vmul.f32 %v2221_v30, %v1860_v25 }
 0x140   :  { %v898_v3 = vmul.f32 %v2223_v37, %v1871_v39  ;;  %v817_v44 = vmul.f32 %v816_v55, %v1874_v42  ;;  %v1496_v52 = vpop.eup %1495  ;;  %v834_v15 = vadd.f32 %v833_v43, %v831_v53  ;;  %v820_v26 = vmul.f32 %v819_v36, %v1877_v47 }
 0x141   :  { %v796_v10 = vadd.f32 %v795_v23, %v793_v5  ;;  %v893_v16 = vadd.f32 %v892_v45, %v890_v51  ;;  %v815_v22 = vadd.f32 %v814_v28, %v812_v29  ;;  %v823_v62 = vmul.f32 %v1883_v58, %v822_v63  ;;  %v916_v51 = vld [vmem:[#allocation3 + $0x28] sm:$0xff] }
 0x142   :  { %v1498_v21 = vpop.eup %1497  ;;  %v836_v0 = vmul.f32 %v816_v55, %v1857_v41  ;;  %v839_v24 = vmul.f32 %v819_v36, %v1860_v25  ;;  %v842_v49 = vmul.f32 %v822_v63, %v1871_v39  ;;  %v855_v50 = vmul.f32 %v816_v55, %v1817_v34 }
 0x143   :  { %797 = vst.msk [vmem:[#allocation3 + $0x58] sm:$0xff] %vm348_vm1, %v796_v10  ;;  %v896_v2 = vadd.f32 %v895_v4, %v893_v16  ;;  %v858_v23 = vmul.f32 %v819_v36, %v1821_v40  ;;  %v818_v5 = vadd.f32 %v817_v44, %v815_v22  ;;  %v861_v28 = vmul.f32 %v822_v63, %v1827_v56  ;;  %v2547_v16 = vld [vmem:[#allocation11_spill] sm:$0xff]  ;;  %v919_v36 = vld [vmem:[#allocation3 + $0x40] sm:$0xff]  ;;  %v2548_v44 = vld [vmem:[#allocation10_spill] sm:$0xff] }
 0x144   :  { %v837_v53 = vadd.f32 %v836_v0, %v834_v15  ;;  %v1021_v43 = vadd.f32 1.0, %v1496_v52  ;;  %v1022_v41 = vadd.f32 1.0, %v1498_v21  ;;  %1499 = vpow2.f32 %v2169_v32  ;;  %v2550_v22 = vld [vmem:[#allocation13_spill] sm:$0xff] }
 0x145   :  { %v899_v45 = vadd.f32 %v898_v3, %v896_v2  ;;  %v859_v29 = vadd.f32 %v858_v23, %v855_v50  ;;  %v821_v25 = vadd.f32 %v820_v26, %v818_v5  ;;  %v939_v4 = vmul.f32 %v2115_v12, %v916_v51 }
 0x146   :  { %v840_v10 = vadd.f32 %v839_v24, %v837_v53  ;;  %1501 = vrcp.f32 %v1021_v43  ;;  %v654_v40 = vadd.f32 %v2053_v19, %v2184_v11  ;;  %v683_v52 = vadd.f32 %v2548_v44, %v2188_v48 }
 0x147   :  { %v903_v34 = vadd.f32 %v2547_v16, %v899_v45  ;;  %v862_v55 = vadd.f32 %v861_v28, %v859_v29  ;;  %1503 = vrcp.f32 %v1022_v41  ;;  %v824_v56 = vadd.f32 %v823_v62, %v821_v25 }
 0x148   :  { %v843_v63 = vadd.f32 %v842_v49, %v840_v10  ;;  %1505 = vpow2.f32 %v2172_v60  ;;  %v2251_v3 = vadd.f32 %v2127_v27, %v939_v4  ;;  %655 = vst.msk [vmem:[#allocation3 + $0x30] sm:$0xff] %vm348_vm1, %v654_v40  ;;  %v740_v19 = vadd.f32 %v2066_v7, %v2191_v61  ;;  %684 = vst.msk [vmem:[#allocation3 + $0x38] sm:$0xff] %vm348_vm1, %v683_v52  ;;  %v2549_v61 = vld [vmem:[#allocation12_spill] sm:$0xff] }
 0x149   :  { %v865_v32 = vadd.f32 %v2206_v54, %v862_v55  ;;  %1507 = vpow2.f32 %v2178_v20  ;;  %825 = vst.msk [vmem:[#allocation3 + $0x60] sm:$0xff] %vm348_vm1, %v824_v56  ;;  %v942_v15 = vmul.f32 %v2115_v12, %v919_v36  ;;  %v762_v54 = vadd.f32 %v2096_v8, %v2181_v9 }
 0x14a   :  { %v846_v11 = vadd.f32 %v2194_v1, %v843_v63  ;;  %v1347_v60 = vmul.f32 -1.442695, %v2251_v3  ;;  %v922_v20 = vld [vmem:[#allocation3 + $0x58] sm:$0xff]  ;;  %v870_v26 = vmul.f32 %v2175_v13, %v1871_v39  ;;  %741 = vst.msk [vmem:[#allocation3 + $0x48] sm:$0xff] %vm348_vm1, %v740_v19  ;;  %v906_v1 = vadd.f32 %v2549_v61, %v903_v34 }
 0x14b   :  { %v868_v48 = vadd.f32 %v2209_v33, %v865_v32  ;;  %v945_v7 = vmul.f32 %v2115_v12, %v922_v20  ;;  %v2274_v21 = vadd.f32 %v2127_v27, %v942_v15  ;;  %v765_v8 = vadd.f32 %v2104_v59, %v762_v54 }
 0x14c   :  { %1509 = vpow2.f32 %v1347_v60  ;;  %v849_v9 = vadd.f32 %v2197_v57, %v846_v11  ;;  %v873_v39 = vmul.f32 %v2216_v35, %v1874_v42  ;;  %v909_v62 = vadd.f32 %v2550_v22, %v906_v1 }
 0x14d   :  { %v871_v13 = vadd.f32 %v870_v26, %v868_v48  ;;  %v2281_v33 = vadd.f32 %v2127_v27, %v945_v7  ;;  %v1350_v0 = vmul.f32 -1.442695, %v2274_v21  ;;  %v768_v24 = vadd.f32 %v2166_v31, %v765_v8 }
 0x14e   :  { %v852_v2 = vadd.f32 %v2203_v46, %v849_v9  ;;  %v1500_v49 = vpop.eup %1499  ;;  %v876_v59 = vmul.f32 %v2221_v30, %v1877_v47  ;;  %910 = vst.msk [vmem:[#allocation3 + $0x78] sm:$0xff] %vm348_vm1, %v909_v62  ;;  %v879_v46 = vmul.f32 %v1883_v58, %v2223_v37 }
 0x14f   :  { %v1353_v57 = vmul.f32 -1.442695, %v2281_v33  ;;  %v874_v50 = vadd.f32 %v873_v39, %v871_v13  ;;  %v1023_v35 = vadd.f32 1.0, %v1500_v49  ;;  %v917_v23 = vld [vmem:[#allocation3 + $0x30] sm:$0xff]  ;;  %1511 = vpow2.f32 %v1350_v0  ;;  %769 = vst.msk [vmem:[#allocation3 + $0x50] sm:$0xff] %vm348_vm1, %v768_v24  ;;  %v918_v43 = vld [vmem:[#allocation3 + $0x38] sm:$0xff] }
 0x150   :  { %v1502_v42 = vpop.eup %1501  ;;  %853 = vst.msk [vmem:[#allocation3 + $0x68] sm:$0xff] %vm348_vm1, %v852_v2  ;;  %v940_v51 = vmul.f32 %v2115_v12, %v917_v23  ;;  %v923_v47 = vld [vmem:[#allocation3 + $0x60] sm:$0xff]  ;;  %v941_v10 = vmul.f32 %v2115_v12, %v918_v43 }
 0x151   :  { %v1504_v31 = vpop.eup %1503  ;;  %1513 = vpow2.f32 %v1353_v57  ;;  %v877_v30 = vadd.f32 %v876_v59, %v874_v50  ;;  %v1069_v53 = vmul.f32 %v1502_v42, %v2140_v17  ;;  %v920_v45 = vld [vmem:[#allocation3 + $0x48] sm:$0xff]  ;;  %v946_v29 = vmul.f32 %v2115_v12, %v923_v47 }
 0x152   :  { %v1506_v5 = vpop.eup %1505  ;;  %v1070_v28 = vmul.f32 %v1504_v31, %v2143_v6  ;;  %1515 = vrcp.f32 %v1023_v35  ;;  %v2301_v58 = vadd.f32 %v2127_v27, %v940_v51  ;;  %v943_v37 = vmul.f32 %v2115_v12, %v920_v45 }
 0x153   :  { %v1508_v41 = vpop.eup %1507  ;;  %v1024_v25 = vadd.f32 1.0, %v1506_v5  ;;  %v2305_v17 = vadd.f32 %v2127_v27, %v946_v29  ;;  %v880_v6 = vadd.f32 %v879_v46, %v877_v30  ;;  %v2308_v34 = vadd.f32 %v2127_v27, %v941_v10 }
 0x154   :  { %v1085_v4 = vpack.c.bf16 %v1070_v28, %v1069_v53  ;;  %v1025_v16 = vadd.f32 1.0, %v1508_v41  ;;  %v1348_v55 = vmul.f32 -1.442695, %v2301_v58  ;;  %v2312_v40 = vadd.f32 %v2127_v27, %v943_v37 }
 0x155   :  { %1517 = vrcp.f32 %v1024_v25  ;;  %v1354_v56 = vmul.f32 -1.442695, %v2305_v17  ;;  %881 = vst.msk [vmem:[#allocation3 + $0x70] sm:$0xff] %vm348_vm1, %v880_v6  ;;  %v926_v63 = vld [vmem:[#allocation3 + $0x78] sm:$0xff]  ;;  %v1349_v44 = vmul.f32 -1.442695, %v2308_v34 }
 0x156   :  { %v1510_v36 = vpop.eup %1509  ;;  %1411 = vmatprep.mubr.msk.bf16.mxu1 %vm348_vm1, %v1085_v4  ;;  %1519 = vrcp.f32 %v1025_v16  ;;  %v1351_v52 = vmul.f32 -1.442695, %v2312_v40  ;;  %v921_v19 = vld [vmem:[#allocation3 + $0x50] sm:$0xff]  ;;  %v949_v15 = vmul.f32 %v2115_v12, %v926_v63 }
 0x157   :  { %v1026_v32 = vadd.f32 1.0, %v1510_v36  ;;  %1521 = vpow2.f32 %v1348_v55  ;;  %v944_v11 = vmul.f32 %v2115_v12, %v921_v19  ;;  %v924_v60 = vld [vmem:[#allocation3 + $0x68] sm:$0xff] }
 0x158   :  { %1523 = vpow2.f32 %v1354_v56  ;;  %v947_v54 = vmul.f32 %v2115_v12, %v924_v60  ;;  %v2326_v48 = vadd.f32 %v2127_v27, %v949_v15 }
 0x159   :  { %1525 = vrcp.f32 %v1026_v32  ;;  %v1512_v20 = vpop.eup %1511  ;;  %v2323_v26 = vadd.f32 %v2127_v27, %v944_v11 }
 0x15a   :  { %1527 = vpow2.f32 %v1349_v44  ;;  %v2329_v61 = vadd.f32 %v2127_v27, %v947_v54  ;;  %v1357_v13 = vmul.f32 -1.442695, %v2326_v48  ;;  %v1029_v57 = vadd.f32 1.0, %v1512_v20 }
 0x15b   :  { %v1514_v7 = vpop.eup %1513  ;;  %1529 = vpow2.f32 %v1351_v52  ;;  %v1352_v8 = vmul.f32 -1.442695, %v2323_v26 }
 0x15c   :  { %v1516_v1 = vpop.eup %1515  ;;  %v1355_v9 = vmul.f32 -1.442695, %v2329_v61  ;;  %v925_v39 = vld [vmem:[#allocation3 + $0x70] sm:$0xff]  ;;  %v1032_v30 = vadd.f32 1.0, %v1514_v7 }
 0x15d   :  { %v1071_v22 = vmul.f32 %v1516_v1, %v2150_v18  ;;  %1531 = vpow2.f32 %v1352_v8  ;;  %v948_v62 = vmul.f32 %v2115_v12, %v925_v39 }
 0x15e   :  { %1533 = vpow2.f32 %v1355_v9 }
 0x15f   :  { %v1518_v0 = vpop.eup %1517  ;;  %v2338_v49 = vadd.f32 %v2127_v27, %v948_v62  ;;  %1535 = vpow2.f32 %v1357_v13 }
 0x160   :  { %v1520_v24 = vpop.eup %1519  ;;  %v1072_v2 = vmul.f32 %v1518_v0, %v2153_v38 }
 0x161   :  { %v1522_v59 = vpop.eup %1521  ;;  %v1356_v23 = vmul.f32 -1.442695, %v2338_v49  ;;  %v1073_v12 = vmul.f32 %v1520_v24, %v2159_v14  ;;  %v1559_v24 = vld [vmem:[%s2515_s0 + $0x10] sm:$0xff] }
 0x162   :  { %v1524_v50 = vpop.eup %1523  ;;  %v1086_v42 = vpack.c.bf16 %v1072_v2, %v1071_v22  ;;  %v1027_v35 = vadd.f32 1.0, %v1522_v59  ;;  %v1560_v59 = vld [vmem:[%s2515_s0] sm:$0xff] }
 0x163   :  { %v1526_v18 = vpop.eup %1525  ;;  %v1033_v53 = vadd.f32 1.0, %v1524_v50 }
 0x164   :  { %v1528_v31 = vpop.eup %1527  ;;  %1412 = vmatmul.mubr.msk.bf16.vlgmr.msra.gmra.mrb[0].mxu1 %vm348_vm1, %v1086_v42  ;;  %v1074_v38 = vmul.f32 %v1526_v18, %v2251_v3  ;;  %1537 = vrcp.f32 %v1027_v35  ;;  %v1561_v42 = vld [vmem:[%s2515_s0 + $0x18] sm:$0xff] }
 0x165   :  { %v1530_v46 = vpop.eup %1529  ;;  %v1028_v27 = vadd.f32 1.0, %v1528_v31  ;;  %1539 = vrcp.f32 %v1029_v57 }
 0x166   :  { %v1087_v51 = vpack.c.bf16 %v1074_v38, %v1073_v12  ;;  %v1030_v47 = vadd.f32 1.0, %v1530_v46  ;;  %1541 = vpow2.f32 %v1356_v23  ;;  %v1562_v23 = vld [vmem:[%s2515_s0 + $0x8] sm:$0xff] }
 0x167   :  { %1543 = vrcp.f32 %v1028_v27  ;;  %v1532_v5 = vpop.eup %1531 }
 0x168   :  { %1415 = vmatprep.mubr.msk.bf16.mxu1 %vm348_vm1, %v1087_v51  ;;  %1545 = vrcp.f32 %v1030_v47  ;;  %v1031_v28 = vadd.f32 1.0, %v1532_v5  ;;  %v1534_v43 = vpop.eup %1533 }
 0x169   :  { %1547 = vrcp.f32 %v1032_v30  ;;  %v1536_v14 = vpop.eup %1535  ;;  %v1034_v3 = vadd.f32 1.0, %v1534_v43 }
 0x16a   :  { %1549 = vrcp.f32 %v1031_v28  ;;  %v1036_v29 = vadd.f32 1.0, %v1536_v14  ;;  %v1563_v28 = vld [vmem:[%s2515_s0 + $0x30] sm:$0xff] }
 0x16b   :  { %1551 = vrcp.f32 %v1033_v53 }
 0x16c   :  { %1553 = vrcp.f32 %v1034_v3  ;;  %v1564_v3 = vld [vmem:[%s2515_s0 + $0x20] sm:$0xff] }
 0x16d   :  { %1555 = vrcp.f32 %v1036_v29 }
 0x16e   :  { %v1538_v45 = vpop.eup %1537 }
 0x16f   :  { %v1540_v41 = vpop.eup %1539  ;;  %v1075_v10 = vmul.f32 %v1538_v45, %v2301_v58 }
 0x170   :  { %v1542_v25 = vpop.eup %1541  ;;  %v1077_v55 = vmul.f32 %v1540_v41, %v2274_v21  ;;  %v1565_v41 = vld [vmem:[%s2515_s0 + $0x38] sm:$0xff] }
 0x171   :  { %v1544_v37 = vpop.eup %1543  ;;  %v1035_v4 = vadd.f32 1.0, %v1542_v25 }
 0x172   :  { %v1546_v16 = vpop.eup %1545  ;;  %v1076_v6 = vmul.f32 %v1544_v37, %v2308_v34 }
 0x173   :  { %v1078_v36 = vmul.f32 %v1546_v16, %v2312_v40  ;;  %1557 = vrcp.f32 %v1035_v4  ;;  %v1548_v56 = vpop.eup %1547 }
 0x174   :  { %v1088_v63 = vpack.c.bf16 %v1076_v6, %v1075_v10  ;;  %v1550_v32 = vpop.eup %1549  ;;  %v1080_v34 = vmul.f32 %v1548_v56, %v2281_v33  ;;  %v2363_v33 = vld [vmem:[%s2522_s8] ss:$0 sm:$0xff]  ;;  %v1566_v10 = vld [vmem:[%s2515_s0 + $0x28] sm:$0xff] }
 0x175   :  { %v1089_v44 = vpack.c.bf16 %v1078_v36, %v1077_v55  ;;  %v1552_v52 = vpop.eup %1551  ;;  %v1079_v58 = vmul.f32 %v1550_v32, %v2323_v26 }
 0x176   :  { %1416 = vmatmul.mubr.msk.bf16.gmra.mrb[4].mxu1 %vm348_vm1, %v1088_v63  ;;  %v1554_v19 = vpop.eup %1553  ;;  %v1081_v21 = vmul.f32 %v1552_v52, %v2305_v17 }
 0x177   :  { %1419 = vmatprep.mubr.msk.bf16.mxu1 %vm348_vm1, %v1089_v44  ;;  %v1082_v11 = vmul.f32 %v1554_v19, %v2329_v61  ;;  %v1090_v40 = vpack.c.bf16 %v1080_v34, %v1079_v58  ;;  %v1556_v15 = vpop.eup %1555  ;;  %v2368_v61 = vld [vmem:[%s2523_s9] ss:$0 sm:$0xff]  ;;  %v1567_v58 = vld [vmem:[%s2515_s0 + $0x50] sm:$0xff] }
 0x178   :  { %v1084_v26 = vmul.f32 %v1556_v15, %v2326_v48 }
 0x179   :  { %v1091_v60 = vpack.c.bf16 %v1082_v11, %v1081_v21  ;;  %v1568_v11 = vld [vmem:[%s2515_s0 + $0x40] sm:$0xff] }
 0x17d   :  { %v1558_v54 = vpop.eup %1557 }
 0x17e   :  { %1420 = vmatmul.mubr.msk.bf16.gmra.mrb[8].mxu1 %vm348_vm1, %v1090_v40  ;;  %v1083_v20 = vmul.f32 %v1558_v54, %v2338_v49  ;;  %v1570_v54 = vld [vmem:[%s2515_s0 + $0x48] sm:$0xff] }
 0x17f   :  { %1423 = vmatprep.mubr.msk.bf16.mxu1 %vm348_vm1, %v1091_v60  ;;  %v1569_v60 = vld [vmem:[%s2515_s0 + $0x58] sm:$0xff] }
 0x180   :  { %v1092_v7 = vpack.c.bf16 %v1084_v26, %v1083_v20 }
 0x186   :  { %1424 = vmatmul.mubr.msk.bf16.gmra.mrb[12].mxu1 %vm348_vm1, %v1092_v7 }
 0x237   :  { %v1413_v17 = vpop.f32.mrb[0].mxu1 }
 0x238   :  { %v1239_v1 = vmul.f32 %v1413_v17, %v2363_v33  ;;  %v1167_v8 = vpop.f32.mrb[1].mxu1 }
 0x239   :  { %v1237_v9 = vmul.f32 %v2363_v33, %v1167_v8  ;;  %v1414_v48 = vpop.f32.mrb[2].mxu1 }
 0x23a   :  { %v1262_v39 = vadd.f32 %v2368_v61, %v1239_v1  ;;  %v1240_v13 = vmul.f32 %v1414_v48, %v2363_v33  ;;  %v1170_v22 = vpop.f32.mrb[3].mxu1 }
 0x23b   :  { %v1260_v62 = vadd.f32 %v2368_v61, %v1237_v9  ;;  %v1238_v0 = vmul.f32 %v2363_v33, %v1170_v22 }
 0x23c   :  { %v1278_v2 = vadd.f32 %v1559_v24, %v1262_v39  ;;  %v1263_v49 = vadd.f32 %v2368_v61, %v1240_v13 }
 0x23d   :  { %v1276_v57 = vadd.f32 %v1560_v59, %v1260_v62  ;;  %v1261_v50 = vadd.f32 %v2368_v61, %v1238_v0  ;;  %v1571_v62 = vld [vmem:[%s2515_s0 + $0x70] sm:$0xff] }
 0x23e   :  { %1294 = vst.msk [vmem:[%s2524_s10 + $0x10] sm:$0xff] %vm68_vm0, %v1278_v2  ;;  %v1279_v35 = vadd.f32 %v1561_v42, %v1263_v49  ;;  %v1572_v2 = vld [vmem:[%s2515_s0 + $0x60] sm:$0xff] }
 0x23f   :  { %1292 = vst.msk [vmem:[%s2524_s10] sm:$0xff] %vm68_vm0, %v1276_v57  ;;  %v1277_v18 = vadd.f32 %v1562_v23, %v1261_v50  ;;  %v1574_v50 = vld [vmem:[%s2515_s0 + $0x68] sm:$0xff] }
 0x240   :  { %1295 = vst.msk [vmem:[%s2524_s10 + $0x18] sm:$0xff] %vm68_vm0, %v1279_v35 }
 0x241   :  { %1293 = vst.msk [vmem:[%s2524_s10 + $0x8] sm:$0xff] %vm68_vm0, %v1277_v18 }
 0x249   :  { %v1417_v31 = vpop.f32.mrb[4].mxu1 }
 0x24a   :  { %v1243_v12 = vmul.f32 %v1417_v31, %v2363_v33  ;;  %v1183_v38 = vpop.f32.mrb[5].mxu1 }
 0x24b   :  { %v1241_v46 = vmul.f32 %v2363_v33, %v1183_v38  ;;  %v1418_v27 = vpop.f32.mrb[6].mxu1 }
 0x24c   :  { %v1266_v51 = vadd.f32 %v2368_v61, %v1243_v12  ;;  %v1244_v47 = vmul.f32 %v1418_v27, %v2363_v33  ;;  %v1186_v30 = vpop.f32.mrb[7].mxu1 }
 0x24d   :  { %v1264_v5 = vadd.f32 %v2368_v61, %v1241_v46  ;;  %v1242_v53 = vmul.f32 %v2363_v33, %v1186_v30 }
 0x24e   :  { %v1282_v43 = vadd.f32 %v1563_v28, %v1266_v51  ;;  %v1267_v14 = vadd.f32 %v2368_v61, %v1244_v47 }
 0x24f   :  { %v1280_v45 = vadd.f32 %v1564_v3, %v1264_v5  ;;  %v1265_v29 = vadd.f32 %v2368_v61, %v1242_v53 }
 0x250   :  { %1298 = vst.msk [vmem:[%s2524_s10 + $0x30] sm:$0xff] %vm68_vm0, %v1282_v43  ;;  %v1283_v25 = vadd.f32 %v1565_v41, %v1267_v14 }
 0x251   :  { %1296 = vst.msk [vmem:[%s2524_s10 + $0x20] sm:$0xff] %vm68_vm0, %v1280_v45  ;;  %v1281_v37 = vadd.f32 %v1566_v10, %v1265_v29  ;;  %v1421_v4 = vpop.f32.mrb[8].mxu1 }
 0x252   :  { %1299 = vst.msk [vmem:[%s2524_s10 + $0x38] sm:$0xff] %vm68_vm0, %v1283_v25  ;;  %v1247_v16 = vmul.f32 %v1421_v4, %v2363_v33  ;;  %v1199_v6 = vpop.f32.mrb[9].mxu1 }
 0x253   :  { %1297 = vst.msk [vmem:[%s2524_s10 + $0x28] sm:$0xff] %vm68_vm0, %v1281_v37  ;;  %v1245_v55 = vmul.f32 %v2363_v33, %v1199_v6  ;;  %v1422_v36 = vpop.f32.mrb[10].mxu1 }
 0x254   :  { %v1270_v56 = vadd.f32 %v2368_v61, %v1247_v16  ;;  %v1248_v63 = vmul.f32 %v1422_v36, %v2363_v33  ;;  %v1202_v32 = vpop.f32.mrb[11].mxu1 }
 0x255   :  { %v1268_v44 = vadd.f32 %v2368_v61, %v1245_v55  ;;  %v1246_v52 = vmul.f32 %v2363_v33, %v1202_v32 }
 0x256   :  { %v1286_v19 = vadd.f32 %v1567_v58, %v1270_v56  ;;  %v1271_v34 = vadd.f32 %v2368_v61, %v1248_v63 }
 0x257   :  { %v1284_v21 = vadd.f32 %v1568_v11, %v1268_v44  ;;  %v1269_v40 = vadd.f32 %v2368_v61, %v1246_v52 }
 0x258   :  { %1302 = vst.msk [vmem:[%s2524_s10 + $0x50] sm:$0xff] %vm68_vm0, %v1286_v19  ;;  %v1287_v15 = vadd.f32 %v1569_v60, %v1271_v34 }
 0x259   :  { %1300 = vst.msk [vmem:[%s2524_s10 + $0x40] sm:$0xff] %vm68_vm0, %v1284_v21  ;;  %v1285_v20 = vadd.f32 %v1570_v54, %v1269_v40  ;;  %v1425_v26 = vpop.f32.mrb[12].mxu1 }
 0x25a   :  { %1303 = vst.msk [vmem:[%s2524_s10 + $0x58] sm:$0xff] %vm68_vm0, %v1287_v15  ;;  %v1251_v7 = vmul.f32 %v1425_v26, %v2363_v33  ;;  %v1215_v17 = vpop.f32.mrb[13].mxu1 }
 0x25b   :  { %1301 = vst.msk [vmem:[%s2524_s10 + $0x48] sm:$0xff] %vm68_vm0, %v1285_v20  ;;  %v1249_v1 = vmul.f32 %v2363_v33, %v1215_v17  ;;  %v1426_v8 = vpop.f32.mrb[14].mxu1 }
 0x25c   :  { %v1274_v9 = vadd.f32 %v2368_v61, %v1251_v7  ;;  %v1252_v48 = vmul.f32 %v1426_v8, %v2363_v33  ;;  %v1218_v39 = vpop.f32.mrb[15].mxu1 }
 0x25d   :  { %v1272_v13 = vadd.f32 %v2368_v61, %v1249_v1  ;;  %v1250_v22 = vmul.f32 %v2363_v33, %v1218_v39  ;;  %v1573_v33 = vld [vmem:[%s2515_s0 + $0x78] sm:$0xff] }
 0x25e   :  { %v1290_v0 = vadd.f32 %v1571_v62, %v1274_v9  ;;  %v1275_v24 = vadd.f32 %v2368_v61, %v1252_v48 }
 0x25f   :  { %v1288_v49 = vadd.f32 %v1572_v2, %v1272_v13  ;;  %v1273_v59 = vadd.f32 %v2368_v61, %v1250_v22 }
 0x260   :  { %1306 = vst.msk [vmem:[%s2524_s10 + $0x70] sm:$0xff] %vm68_vm0, %v1290_v0  ;;  %v1291_v57 = vadd.f32 %v1573_v33, %v1275_v24 }
 0x261   :  { %1304 = vst.msk [vmem:[%s2524_s10 + $0x60] sm:$0xff] %vm68_vm0, %v1288_v49  ;;  %v1289_v61 = vadd.f32 %v1574_v50, %v1273_v59 }
 0x262   :  { %1307 = vst.msk [vmem:[%s2524_s10 + $0x78] sm:$0xff] %vm68_vm0, %v1291_v57 }
 0x263   :  { %1305 = vst.msk [vmem:[%s2524_s10 + $0x68] sm:$0xff] %vm68_vm0, %v1289_v61 }

// kernel: encoder_forward.7
= control target key start
LH: loop header
LB: loop body
LE: loop exit
PB: predicated region body
PF: predicated region fallthrough
CT: control target
= control target key end

     0   :  { %vm68_vm0 = vcmask 130048   ;;  %vm348_vm1 = vcmask 261120   ;;  %vm350_vm2 = vcmask 254976   ;;  %v1036_v25 = vmov 0.0   ;;  %s1533_s1 = inlined_call_operand.vmem [shape: bf16[16,32], index: 1, kind: input, shape index: {}]   ;;  %s1534_s0 = inlined_call_operand.vmem [shape: f32[128,16], index: 0, kind: input, shape index: {}]   ;;  %s1535_s7 = inlined_call_operand.vmem [shape: bf16[32,24], index: 7, kind: input, shape index: {}]   ;;  %s1536_s2 = inlined_call_operand.vmem [shape: f32[1,32], index: 2, kind: input, shape index: {}]   ;;  %s1537_s3 = inlined_call_operand.vmem [shape: f32[1,32], index: 3, kind: input, shape index: {}]   ;;  %s1538_s4 = inlined_call_operand.vmem [shape: f32[9,32], index: 4, kind: input, shape index: {}]   ;;  %s1539_s5 = inlined_call_operand.vmem [shape: f32[1,32], index: 5, kind: input, shape index: {}]   ;;  %s1540_s6 = inlined_call_operand.vmem [shape: f32[1,32], index: 6, kind: input, shape index: {}]   ;;  %s1541_s8 = inlined_call_operand.vmem [shape: f32[1,24], index: 8, kind: input, shape index: {}]   ;;  %s1542_s9 = inlined_call_operand.vmem [shape: f32[1,24], index: 9, kind: input, shape index: {}]   ;;  %s1543_s10 = inlined_call_operand.vmem [shape: f32[32,24], index: 10, kind: output, shape index: {}]  }
   0x1   :  { %v953_v0 = vld [vmem:[%s1533_s1] sm:$0xff]   ;;  %v37_v2 = vld [vmem:[%s1534_s0 + $0x8] sm:$0xff]  ;;  %v38_v6 = vld [vmem:[%s1534_s0 + $0x10] sm:$0xff]  ;;  %356 = vst.msk [vmem:[#allocation2 + $0x30] sm:$0xff] %vm348_vm1, %v1036_v25  ;;  %vm487_vm3 = vcmask 253952   ;;  %vm489_vm4 = vcmask 256002  }
   0x2   :  { %v36_v1 = vld [vmem:[%s1534_s0] sm:$0xff]  ;;  %924 = vmatprep.subr.bf16.mxu0 %v953_v0  ;;  %950 = vmatprep.subr.bf16.mxu1 %v953_v0  ;;  %v49_v5 = vld [vmem:[%s1534_s0 + $0x68] sm:$0xff]  ;;  %v39_v7 = vld [vmem:[%s1534_s0 + $0x18] sm:$0xff]  ;;  %357 = vst.msk [vmem:[#allocation2 + $0x38] sm:$0x3] %vm350_vm2, %v1036_v25  ;;  %vm491_vm5 = vcmask 258052  }
   0x3   :  { %v48_v3 = vld [vmem:[%s1534_s0 + $0x60] sm:$0xff]  ;;  %v52_v4 = vpack.c.bf16 %v37_v2, %v36_v1  ;;  %925 = vmatpush3.bf16.msra.mxu0 %v953_v0  ;;  %951 = vmatpush3.bf16.msra.mxu1 %v953_v0  ;;  %v53_v9 = vpack.c.bf16 %v39_v7, %v38_v6  ;;  %v50_v10 = vld [vmem:[%s1534_s0 + $0x70] sm:$0xff]  ;;  %v51_v11 = vld [vmem:[%s1534_s0 + $0x78] sm:$0xff]  ;;  %349 = vst.msk [vmem:[#allocation2] sm:$0xff] %vm348_vm1, %v1036_v25  ;;  %vm493_vm6 = vcmask 260102   ;;  %vm862_vm7 = vcmask 195584  }
   0x4   :  { %v58_v8 = vpack.c.bf16 %v49_v5, %v48_v3  ;;  %v40_v12 = vld [vmem:[%s1534_s0 + $0x20] sm:$0xff]  ;;  %v59_v13 = vpack.c.bf16 %v51_v11, %v50_v10  ;;  %v41_v14 = vld [vmem:[%s1534_s0 + $0x28] sm:$0xff]  ;;  %v42_v16 = vld [vmem:[%s1534_s0 + $0x30] sm:$0xff]  ;;  %351 = vst.msk [vmem:[#allocation2 + $0x8] sm:$0x3] %vm350_vm2, %v1036_v25 }
   0x5   :  { %926 = vmatprep.mubr.msk.bf16.mxu0 %vm68_vm0, %v52_v4  ;;  %v54_v15 = vpack.c.bf16 %v41_v14, %v40_v12  ;;  %v43_v17 = vld [vmem:[%s1534_s0 + $0x38] sm:$0xff]  ;;  %v44_v18 = vld [vmem:[%s1534_s0 + $0x40] sm:$0xff]  ;;  %v45_v19 = vld [vmem:[%s1534_s0 + $0x48] sm:$0xff]  ;;  %352 = vst.msk [vmem:[#allocation2 + $0x10] sm:$0xff] %vm348_vm1, %v1036_v25 }
   0x6   :  { %938 = vmatprep.mubr.msk.bf16.mxu1 %vm68_vm0, %v58_v8  ;;  %927 = vmatmul.mubr.msk.bf16.vlgmr.msra.gmra.mrb[0].mxu0 %vm68_vm0, %v53_v9  ;;  %v55_v20 = vpack.c.bf16 %v43_v17, %v42_v16  ;;  %v56_v21 = vpack.c.bf16 %v45_v19, %v44_v18  ;;  %v46_v22 = vld [vmem:[%s1534_s0 + $0x50] sm:$0xff]  ;;  %v47_v23 = vld [vmem:[%s1534_s0 + $0x58] sm:$0xff]  ;;  %353 = vst.msk [vmem:[#allocation2 + $0x18] sm:$0x3] %vm350_vm2, %v1036_v25  ;;  %355 = vst.msk [vmem:[#allocation2 + $0x28] sm:$0x3] %vm350_vm2, %v1036_v25 }
   0x7   :  { %939 = vmatmul.mubr.msk.bf16.vlgmr.msra.gmra.mrb[0].mxu1 %vm68_vm0, %v59_v13  ;;  %930 = vmatprep.mubr.msk.bf16.mxu0 %vm68_vm0, %v54_v15  ;;  %v57_v24 = vpack.c.bf16 %v47_v23, %v46_v22  ;;  %354 = vst.msk [vmem:[#allocation2 + $0x20] sm:$0xff] %vm348_vm1, %v1036_v25  ;;  %358 = vst.msk [vmem:[#allocation2 + $0x40] sm:$0xff] %vm348_vm1, %v1036_v25  ;;  %v954_v26 = vld [vmem:[%s1535_s7] sm:$0xff]   ;;  %v955_v27 = vld [vmem:[%s1535_s7 + $0x8] sm:$0xff]   ;;  %v425_v13 = vlaneseq }
   0x8   :  { %359 = vst.msk [vmem:[#allocation2 + $0x48] sm:$0x3] %vm350_vm2, %v1036_v25  ;;  %361 = vst.msk [vmem:[#allocation2 + $0x58] sm:$0x3] %vm350_vm2, %v1036_v25  ;;  %942 = vmatprep.subr.bf16.mxu1 %v954_v26  ;;  %v1196_v28 = vld [vmem:[%s1536_s2] ss:$0 sm:$0xff] }
   0x9   :  { %360 = vst.msk [vmem:[#allocation2 + $0x50] sm:$0xff] %vm348_vm1, %v1036_v25  ;;  %362 = vst.msk [vmem:[#allocation2 + $0x60] sm:$0xff] %vm348_vm1, %v1036_v25  ;;  %943 = vmatpush3.bf16.msra.mxu1 %v954_v26  ;;  %v1201_v30 = vld [vmem:[%s1537_s3] ss:$0 sm:$0xff] }
   0xa   :  { %363 = vst.msk [vmem:[#allocation2 + $0x68] sm:$0x3] %vm350_vm2, %v1036_v25  ;;  %365 = vst.msk [vmem:[#allocation2 + $0x78] sm:$0x3] %vm350_vm2, %v1036_v25  ;;  %944 = vmatprep.subr.bf16.mxu1 %v955_v27 }
   0xb   :  { %364 = vst.msk [vmem:[#allocation2 + $0x70] sm:$0xff] %vm348_vm1, %v1036_v25  ;;  %366 = vst.msk [vmem:[#allocation2 + $0x80] sm:$0xff] %vm348_vm1, %v1036_v25 }
   0xc   :  { %367 = vst.msk [vmem:[#allocation2 + $0x88] sm:$0x3] %vm350_vm2, %v1036_v25  ;;  %371 = vst.msk [vmem:[#allocation2 + $0xa8] sm:$0x3] %vm350_vm2, %v1036_v25 }
   0xd   :  { %370 = vst.msk [vmem:[#allocation2 + $0xa0] sm:$0xff] %vm348_vm1, %v1036_v25  ;;  %372 = vst.msk [vmem:[#allocation2 + $0xb0] sm:$0xff] %vm348_vm1, %v1036_v25  ;;  %945 = vmatpush3.bf16.msra.mxu1 %v955_v27 }
   0xe   :  { %931 = vmatmul.mubr.msk.bf16.gmra.mrb[4].mxu0 %vm68_vm0, %v55_v20  ;;  %373 = vst.msk [vmem:[#allocation2 + $0xb8] sm:$0x3] %vm350_vm2, %v1036_v25  ;;  %375 = vst.msk [vmem:[#allocation2 + $0xc8] sm:$0x3] %vm350_vm2, %v1036_v25 }
   0xf   :  { %934 = vmatprep.mubr.msk.bf16.mxu0 %vm68_vm0, %v56_v21  ;;  %374 = vst.msk [vmem:[#allocation2 + $0xc0] sm:$0xff] %vm348_vm1, %v1036_v25  ;;  %376 = vst.msk [vmem:[#allocation2 + $0xd0] sm:$0xff] %vm348_vm1, %v1036_v25 }
  0x10   :  { %377 = vst.msk [vmem:[#allocation2 + $0xd8] sm:$0x3] %vm350_vm2, %v1036_v25  ;;  %379 = vst.msk [vmem:[#allocation2 + $0xe8] sm:$0x3] %vm350_vm2, %v1036_v25 }
  0x11   :  { %378 = vst.msk [vmem:[#allocation2 + $0xe0] sm:$0xff] %vm348_vm1, %v1036_v25  ;;  %380 = vst.msk [vmem:[#allocation2 + $0xf0] sm:$0xff] %vm348_vm1, %v1036_v25 }
  0x12   :  { %381 = vst.msk [vmem:[#allocation2 + $0xf8] sm:$0x3] %vm350_vm2, %v1036_v25  ;;  %383 = vst.msk [vmem:[#allocation2 + $0x108] sm:$0x3] %vm350_vm2, %v1036_v25 }
  0x13   :  { %382 = vst.msk [vmem:[#allocation2 + $0x100] sm:$0xff] %vm348_vm1, %v1036_v25  ;;  %384 = vst.msk [vmem:[#allocation2 + $0x110] sm:$0xff] %vm348_vm1, %v1036_v25 }
  0x14   :  { %385 = vst.msk [vmem:[#allocation2 + $0x118] sm:$0x3] %vm350_vm2, %v1036_v25  ;;  %387 = vst.msk [vmem:[#allocation2 + $0x128] sm:$0x3] %vm350_vm2, %v1036_v25 }
  0x15   :  { %386 = vst.msk [vmem:[#allocation2 + $0x120] sm:$0xff] %vm348_vm1, %v1036_v25  ;;  %v1265_v25 = vshrl.u32 %v425_v13, 7 }
  0x16   :  { %935 = vmatmul.mubr.msk.bf16.gmra.mrb[8].mxu0 %vm68_vm0, %v57_v24 }
  0xd9   :  { %v928_v29 = vpop.f32.mrb[0].mxu0 }
  0xda   :  { %v940_v31 = vpop.f32.mrb[0].mxu1  ;;  %v199_v32 = vmul.f32 %v928_v29, %v1196_v28  ;;  %v127_v34 = vpop.f32.mrb[1].mxu0 }
  0xdb   :  { %v211_v33 = vmul.f32 %v940_v31, %v1196_v28  ;;  %v175_v35 = vpop.f32.mrb[1].mxu1  ;;  %v197_v36 = vmul.f32 %v1196_v28, %v127_v34  ;;  %v929_v38 = vpop.f32.mrb[2].mxu0 }
  0xdc   :  { %v209_v37 = vmul.f32 %v1196_v28, %v175_v35  ;;  %v941_v39 = vpop.f32.mrb[2].mxu1  ;;  %v1208_v40 = vadd.f32 %v1201_v30, %v199_v32  ;;  %v200_v42 = vmul.f32 %v929_v38, %v1196_v28  ;;  %v130_v44 = vpop.f32.mrb[3].mxu0 }
  0xdd   :  { %v1211_v41 = vadd.f32 %v1201_v30, %v211_v33  ;;  %v212_v43 = vmul.f32 %v941_v39, %v1196_v28  ;;  %v178_v45 = vpop.f32.mrb[3].mxu1  ;;  %v1216_v46 = vadd.f32 %v1201_v30, %v197_v36  ;;  %v198_v48 = vmul.f32 %v1196_v28, %v130_v44 }
  0xde   :  { %v1219_v47 = vadd.f32 %v1201_v30, %v209_v37  ;;  %v210_v49 = vmul.f32 %v1196_v28, %v178_v45  ;;  %v884_v50 = vmul.f32 -1.442695, %v1208_v40  ;;  %v1226_v52 = vadd.f32 %v1201_v30, %v200_v42  ;;  %v1272_v42 = vld [vmem:[%s1538_s4] sm:$0xff] }
  0xdf   :  { %v896_v51 = vmul.f32 -1.442695, %v1211_v41  ;;  %v1229_v53 = vadd.f32 %v1201_v30, %v212_v43  ;;  %v882_v54 = vmul.f32 -1.442695, %v1216_v46  ;;  %v1234_v56 = vadd.f32 %v1201_v30, %v198_v48 }
  0xe0   :  { %v894_v55 = vmul.f32 -1.442695, %v1219_v47  ;;  %v1237_v57 = vadd.f32 %v1201_v30, %v210_v49  ;;  %956 = vpow2.f32 %v884_v50  ;;  %v885_v58 = vmul.f32 -1.442695, %v1226_v52 }
  0xe1   :  { %958 = vpow2.f32 %v896_v51  ;;  %v897_v59 = vmul.f32 -1.442695, %v1229_v53  ;;  %v932_v60 = vpop.f32.mrb[4].mxu0  ;;  %v883_v61 = vmul.f32 -1.442695, %v1234_v56  ;;  %v427_v36 = vsub.s32 0, %v1265_v25 }
  0xe2   :  { %960 = vpow2.f32 %v882_v54  ;;  %v203_v62 = vmul.f32 %v932_v60, %v1196_v28  ;;  %v143_v63 = vpop.f32.mrb[5].mxu0  ;;  %v895_v0 = vmul.f32 -1.442695, %v1237_v57  ;;  %v434_v37 = vsub.s32 1, %v1265_v25  ;;  %v424_v60 = vld [vmem:[#allocation2] sm:$0xff] }
  0xe3   :  { %962 = vpow2.f32 %v894_v55  ;;  %v201_v1 = vmul.f32 %v1196_v28, %v143_v63  ;;  %v933_v2 = vpop.f32.mrb[6].mxu0  ;;  %v1277_v55 = vrot.slane %v1272_v42, %v427_v36 }
  0xe4   :  { %964 = vpow2.f32 %v885_v58  ;;  %v1246_v3 = vadd.f32 %v1201_v30, %v203_v62  ;;  %v204_v4 = vmul.f32 %v933_v2, %v1196_v28  ;;  %v146_v5 = vpop.f32.mrb[7].mxu0  ;;  %v1280_v58 = vrot.slane %v1272_v42, %v434_v37 }
  0xe5   :  { %966 = vpow2.f32 %v897_v59  ;;  %v1250_v6 = vadd.f32 %v1201_v30, %v201_v1  ;;  %v202_v7 = vmul.f32 %v1196_v28, %v146_v5  ;;  %v441_v62 = vsub.s32 2, %v1265_v25 }
  0xe6   :  { %968 = vpow2.f32 %v883_v61  ;;  %v888_v8 = vmul.f32 -1.442695, %v1246_v3  ;;  %v1255_v9 = vadd.f32 %v1201_v30, %v204_v4  ;;  %v431_v61 = vld [vmem:[#allocation2 + $0x1] sm:$0xff] }
  0xe7   :  { %970 = vpow2.f32 %v895_v0  ;;  %v886_v10 = vmul.f32 -1.442695, %v1250_v6  ;;  %v1259_v11 = vadd.f32 %v1201_v30, %v202_v7 }
  0xe8   :  { %972 = vpow2.f32 %v888_v8  ;;  %v889_v12 = vmul.f32 -1.442695, %v1255_v9 }
  0xe9   :  { %974 = vpow2.f32 %v886_v10  ;;  %v887_v14 = vmul.f32 -1.442695, %v1259_v11  ;;  %v936_v15 = vpop.f32.mrb[8].mxu0  ;;  %v429_v10 = vmul.f32 %v1277_v55, %v424_v60 }
  0xea   :  { %v957_v16 = vpop.eup %956  ;;  %976 = vpow2.f32 %v889_v12  ;;  %v159_v17 = vpop.f32.mrb[9].mxu0  ;;  %v207_v44 = vmul.f32 %v936_v15, %v1196_v28  ;;  %v436_v12 = vmul.f32 %v1280_v58, %v431_v61  ;;  %v1296_v15 = vrot.slane %v1272_v42, %v441_v62 }
  0xeb   :  { %v959_v18 = vpop.eup %958  ;;  %v286_v19 = vadd.f32 1.0, %v957_v16  ;;  %978 = vpow2.f32 %v887_v14  ;;  %v937_v20 = vpop.f32.mrb[10].mxu0  ;;  %v205_v51 = vmul.f32 %v1196_v28, %v159_v17 }
  0xec   :  { %v961_v21 = vpop.eup %960  ;;  %v298_v22 = vadd.f32 1.0, %v959_v18  ;;  %v1263_v23 = vpop.f32.mrb[11].mxu0  ;;  %v1284_v0 = vadd.f32 %v1201_v30, %v207_v44  ;;  %v208_v16 = vmul.f32 %v937_v20, %v1196_v28  ;;  %v455_v20 = vsub.s32 4, %v1265_v25 }
  0xed   :  { %v963_v24 = vpop.eup %962  ;;  %980 = vrcp.f32 %v286_v19  ;;  %v284_v26 = vadd.f32 1.0, %v961_v21  ;;  %v1288_v5 = vadd.f32 %v1201_v30, %v205_v51  ;;  %v206_v19 = vmul.f32 %v1196_v28, %v1263_v23 }
  0xee   :  { %v965_v27 = vpop.eup %964  ;;  %982 = vrcp.f32 %v298_v22  ;;  %v296_v29 = vadd.f32 1.0, %v963_v24  ;;  %v448_v22 = vsub.s32 3, %v1265_v25  ;;  %v1329_v37 = vrot.slane %v1272_v42, %v455_v20 }
  0xef   :  { %v967_v31 = vpop.eup %966  ;;  %984 = vrcp.f32 %v284_v26  ;;  %v287_v32 = vadd.f32 1.0, %v965_v27  ;;  %v890_v24 = vmul.f32 -1.442695, %v1288_v5  ;;  %v437_v27 = vadd.f32 %v436_v12, %v429_v10 }
  0xf0   :  { %v969_v33 = vpop.eup %968  ;;  %986 = vrcp.f32 %v296_v29  ;;  %v299_v34 = vadd.f32 1.0, %v967_v31 }
  0xf1   :  { %v971_v35 = vpop.eup %970  ;;  %988 = vrcp.f32 %v287_v32  ;;  %v285_v38 = vadd.f32 1.0, %v969_v33  ;;  %v1320_v33 = vadd.f32 %v1201_v30, %v206_v19 }
  0xf2   :  { %v973_v39 = vpop.eup %972  ;;  %990 = vrcp.f32 %v299_v34  ;;  %v297_v43 = vadd.f32 1.0, %v971_v35  ;;  %v1323_v34 = vrot.slane %v1272_v42, %v448_v22  ;;  %v462_v35 = vsub.s32 5, %v1265_v25 }
  0xf3   :  { %v975_v45 = vpop.eup %974  ;;  %992 = vrcp.f32 %v285_v38  ;;  %v290_v48 = vadd.f32 1.0, %v973_v39 }
  0xf4   :  { %v977_v49 = vpop.eup %976  ;;  %994 = vrcp.f32 %v297_v43  ;;  %v288_v50 = vadd.f32 1.0, %v975_v45  ;;  %v476_v43 = vsub.s32 7, %v1265_v25 }
  0xf5   :  { %v979_v54 = vpop.eup %978  ;;  %996 = vrcp.f32 %v290_v48  ;;  %v291_v59 = vadd.f32 1.0, %v977_v49 }
  0xf6   :  { %998 = vrcp.f32 %v288_v50  ;;  %v289_v63 = vadd.f32 1.0, %v979_v54  ;;  %v891_v50 = vmul.f32 -1.442695, %v1320_v33 }
  0xf7   :  { %v981_v1 = vpop.eup %980  ;;  %1000 = vrcp.f32 %v291_v59 }
  0xf8   :  { %v983_v2 = vpop.eup %982  ;;  %v334_v4 = vmul.f32 %v981_v1, %v1208_v40  ;;  %1002 = vrcp.f32 %v289_v63  ;;  %v892_v40 = vmul.f32 -1.442695, %v1284_v0 }
  0xf9   :  { %v985_v7 = vpop.eup %984  ;;  %v346_v8 = vmul.f32 %v983_v2, %v1211_v41  ;;  %v438_v41 = vld [vmem:[#allocation2 + $0x2] sm:$0xff] }
  0xfa   :  { %v987_v13 = vpop.eup %986  ;;  %395 = vst.msk [vmem:[#allocation2 + $0x31] sm:$0xff] %vm348_vm1, %v334_v4  ;;  %v332_v14 = vmul.f32 %v985_v7, %v1216_v46  ;;  %v443_v28 = vmul.f32 %v1296_v15, %v438_v41  ;;  %1004 = vpow2.f32 %v892_v40  ;;  %v1352_v4 = vrot.slane %v1272_v42, %v476_v43 }
  0xfb   :  { %v989_v17 = vpop.eup %988  ;;  %419 = vst.msk [vmem:[#allocation2 + $0x111] sm:$0xff] %vm348_vm1, %v346_v8  ;;  %v344_v18 = vmul.f32 %v987_v13, %v1219_v47  ;;  %1006 = vpow2.f32 %v890_v24 }
  0xfc   :  { %v991_v21 = vpop.eup %990  ;;  %391 = vst.msk [vmem:[#allocation2 + $0x11] sm:$0xff] %vm348_vm1, %v332_v14  ;;  %v335_v46 = vmul.f32 %v989_v17, %v1226_v52  ;;  %v1315_v52 = vadd.f32 %v1201_v30, %v208_v16  ;;  %v444_v39 = vadd.f32 %v443_v28, %v437_v27  ;;  %v1377_v28 = vld [vmem:[%s1538_s4 + $0x8] ss:$0 sm:$0xff] }
  0xfd   :  { %v993_v26 = vpop.eup %992  ;;  %415 = vst.msk [vmem:[#allocation2 + $0xf1] sm:$0xff] %vm348_vm1, %v344_v18  ;;  %v347_v47 = vmul.f32 %v991_v21, %v1229_v53 }
  0xfe   :  { %v995_v29 = vpop.eup %994  ;;  %397 = vst.msk [vmem:[#allocation2 + $0x41] sm:$0xff] %vm348_vm1, %v335_v46  ;;  %v333_v23 = vmul.f32 %v993_v26, %v1234_v56 }
  0xff   :  { %v997_v31 = vpop.eup %996  ;;  %421 = vst.msk [vmem:[#allocation2 + $0x121] sm:$0xff] %vm348_vm1, %v347_v47  ;;  %v345_v32 = vmul.f32 %v995_v29, %v1237_v57  ;;  %v469_v57 = vsub.s32 6, %v1265_v25 }
 0x100   :  { %v999_v53 = vpop.eup %998  ;;  %393 = vst.msk [vmem:[#allocation2 + $0x21] sm:$0xff] %vm348_vm1, %v333_v23  ;;  %v338_v56 = vmul.f32 %v997_v31, %v1246_v3  ;;  %v893_v3 = vmul.f32 -1.442695, %v1315_v52 }
 0x101   :  { %v1001_v36 = vpop.eup %1000  ;;  %417 = vst.msk [vmem:[#allocation2 + $0x101] sm:$0xff] %vm348_vm1, %v345_v32  ;;  %v336_v30 = vmul.f32 %v999_v53, %v1250_v6  ;;  %v1342_v6 = vrot.slane %v1272_v42, %v462_v35  ;;  %v504_v51 = vld [vmem:[#allocation2 + $0x30] sm:$0xff]  ;;  %v1347_v60 = vrot.slane %v1272_v42, %v469_v57 }
 0x102   :  { %v1003_v38 = vpop.eup %1002  ;;  %403 = vst.msk [vmem:[#allocation2 + $0x71] sm:$0xff] %vm348_vm1, %v338_v56  ;;  %v339_v44 = vmul.f32 %v1001_v36, %v1255_v9  ;;  %v507_v54 = vld [vmem:[#allocation2 + $0x31] sm:$0xff]  ;;  %1008 = vpow2.f32 %v893_v3  ;;  %v505_v7 = vmul.f32 %v504_v51, %v1323_v34 }
 0x103   :  { %v445_v45 = vld [vmem:[#allocation2 + $0x10] sm:$0xff]  ;;  %399 = vst.msk [vmem:[#allocation2 + $0x51] sm:$0xff] %vm348_vm1, %v336_v30  ;;  %v337_v49 = vmul.f32 %v1003_v38, %v1259_v11  ;;  %1010 = vpow2.f32 %v891_v50  ;;  %v508_v16 = vmul.f32 %v507_v54, %v1329_v37 }
 0x104   :  { %v452_v48 = vld [vmem:[#allocation2 + $0x11] sm:$0xff]  ;;  %v450_v59 = vmul.f32 %v1323_v34, %v445_v45  ;;  %405 = vst.msk [vmem:[#allocation2 + $0x81] sm:$0xff] %vm348_vm1, %v339_v44  ;;  %v1005_v40 = vpop.eup %1004 }
 0x105   :  { %v510_v25 = vld [vmem:[#allocation2 + $0x32] sm:$0xff]  ;;  %v513_v61 = vld [vmem:[#allocation2 + $0x40] sm:$0xff]  ;;  %401 = vst.msk [vmem:[#allocation2 + $0x61] sm:$0xff] %vm348_vm1, %v337_v49  ;;  %v457_v2 = vmul.f32 %v1329_v37, %v452_v48  ;;  %v1007_v27 = vpop.eup %1006  ;;  %v294_v57 = vadd.f32 1.0, %v1005_v40 }
 0x106   :  { %v459_v9 = vld [vmem:[#allocation2 + $0x12] sm:$0xff]  ;;  %v516_v62 = vld [vmem:[#allocation2 + $0x41] sm:$0xff]  ;;  %v451_v1 = vadd.f32 %v450_v59, %v444_v39  ;;  %v527_v10 = vmul.f32 %v513_v61, %v1277_v55  ;;  %v1359_v42 = vmul.f32 %v510_v25, %v1342_v6  ;;  %v292_v49 = vadd.f32 1.0, %v1007_v27 }
 0x107   :  { %v691_v11 = vld [vmem:[#allocation2 + $0x110] sm:$0xff]  ;;  %v530_v12 = vmul.f32 %v516_v62, %v1280_v58  ;;  %v466_v13 = vld [vmem:[#allocation2 + $0x20] sm:$0xff]  ;;  %v464_v41 = vmul.f32 %v1342_v6, %v459_v9  ;;  %1012 = vrcp.f32 %v294_v57 }
 0x108   :  { %v694_v63 = vld [vmem:[#allocation2 + $0x111] sm:$0xff]  ;;  %v473_v14 = vld [vmem:[#allocation2 + $0x21] sm:$0xff]  ;;  %v458_v17 = vadd.f32 %v457_v2, %v451_v1  ;;  %v692_v21 = vmul.f32 %v691_v11, %v1323_v34  ;;  %v496_v26 = vmul.f32 %v466_v13, %v1277_v55  ;;  %v471_v23 = vmul.f32 %v1347_v60, %v466_v13 }
 0x109   :  { %v697_v8 = vld [vmem:[#allocation2 + $0x112] sm:$0xff]  ;;  %v519_v18 = vld [vmem:[#allocation2 + $0x42] sm:$0xff]  ;;  %v1366_v22 = vmul.f32 %v694_v63, %v1329_v37  ;;  %v531_v46 = vadd.f32 %v530_v12, %v527_v10  ;;  %v499_v31 = vmul.f32 %v473_v14, %v1280_v58  ;;  %v478_v35 = vmul.f32 %v1352_v4, %v473_v14 }
 0x10a   :  { %v1362_v19 = vld [vmem:[#allocation2 + $0x100] sm:$0xff]  ;;  %v1372_v47 = vmul.f32 %v697_v8, %v1342_v6  ;;  %v465_v29 = vadd.f32 %v464_v41, %v458_v17  ;;  %v535_v32 = vld [vmem:[#allocation2 + $0x50] sm:$0xff]  ;;  %v533_v53 = vmul.f32 %v519_v18, %v1296_v15  ;;  %v514_v63 = vmul.f32 %v513_v61, %v1347_v60 }
 0x10b   :  { %v480_v24 = vld [vmem:[#allocation2 + $0x22] sm:$0xff]  ;;  %v683_v36 = vmul.f32 %v1362_v19, %v1277_v55  ;;  %v500_v38 = vadd.f32 %v499_v31, %v496_v26  ;;  %v538_v44 = vld [vmem:[#allocation2 + $0x51] sm:$0xff]  ;;  %v536_v48 = vmul.f32 %v535_v32, %v1323_v34  ;;  %v517_v1 = vmul.f32 %v516_v62, %v1352_v4 }
 0x10c   :  { %v1369_v20 = vld [vmem:[#allocation2 + $0x101] sm:$0xff]  ;;  %v472_v30 = vadd.f32 %v471_v23, %v465_v29  ;;  %v502_v39 = vmul.f32 %v480_v24, %v1296_v15  ;;  %v534_v3 = vadd.f32 %v533_v53, %v531_v46  ;;  %v485_v45 = vmul.f32 %v1377_v28, %v480_v24  ;;  %v541_v9 = vld [vmem:[#allocation2 + $0x52] sm:$0xff]  ;;  %v1009_v12 = vpop.eup %1008 }
 0x10d   :  { %v1383_v56 = vld [vmem:[#allocation2 + $0x102] sm:$0xff]  ;;  %v686_v43 = vmul.f32 %v1369_v20, %v1280_v58  ;;  %v539_v8 = vmul.f32 %v538_v44, %v1329_v37  ;;  %v520_v13 = vmul.f32 %v1377_v28, %v519_v18  ;;  %v1011_v46 = vpop.eup %1010  ;;  %v542_v27 = vmul.f32 %v541_v9, %v1342_v6 }
 0x10e   :  { %v700_v50 = vld [vmem:[#allocation2 + $0x120] sm:$0xff]  ;;  %v479_v51 = vadd.f32 %v478_v35, %v472_v30  ;;  %v503_v54 = vadd.f32 %v502_v39, %v500_v38  ;;  %v689_v59 = vmul.f32 %v1383_v56, %v1296_v15  ;;  %v537_v2 = vadd.f32 %v536_v48, %v534_v3  ;;  %v569_v30 = vld [vmem:[#allocation2 + $0x71] sm:$0xff] }
 0x10f   :  { %v687_v25 = vadd.f32 %v686_v43, %v683_v36  ;;  %v544_v11 = vld [vmem:[#allocation2 + $0x60] sm:$0xff]  ;;  %v701_v24 = vmul.f32 %v700_v50, %v1347_v60  ;;  %v295_v53 = vadd.f32 1.0, %v1009_v12  ;;  %1014 = vrcp.f32 %v292_v49 }
 0x110   :  { %v547_v10 = vld [vmem:[#allocation2 + $0x61] sm:$0xff]  ;;  %v486_v14 = vadd.f32 %v485_v45, %v479_v51  ;;  %v506_v40 = vadd.f32 %v505_v7, %v503_v54  ;;  %v540_v26 = vadd.f32 %v539_v8, %v537_v2  ;;  %v545_v61 = vmul.f32 %v544_v11, %v1347_v60  ;;  %v566_v7 = vld [vmem:[#allocation2 + $0x70] sm:$0xff] }
 0x111   :  { %v690_v17 = vadd.f32 %v689_v59, %v687_v25  ;;  %v550_v41 = vld [vmem:[#allocation2 + $0x62] sm:$0xff]  ;;  %v558_v23 = vmul.f32 %v544_v11, %v1277_v55  ;;  %v561_v31 = vmul.f32 %v547_v10, %v1280_v58  ;;  %v548_v39 = vmul.f32 %v547_v10, %v1352_v4 }
 0x112   :  { %v509_v62 = vadd.f32 %v508_v16, %v506_v40  ;;  %488 = vst.msk [vmem:[#allocation3] sm:$0x1] %vm487_vm3, %v486_v14  ;;  %v543_v18 = vadd.f32 %v542_v27, %v540_v26  ;;  %v564_v32 = vmul.f32 %v550_v41, %v1296_v15  ;;  %v703_v16 = vld [vmem:[#allocation2 + $0x121] sm:$0xff]  ;;  %1016 = vrcp.f32 %v295_v53 }
 0x113   :  { %v693_v29 = vadd.f32 %v692_v21, %v690_v17  ;;  %490 = vst.msk [vmem:[#allocation3 - $0x1] sm:$0x4] %vm489_vm4, %v486_v14  ;;  %v562_v36 = vadd.f32 %v561_v31, %v558_v23  ;;  %v293_v43 = vadd.f32 1.0, %v1011_v46  ;;  %v706_v44 = vld [vmem:[#allocation2 + $0x122] sm:$0xff]  ;;  %v567_v57 = vmul.f32 %v566_v7, %v1323_v34 }
 0x114   :  { %492 = vst.msk [vmem:[#allocation3 - $0x2] sm:$0x10] %vm491_vm5, %v486_v14  ;;  %v512_v21 = vadd.f32 %v1359_v42, %v509_v62  ;;  %v546_v38 = vadd.f32 %v545_v61, %v543_v18  ;;  %v704_v50 = vmul.f32 %v703_v16, %v1352_v4  ;;  %v572_v42 = vld [vmem:[#allocation2 + $0x72] sm:$0xff]  ;;  %v570_v54 = vmul.f32 %v569_v30, %v1329_v37  ;;  %v575_v11 = vld [vmem:[#allocation2 + $0x80] sm:$0xff] }
 0x115   :  { %494 = vst.msk [vmem:[#allocation3 - $0x3] sm:$0x40] %vm493_vm6, %v486_v14  ;;  %v696_v35 = vadd.f32 %v1366_v22, %v693_v29  ;;  %v565_v48 = vadd.f32 %v564_v32, %v562_v36  ;;  %v551_v22 = vmul.f32 %v1377_v28, %v550_v41  ;;  %1018 = vrcp.f32 %v293_v43  ;;  %v578_v12 = vld [vmem:[#allocation2 + $0x81] sm:$0xff]  ;;  %v1013_v41 = vpop.eup %1012  ;;  %v1443_v16 = vld [vmem:[%s1539_s5] ss:$0 sm:$0xff] }
 0x116   :  { %v515_v3 = vadd.f32 %v514_v63, %v512_v21  ;;  %v549_v51 = vadd.f32 %v548_v39, %v546_v38  ;;  %v707_v9 = vmul.f32 %v1377_v28, %v706_v44  ;;  %v573_v2 = vmul.f32 %v572_v42, %v1342_v6  ;;  %v589_v40 = vld [vmem:[#allocation2 + $0xa0] sm:$0xff] }
 0x117   :  { %v699_v45 = vadd.f32 %v1372_v47, %v696_v35  ;;  %v568_v25 = vadd.f32 %v567_v57, %v565_v48  ;;  %v592_v17 = vld [vmem:[#allocation2 + $0xa1] sm:$0xff]  ;;  %v579_v26 = vmul.f32 %v578_v12, %v1352_v4  ;;  %v342_v61 = vmul.f32 %v1013_v41, %v1284_v0 }
 0x118   :  { %v518_v59 = vadd.f32 %v517_v1, %v515_v3  ;;  %v552_v63 = vadd.f32 %v551_v22, %v549_v51  ;;  %v576_v1 = vmul.f32 %v575_v11, %v1347_v60  ;;  %v581_v46 = vld [vmem:[#allocation2 + $0x82] sm:$0xff]  ;;  %v590_v23 = vmul.f32 %v589_v40, %v1277_v55  ;;  %v660_v22 = vld [vmem:[#allocation2 + $0xf0] sm:$0xff] }
 0x119   :  { %v702_v49 = vadd.f32 %v701_v24, %v699_v45  ;;  %v571_v8 = vadd.f32 %v570_v54, %v568_v25  ;;  %v1015_v24 = vpop.eup %1014  ;;  %v593_v31 = vmul.f32 %v592_v17, %v1280_v58  ;;  %v582_v7 = vmul.f32 %v1377_v28, %v581_v46  ;;  %411 = vst.msk [vmem:[#allocation2 + $0xd1] sm:$0xff] %vm348_vm1, %v342_v61  ;;  %v595_v0 = vld [vmem:[#allocation2 + $0xa2] sm:$0xff]  ;;  %v666_v46 = vld [vmem:[#allocation2 + $0xf2] sm:$0xff] }
 0x11a   :  { %v521_v10 = vadd.f32 %v520_v13, %v518_v59  ;;  %553 = vst.msk [vmem:[#allocation3 + $0x8] sm:$0x1] %vm487_vm3, %v552_v63  ;;  %v340_v29 = vmul.f32 %v1015_v24, %v1288_v5  ;;  %v596_v36 = vmul.f32 %v595_v0, %v1296_v15  ;;  %v661_v17 = vmul.f32 %v660_v22, %v1323_v34 }
 0x11b   :  { %v705_v47 = vadd.f32 %v704_v50, %v702_v49  ;;  %554 = vst.msk [vmem:[#allocation3 + $0x7] sm:$0x4] %vm489_vm4, %v552_v63  ;;  %v574_v14 = vadd.f32 %v573_v2, %v571_v8  ;;  %v594_v35 = vadd.f32 %v593_v31, %v590_v23  ;;  %v663_v8 = vld [vmem:[#allocation2 + $0xf1] sm:$0xff] }
 0x11c   :  { %555 = vst.msk [vmem:[#allocation3 + $0x6] sm:$0x10] %vm491_vm5, %v552_v63  ;;  %524 = vst.msk [vmem:[#allocation3 + $0x2] sm:$0x10] %vm491_vm5, %v521_v10  ;;  %v1017_v62 = vpop.eup %1016 }
 0x11d   :  { %556 = vst.msk [vmem:[#allocation3 + $0x5] sm:$0x40] %vm493_vm6, %v552_v63  ;;  %525 = vst.msk [vmem:[#allocation3 + $0x1] sm:$0x40] %vm493_vm6, %v521_v10  ;;  %v708_v13 = vadd.f32 %v707_v9, %v705_v47  ;;  %v577_v27 = vadd.f32 %v576_v1, %v574_v14  ;;  %v343_v18 = vmul.f32 %v1017_v62, %v1315_v52  ;;  %v1451_v52 = vld [vmem:[%s1540_s6] ss:$0 sm:$0xff] }
 0x11e   :  { %522 = vst.msk [vmem:[#allocation3 + $0x4] sm:$0x1] %vm487_vm3, %v521_v10  ;;  %v597_v39 = vadd.f32 %v596_v36, %v594_v35  ;;  %v664_v62 = vmul.f32 %v663_v8, %v1329_v37 }
 0x11f   :  { %523 = vst.msk [vmem:[#allocation3 + $0x3] sm:$0x4] %vm489_vm4, %v521_v10  ;;  %710 = vst.msk [vmem:[#allocation3 + $0x1b] sm:$0x4] %vm489_vm4, %v708_v13  ;;  %v580_v32 = vadd.f32 %v579_v26, %v577_v27  ;;  %v1019_v53 = vpop.eup %1018 }
 0x120   :  { %709 = vst.msk [vmem:[#allocation3 + $0x1c] sm:$0x1] %vm487_vm3, %v708_v13  ;;  %v341_v5 = vmul.f32 %v1019_v53, %v1320_v33  ;;  %v629_v10 = vld [vmem:[#allocation2 + $0xd0] sm:$0xff] }
 0x121   :  { %711 = vst.msk [vmem:[#allocation3 + $0x1a] sm:$0x10] %vm491_vm5, %v708_v13  ;;  %v583_v21 = vadd.f32 %v582_v7, %v580_v32  ;;  %v632_v24 = vld [vmem:[#allocation2 + $0xd1] sm:$0xff] }
 0x122   :  { %712 = vst.msk [vmem:[#allocation3 + $0x19] sm:$0x40] %vm493_vm6, %v708_v13  ;;  %v633_v32 = vmul.f32 %v632_v24, %v1329_v37  ;;  %v635_v53 = vld [vmem:[#allocation2 + $0xd2] sm:$0xff] }
 0x123   :  { %407 = vst.msk [vmem:[#allocation2 + $0xb1] sm:$0xff] %vm348_vm1, %v340_v29  ;;  %413 = vst.msk [vmem:[#allocation2 + $0xe1] sm:$0xff] %vm348_vm1, %v343_v18  ;;  %v630_v29 = vmul.f32 %v629_v10, %v1323_v34  ;;  %v667_v18 = vmul.f32 %v666_v46, %v1342_v6 }
 0x124   :  { %409 = vst.msk [vmem:[#allocation2 + $0xc1] sm:$0xff] %vm348_vm1, %v341_v5 }
 0x125   :  { %584 = vst.msk [vmem:[#allocation3 + $0xc] sm:$0x1] %vm487_vm3, %v583_v21 }
 0x126   :  { %v713_v30 = vld [vmem:[#allocation3] sm:$0xff]  ;;  %585 = vst.msk [vmem:[#allocation3 + $0xb] sm:$0x4] %vm489_vm4, %v583_v21 }
 0x127   :  { %586 = vst.msk [vmem:[#allocation3 + $0xa] sm:$0x10] %vm491_vm5, %v583_v21  ;;  %v724_v33 = vmul.f32 %v1443_v16, %v713_v30  ;;  %v636_v30 = vmul.f32 %v635_v53, %v1342_v6 }
 0x128   :  { %587 = vst.msk [vmem:[#allocation3 + $0x9] sm:$0x40] %vm493_vm6, %v583_v21 }
 0x129   :  { %v1460_v38 = vadd.f32 %v1451_v52, %v724_v33 }
 0x12a   :  { %v598_v43 = vld [vmem:[#allocation2 + $0xb0] sm:$0xff]  ;;  %v638_v57 = vld [vmem:[#allocation2 + $0xe0] sm:$0xff] }
 0x12b   :  { %v601_v44 = vld [vmem:[#allocation2 + $0xb1] sm:$0xff]  ;;  %v599_v3 = vmul.f32 %v598_v43, %v1323_v34  ;;  %v641_v48 = vld [vmem:[#allocation2 + $0xe1] sm:$0xff]  ;;  %v652_v42 = vmul.f32 %v638_v57, %v1277_v55  ;;  %v901_v51 = vmul.f32 -1.442695, %v1460_v38  ;;  %v670_v34 = vmul.f32 %v1362_v19, %v1347_v60 }
 0x12c   :  { %v604_v45 = vld [vmem:[#allocation2 + $0xb2] sm:$0xff]  ;;  %v1463_v50 = vld [vmem:[#allocation2 + $0xe2] sm:$0xff]  ;;  %v602_v54 = vmul.f32 %v601_v44, %v1329_v37  ;;  %v655_v25 = vmul.f32 %v641_v48, %v1280_v58  ;;  %v673_v44 = vmul.f32 %v1369_v20, %v1352_v4  ;;  %v639_v37 = vmul.f32 %v638_v57, %v1347_v60 }
 0x12d   :  { %v600_v49 = vadd.f32 %v599_v3, %v597_v39  ;;  %v607_v59 = vld [vmem:[#allocation2 + $0xc0] sm:$0xff]  ;;  %v605_v11 = vmul.f32 %v604_v45, %v1342_v6  ;;  %v658_v14 = vmul.f32 %v1463_v50, %v1296_v15  ;;  %1020 = vpow2.f32 %v901_v51 }
 0x12e   :  { %v610_v9 = vld [vmem:[#allocation2 + $0xc1] sm:$0xff]  ;;  %v621_v47 = vmul.f32 %v607_v59, %v1277_v55  ;;  %v656_v1 = vadd.f32 %v655_v25, %v652_v42  ;;  %v608_v13 = vmul.f32 %v607_v59, %v1347_v60  ;;  %v676_v6 = vmul.f32 %v1377_v28, %v1383_v56 }
 0x12f   :  { %v613_v63 = vld [vmem:[#allocation2 + $0xc2] sm:$0xff]  ;;  %v603_v12 = vadd.f32 %v602_v54, %v600_v49  ;;  %v624_v40 = vmul.f32 %v610_v9, %v1280_v58  ;;  %v611_v7 = vmul.f32 %v610_v9, %v1352_v4  ;;  %v642_v42 = vmul.f32 %v641_v48, %v1352_v4 }
 0x130   :  { %v714_v2 = vld [vmem:[#allocation3 + $0x8] sm:$0xff]  ;;  %v659_v26 = vadd.f32 %v658_v14, %v656_v1  ;;  %v627_v61 = vmul.f32 %v613_v63, %v1296_v15  ;;  %v614_v15 = vmul.f32 %v1377_v28, %v613_v63  ;;  %v645_v60 = vmul.f32 %v1377_v28, %v1463_v50 }
 0x131   :  { %v725_v41 = vmul.f32 %v1443_v16, %v714_v2  ;;  %v606_v55 = vadd.f32 %v605_v11, %v603_v12  ;;  %v625_v27 = vadd.f32 %v624_v40, %v621_v47 }
 0x132   :  { %v662_v23 = vadd.f32 %v661_v17, %v659_v26 }
 0x133   :  { %v736_v58 = vadd.f32 %v1451_v52, %v725_v41  ;;  %v609_v31 = vadd.f32 %v608_v13, %v606_v55  ;;  %v628_v0 = vadd.f32 %v627_v61, %v625_v27  ;;  %v910_v55 = vld [vmem:[%s1542_s9] ss:$0 sm:$0xff] }
 0x134   :  { %v665_v21 = vadd.f32 %v664_v62, %v662_v23 }
 0x135   :  { %v902_v5 = vmul.f32 -1.442695, %v736_v58  ;;  %v612_v35 = vadd.f32 %v611_v7, %v609_v31  ;;  %v631_v36 = vadd.f32 %v630_v29, %v628_v0 }
 0x136   :  { %v668_v33 = vadd.f32 %v667_v18, %v665_v21 }
 0x137   :  { %1022 = vpow2.f32 %v902_v5  ;;  %v615_v39 = vadd.f32 %v614_v15, %v612_v35  ;;  %v634_v43 = vadd.f32 %v633_v32, %v631_v36  ;;  %v1021_v19 = vpop.eup %1020 }
 0x138   :  { %v671_v3 = vadd.f32 %v670_v34, %v668_v33  ;;  %v751_v22 = vadd.f32 1.0, %v1021_v19 }
 0x139   :  { %v637_v45 = vadd.f32 %v636_v30, %v634_v43  ;;  %616 = vst.msk [vmem:[#allocation3 + $0x10] sm:$0x1] %vm487_vm3, %v615_v39 }
 0x13a   :  { %617 = vst.msk [vmem:[#allocation3 + $0xf] sm:$0x4] %vm489_vm4, %v615_v39  ;;  %v674_v51 = vadd.f32 %v673_v44, %v671_v3  ;;  %1024 = vrcp.f32 %v751_v22 }
 0x13b   :  { %618 = vst.msk [vmem:[#allocation3 + $0xe] sm:$0x10] %vm491_vm5, %v615_v39  ;;  %v640_v20 = vadd.f32 %v639_v37, %v637_v45 }
 0x13c   :  { %619 = vst.msk [vmem:[#allocation3 + $0xd] sm:$0x40] %vm493_vm6, %v615_v39  ;;  %v677_v49 = vadd.f32 %v676_v6, %v674_v51 }
 0x13d   :  { %v643_v57 = vadd.f32 %v642_v42, %v640_v20 }
 0x13e   :  { %678 = vst.msk [vmem:[#allocation3 + $0x18] sm:$0x1] %vm487_vm3, %v677_v49 }
 0x13f   :  { %v646_v54 = vadd.f32 %v645_v60, %v643_v57  ;;  %679 = vst.msk [vmem:[#allocation3 + $0x17] sm:$0x4] %vm489_vm4, %v677_v49 }
 0x140   :  { %680 = vst.msk [vmem:[#allocation3 + $0x16] sm:$0x10] %vm491_vm5, %v677_v49 }
 0x141   :  { %681 = vst.msk [vmem:[#allocation3 + $0x15] sm:$0x40] %vm493_vm6, %v677_v49  ;;  %v1023_v56 = vpop.eup %1022  ;;  %650 = vst.msk [vmem:[#allocation3 + $0x11] sm:$0x40] %vm493_vm6, %v646_v54 }
 0x142   :  { %v752_v25 = vadd.f32 1.0, %v1023_v56  ;;  %647 = vst.msk [vmem:[#allocation3 + $0x14] sm:$0x1] %vm487_vm3, %v646_v54 }
 0x143   :  { %648 = vst.msk [vmem:[#allocation3 + $0x13] sm:$0x4] %vm489_vm4, %v646_v54 }
 0x144   :  { %649 = vst.msk [vmem:[#allocation3 + $0x12] sm:$0x10] %vm491_vm5, %v646_v54  ;;  %1026 = vrcp.f32 %v752_v25  ;;  %v1025_v9 = vpop.eup %1024 }
 0x145   :  { %v763_v8 = vmul.f32 %v1025_v9, %v1460_v38  ;;  %v909_v38 = vld [vmem:[%s1541_s8] ss:$0 sm:$0xff] }
 0x148   :  { %v716_v4 = vld [vmem:[#allocation3 + $0x18] sm:$0xff] }
 0x149   :  { %v727_v28 = vmul.f32 %v1443_v16, %v716_v4 }
 0x14b   :  { %v715_v48 = vld [vmem:[#allocation3 + $0x10] sm:$0xff]  ;;  %v738_v59 = vadd.f32 %v1451_v52, %v727_v28 }
 0x14c   :  { %v726_v50 = vmul.f32 %v1443_v16, %v715_v48 }
 0x14d   :  { %v904_v63 = vmul.f32 -1.442695, %v738_v59 }
 0x14e   :  { %v737_v11 = vadd.f32 %v1451_v52, %v726_v50  ;;  %v1027_v47 = vpop.eup %1026 }
 0x14f   :  { %1028 = vpow2.f32 %v904_v63  ;;  %v764_v10 = vmul.f32 %v1027_v47, %v736_v58 }
 0x150   :  { %v903_v2 = vmul.f32 -1.442695, %v737_v11 }
 0x151   :  { %v767_v12 = vpack.c.bf16 %v764_v10, %v763_v8 }
 0x152   :  { %1030 = vpow2.f32 %v903_v2 }
 0x153   :  { %946 = vmatprep.mubr.msk.bf16.mxu1 %vm348_vm1, %v767_v12 }
 0x159   :  { %v1029_v1 = vpop.eup %1028 }
 0x15a   :  { %v754_v14 = vadd.f32 1.0, %v1029_v1 }
 0x15c   :  { %v1031_v40 = vpop.eup %1030  ;;  %1032 = vrcp.f32 %v754_v14 }
 0x15d   :  { %v753_v16 = vadd.f32 1.0, %v1031_v40 }
 0x15f   :  { %1034 = vrcp.f32 %v753_v16 }
 0x166   :  { %v1033_v17 = vpop.eup %1032 }
 0x167   :  { %v766_v13 = vmul.f32 %v1033_v17, %v738_v59 }
 0x169   :  { %v1035_v52 = vpop.eup %1034 }
 0x16a   :  { %v765_v41 = vmul.f32 %v1035_v52, %v737_v11 }
 0x16c   :  { %v768_v46 = vpack.c.bf16 %v766_v13, %v765_v41 }
 0x16e   :  { %947 = vmatmul.mubr.msk.bf16.vlgmr.msra.gmra.mrb[4].mxu1 %vm348_vm1, %v768_v46 }
 0x241   :  { %v948_v24 = vpop.f32.mrb[4].mxu1 }
 0x242   :  { %v849_v26 = vmul.f32 %v948_v24, %v909_v38  ;;  %v825_v27 = vpop.f32.mrb[5].mxu1 }
 0x243   :  { %v847_v61 = vmul.f32 %v909_v38, %v825_v27  ;;  %v949_v62 = vpop.f32.mrb[6].mxu1 }
 0x244   :  { %v860_v29 = vadd.f32 %v910_v55, %v849_v26  ;;  %v850_v58 = vmul.f32 %v949_v62, %v909_v38  ;;  %v828_v23 = vpop.f32.mrb[7].mxu1 }
 0x245   :  { %v858_v31 = vadd.f32 %v910_v55, %v847_v61  ;;  %v848_v7 = vmul.f32 %v909_v38, %v828_v23 }
 0x246   :  { %865 = vst.msk [vmem:[%s1543_s10 + $0x10] sm:$0xff] %vm862_vm7, %v860_v29  ;;  %v861_v0 = vadd.f32 %v910_v55, %v850_v58 }
 0x247   :  { %863 = vst.msk [vmem:[%s1543_s10] sm:$0xff] %vm862_vm7, %v858_v31  ;;  %v859_v18 = vadd.f32 %v910_v55, %v848_v7 }
 0x248   :  { %866 = vst.msk [vmem:[%s1543_s10 + $0x18] sm:$0xff] %vm862_vm7, %v861_v0 }
 0x249   :  { %864 = vst.msk [vmem:[%s1543_s10 + $0x8] sm:$0xff] %vm862_vm7, %v859_v18 }

</bundles_post_ra>
